<compile_context>
chip_gen: v5e
topology: v5e:2x2
jax: 0.10.0
libtpu: 0.0.40
codegen_flags: <defaults>
</compile_context>

<pallas_src>
import math
import functools

import jax
import jax.numpy as jnp
from jax import lax
from jax.experimental import pallas as pl
from jax.experimental.pallas import tpu as pltpu


# ----------------------------------------------------------------------------
# helpers
# ----------------------------------------------------------------------------
def _layer_norm(h, g, b, eps=1e-5):
    mu = jnp.mean(h, axis=-1, keepdims=True)
    var = jnp.mean((h - mu) ** 2, axis=-1, keepdims=True)
    return (h - mu) * lax.rsqrt(var + eps) * g + b


def _linear_bf16(h, w, b):
    # torch nn.Linear semantics: y = h @ W.T + b,  W: (C_out, C_in).
    # bf16 MXU inputs, f32 accumulation, f32 bias add.
    y = lax.dot_general(h.astype(jnp.bfloat16), w.astype(jnp.bfloat16),
                        (((1,), (1,)), ((), ())),
                        preferred_element_type=jnp.float32)
    return y + b


def _pick_block_b(B, F, target_rows=1024):
    """Largest sublane-aligned divisor of B giving >=2 grid steps when possible."""
    divs = [d for d in range(1, B + 1) if B % d == 0]
    cands = [d for d in divs if (d % 8 == 0 or d == B)]
    multi = [d for d in cands if B // d >= 2]
    pool = multi if multi else cands
    sized = [d for d in pool if d * F <= target_rows]
    return max(sized) if sized else min(pool)


# ----------------------------------------------------------------------------
# fused ExcelFormer kernel (encoder + all conv layers + decoder per sample block)
# ----------------------------------------------------------------------------
def excelformer_fused_kernel(
        feat_ref, mean_ref, std_ref, ew1_ref, eb1_ref, ew2_ref, eb2_ref,
        ln1g_ref, ln1b_ref, wq_ref, bq_ref, wk_ref, bk_ref, wv_ref, bv_ref,
        ln2g_ref, ln2b_ref, w1_ref, b1_ref, w2_ref, b2_ref,
        wf_ref, bf_ref, pa_ref, wd_ref, bd_ref,
        o_ref, *, num_heads, num_layers):
    BB, Fc = feat_ref.shape
    C = ew1_ref.shape[1]
    Dh = C // num_heads
    scale = 1.0 / math.sqrt(Dh)

    # ---- 1) encoder ----------------------------------------------------------
    feat = (feat_ref[...] - mean_ref[...]) / std_ref[...]          # (BB, F) f32
    f3 = feat[:, :, None]                                          # (BB, F, 1)
    x1 = f3 * ew1_ref[...][None] + eb1_ref[...][None]              # (BB, F, C)
    x2 = f3 * ew2_ref[...][None] + eb2_ref[...][None]
    x = jnp.tanh(x1) * x2                                          # (BB, F, C) f32

    # ---- semi-permeable (DiaM) mask: built once, reused by every layer -------
    row = lax.broadcasted_iota(jnp.int32, (Fc, Fc), 0)
    col = lax.broadcasted_iota(jnp.int32, (Fc, Fc), 1)
    allowed = (row >= col)[None]                                   # (1, F, F)

    # ---- 2) conv layers -------------------------------------------------------
    for l in range(num_layers):
        # DiaM attention
        x2d = x.reshape(BB * Fc, C)
        h = _layer_norm(x2d, ln1g_ref[l], ln1b_ref[l])
        q = _linear_bf16(h, wq_ref[l], bq_ref[l]).reshape(BB, Fc, C)
        k = _linear_bf16(h, wk_ref[l], bk_ref[l]).reshape(BB, Fc, C)
        v = _linear_bf16(h, wv_ref[l], bv_ref[l]).reshape(BB, Fc, C)

        heads = []
        for hh in range(num_heads):
            s0 = hh * Dh
            qh = q[:, :, s0:s0 + Dh].astype(jnp.bfloat16)
            kh = k[:, :, s0:s0 + Dh].astype(jnp.bfloat16)
            vh = v[:, :, s0:s0 + Dh].astype(jnp.bfloat16)
            s = jnp.einsum('bfd,bgd->bfg', qh, kh,
                           preferred_element_type=jnp.float32) * scale
            s = jnp.where(allowed, s, -1e30)                       # f32 masking
            m = jnp.max(s, axis=-1, keepdims=True)
            e = jnp.exp(s - m)
            inv = pl.reciprocal(jnp.sum(e, axis=-1, keepdims=True), approx=True)
            p = e * inv
            heads.append(jnp.einsum('bfg,bgd->bfd', p.astype(jnp.bfloat16), vh,
                                    preferred_element_type=jnp.float32))
        attn = jnp.concatenate(heads, axis=-1)                     # (BB, F, C)
        x = x + attn                                               # residual

        # AiuM: tanh-gated linear unit
        x2d = x.reshape(BB * Fc, C)
        h2 = _layer_norm(x2d, ln2g_ref[l], ln2b_ref[l])
        g1 = jnp.tanh(_linear_bf16(h2, w1_ref[l], b1_ref[l]))
        g2 = _linear_bf16(h2, w2_ref[l], b2_ref[l])
        x = x + (g1 * g2).reshape(BB, Fc, C)

    # ---- 3) decoder (batched over the sample block) ---------------------------
    O = wf_ref.shape[0]
    wf_b = jnp.broadcast_to(wf_ref[...].astype(jnp.bfloat16)[None], (BB, O, Fc))
    # y^T[b,o,c] = sum_f Wf[o,f] * x[b,f,c]
    yT = jnp.einsum('bof,bfc->boc', wf_b, x.astype(jnp.bfloat16),
                    preferred_element_type=jnp.float32)            # (BB, O, C)
    yT = yT + bf_ref[...]                                          # (1, O, 1) bias
    yT = jnp.where(yT > 0, yT, yT * pa_ref[...])                   # PReLU (shared param)
    out = jnp.sum(yT * wd_ref[...], axis=-1) + bd_ref[...]         # (BB, O)
    o_ref[...] = out.astype(o_ref.dtype)


# ----------------------------------------------------------------------------
# wrapper: single fused pallas_call over sample blocks
# ----------------------------------------------------------------------------
def excelformer_forward(feat, params, num_heads):
    B, F = feat.shape
    enc, conv, dec = params["enc"], params["conv"], params["dec"]
    C = enc["W1"].shape[1]
    L = conv["Wq"].shape[0]
    O = dec["Wf"].shape[0]
    assert C % num_heads == 0

    BB = _pick_block_b(B, F)
    grid = (B // BB,)

    bf16 = lambda a: a.astype(jnp.bfloat16)
    args = [
        enc["mean"], enc["std"], enc["W1"], enc["b1"], enc["W2"], enc["b2"],
        conv["ln1g"], conv["ln1b"],
        bf16(conv["Wq"]), conv["bq"], bf16(conv["Wk"]), conv["bk"],
        bf16(conv["Wv"]), conv["bv"],
        conv["ln2g"], conv["ln2b"],
        bf16(conv["W1"]), conv["b1"], bf16(conv["W2"]), conv["b2"],
        bf16(dec["Wf"]), dec["bf"].reshape(1, O, 1),
        dec["a"].reshape(1, 1, 1), dec["Wd"].reshape(1, 1, C), dec["bd"],
    ]

    def full_spec(a):
        nd = a.ndim
        return pl.BlockSpec(a.shape, lambda i, n=nd: (0,) * n)

    in_specs = [pl.BlockSpec((BB, F), lambda i: (i, 0))] + [full_spec(a) for a in args]

    out = pl.pallas_call(
        functools.partial(excelformer_fused_kernel,
                          num_heads=num_heads, num_layers=int(L)),
        out_shape=jax.ShapeDtypeStruct((B, O), jnp.float32),
        grid=grid,
        in_specs=in_specs,
        out_specs=pl.BlockSpec((BB, O), lambda i: (i, 0)),
        compiler_params=pltpu.CompilerParams(dimension_semantics=("parallel",)),
    )(feat, *args)
    return out


# ----------------------------------------------------------------------------
# deterministic parameter construction (conv params stacked across layers)
# ----------------------------------------------------------------------------
def make_params(key, num_cols, channels, out_channels, num_layers):
    F, C, O, L = num_cols, channels, out_channels, num_layers
    keys = iter(jax.random.split(key, 32))

    def u(shape, scale=0.1):
        return scale * jax.random.uniform(next(keys), shape, jnp.float32, -1.0, 1.0)

    enc = dict(
        mean=u((1, F), 0.5),
        std=1.0 + 1e-6 + 0.1 * jnp.abs(u((1, F), 1.0)),
        W1=u((F, C)), b1=jnp.zeros((F, C), jnp.float32),
        W2=u((F, C)), b2=jnp.zeros((F, C), jnp.float32),
    )

    conv = dict(
        ln1g=jnp.ones((L, 1, C), jnp.float32), ln1b=jnp.zeros((L, 1, C), jnp.float32),
        Wq=u((L, C, C)), bq=u((L, 1, C), 0.01),
        Wk=u((L, C, C)), bk=u((L, 1, C), 0.01),
        Wv=u((L, C, C)), bv=u((L, 1, C), 0.01),
        ln2g=jnp.ones((L, 1, C), jnp.float32), ln2b=jnp.zeros((L, 1, C), jnp.float32),
        W1=u((L, C, C)), b1=u((L, 1, C), 0.01),
        W2=u((L, C, C)), b2=u((L, 1, C), 0.01),
    )

    dec = dict(
        Wf=u((O, F)),
        bf=u((1, O), 0.01),
        a=jnp.full((1, 1), 0.25, jnp.float32),          # PReLU default weight
        Wd=u((1, C)),
        bd=u((1, 1), 0.01),
    )
    return dict(enc=enc, conv=conv, dec=dec)


# TODO(synk): feature_mixup (mixup_encoded=True training path) relies on torch Beta
# sampling / randperm RNG semantics and is not part of the default inference forward.

if __name__ == "__main__":
    # batch, num_cols, in_channels, heads, out_channels, layers
    B, F, C, H, O, L = 16, 8, 32, 4, 4, 2
    key = jax.random.PRNGKey(0)
    k_feat, k_param = jax.random.split(key)

    feat = jax.random.normal(k_feat, (B, F), jnp.float32)   # numerical features [batch, num_cols]
    params = make_params(k_param, F, C, O, L)

    out = excelformer_forward(feat, params, num_heads=H)
    out = jax.block_until_ready(out)

    assert out.shape == (B, O), out.shape
    assert bool(jnp.all(jnp.isfinite(out)))
    print("KERNEL_OK")
</pallas_src>

<mosaic_0001>
module attributes {stable_mosaic.version = 11 : i64} {
  func.func @excelformer_fused_kernel(%arg0: i32, %arg1: memref<8x8xf32, #tpu.memory_space<vmem>>, %arg2: memref<1x8xf32, #tpu.memory_space<vmem>>, %arg3: memref<1x8xf32, #tpu.memory_space<vmem>>, %arg4: memref<8x32xf32, #tpu.memory_space<vmem>>, %arg5: memref<8x32xf32, #tpu.memory_space<vmem>>, %arg6: memref<8x32xf32, #tpu.memory_space<vmem>>, %arg7: memref<8x32xf32, #tpu.memory_space<vmem>>, %arg8: memref<2x1x32xf32, #tpu.memory_space<vmem>>, %arg9: memref<2x1x32xf32, #tpu.memory_space<vmem>>, %arg10: memref<2x32x32xbf16, #tpu.memory_space<vmem>>, %arg11: memref<2x1x32xf32, #tpu.memory_space<vmem>>, %arg12: memref<2x32x32xbf16, #tpu.memory_space<vmem>>, %arg13: memref<2x1x32xf32, #tpu.memory_space<vmem>>, %arg14: memref<2x32x32xbf16, #tpu.memory_space<vmem>>, %arg15: memref<2x1x32xf32, #tpu.memory_space<vmem>>, %arg16: memref<2x1x32xf32, #tpu.memory_space<vmem>>, %arg17: memref<2x1x32xf32, #tpu.memory_space<vmem>>, %arg18: memref<2x32x32xbf16, #tpu.memory_space<vmem>>, %arg19: memref<2x1x32xf32, #tpu.memory_space<vmem>>, %arg20: memref<2x32x32xbf16, #tpu.memory_space<vmem>>, %arg21: memref<2x1x32xf32, #tpu.memory_space<vmem>>, %arg22: memref<4x8xbf16, #tpu.memory_space<vmem>>, %arg23: memref<1x4x1xf32, #tpu.memory_space<vmem>>, %arg24: memref<1x1x1xf32, #tpu.memory_space<vmem>>, %arg25: memref<1x1x32xf32, #tpu.memory_space<vmem>>, %arg26: memref<1x1xf32, #tpu.memory_space<vmem>>, %arg27: memref<8x4xf32, #tpu.memory_space<vmem>>) attributes {dimension_semantics = [#tpu.dimension_semantics<parallel>], iteration_bounds = array<i64: 2>, scalar_prefetch = 0 : i64, scratch_operands = 0 : i64, tpu.core_type = #tpu.core_type<tc>, window_params = [{transform_indices = @transform_0, window_bounds = array<i64: 8, 8>}, {pipeline_mode = #tpu.pipeline_mode<synchronous>, transform_indices = @transform_1, window_bounds = array<i64: 1, 8>}, {pipeline_mode = #tpu.pipeline_mode<synchronous>, transform_indices = @transform_2, window_bounds = array<i64: 1, 8>}, {pipeline_mode = #tpu.pipeline_mode<synchronous>, transform_indices = @transform_3, window_bounds = array<i64: 8, 32>}, {pipeline_mode = #tpu.pipeline_mode<synchronous>, transform_indices = @transform_4, window_bounds = array<i64: 8, 32>}, {pipeline_mode = #tpu.pipeline_mode<synchronous>, transform_indices = @transform_5, window_bounds = array<i64: 8, 32>}, {pipeline_mode = #tpu.pipeline_mode<synchronous>, transform_indices = @transform_6, window_bounds = array<i64: 8, 32>}, {pipeline_mode = #tpu.pipeline_mode<synchronous>, transform_indices = @transform_7, window_bounds = array<i64: 2, 1, 32>}, {pipeline_mode = #tpu.pipeline_mode<synchronous>, transform_indices = @transform_8, window_bounds = array<i64: 2, 1, 32>}, {pipeline_mode = #tpu.pipeline_mode<synchronous>, transform_indices = @transform_9, window_bounds = array<i64: 2, 32, 32>}, {pipeline_mode = #tpu.pipeline_mode<synchronous>, transform_indices = @transform_10, window_bounds = array<i64: 2, 1, 32>}, {pipeline_mode = #tpu.pipeline_mode<synchronous>, transform_indices = @transform_11, window_bounds = array<i64: 2, 32, 32>}, {pipeline_mode = #tpu.pipeline_mode<synchronous>, transform_indices = @transform_12, window_bounds = array<i64: 2, 1, 32>}, {pipeline_mode = #tpu.pipeline_mode<synchronous>, transform_indices = @transform_13, window_bounds = array<i64: 2, 32, 32>}, {pipeline_mode = #tpu.pipeline_mode<synchronous>, transform_indices = @transform_14, window_bounds = array<i64: 2, 1, 32>}, {pipeline_mode = #tpu.pipeline_mode<synchronous>, transform_indices = @transform_15, window_bounds = array<i64: 2, 1, 32>}, {pipeline_mode = #tpu.pipeline_mode<synchronous>, transform_indices = @transform_16, window_bounds = array<i64: 2, 1, 32>}, {pipeline_mode = #tpu.pipeline_mode<synchronous>, transform_indices = @transform_17, window_bounds = array<i64: 2, 32, 32>}, {pipeline_mode = #tpu.pipeline_mode<synchronous>, transform_indices = @transform_18, window_bounds = array<i64: 2, 1, 32>}, {pipeline_mode = #tpu.pipeline_mode<synchronous>, transform_indices = @transform_19, window_bounds = array<i64: 2, 32, 32>}, {pipeline_mode = #tpu.pipeline_mode<synchronous>, transform_indices = @transform_20, window_bounds = array<i64: 2, 1, 32>}, {pipeline_mode = #tpu.pipeline_mode<synchronous>, transform_indices = @transform_21, window_bounds = array<i64: 4, 8>}, {pipeline_mode = #tpu.pipeline_mode<synchronous>, transform_indices = @transform_22, window_bounds = array<i64: 1, 4, 1>}, {pipeline_mode = #tpu.pipeline_mode<synchronous>, transform_indices = @transform_23, window_bounds = array<i64: 1, 1, 1>}, {pipeline_mode = #tpu.pipeline_mode<synchronous>, transform_indices = @transform_24, window_bounds = array<i64: 1, 1, 32>}, {pipeline_mode = #tpu.pipeline_mode<synchronous>, transform_indices = @transform_25, window_bounds = array<i64: 1, 1>}, {transform_indices = @transform_26, window_bounds = array<i64: 8, 4>}]} {
    %c0 = arith.constant 0 : index
    %c0_0 = arith.constant 0 : index
    %0 = vector.load %arg1[%c0, %c0_0] : memref<8x8xf32, #tpu.memory_space<vmem>>, vector<8x8xf32>
    %c0_1 = arith.constant 0 : index
    %c0_2 = arith.constant 0 : index
    %1 = vector.load %arg2[%c0_1, %c0_2] : memref<1x8xf32, #tpu.memory_space<vmem>>, vector<1x8xf32>
    %2 = vector.broadcast %1 : vector<1x8xf32> to vector<8x8xf32>
    %3 = arith.subf %0, %2 : vector<8x8xf32>
    %c0_3 = arith.constant 0 : index
    %c0_4 = arith.constant 0 : index
    %4 = vector.load %arg3[%c0_3, %c0_4] : memref<1x8xf32, #tpu.memory_space<vmem>>, vector<1x8xf32>
    %5 = vector.broadcast %4 : vector<1x8xf32> to vector<8x8xf32>
    %6 = arith.divf %3, %5 : vector<8x8xf32>
    %7 = vector.shape_cast %6 : vector<8x8xf32> to vector<8x8x1xf32>
    %c0_5 = arith.constant 0 : index
    %c0_6 = arith.constant 0 : index
    %8 = vector.load %arg4[%c0_5, %c0_6] : memref<8x32xf32, #tpu.memory_space<vmem>>, vector<8x32xf32>
    %9 = vector.shape_cast %8 : vector<8x32xf32> to vector<1x8x32xf32>
    %10 = vector.broadcast %7 : vector<8x8x1xf32> to vector<8x8x32xf32>
    %11 = vector.broadcast %9 : vector<1x8x32xf32> to vector<8x8x32xf32>
    %12 = arith.mulf %10, %11 : vector<8x8x32xf32>
    %c0_7 = arith.constant 0 : index
    %c0_8 = arith.constant 0 : index
    %13 = vector.load %arg5[%c0_7, %c0_8] : memref<8x32xf32, #tpu.memory_space<vmem>>, vector<8x32xf32>
    %14 = vector.shape_cast %13 : vector<8x32xf32> to vector<1x8x32xf32>
    %15 = vector.broadcast %14 : vector<1x8x32xf32> to vector<8x8x32xf32>
    %16 = arith.addf %12, %15 : vector<8x8x32xf32>
    %c0_9 = arith.constant 0 : index
    %c0_10 = arith.constant 0 : index
    %17 = vector.load %arg6[%c0_9, %c0_10] : memref<8x32xf32, #tpu.memory_space<vmem>>, vector<8x32xf32>
    %18 = vector.shape_cast %17 : vector<8x32xf32> to vector<1x8x32xf32>
    %19 = vector.broadcast %7 : vector<8x8x1xf32> to vector<8x8x32xf32>
    %20 = vector.broadcast %18 : vector<1x8x32xf32> to vector<8x8x32xf32>
    %21 = arith.mulf %19, %20 : vector<8x8x32xf32>
    %c0_11 = arith.constant 0 : index
    %c0_12 = arith.constant 0 : index
    %22 = vector.load %arg7[%c0_11, %c0_12] : memref<8x32xf32, #tpu.memory_space<vmem>>, vector<8x32xf32>
    %23 = vector.shape_cast %22 : vector<8x32xf32> to vector<1x8x32xf32>
    %24 = vector.broadcast %23 : vector<1x8x32xf32> to vector<8x8x32xf32>
    %25 = arith.addf %21, %24 : vector<8x8x32xf32>
    %26 = math.tanh %16 : vector<8x8x32xf32>
    %27 = arith.mulf %26, %25 : vector<8x8x32xf32>
    %28 = tpu.iota {dimensions = array<i32: 0>} : vector<8x8xi32>
    %29 = tpu.iota {dimensions = array<i32: 1>} : vector<8x8xi32>
    %30 = arith.cmpi sge, %28, %29 : vector<8x8xi32>
    %31 = vector.shape_cast %30 : vector<8x8xi1> to vector<1x8x8xi1>
    %32 = vector.shape_cast %27 : vector<8x8x32xf32> to vector<64x32xf32>
    %c0_13 = arith.constant 0 : index
    %c0_14 = arith.constant 0 : index
    %c0_15 = arith.constant 0 : index
    %33 = vector.load %arg8[%c0_13, %c0_14, %c0_15] : memref<2x1x32xf32, #tpu.memory_space<vmem>>, vector<1x1x32xf32>
    %34 = vector.shape_cast %33 : vector<1x1x32xf32> to vector<1x32xf32>
    %c0_16 = arith.constant 0 : index
    %c0_17 = arith.constant 0 : index
    %c0_18 = arith.constant 0 : index
    %35 = vector.load %arg9[%c0_16, %c0_17, %c0_18] : memref<2x1x32xf32, #tpu.memory_space<vmem>>, vector<1x1x32xf32>
    %36 = vector.shape_cast %35 : vector<1x1x32xf32> to vector<1x32xf32>
    %cst = arith.constant dense<0.000000e+00> : vector<64xf32>
    %37 = vector.multi_reduction <add>, %32, %cst [1] : vector<64x32xf32> to vector<64xf32>
    %38 = vector.shape_cast %37 : vector<64xf32> to vector<64x1xf32>
    %cst_19 = arith.constant 3.200000e+01 : f32
    %39 = vector.broadcast %cst_19 : f32 to vector<64x1xf32>
    %40 = arith.divf %38, %39 : vector<64x1xf32>
    %41 = vector.broadcast %40 : vector<64x1xf32> to vector<64x32xf32>
    %42 = arith.subf %32, %41 : vector<64x32xf32>
    %43 = arith.mulf %42, %42 : vector<64x32xf32>
    %cst_20 = arith.constant dense<0.000000e+00> : vector<64xf32>
    %44 = vector.multi_reduction <add>, %43, %cst_20 [1] : vector<64x32xf32> to vector<64xf32>
    %45 = vector.shape_cast %44 : vector<64xf32> to vector<64x1xf32>
    %cst_21 = arith.constant 3.200000e+01 : f32
    %46 = vector.broadcast %cst_21 : f32 to vector<64x1xf32>
    %47 = arith.divf %45, %46 : vector<64x1xf32>
    %48 = vector.broadcast %40 : vector<64x1xf32> to vector<64x32xf32>
    %49 = arith.subf %32, %48 : vector<64x32xf32>
    %cst_22 = arith.constant 9.99999974E-6 : f32
    %50 = vector.broadcast %cst_22 : f32 to vector<64x1xf32>
    %51 = arith.addf %47, %50 : vector<64x1xf32>
    %52 = math.rsqrt %51 : vector<64x1xf32>
    %53 = vector.broadcast %52 : vector<64x1xf32> to vector<64x32xf32>
    %54 = arith.mulf %49, %53 : vector<64x32xf32>
    %55 = vector.broadcast %34 : vector<1x32xf32> to vector<64x32xf32>
    %56 = arith.mulf %54, %55 : vector<64x32xf32>
    %57 = vector.broadcast %36 : vector<1x32xf32> to vector<64x32xf32>
    %58 = arith.addf %56, %57 : vector<64x32xf32>
    %c0_23 = arith.constant 0 : index
    %c0_24 = arith.constant 0 : index
    %c0_25 = arith.constant 0 : index
    %59 = vector.load %arg10[%c0_23, %c0_24, %c0_25] : memref<2x32x32xbf16, #tpu.memory_space<vmem>>, vector<1x32x32xbf16>
    %60 = vector.shape_cast %59 : vector<1x32x32xbf16> to vector<32x32xbf16>
    %c0_26 = arith.constant 0 : index
    %c0_27 = arith.constant 0 : index
    %c0_28 = arith.constant 0 : index
    %61 = vector.load %arg11[%c0_26, %c0_27, %c0_28] : memref<2x1x32xf32, #tpu.memory_space<vmem>>, vector<1x1x32xf32>
    %62 = vector.shape_cast %61 : vector<1x1x32xf32> to vector<1x32xf32>
    %63 = arith.truncf %58 : vector<64x32xf32> to vector<64x32xbf16>
    %cst_29 = arith.constant dense<0.000000e+00> : vector<64x32xf32>
    %64 = tpu.matmul %63, %60, %cst_29 {dimension_numbers = #tpu.dot_dimension_numbers<[1], [1], [0], [0], [0, 0, 1, 0], [], []>} : vector<64x32xbf16>, vector<32x32xbf16>, vector<64x32xf32> -> vector<64x32xf32>
    %65 = vector.broadcast %62 : vector<1x32xf32> to vector<64x32xf32>
    %66 = arith.addf %64, %65 : vector<64x32xf32>
    %67 = vector.shape_cast %66 : vector<64x32xf32> to vector<8x8x32xf32>
    %c0_30 = arith.constant 0 : index
    %c0_31 = arith.constant 0 : index
    %c0_32 = arith.constant 0 : index
    %68 = vector.load %arg12[%c0_30, %c0_31, %c0_32] : memref<2x32x32xbf16, #tpu.memory_space<vmem>>, vector<1x32x32xbf16>
    %69 = vector.shape_cast %68 : vector<1x32x32xbf16> to vector<32x32xbf16>
    %c0_33 = arith.constant 0 : index
    %c0_34 = arith.constant 0 : index
    %c0_35 = arith.constant 0 : index
    %70 = vector.load %arg13[%c0_33, %c0_34, %c0_35] : memref<2x1x32xf32, #tpu.memory_space<vmem>>, vector<1x1x32xf32>
    %71 = vector.shape_cast %70 : vector<1x1x32xf32> to vector<1x32xf32>
    %72 = arith.truncf %58 : vector<64x32xf32> to vector<64x32xbf16>
    %cst_36 = arith.constant dense<0.000000e+00> : vector<64x32xf32>
    %73 = tpu.matmul %72, %69, %cst_36 {dimension_numbers = #tpu.dot_dimension_numbers<[1], [1], [0], [0], [0, 0, 1, 0], [], []>} : vector<64x32xbf16>, vector<32x32xbf16>, vector<64x32xf32> -> vector<64x32xf32>
    %74 = vector.broadcast %71 : vector<1x32xf32> to vector<64x32xf32>
    %75 = arith.addf %73, %74 : vector<64x32xf32>
    %76 = vector.shape_cast %75 : vector<64x32xf32> to vector<8x8x32xf32>
    %c0_37 = arith.constant 0 : index
    %c0_38 = arith.constant 0 : index
    %c0_39 = arith.constant 0 : index
    %77 = vector.load %arg14[%c0_37, %c0_38, %c0_39] : memref<2x32x32xbf16, #tpu.memory_space<vmem>>, vector<1x32x32xbf16>
    %78 = vector.shape_cast %77 : vector<1x32x32xbf16> to vector<32x32xbf16>
    %c0_40 = arith.constant 0 : index
    %c0_41 = arith.constant 0 : index
    %c0_42 = arith.constant 0 : index
    %79 = vector.load %arg15[%c0_40, %c0_41, %c0_42] : memref<2x1x32xf32, #tpu.memory_space<vmem>>, vector<1x1x32xf32>
    %80 = vector.shape_cast %79 : vector<1x1x32xf32> to vector<1x32xf32>
    %81 = arith.truncf %58 : vector<64x32xf32> to vector<64x32xbf16>
    %cst_43 = arith.constant dense<0.000000e+00> : vector<64x32xf32>
    %82 = tpu.matmul %81, %78, %cst_43 {dimension_numbers = #tpu.dot_dimension_numbers<[1], [1], [0], [0], [0, 0, 1, 0], [], []>} : vector<64x32xbf16>, vector<32x32xbf16>, vector<64x32xf32> -> vector<64x32xf32>
    %83 = vector.broadcast %80 : vector<1x32xf32> to vector<64x32xf32>
    %84 = arith.addf %82, %83 : vector<64x32xf32>
    %85 = vector.shape_cast %84 : vector<64x32xf32> to vector<8x8x32xf32>
    %86 = vector.extract_strided_slice %67 {offsets = [0, 0, 0], sizes = [8, 8, 8], strides = [1, 1, 1]} : vector<8x8x32xf32> to vector<8x8x8xf32>
    %87 = arith.truncf %86 : vector<8x8x8xf32> to vector<8x8x8xbf16>
    %88 = vector.extract_strided_slice %76 {offsets = [0, 0, 0], sizes = [8, 8, 8], strides = [1, 1, 1]} : vector<8x8x32xf32> to vector<8x8x8xf32>
    %89 = arith.truncf %88 : vector<8x8x8xf32> to vector<8x8x8xbf16>
    %90 = vector.extract_strided_slice %85 {offsets = [0, 0, 0], sizes = [8, 8, 8], strides = [1, 1, 1]} : vector<8x8x32xf32> to vector<8x8x8xf32>
    %91 = arith.truncf %90 : vector<8x8x8xf32> to vector<8x8x8xbf16>
    "tpu.trace_start"() <{level = 10 : i32, message = "bfd,bgd->bfg"}> : () -> ()
    %cst_44 = arith.constant dense<0.000000e+00> : vector<8x8x8xf32>
    %92 = tpu.matmul %87, %89, %cst_44 {dimension_numbers = #tpu.dot_dimension_numbers<[2], [2], [1], [1], [0, 0, 0, 1, 1, 1], [0], [0]>} : vector<8x8x8xbf16>, vector<8x8x8xbf16>, vector<8x8x8xf32> -> vector<8x8x8xf32>
    "tpu.trace_stop"() : () -> ()
    %cst_45 = arith.constant 0.353553385 : f32
    %93 = vector.broadcast %cst_45 : f32 to vector<8x8x8xf32>
    %94 = arith.mulf %92, %93 : vector<8x8x8xf32>
    %cst_46 = arith.constant -1.000000e+30 : f32
    %95 = vector.shape_cast %31 : vector<1x8x8xi1> to vector<1x8x8xi1>
    %96 = vector.broadcast %95 : vector<1x8x8xi1> to vector<8x8x8xi1>
    %97 = vector.broadcast %cst_46 : f32 to vector<8x8x8xf32>
    %98 = arith.select %96, %94, %97 : vector<8x8x8xi1>, vector<8x8x8xf32>
    %cst_47 = arith.constant dense<0xFF800000> : vector<8x8xf32>
    %99 = vector.multi_reduction <maximumf>, %98, %cst_47 [2] : vector<8x8x8xf32> to vector<8x8xf32>
    %100 = vector.shape_cast %99 : vector<8x8xf32> to vector<8x8x1xf32>
    %101 = vector.broadcast %100 : vector<8x8x1xf32> to vector<8x8x8xf32>
    %102 = arith.subf %98, %101 : vector<8x8x8xf32>
    %103 = math.exp %102 : vector<8x8x8xf32>
    %cst_48 = arith.constant dense<0.000000e+00> : vector<8x8xf32>
    %104 = vector.multi_reduction <add>, %103, %cst_48 [2] : vector<8x8x8xf32> to vector<8x8xf32>
    %105 = vector.shape_cast %104 : vector<8x8xf32> to vector<8x8x1xf32>
    %106 = tpu.reciprocal %105 {approx = true} : vector<8x8x1xf32> -> vector<8x8x1xf32>
    %107 = vector.broadcast %106 : vector<8x8x1xf32> to vector<8x8x8xf32>
    %108 = arith.mulf %103, %107 : vector<8x8x8xf32>
    %109 = arith.truncf %108 : vector<8x8x8xf32> to vector<8x8x8xbf16>
    "tpu.trace_start"() <{level = 10 : i32, message = "bfg,bgd->bfd"}> : () -> ()
    %cst_49 = arith.constant dense<0.000000e+00> : vector<8x8x8xf32>
    %110 = tpu.matmul %109, %91, %cst_49 {dimension_numbers = #tpu.dot_dimension_numbers<[2], [1], [1], [2], [0, 0, 0, 1, 1, 2], [0], [0]>} : vector<8x8x8xbf16>, vector<8x8x8xbf16>, vector<8x8x8xf32> -> vector<8x8x8xf32>
    "tpu.trace_stop"() : () -> ()
    %111 = vector.extract_strided_slice %67 {offsets = [0, 0, 8], sizes = [8, 8, 8], strides = [1, 1, 1]} : vector<8x8x32xf32> to vector<8x8x8xf32>
    %112 = arith.truncf %111 : vector<8x8x8xf32> to vector<8x8x8xbf16>
    %113 = vector.extract_strided_slice %76 {offsets = [0, 0, 8], sizes = [8, 8, 8], strides = [1, 1, 1]} : vector<8x8x32xf32> to vector<8x8x8xf32>
    %114 = arith.truncf %113 : vector<8x8x8xf32> to vector<8x8x8xbf16>
    %115 = vector.extract_strided_slice %85 {offsets = [0, 0, 8], sizes = [8, 8, 8], strides = [1, 1, 1]} : vector<8x8x32xf32> to vector<8x8x8xf32>
    %116 = arith.truncf %115 : vector<8x8x8xf32> to vector<8x8x8xbf16>
    "tpu.trace_start"() <{level = 10 : i32, message = "bfd,bgd->bfg"}> : () -> ()
    %cst_50 = arith.constant dense<0.000000e+00> : vector<8x8x8xf32>
    %117 = tpu.matmul %112, %114, %cst_50 {dimension_numbers = #tpu.dot_dimension_numbers<[2], [2], [1], [1], [0, 0, 0, 1, 1, 1], [0], [0]>} : vector<8x8x8xbf16>, vector<8x8x8xbf16>, vector<8x8x8xf32> -> vector<8x8x8xf32>
    "tpu.trace_stop"() : () -> ()
    %cst_51 = arith.constant 0.353553385 : f32
    %118 = vector.broadcast %cst_51 : f32 to vector<8x8x8xf32>
    %119 = arith.mulf %117, %118 : vector<8x8x8xf32>
    %cst_52 = arith.constant -1.000000e+30 : f32
    %120 = vector.shape_cast %31 : vector<1x8x8xi1> to vector<1x8x8xi1>
    %121 = vector.broadcast %120 : vector<1x8x8xi1> to vector<8x8x8xi1>
    %122 = vector.broadcast %cst_52 : f32 to vector<8x8x8xf32>
    %123 = arith.select %121, %119, %122 : vector<8x8x8xi1>, vector<8x8x8xf32>
    %cst_53 = arith.constant dense<0xFF800000> : vector<8x8xf32>
    %124 = vector.multi_reduction <maximumf>, %123, %cst_53 [2] : vector<8x8x8xf32> to vector<8x8xf32>
    %125 = vector.shape_cast %124 : vector<8x8xf32> to vector<8x8x1xf32>
    %126 = vector.broadcast %125 : vector<8x8x1xf32> to vector<8x8x8xf32>
    %127 = arith.subf %123, %126 : vector<8x8x8xf32>
    %128 = math.exp %127 : vector<8x8x8xf32>
    %cst_54 = arith.constant dense<0.000000e+00> : vector<8x8xf32>
    %129 = vector.multi_reduction <add>, %128, %cst_54 [2] : vector<8x8x8xf32> to vector<8x8xf32>
    %130 = vector.shape_cast %129 : vector<8x8xf32> to vector<8x8x1xf32>
    %131 = tpu.reciprocal %130 {approx = true} : vector<8x8x1xf32> -> vector<8x8x1xf32>
    %132 = vector.broadcast %131 : vector<8x8x1xf32> to vector<8x8x8xf32>
    %133 = arith.mulf %128, %132 : vector<8x8x8xf32>
    %134 = arith.truncf %133 : vector<8x8x8xf32> to vector<8x8x8xbf16>
    "tpu.trace_start"() <{level = 10 : i32, message = "bfg,bgd->bfd"}> : () -> ()
    %cst_55 = arith.constant dense<0.000000e+00> : vector<8x8x8xf32>
    %135 = tpu.matmul %134, %116, %cst_55 {dimension_numbers = #tpu.dot_dimension_numbers<[2], [1], [1], [2], [0, 0, 0, 1, 1, 2], [0], [0]>} : vector<8x8x8xbf16>, vector<8x8x8xbf16>, vector<8x8x8xf32> -> vector<8x8x8xf32>
    "tpu.trace_stop"() : () -> ()
    %136 = vector.extract_strided_slice %67 {offsets = [0, 0, 16], sizes = [8, 8, 8], strides = [1, 1, 1]} : vector<8x8x32xf32> to vector<8x8x8xf32>
    %137 = arith.truncf %136 : vector<8x8x8xf32> to vector<8x8x8xbf16>
    %138 = vector.extract_strided_slice %76 {offsets = [0, 0, 16], sizes = [8, 8, 8], strides = [1, 1, 1]} : vector<8x8x32xf32> to vector<8x8x8xf32>
    %139 = arith.truncf %138 : vector<8x8x8xf32> to vector<8x8x8xbf16>
    %140 = vector.extract_strided_slice %85 {offsets = [0, 0, 16], sizes = [8, 8, 8], strides = [1, 1, 1]} : vector<8x8x32xf32> to vector<8x8x8xf32>
    %141 = arith.truncf %140 : vector<8x8x8xf32> to vector<8x8x8xbf16>
    "tpu.trace_start"() <{level = 10 : i32, message = "bfd,bgd->bfg"}> : () -> ()
    %cst_56 = arith.constant dense<0.000000e+00> : vector<8x8x8xf32>
    %142 = tpu.matmul %137, %139, %cst_56 {dimension_numbers = #tpu.dot_dimension_numbers<[2], [2], [1], [1], [0, 0, 0, 1, 1, 1], [0], [0]>} : vector<8x8x8xbf16>, vector<8x8x8xbf16>, vector<8x8x8xf32> -> vector<8x8x8xf32>
    "tpu.trace_stop"() : () -> ()
    %cst_57 = arith.constant 0.353553385 : f32
    %143 = vector.broadcast %cst_57 : f32 to vector<8x8x8xf32>
    %144 = arith.mulf %142, %143 : vector<8x8x8xf32>
    %cst_58 = arith.constant -1.000000e+30 : f32
    %145 = vector.shape_cast %31 : vector<1x8x8xi1> to vector<1x8x8xi1>
    %146 = vector.broadcast %145 : vector<1x8x8xi1> to vector<8x8x8xi1>
    %147 = vector.broadcast %cst_58 : f32 to vector<8x8x8xf32>
    %148 = arith.select %146, %144, %147 : vector<8x8x8xi1>, vector<8x8x8xf32>
    %cst_59 = arith.constant dense<0xFF800000> : vector<8x8xf32>
    %149 = vector.multi_reduction <maximumf>, %148, %cst_59 [2] : vector<8x8x8xf32> to vector<8x8xf32>
    %150 = vector.shape_cast %149 : vector<8x8xf32> to vector<8x8x1xf32>
    %151 = vector.broadcast %150 : vector<8x8x1xf32> to vector<8x8x8xf32>
    %152 = arith.subf %148, %151 : vector<8x8x8xf32>
    %153 = math.exp %152 : vector<8x8x8xf32>
    %cst_60 = arith.constant dense<0.000000e+00> : vector<8x8xf32>
    %154 = vector.multi_reduction <add>, %153, %cst_60 [2] : vector<8x8x8xf32> to vector<8x8xf32>
    %155 = vector.shape_cast %154 : vector<8x8xf32> to vector<8x8x1xf32>
    %156 = tpu.reciprocal %155 {approx = true} : vector<8x8x1xf32> -> vector<8x8x1xf32>
    %157 = vector.broadcast %156 : vector<8x8x1xf32> to vector<8x8x8xf32>
    %158 = arith.mulf %153, %157 : vector<8x8x8xf32>
    %159 = arith.truncf %158 : vector<8x8x8xf32> to vector<8x8x8xbf16>
    "tpu.trace_start"() <{level = 10 : i32, message = "bfg,bgd->bfd"}> : () -> ()
    %cst_61 = arith.constant dense<0.000000e+00> : vector<8x8x8xf32>
    %160 = tpu.matmul %159, %141, %cst_61 {dimension_numbers = #tpu.dot_dimension_numbers<[2], [1], [1], [2], [0, 0, 0, 1, 1, 2], [0], [0]>} : vector<8x8x8xbf16>, vector<8x8x8xbf16>, vector<8x8x8xf32> -> vector<8x8x8xf32>
    "tpu.trace_stop"() : () -> ()
    %161 = vector.extract_strided_slice %67 {offsets = [0, 0, 24], sizes = [8, 8, 8], strides = [1, 1, 1]} : vector<8x8x32xf32> to vector<8x8x8xf32>
    %162 = arith.truncf %161 : vector<8x8x8xf32> to vector<8x8x8xbf16>
    %163 = vector.extract_strided_slice %76 {offsets = [0, 0, 24], sizes = [8, 8, 8], strides = [1, 1, 1]} : vector<8x8x32xf32> to vector<8x8x8xf32>
    %164 = arith.truncf %163 : vector<8x8x8xf32> to vector<8x8x8xbf16>
    %165 = vector.extract_strided_slice %85 {offsets = [0, 0, 24], sizes = [8, 8, 8], strides = [1, 1, 1]} : vector<8x8x32xf32> to vector<8x8x8xf32>
    %166 = arith.truncf %165 : vector<8x8x8xf32> to vector<8x8x8xbf16>
    "tpu.trace_start"() <{level = 10 : i32, message = "bfd,bgd->bfg"}> : () -> ()
    %cst_62 = arith.constant dense<0.000000e+00> : vector<8x8x8xf32>
    %167 = tpu.matmul %162, %164, %cst_62 {dimension_numbers = #tpu.dot_dimension_numbers<[2], [2], [1], [1], [0, 0, 0, 1, 1, 1], [0], [0]>} : vector<8x8x8xbf16>, vector<8x8x8xbf16>, vector<8x8x8xf32> -> vector<8x8x8xf32>
    "tpu.trace_stop"() : () -> ()
    %cst_63 = arith.constant 0.353553385 : f32
    %168 = vector.broadcast %cst_63 : f32 to vector<8x8x8xf32>
    %169 = arith.mulf %167, %168 : vector<8x8x8xf32>
    %cst_64 = arith.constant -1.000000e+30 : f32
    %170 = vector.shape_cast %31 : vector<1x8x8xi1> to vector<1x8x8xi1>
    %171 = vector.broadcast %170 : vector<1x8x8xi1> to vector<8x8x8xi1>
    %172 = vector.broadcast %cst_64 : f32 to vector<8x8x8xf32>
    %173 = arith.select %171, %169, %172 : vector<8x8x8xi1>, vector<8x8x8xf32>
    %cst_65 = arith.constant dense<0xFF800000> : vector<8x8xf32>
    %174 = vector.multi_reduction <maximumf>, %173, %cst_65 [2] : vector<8x8x8xf32> to vector<8x8xf32>
    %175 = vector.shape_cast %174 : vector<8x8xf32> to vector<8x8x1xf32>
    %176 = vector.broadcast %175 : vector<8x8x1xf32> to vector<8x8x8xf32>
    %177 = arith.subf %173, %176 : vector<8x8x8xf32>
    %178 = math.exp %177 : vector<8x8x8xf32>
    %cst_66 = arith.constant dense<0.000000e+00> : vector<8x8xf32>
    %179 = vector.multi_reduction <add>, %178, %cst_66 [2] : vector<8x8x8xf32> to vector<8x8xf32>
    %180 = vector.shape_cast %179 : vector<8x8xf32> to vector<8x8x1xf32>
    %181 = tpu.reciprocal %180 {approx = true} : vector<8x8x1xf32> -> vector<8x8x1xf32>
    %182 = vector.broadcast %181 : vector<8x8x1xf32> to vector<8x8x8xf32>
    %183 = arith.mulf %178, %182 : vector<8x8x8xf32>
    %184 = arith.truncf %183 : vector<8x8x8xf32> to vector<8x8x8xbf16>
    "tpu.trace_start"() <{level = 10 : i32, message = "bfg,bgd->bfd"}> : () -> ()
    %cst_67 = arith.constant dense<0.000000e+00> : vector<8x8x8xf32>
    %185 = tpu.matmul %184, %166, %cst_67 {dimension_numbers = #tpu.dot_dimension_numbers<[2], [1], [1], [2], [0, 0, 0, 1, 1, 2], [0], [0]>} : vector<8x8x8xbf16>, vector<8x8x8xbf16>, vector<8x8x8xf32> -> vector<8x8x8xf32>
    "tpu.trace_stop"() : () -> ()
    %186 = tpu.concatenate %110, %135, %160, %185 in 2 : vector<8x8x8xf32>, vector<8x8x8xf32>, vector<8x8x8xf32>, vector<8x8x8xf32> -> vector<8x8x32xf32>
    %187 = arith.addf %27, %186 : vector<8x8x32xf32>
    %188 = vector.shape_cast %187 : vector<8x8x32xf32> to vector<64x32xf32>
    %c0_68 = arith.constant 0 : index
    %c0_69 = arith.constant 0 : index
    %c0_70 = arith.constant 0 : index
    %189 = vector.load %arg16[%c0_68, %c0_69, %c0_70] : memref<2x1x32xf32, #tpu.memory_space<vmem>>, vector<1x1x32xf32>
    %190 = vector.shape_cast %189 : vector<1x1x32xf32> to vector<1x32xf32>
    %c0_71 = arith.constant 0 : index
    %c0_72 = arith.constant 0 : index
    %c0_73 = arith.constant 0 : index
    %191 = vector.load %arg17[%c0_71, %c0_72, %c0_73] : memref<2x1x32xf32, #tpu.memory_space<vmem>>, vector<1x1x32xf32>
    %192 = vector.shape_cast %191 : vector<1x1x32xf32> to vector<1x32xf32>
    %cst_74 = arith.constant dense<0.000000e+00> : vector<64xf32>
    %193 = vector.multi_reduction <add>, %188, %cst_74 [1] : vector<64x32xf32> to vector<64xf32>
    %194 = vector.shape_cast %193 : vector<64xf32> to vector<64x1xf32>
    %cst_75 = arith.constant 3.200000e+01 : f32
    %195 = vector.broadcast %cst_75 : f32 to vector<64x1xf32>
    %196 = arith.divf %194, %195 : vector<64x1xf32>
    %197 = vector.broadcast %196 : vector<64x1xf32> to vector<64x32xf32>
    %198 = arith.subf %188, %197 : vector<64x32xf32>
    %199 = arith.mulf %198, %198 : vector<64x32xf32>
    %cst_76 = arith.constant dense<0.000000e+00> : vector<64xf32>
    %200 = vector.multi_reduction <add>, %199, %cst_76 [1] : vector<64x32xf32> to vector<64xf32>
    %201 = vector.shape_cast %200 : vector<64xf32> to vector<64x1xf32>
    %cst_77 = arith.constant 3.200000e+01 : f32
    %202 = vector.broadcast %cst_77 : f32 to vector<64x1xf32>
    %203 = arith.divf %201, %202 : vector<64x1xf32>
    %204 = vector.broadcast %196 : vector<64x1xf32> to vector<64x32xf32>
    %205 = arith.subf %188, %204 : vector<64x32xf32>
    %cst_78 = arith.constant 9.99999974E-6 : f32
    %206 = vector.broadcast %cst_78 : f32 to vector<64x1xf32>
    %207 = arith.addf %203, %206 : vector<64x1xf32>
    %208 = math.rsqrt %207 : vector<64x1xf32>
    %209 = vector.broadcast %208 : vector<64x1xf32> to vector<64x32xf32>
    %210 = arith.mulf %205, %209 : vector<64x32xf32>
    %211 = vector.broadcast %190 : vector<1x32xf32> to vector<64x32xf32>
    %212 = arith.mulf %210, %211 : vector<64x32xf32>
    %213 = vector.broadcast %192 : vector<1x32xf32> to vector<64x32xf32>
    %214 = arith.addf %212, %213 : vector<64x32xf32>
    %c0_79 = arith.constant 0 : index
    %c0_80 = arith.constant 0 : index
    %c0_81 = arith.constant 0 : index
    %215 = vector.load %arg18[%c0_79, %c0_80, %c0_81] : memref<2x32x32xbf16, #tpu.memory_space<vmem>>, vector<1x32x32xbf16>
    %216 = vector.shape_cast %215 : vector<1x32x32xbf16> to vector<32x32xbf16>
    %c0_82 = arith.constant 0 : index
    %c0_83 = arith.constant 0 : index
    %c0_84 = arith.constant 0 : index
    %217 = vector.load %arg19[%c0_82, %c0_83, %c0_84] : memref<2x1x32xf32, #tpu.memory_space<vmem>>, vector<1x1x32xf32>
    %218 = vector.shape_cast %217 : vector<1x1x32xf32> to vector<1x32xf32>
    %219 = arith.truncf %214 : vector<64x32xf32> to vector<64x32xbf16>
    %cst_85 = arith.constant dense<0.000000e+00> : vector<64x32xf32>
    %220 = tpu.matmul %219, %216, %cst_85 {dimension_numbers = #tpu.dot_dimension_numbers<[1], [1], [0], [0], [0, 0, 1, 0], [], []>} : vector<64x32xbf16>, vector<32x32xbf16>, vector<64x32xf32> -> vector<64x32xf32>
    %221 = vector.broadcast %218 : vector<1x32xf32> to vector<64x32xf32>
    %222 = arith.addf %220, %221 : vector<64x32xf32>
    %223 = math.tanh %222 : vector<64x32xf32>
    %c0_86 = arith.constant 0 : index
    %c0_87 = arith.constant 0 : index
    %c0_88 = arith.constant 0 : index
    %224 = vector.load %arg20[%c0_86, %c0_87, %c0_88] : memref<2x32x32xbf16, #tpu.memory_space<vmem>>, vector<1x32x32xbf16>
    %225 = vector.shape_cast %224 : vector<1x32x32xbf16> to vector<32x32xbf16>
    %c0_89 = arith.constant 0 : index
    %c0_90 = arith.constant 0 : index
    %c0_91 = arith.constant 0 : index
    %226 = vector.load %arg21[%c0_89, %c0_90, %c0_91] : memref<2x1x32xf32, #tpu.memory_space<vmem>>, vector<1x1x32xf32>
    %227 = vector.shape_cast %226 : vector<1x1x32xf32> to vector<1x32xf32>
    %228 = arith.truncf %214 : vector<64x32xf32> to vector<64x32xbf16>
    %cst_92 = arith.constant dense<0.000000e+00> : vector<64x32xf32>
    %229 = tpu.matmul %228, %225, %cst_92 {dimension_numbers = #tpu.dot_dimension_numbers<[1], [1], [0], [0], [0, 0, 1, 0], [], []>} : vector<64x32xbf16>, vector<32x32xbf16>, vector<64x32xf32> -> vector<64x32xf32>
    %230 = vector.broadcast %227 : vector<1x32xf32> to vector<64x32xf32>
    %231 = arith.addf %229, %230 : vector<64x32xf32>
    %232 = arith.mulf %223, %231 : vector<64x32xf32>
    %233 = vector.shape_cast %232 : vector<64x32xf32> to vector<8x8x32xf32>
    %234 = arith.addf %187, %233 : vector<8x8x32xf32>
    %235 = vector.shape_cast %234 : vector<8x8x32xf32> to vector<64x32xf32>
    %c1 = arith.constant 1 : index
    %c0_93 = arith.constant 0 : index
    %c0_94 = arith.constant 0 : index
    %236 = vector.load %arg8[%c1, %c0_93, %c0_94] : memref<2x1x32xf32, #tpu.memory_space<vmem>>, vector<1x1x32xf32>
    %237 = vector.shape_cast %236 : vector<1x1x32xf32> to vector<1x32xf32>
    %c1_95 = arith.constant 1 : index
    %c0_96 = arith.constant 0 : index
    %c0_97 = arith.constant 0 : index
    %238 = vector.load %arg9[%c1_95, %c0_96, %c0_97] : memref<2x1x32xf32, #tpu.memory_space<vmem>>, vector<1x1x32xf32>
    %239 = vector.shape_cast %238 : vector<1x1x32xf32> to vector<1x32xf32>
    %cst_98 = arith.constant dense<0.000000e+00> : vector<64xf32>
    %240 = vector.multi_reduction <add>, %235, %cst_98 [1] : vector<64x32xf32> to vector<64xf32>
    %241 = vector.shape_cast %240 : vector<64xf32> to vector<64x1xf32>
    %cst_99 = arith.constant 3.200000e+01 : f32
    %242 = vector.broadcast %cst_99 : f32 to vector<64x1xf32>
    %243 = arith.divf %241, %242 : vector<64x1xf32>
    %244 = vector.broadcast %243 : vector<64x1xf32> to vector<64x32xf32>
    %245 = arith.subf %235, %244 : vector<64x32xf32>
    %246 = arith.mulf %245, %245 : vector<64x32xf32>
    %cst_100 = arith.constant dense<0.000000e+00> : vector<64xf32>
    %247 = vector.multi_reduction <add>, %246, %cst_100 [1] : vector<64x32xf32> to vector<64xf32>
    %248 = vector.shape_cast %247 : vector<64xf32> to vector<64x1xf32>
    %cst_101 = arith.constant 3.200000e+01 : f32
    %249 = vector.broadcast %cst_101 : f32 to vector<64x1xf32>
    %250 = arith.divf %248, %249 : vector<64x1xf32>
    %251 = vector.broadcast %243 : vector<64x1xf32> to vector<64x32xf32>
    %252 = arith.subf %235, %251 : vector<64x32xf32>
    %cst_102 = arith.constant 9.99999974E-6 : f32
    %253 = vector.broadcast %cst_102 : f32 to vector<64x1xf32>
    %254 = arith.addf %250, %253 : vector<64x1xf32>
    %255 = math.rsqrt %254 : vector<64x1xf32>
    %256 = vector.broadcast %255 : vector<64x1xf32> to vector<64x32xf32>
    %257 = arith.mulf %252, %256 : vector<64x32xf32>
    %258 = vector.broadcast %237 : vector<1x32xf32> to vector<64x32xf32>
    %259 = arith.mulf %257, %258 : vector<64x32xf32>
    %260 = vector.broadcast %239 : vector<1x32xf32> to vector<64x32xf32>
    %261 = arith.addf %259, %260 : vector<64x32xf32>
    %c1_103 = arith.constant 1 : index
    %c0_104 = arith.constant 0 : index
    %c0_105 = arith.constant 0 : index
    %262 = vector.load %arg10[%c1_103, %c0_104, %c0_105] : memref<2x32x32xbf16, #tpu.memory_space<vmem>>, vector<1x32x32xbf16>
    %263 = vector.shape_cast %262 : vector<1x32x32xbf16> to vector<32x32xbf16>
    %c1_106 = arith.constant 1 : index
    %c0_107 = arith.constant 0 : index
    %c0_108 = arith.constant 0 : index
    %264 = vector.load %arg11[%c1_106, %c0_107, %c0_108] : memref<2x1x32xf32, #tpu.memory_space<vmem>>, vector<1x1x32xf32>
    %265 = vector.shape_cast %264 : vector<1x1x32xf32> to vector<1x32xf32>
    %266 = arith.truncf %261 : vector<64x32xf32> to vector<64x32xbf16>
    %cst_109 = arith.constant dense<0.000000e+00> : vector<64x32xf32>
    %267 = tpu.matmul %266, %263, %cst_109 {dimension_numbers = #tpu.dot_dimension_numbers<[1], [1], [0], [0], [0, 0, 1, 0], [], []>} : vector<64x32xbf16>, vector<32x32xbf16>, vector<64x32xf32> -> vector<64x32xf32>
    %268 = vector.broadcast %265 : vector<1x32xf32> to vector<64x32xf32>
    %269 = arith.addf %267, %268 : vector<64x32xf32>
    %270 = vector.shape_cast %269 : vector<64x32xf32> to vector<8x8x32xf32>
    %c1_110 = arith.constant 1 : index
    %c0_111 = arith.constant 0 : index
    %c0_112 = arith.constant 0 : index
    %271 = vector.load %arg12[%c1_110, %c0_111, %c0_112] : memref<2x32x32xbf16, #tpu.memory_space<vmem>>, vector<1x32x32xbf16>
    %272 = vector.shape_cast %271 : vector<1x32x32xbf16> to vector<32x32xbf16>
    %c1_113 = arith.constant 1 : index
    %c0_114 = arith.constant 0 : index
    %c0_115 = arith.constant 0 : index
    %273 = vector.load %arg13[%c1_113, %c0_114, %c0_115] : memref<2x1x32xf32, #tpu.memory_space<vmem>>, vector<1x1x32xf32>
    %274 = vector.shape_cast %273 : vector<1x1x32xf32> to vector<1x32xf32>
    %275 = arith.truncf %261 : vector<64x32xf32> to vector<64x32xbf16>
    %cst_116 = arith.constant dense<0.000000e+00> : vector<64x32xf32>
    %276 = tpu.matmul %275, %272, %cst_116 {dimension_numbers = #tpu.dot_dimension_numbers<[1], [1], [0], [0], [0, 0, 1, 0], [], []>} : vector<64x32xbf16>, vector<32x32xbf16>, vector<64x32xf32> -> vector<64x32xf32>
    %277 = vector.broadcast %274 : vector<1x32xf32> to vector<64x32xf32>
    %278 = arith.addf %276, %277 : vector<64x32xf32>
    %279 = vector.shape_cast %278 : vector<64x32xf32> to vector<8x8x32xf32>
    %c1_117 = arith.constant 1 : index
    %c0_118 = arith.constant 0 : index
    %c0_119 = arith.constant 0 : index
    %280 = vector.load %arg14[%c1_117, %c0_118, %c0_119] : memref<2x32x32xbf16, #tpu.memory_space<vmem>>, vector<1x32x32xbf16>
    %281 = vector.shape_cast %280 : vector<1x32x32xbf16> to vector<32x32xbf16>
    %c1_120 = arith.constant 1 : index
    %c0_121 = arith.constant 0 : index
    %c0_122 = arith.constant 0 : index
    %282 = vector.load %arg15[%c1_120, %c0_121, %c0_122] : memref<2x1x32xf32, #tpu.memory_space<vmem>>, vector<1x1x32xf32>
    %283 = vector.shape_cast %282 : vector<1x1x32xf32> to vector<1x32xf32>
    %284 = arith.truncf %261 : vector<64x32xf32> to vector<64x32xbf16>
    %cst_123 = arith.constant dense<0.000000e+00> : vector<64x32xf32>
    %285 = tpu.matmul %284, %281, %cst_123 {dimension_numbers = #tpu.dot_dimension_numbers<[1], [1], [0], [0], [0, 0, 1, 0], [], []>} : vector<64x32xbf16>, vector<32x32xbf16>, vector<64x32xf32> -> vector<64x32xf32>
    %286 = vector.broadcast %283 : vector<1x32xf32> to vector<64x32xf32>
    %287 = arith.addf %285, %286 : vector<64x32xf32>
    %288 = vector.shape_cast %287 : vector<64x32xf32> to vector<8x8x32xf32>
    %289 = vector.extract_strided_slice %270 {offsets = [0, 0, 0], sizes = [8, 8, 8], strides = [1, 1, 1]} : vector<8x8x32xf32> to vector<8x8x8xf32>
    %290 = arith.truncf %289 : vector<8x8x8xf32> to vector<8x8x8xbf16>
    %291 = vector.extract_strided_slice %279 {offsets = [0, 0, 0], sizes = [8, 8, 8], strides = [1, 1, 1]} : vector<8x8x32xf32> to vector<8x8x8xf32>
    %292 = arith.truncf %291 : vector<8x8x8xf32> to vector<8x8x8xbf16>
    %293 = vector.extract_strided_slice %288 {offsets = [0, 0, 0], sizes = [8, 8, 8], strides = [1, 1, 1]} : vector<8x8x32xf32> to vector<8x8x8xf32>
    %294 = arith.truncf %293 : vector<8x8x8xf32> to vector<8x8x8xbf16>
    "tpu.trace_start"() <{level = 10 : i32, message = "bfd,bgd->bfg"}> : () -> ()
    %cst_124 = arith.constant dense<0.000000e+00> : vector<8x8x8xf32>
    %295 = tpu.matmul %290, %292, %cst_124 {dimension_numbers = #tpu.dot_dimension_numbers<[2], [2], [1], [1], [0, 0, 0, 1, 1, 1], [0], [0]>} : vector<8x8x8xbf16>, vector<8x8x8xbf16>, vector<8x8x8xf32> -> vector<8x8x8xf32>
    "tpu.trace_stop"() : () -> ()
    %cst_125 = arith.constant 0.353553385 : f32
    %296 = vector.broadcast %cst_125 : f32 to vector<8x8x8xf32>
    %297 = arith.mulf %295, %296 : vector<8x8x8xf32>
    %cst_126 = arith.constant -1.000000e+30 : f32
    %298 = vector.shape_cast %31 : vector<1x8x8xi1> to vector<1x8x8xi1>
    %299 = vector.broadcast %298 : vector<1x8x8xi1> to vector<8x8x8xi1>
    %300 = vector.broadcast %cst_126 : f32 to vector<8x8x8xf32>
    %301 = arith.select %299, %297, %300 : vector<8x8x8xi1>, vector<8x8x8xf32>
    %cst_127 = arith.constant dense<0xFF800000> : vector<8x8xf32>
    %302 = vector.multi_reduction <maximumf>, %301, %cst_127 [2] : vector<8x8x8xf32> to vector<8x8xf32>
    %303 = vector.shape_cast %302 : vector<8x8xf32> to vector<8x8x1xf32>
    %304 = vector.broadcast %303 : vector<8x8x1xf32> to vector<8x8x8xf32>
    %305 = arith.subf %301, %304 : vector<8x8x8xf32>
    %306 = math.exp %305 : vector<8x8x8xf32>
    %cst_128 = arith.constant dense<0.000000e+00> : vector<8x8xf32>
    %307 = vector.multi_reduction <add>, %306, %cst_128 [2] : vector<8x8x8xf32> to vector<8x8xf32>
    %308 = vector.shape_cast %307 : vector<8x8xf32> to vector<8x8x1xf32>
    %309 = tpu.reciprocal %308 {approx = true} : vector<8x8x1xf32> -> vector<8x8x1xf32>
    %310 = vector.broadcast %309 : vector<8x8x1xf32> to vector<8x8x8xf32>
    %311 = arith.mulf %306, %310 : vector<8x8x8xf32>
    %312 = arith.truncf %311 : vector<8x8x8xf32> to vector<8x8x8xbf16>
    "tpu.trace_start"() <{level = 10 : i32, message = "bfg,bgd->bfd"}> : () -> ()
    %cst_129 = arith.constant dense<0.000000e+00> : vector<8x8x8xf32>
    %313 = tpu.matmul %312, %294, %cst_129 {dimension_numbers = #tpu.dot_dimension_numbers<[2], [1], [1], [2], [0, 0, 0, 1, 1, 2], [0], [0]>} : vector<8x8x8xbf16>, vector<8x8x8xbf16>, vector<8x8x8xf32> -> vector<8x8x8xf32>
    "tpu.trace_stop"() : () -> ()
    %314 = vector.extract_strided_slice %270 {offsets = [0, 0, 8], sizes = [8, 8, 8], strides = [1, 1, 1]} : vector<8x8x32xf32> to vector<8x8x8xf32>
    %315 = arith.truncf %314 : vector<8x8x8xf32> to vector<8x8x8xbf16>
    %316 = vector.extract_strided_slice %279 {offsets = [0, 0, 8], sizes = [8, 8, 8], strides = [1, 1, 1]} : vector<8x8x32xf32> to vector<8x8x8xf32>
    %317 = arith.truncf %316 : vector<8x8x8xf32> to vector<8x8x8xbf16>
    %318 = vector.extract_strided_slice %288 {offsets = [0, 0, 8], sizes = [8, 8, 8], strides = [1, 1, 1]} : vector<8x8x32xf32> to vector<8x8x8xf32>
    %319 = arith.truncf %318 : vector<8x8x8xf32> to vector<8x8x8xbf16>
    "tpu.trace_start"() <{level = 10 : i32, message = "bfd,bgd->bfg"}> : () -> ()
    %cst_130 = arith.constant dense<0.000000e+00> : vector<8x8x8xf32>
    %320 = tpu.matmul %315, %317, %cst_130 {dimension_numbers = #tpu.dot_dimension_numbers<[2], [2], [1], [1], [0, 0, 0, 1, 1, 1], [0], [0]>} : vector<8x8x8xbf16>, vector<8x8x8xbf16>, vector<8x8x8xf32> -> vector<8x8x8xf32>
    "tpu.trace_stop"() : () -> ()
    %cst_131 = arith.constant 0.353553385 : f32
    %321 = vector.broadcast %cst_131 : f32 to vector<8x8x8xf32>
    %322 = arith.mulf %320, %321 : vector<8x8x8xf32>
    %cst_132 = arith.constant -1.000000e+30 : f32
    %323 = vector.shape_cast %31 : vector<1x8x8xi1> to vector<1x8x8xi1>
    %324 = vector.broadcast %323 : vector<1x8x8xi1> to vector<8x8x8xi1>
    %325 = vector.broadcast %cst_132 : f32 to vector<8x8x8xf32>
    %326 = arith.select %324, %322, %325 : vector<8x8x8xi1>, vector<8x8x8xf32>
    %cst_133 = arith.constant dense<0xFF800000> : vector<8x8xf32>
    %327 = vector.multi_reduction <maximumf>, %326, %cst_133 [2] : vector<8x8x8xf32> to vector<8x8xf32>
    %328 = vector.shape_cast %327 : vector<8x8xf32> to vector<8x8x1xf32>
    %329 = vector.broadcast %328 : vector<8x8x1xf32> to vector<8x8x8xf32>
    %330 = arith.subf %326, %329 : vector<8x8x8xf32>
    %331 = math.exp %330 : vector<8x8x8xf32>
    %cst_134 = arith.constant dense<0.000000e+00> : vector<8x8xf32>
    %332 = vector.multi_reduction <add>, %331, %cst_134 [2] : vector<8x8x8xf32> to vector<8x8xf32>
    %333 = vector.shape_cast %332 : vector<8x8xf32> to vector<8x8x1xf32>
    %334 = tpu.reciprocal %333 {approx = true} : vector<8x8x1xf32> -> vector<8x8x1xf32>
    %335 = vector.broadcast %334 : vector<8x8x1xf32> to vector<8x8x8xf32>
    %336 = arith.mulf %331, %335 : vector<8x8x8xf32>
    %337 = arith.truncf %336 : vector<8x8x8xf32> to vector<8x8x8xbf16>
    "tpu.trace_start"() <{level = 10 : i32, message = "bfg,bgd->bfd"}> : () -> ()
    %cst_135 = arith.constant dense<0.000000e+00> : vector<8x8x8xf32>
    %338 = tpu.matmul %337, %319, %cst_135 {dimension_numbers = #tpu.dot_dimension_numbers<[2], [1], [1], [2], [0, 0, 0, 1, 1, 2], [0], [0]>} : vector<8x8x8xbf16>, vector<8x8x8xbf16>, vector<8x8x8xf32> -> vector<8x8x8xf32>
    "tpu.trace_stop"() : () -> ()
    %339 = vector.extract_strided_slice %270 {offsets = [0, 0, 16], sizes = [8, 8, 8], strides = [1, 1, 1]} : vector<8x8x32xf32> to vector<8x8x8xf32>
    %340 = arith.truncf %339 : vector<8x8x8xf32> to vector<8x8x8xbf16>
    %341 = vector.extract_strided_slice %279 {offsets = [0, 0, 16], sizes = [8, 8, 8], strides = [1, 1, 1]} : vector<8x8x32xf32> to vector<8x8x8xf32>
    %342 = arith.truncf %341 : vector<8x8x8xf32> to vector<8x8x8xbf16>
    %343 = vector.extract_strided_slice %288 {offsets = [0, 0, 16], sizes = [8, 8, 8], strides = [1, 1, 1]} : vector<8x8x32xf32> to vector<8x8x8xf32>
    %344 = arith.truncf %343 : vector<8x8x8xf32> to vector<8x8x8xbf16>
    "tpu.trace_start"() <{level = 10 : i32, message = "bfd,bgd->bfg"}> : () -> ()
    %cst_136 = arith.constant dense<0.000000e+00> : vector<8x8x8xf32>
    %345 = tpu.matmul %340, %342, %cst_136 {dimension_numbers = #tpu.dot_dimension_numbers<[2], [2], [1], [1], [0, 0, 0, 1, 1, 1], [0], [0]>} : vector<8x8x8xbf16>, vector<8x8x8xbf16>, vector<8x8x8xf32> -> vector<8x8x8xf32>
    "tpu.trace_stop"() : () -> ()
    %cst_137 = arith.constant 0.353553385 : f32
    %346 = vector.broadcast %cst_137 : f32 to vector<8x8x8xf32>
    %347 = arith.mulf %345, %346 : vector<8x8x8xf32>
    %cst_138 = arith.constant -1.000000e+30 : f32
    %348 = vector.shape_cast %31 : vector<1x8x8xi1> to vector<1x8x8xi1>
    %349 = vector.broadcast %348 : vector<1x8x8xi1> to vector<8x8x8xi1>
    %350 = vector.broadcast %cst_138 : f32 to vector<8x8x8xf32>
    %351 = arith.select %349, %347, %350 : vector<8x8x8xi1>, vector<8x8x8xf32>
    %cst_139 = arith.constant dense<0xFF800000> : vector<8x8xf32>
    %352 = vector.multi_reduction <maximumf>, %351, %cst_139 [2] : vector<8x8x8xf32> to vector<8x8xf32>
    %353 = vector.shape_cast %352 : vector<8x8xf32> to vector<8x8x1xf32>
    %354 = vector.broadcast %353 : vector<8x8x1xf32> to vector<8x8x8xf32>
    %355 = arith.subf %351, %354 : vector<8x8x8xf32>
    %356 = math.exp %355 : vector<8x8x8xf32>
    %cst_140 = arith.constant dense<0.000000e+00> : vector<8x8xf32>
    %357 = vector.multi_reduction <add>, %356, %cst_140 [2] : vector<8x8x8xf32> to vector<8x8xf32>
    %358 = vector.shape_cast %357 : vector<8x8xf32> to vector<8x8x1xf32>
    %359 = tpu.reciprocal %358 {approx = true} : vector<8x8x1xf32> -> vector<8x8x1xf32>
    %360 = vector.broadcast %359 : vector<8x8x1xf32> to vector<8x8x8xf32>
    %361 = arith.mulf %356, %360 : vector<8x8x8xf32>
    %362 = arith.truncf %361 : vector<8x8x8xf32> to vector<8x8x8xbf16>
    "tpu.trace_start"() <{level = 10 : i32, message = "bfg,bgd->bfd"}> : () -> ()
    %cst_141 = arith.constant dense<0.000000e+00> : vector<8x8x8xf32>
    %363 = tpu.matmul %362, %344, %cst_141 {dimension_numbers = #tpu.dot_dimension_numbers<[2], [1], [1], [2], [0, 0, 0, 1, 1, 2], [0], [0]>} : vector<8x8x8xbf16>, vector<8x8x8xbf16>, vector<8x8x8xf32> -> vector<8x8x8xf32>
    "tpu.trace_stop"() : () -> ()
    %364 = vector.extract_strided_slice %270 {offsets = [0, 0, 24], sizes = [8, 8, 8], strides = [1, 1, 1]} : vector<8x8x32xf32> to vector<8x8x8xf32>
    %365 = arith.truncf %364 : vector<8x8x8xf32> to vector<8x8x8xbf16>
    %366 = vector.extract_strided_slice %279 {offsets = [0, 0, 24], sizes = [8, 8, 8], strides = [1, 1, 1]} : vector<8x8x32xf32> to vector<8x8x8xf32>
    %367 = arith.truncf %366 : vector<8x8x8xf32> to vector<8x8x8xbf16>
    %368 = vector.extract_strided_slice %288 {offsets = [0, 0, 24], sizes = [8, 8, 8], strides = [1, 1, 1]} : vector<8x8x32xf32> to vector<8x8x8xf32>
    %369 = arith.truncf %368 : vector<8x8x8xf32> to vector<8x8x8xbf16>
    "tpu.trace_start"() <{level = 10 : i32, message = "bfd,bgd->bfg"}> : () -> ()
    %cst_142 = arith.constant dense<0.000000e+00> : vector<8x8x8xf32>
    %370 = tpu.matmul %365, %367, %cst_142 {dimension_numbers = #tpu.dot_dimension_numbers<[2], [2], [1], [1], [0, 0, 0, 1, 1, 1], [0], [0]>} : vector<8x8x8xbf16>, vector<8x8x8xbf16>, vector<8x8x8xf32> -> vector<8x8x8xf32>
    "tpu.trace_stop"() : () -> ()
    %cst_143 = arith.constant 0.353553385 : f32
    %371 = vector.broadcast %cst_143 : f32 to vector<8x8x8xf32>
    %372 = arith.mulf %370, %371 : vector<8x8x8xf32>
    %cst_144 = arith.constant -1.000000e+30 : f32
    %373 = vector.shape_cast %31 : vector<1x8x8xi1> to vector<1x8x8xi1>
    %374 = vector.broadcast %373 : vector<1x8x8xi1> to vector<8x8x8xi1>
    %375 = vector.broadcast %cst_144 : f32 to vector<8x8x8xf32>
    %376 = arith.select %374, %372, %375 : vector<8x8x8xi1>, vector<8x8x8xf32>
    %cst_145 = arith.constant dense<0xFF800000> : vector<8x8xf32>
    %377 = vector.multi_reduction <maximumf>, %376, %cst_145 [2] : vector<8x8x8xf32> to vector<8x8xf32>
    %378 = vector.shape_cast %377 : vector<8x8xf32> to vector<8x8x1xf32>
    %379 = vector.broadcast %378 : vector<8x8x1xf32> to vector<8x8x8xf32>
    %380 = arith.subf %376, %379 : vector<8x8x8xf32>
    %381 = math.exp %380 : vector<8x8x8xf32>
    %cst_146 = arith.constant dense<0.000000e+00> : vector<8x8xf32>
    %382 = vector.multi_reduction <add>, %381, %cst_146 [2] : vector<8x8x8xf32> to vector<8x8xf32>
    %383 = vector.shape_cast %382 : vector<8x8xf32> to vector<8x8x1xf32>
    %384 = tpu.reciprocal %383 {approx = true} : vector<8x8x1xf32> -> vector<8x8x1xf32>
    %385 = vector.broadcast %384 : vector<8x8x1xf32> to vector<8x8x8xf32>
    %386 = arith.mulf %381, %385 : vector<8x8x8xf32>
    %387 = arith.truncf %386 : vector<8x8x8xf32> to vector<8x8x8xbf16>
    "tpu.trace_start"() <{level = 10 : i32, message = "bfg,bgd->bfd"}> : () -> ()
    %cst_147 = arith.constant dense<0.000000e+00> : vector<8x8x8xf32>
    %388 = tpu.matmul %387, %369, %cst_147 {dimension_numbers = #tpu.dot_dimension_numbers<[2], [1], [1], [2], [0, 0, 0, 1, 1, 2], [0], [0]>} : vector<8x8x8xbf16>, vector<8x8x8xbf16>, vector<8x8x8xf32> -> vector<8x8x8xf32>
    "tpu.trace_stop"() : () -> ()
    %389 = tpu.concatenate %313, %338, %363, %388 in 2 : vector<8x8x8xf32>, vector<8x8x8xf32>, vector<8x8x8xf32>, vector<8x8x8xf32> -> vector<8x8x32xf32>
    %390 = arith.addf %234, %389 : vector<8x8x32xf32>
    %391 = vector.shape_cast %390 : vector<8x8x32xf32> to vector<64x32xf32>
    %c1_148 = arith.constant 1 : index
    %c0_149 = arith.constant 0 : index
    %c0_150 = arith.constant 0 : index
    %392 = vector.load %arg16[%c1_148, %c0_149, %c0_150] : memref<2x1x32xf32, #tpu.memory_space<vmem>>, vector<1x1x32xf32>
    %393 = vector.shape_cast %392 : vector<1x1x32xf32> to vector<1x32xf32>
    %c1_151 = arith.constant 1 : index
    %c0_152 = arith.constant 0 : index
    %c0_153 = arith.constant 0 : index
    %394 = vector.load %arg17[%c1_151, %c0_152, %c0_153] : memref<2x1x32xf32, #tpu.memory_space<vmem>>, vector<1x1x32xf32>
    %395 = vector.shape_cast %394 : vector<1x1x32xf32> to vector<1x32xf32>
    %cst_154 = arith.constant dense<0.000000e+00> : vector<64xf32>
    %396 = vector.multi_reduction <add>, %391, %cst_154 [1] : vector<64x32xf32> to vector<64xf32>
    %397 = vector.shape_cast %396 : vector<64xf32> to vector<64x1xf32>
    %cst_155 = arith.constant 3.200000e+01 : f32
    %398 = vector.broadcast %cst_155 : f32 to vector<64x1xf32>
    %399 = arith.divf %397, %398 : vector<64x1xf32>
    %400 = vector.broadcast %399 : vector<64x1xf32> to vector<64x32xf32>
    %401 = arith.subf %391, %400 : vector<64x32xf32>
    %402 = arith.mulf %401, %401 : vector<64x32xf32>
    %cst_156 = arith.constant dense<0.000000e+00> : vector<64xf32>
    %403 = vector.multi_reduction <add>, %402, %cst_156 [1] : vector<64x32xf32> to vector<64xf32>
    %404 = vector.shape_cast %403 : vector<64xf32> to vector<64x1xf32>
    %cst_157 = arith.constant 3.200000e+01 : f32
    %405 = vector.broadcast %cst_157 : f32 to vector<64x1xf32>
    %406 = arith.divf %404, %405 : vector<64x1xf32>
    %407 = vector.broadcast %399 : vector<64x1xf32> to vector<64x32xf32>
    %408 = arith.subf %391, %407 : vector<64x32xf32>
    %cst_158 = arith.constant 9.99999974E-6 : f32
    %409 = vector.broadcast %cst_158 : f32 to vector<64x1xf32>
    %410 = arith.addf %406, %409 : vector<64x1xf32>
    %411 = math.rsqrt %410 : vector<64x1xf32>
    %412 = vector.broadcast %411 : vector<64x1xf32> to vector<64x32xf32>
    %413 = arith.mulf %408, %412 : vector<64x32xf32>
    %414 = vector.broadcast %393 : vector<1x32xf32> to vector<64x32xf32>
    %415 = arith.mulf %413, %414 : vector<64x32xf32>
    %416 = vector.broadcast %395 : vector<1x32xf32> to vector<64x32xf32>
    %417 = arith.addf %415, %416 : vector<64x32xf32>
    %c1_159 = arith.constant 1 : index
    %c0_160 = arith.constant 0 : index
    %c0_161 = arith.constant 0 : index
    %418 = vector.load %arg18[%c1_159, %c0_160, %c0_161] : memref<2x32x32xbf16, #tpu.memory_space<vmem>>, vector<1x32x32xbf16>
    %419 = vector.shape_cast %418 : vector<1x32x32xbf16> to vector<32x32xbf16>
    %c1_162 = arith.constant 1 : index
    %c0_163 = arith.constant 0 : index
    %c0_164 = arith.constant 0 : index
    %420 = vector.load %arg19[%c1_162, %c0_163, %c0_164] : memref<2x1x32xf32, #tpu.memory_space<vmem>>, vector<1x1x32xf32>
    %421 = vector.shape_cast %420 : vector<1x1x32xf32> to vector<1x32xf32>
    %422 = arith.truncf %417 : vector<64x32xf32> to vector<64x32xbf16>
    %cst_165 = arith.constant dense<0.000000e+00> : vector<64x32xf32>
    %423 = tpu.matmul %422, %419, %cst_165 {dimension_numbers = #tpu.dot_dimension_numbers<[1], [1], [0], [0], [0, 0, 1, 0], [], []>} : vector<64x32xbf16>, vector<32x32xbf16>, vector<64x32xf32> -> vector<64x32xf32>
    %424 = vector.broadcast %421 : vector<1x32xf32> to vector<64x32xf32>
    %425 = arith.addf %423, %424 : vector<64x32xf32>
    %426 = math.tanh %425 : vector<64x32xf32>
    %c1_166 = arith.constant 1 : index
    %c0_167 = arith.constant 0 : index
    %c0_168 = arith.constant 0 : index
    %427 = vector.load %arg20[%c1_166, %c0_167, %c0_168] : memref<2x32x32xbf16, #tpu.memory_space<vmem>>, vector<1x32x32xbf16>
    %428 = vector.shape_cast %427 : vector<1x32x32xbf16> to vector<32x32xbf16>
    %c1_169 = arith.constant 1 : index
    %c0_170 = arith.constant 0 : index
    %c0_171 = arith.constant 0 : index
    %429 = vector.load %arg21[%c1_169, %c0_170, %c0_171] : memref<2x1x32xf32, #tpu.memory_space<vmem>>, vector<1x1x32xf32>
    %430 = vector.shape_cast %429 : vector<1x1x32xf32> to vector<1x32xf32>
    %431 = arith.truncf %417 : vector<64x32xf32> to vector<64x32xbf16>
    %cst_172 = arith.constant dense<0.000000e+00> : vector<64x32xf32>
    %432 = tpu.matmul %431, %428, %cst_172 {dimension_numbers = #tpu.dot_dimension_numbers<[1], [1], [0], [0], [0, 0, 1, 0], [], []>} : vector<64x32xbf16>, vector<32x32xbf16>, vector<64x32xf32> -> vector<64x32xf32>
    %433 = vector.broadcast %430 : vector<1x32xf32> to vector<64x32xf32>
    %434 = arith.addf %432, %433 : vector<64x32xf32>
    %435 = arith.mulf %426, %434 : vector<64x32xf32>
    %436 = vector.shape_cast %435 : vector<64x32xf32> to vector<8x8x32xf32>
    %437 = arith.addf %390, %436 : vector<8x8x32xf32>
    %c0_173 = arith.constant 0 : index
    %c0_174 = arith.constant 0 : index
    %438 = vector.load %arg22[%c0_173, %c0_174] : memref<4x8xbf16, #tpu.memory_space<vmem>>, vector<4x8xbf16>
    %439 = vector.shape_cast %438 : vector<4x8xbf16> to vector<1x4x8xbf16>
    %440 = vector.shape_cast %439 : vector<1x4x8xbf16> to vector<1x4x8xbf16>
    %441 = vector.broadcast %440 : vector<1x4x8xbf16> to vector<8x4x8xbf16>
    %442 = arith.truncf %437 : vector<8x8x32xf32> to vector<8x8x32xbf16>
    "tpu.trace_start"() <{level = 10 : i32, message = "bof,bfc->boc"}> : () -> ()
    %cst_175 = arith.constant dense<0.000000e+00> : vector<8x4x32xf32>
    %443 = tpu.matmul %441, %442, %cst_175 {dimension_numbers = #tpu.dot_dimension_numbers<[2], [1], [1], [2], [0, 0, 0, 1, 1, 2], [0], [0]>} : vector<8x4x8xbf16>, vector<8x8x32xbf16>, vector<8x4x32xf32> -> vector<8x4x32xf32>
    "tpu.trace_stop"() : () -> ()
    %c0_176 = arith.constant 0 : index
    %c0_177 = arith.constant 0 : index
    %c0_178 = arith.constant 0 : index
    %444 = vector.load %arg23[%c0_176, %c0_177, %c0_178] : memref<1x4x1xf32, #tpu.memory_space<vmem>>, vector<1x4x1xf32>
    %445 = vector.broadcast %444 : vector<1x4x1xf32> to vector<8x4x32xf32>
    %446 = arith.addf %443, %445 : vector<8x4x32xf32>
    %cst_179 = arith.constant 0.000000e+00 : f32
    %447 = vector.broadcast %cst_179 : f32 to vector<8x4x32xf32>
    %448 = arith.cmpf ogt, %446, %447 : vector<8x4x32xf32>
    %c0_180 = arith.constant 0 : index
    %c0_181 = arith.constant 0 : index
    %c0_182 = arith.constant 0 : index
    %449 = vector.load %arg24[%c0_180, %c0_181, %c0_182] : memref<1x1x1xf32, #tpu.memory_space<vmem>>, vector<1x1x1xf32>
    %450 = vector.broadcast %449 : vector<1x1x1xf32> to vector<8x4x32xf32>
    %451 = arith.mulf %446, %450 : vector<8x4x32xf32>
    %452 = arith.select %448, %446, %451 : vector<8x4x32xi1>, vector<8x4x32xf32>
    %c0_183 = arith.constant 0 : index
    %c0_184 = arith.constant 0 : index
    %c0_185 = arith.constant 0 : index
    %453 = vector.load %arg25[%c0_183, %c0_184, %c0_185] : memref<1x1x32xf32, #tpu.memory_space<vmem>>, vector<1x1x32xf32>
    %454 = vector.broadcast %453 : vector<1x1x32xf32> to vector<8x4x32xf32>
    %455 = arith.mulf %452, %454 : vector<8x4x32xf32>
    %cst_186 = arith.constant dense<0.000000e+00> : vector<8x4xf32>
    %456 = vector.multi_reduction <add>, %455, %cst_186 [2] : vector<8x4x32xf32> to vector<8x4xf32>
    %c0_187 = arith.constant 0 : index
    %c0_188 = arith.constant 0 : index
    %457 = vector.load %arg26[%c0_187, %c0_188] : memref<1x1xf32, #tpu.memory_space<vmem>>, vector<1x1xf32>
    %458 = vector.broadcast %457 : vector<1x1xf32> to vector<8x4xf32>
    %459 = arith.addf %456, %458 : vector<8x4xf32>
    %c0_189 = arith.constant 0 : index
    %c0_190 = arith.constant 0 : index
    %460 = vector.load %arg27[%c0_189, %c0_190] : memref<8x4xf32, #tpu.memory_space<vmem>>, vector<8x4xf32>
    tpu.vector_store %arg27[%c0_189, %c0_190], %459 {strides = array<i32>} : memref<8x4xf32, #tpu.memory_space<vmem>>, vector<8x4xf32>,
    return
  }
  func.func @transform_0(%arg0: i32) -> (i32, i32) {
    %c0_i32 = arith.constant 0 : i32
    %c0_i32_0 = arith.constant 0 : i32
    return %arg0, %c0_i32 : i32, i32
  }
  func.func @transform_1(%arg0: i32) -> (i32, i32) {
    %c0_i32 = arith.constant 0 : i32
    %c0_i32_0 = arith.constant 0 : i32
    %c0_i32_1 = arith.constant 0 : i32
    return %c0_i32, %c0_i32_0 : i32, i32
  }
  func.func @transform_2(%arg0: i32) -> (i32, i32) {
    %c0_i32 = arith.constant 0 : i32
    %c0_i32_0 = arith.constant 0 : i32
    %c0_i32_1 = arith.constant 0 : i32
    return %c0_i32, %c0_i32_0 : i32, i32
  }
  func.func @transform_3(%arg0: i32) -> (i32, i32) {
    %c0_i32 = arith.constant 0 : i32
    %c0_i32_0 = arith.constant 0 : i32
    %c0_i32_1 = arith.constant 0 : i32
    return %c0_i32, %c0_i32_0 : i32, i32
  }
  func.func @transform_4(%arg0: i32) -> (i32, i32) {
    %c0_i32 = arith.constant 0 : i32
    %c0_i32_0 = arith.constant 0 : i32
    %c0_i32_1 = arith.constant 0 : i32
    return %c0_i32, %c0_i32_0 : i32, i32
  }
  func.func @transform_5(%arg0: i32) -> (i32, i32) {
    %c0_i32 = arith.constant 0 : i32
    %c0_i32_0 = arith.constant 0 : i32
    %c0_i32_1 = arith.constant 0 : i32
    return %c0_i32, %c0_i32_0 : i32, i32
  }
  func.func @transform_6(%arg0: i32) -> (i32, i32) {
    %c0_i32 = arith.constant 0 : i32
    %c0_i32_0 = arith.constant 0 : i32
    %c0_i32_1 = arith.constant 0 : i32
    return %c0_i32, %c0_i32_0 : i32, i32
  }
  func.func @transform_7(%arg0: i32) -> (i32, i32, i32) {
    %c0_i32 = arith.constant 0 : i32
    %c0_i32_0 = arith.constant 0 : i32
    %c0_i32_1 = arith.constant 0 : i32
    %c0_i32_2 = arith.constant 0 : i32
    return %c0_i32, %c0_i32_0, %c0_i32_1 : i32, i32, i32
  }
  func.func @transform_8(%arg0: i32) -> (i32, i32, i32) {
    %c0_i32 = arith.constant 0 : i32
    %c0_i32_0 = arith.constant 0 : i32
    %c0_i32_1 = arith.constant 0 : i32
    %c0_i32_2 = arith.constant 0 : i32
    return %c0_i32, %c0_i32_0, %c0_i32_1 : i32, i32, i32
  }
  func.func @transform_9(%arg0: i32) -> (i32, i32, i32) {
    %c0_i32 = arith.constant 0 : i32
    %c0_i32_0 = arith.constant 0 : i32
    %c0_i32_1 = arith.constant 0 : i32
    %c0_i32_2 = arith.constant 0 : i32
    return %c0_i32, %c0_i32_0, %c0_i32_1 : i32, i32, i32
  }
  func.func @transform_10(%arg0: i32) -> (i32, i32, i32) {
    %c0_i32 = arith.constant 0 : i32
    %c0_i32_0 = arith.constant 0 : i32
    %c0_i32_1 = arith.constant 0 : i32
    %c0_i32_2 = arith.constant 0 : i32
    return %c0_i32, %c0_i32_0, %c0_i32_1 : i32, i32, i32
  }
  func.func @transform_11(%arg0: i32) -> (i32, i32, i32) {
    %c0_i32 = arith.constant 0 : i32
    %c0_i32_0 = arith.constant 0 : i32
    %c0_i32_1 = arith.constant 0 : i32
    %c0_i32_2 = arith.constant 0 : i32
    return %c0_i32, %c0_i32_0, %c0_i32_1 : i32, i32, i32
  }
  func.func @transform_12(%arg0: i32) -> (i32, i32, i32) {
    %c0_i32 = arith.constant 0 : i32
    %c0_i32_0 = arith.constant 0 : i32
    %c0_i32_1 = arith.constant 0 : i32
    %c0_i32_2 = arith.constant 0 : i32
    return %c0_i32, %c0_i32_0, %c0_i32_1 : i32, i32, i32
  }
  func.func @transform_13(%arg0: i32) -> (i32, i32, i32) {
    %c0_i32 = arith.constant 0 : i32
    %c0_i32_0 = arith.constant 0 : i32
    %c0_i32_1 = arith.constant 0 : i32
    %c0_i32_2 = arith.constant 0 : i32
    return %c0_i32, %c0_i32_0, %c0_i32_1 : i32, i32, i32
  }
  func.func @transform_14(%arg0: i32) -> (i32, i32, i32) {
    %c0_i32 = arith.constant 0 : i32
    %c0_i32_0 = arith.constant 0 : i32
    %c0_i32_1 = arith.constant 0 : i32
    %c0_i32_2 = arith.constant 0 : i32
    return %c0_i32, %c0_i32_0, %c0_i32_1 : i32, i32, i32
  }
  func.func @transform_15(%arg0: i32) -> (i32, i32, i32) {
    %c0_i32 = arith.constant 0 : i32
    %c0_i32_0 = arith.constant 0 : i32
    %c0_i32_1 = arith.constant 0 : i32
    %c0_i32_2 = arith.constant 0 : i32
    return %c0_i32, %c0_i32_0, %c0_i32_1 : i32, i32, i32
  }
  func.func @transform_16(%arg0: i32) -> (i32, i32, i32) {
    %c0_i32 = arith.constant 0 : i32
    %c0_i32_0 = arith.constant 0 : i32
    %c0_i32_1 = arith.constant 0 : i32
    %c0_i32_2 = arith.constant 0 : i32
    return %c0_i32, %c0_i32_0, %c0_i32_1 : i32, i32, i32
  }
  func.func @transform_17(%arg0: i32) -> (i32, i32, i32) {
    %c0_i32 = arith.constant 0 : i32
    %c0_i32_0 = arith.constant 0 : i32
    %c0_i32_1 = arith.constant 0 : i32
    %c0_i32_2 = arith.constant 0 : i32
    return %c0_i32, %c0_i32_0, %c0_i32_1 : i32, i32, i32
  }
  func.func @transform_18(%arg0: i32) -> (i32, i32, i32) {
    %c0_i32 = arith.constant 0 : i32
    %c0_i32_0 = arith.constant 0 : i32
    %c0_i32_1 = arith.constant 0 : i32
    %c0_i32_2 = arith.constant 0 : i32
    return %c0_i32, %c0_i32_0, %c0_i32_1 : i32, i32, i32
  }
  func.func @transform_19(%arg0: i32) -> (i32, i32, i32) {
    %c0_i32 = arith.constant 0 : i32
    %c0_i32_0 = arith.constant 0 : i32
    %c0_i32_1 = arith.constant 0 : i32
    %c0_i32_2 = arith.constant 0 : i32
    return %c0_i32, %c0_i32_0, %c0_i32_1 : i32, i32, i32
  }
  func.func @transform_20(%arg0: i32) -> (i32, i32, i32) {
    %c0_i32 = arith.constant 0 : i32
    %c0_i32_0 = arith.constant 0 : i32
    %c0_i32_1 = arith.constant 0 : i32
    %c0_i32_2 = arith.constant 0 : i32
    return %c0_i32, %c0_i32_0, %c0_i32_1 : i32, i32, i32
  }
  func.func @transform_21(%arg0: i32) -> (i32, i32) {
    %c0_i32 = arith.constant 0 : i32
    %c0_i32_0 = arith.constant 0 : i32
    %c0_i32_1 = arith.constant 0 : i32
    return %c0_i32, %c0_i32_0 : i32, i32
  }
  func.func @transform_22(%arg0: i32) -> (i32, i32, i32) {
    %c0_i32 = arith.constant 0 : i32
    %c0_i32_0 = arith.constant 0 : i32
    %c0_i32_1 = arith.constant 0 : i32
    %c0_i32_2 = arith.constant 0 : i32
    return %c0_i32, %c0_i32_0, %c0_i32_1 : i32, i32, i32
  }
  func.func @transform_23(%arg0: i32) -> (i32, i32, i32) {
    %c0_i32 = arith.constant 0 : i32
    %c0_i32_0 = arith.constant 0 : i32
    %c0_i32_1 = arith.constant 0 : i32
    %c0_i32_2 = arith.constant 0 : i32
    return %c0_i32, %c0_i32_0, %c0_i32_1 : i32, i32, i32
  }
  func.func @transform_24(%arg0: i32) -> (i32, i32, i32) {
    %c0_i32 = arith.constant 0 : i32
    %c0_i32_0 = arith.constant 0 : i32
    %c0_i32_1 = arith.constant 0 : i32
    %c0_i32_2 = arith.constant 0 : i32
    return %c0_i32, %c0_i32_0, %c0_i32_1 : i32, i32, i32
  }
  func.func @transform_25(%arg0: i32) -> (i32, i32) {
    %c0_i32 = arith.constant 0 : i32
    %c0_i32_0 = arith.constant 0 : i32
    %c0_i32_1 = arith.constant 0 : i32
    return %c0_i32, %c0_i32_0 : i32, i32
  }
  func.func @transform_26(%arg0: i32) -> (i32, i32) {
    %c0_i32 = arith.constant 0 : i32
    %c0_i32_0 = arith.constant 0 : i32
    return %arg0, %c0_i32 : i32, i32
  }
}

</mosaic_0001>

<bundles_post_ra>
// kernel: tpu_custom_call.1
= control target key start
LH: loop header
LB: loop body
LE: loop exit
PB: predicated region body
PF: predicated region fallthrough
CT: control target
= control target key end

     0   :  { %s10908_s0 = inlined_call_operand.vmem [shape: f32[16,8], index: 0, kind: input, shape index: {}]   ;;  %s10909_s1 = inlined_call_operand.hbm [shape: f32[1,8], index: 1, kind: input, shape index: {}]   ;;  %s10910_s2 = inlined_call_operand.hbm [shape: f32[1,8], index: 2, kind: input, shape index: {}]   ;;  %s10911_s3 = inlined_call_operand.vmem [shape: f32[8,32], index: 3, kind: input, shape index: {}]   ;;  %s10912_s4 = inlined_call_operand.vmem [shape: f32[8,32], index: 4, kind: input, shape index: {}]   ;;  %s10913_s5 = inlined_call_operand.vmem [shape: f32[8,32], index: 5, kind: input, shape index: {}]   ;;  %s10914_s6 = inlined_call_operand.hbm [shape: f32[8,32], index: 6, kind: input, shape index: {}]   ;;  %s10915_s7 = inlined_call_operand.vmem [shape: f32[2,1,32], index: 7, kind: input, shape index: {}]   ;;  %s10916_s8 = inlined_call_operand.vmem [shape: f32[2,1,32], index: 8, kind: input, shape index: {}]   ;;  %s10917_s9 = inlined_call_operand.hbm [shape: bf16[2,32,32], index: 9, kind: input, shape index: {}]   ;;  %s10918_s10 = inlined_call_operand.vmem [shape: f32[2,1,32], index: 10, kind: input, shape index: {}]   ;;  %s10919_s11 = inlined_call_operand.hbm [shape: bf16[2,32,32], index: 11, kind: input, shape index: {}]   ;;  %s10920_s12 = inlined_call_operand.vmem [shape: f32[2,1,32], index: 12, kind: input, shape index: {}]   ;;  %s10921_s13 = inlined_call_operand.hbm [shape: bf16[2,32,32], index: 13, kind: input, shape index: {}]   ;;  %s10922_s14 = inlined_call_operand.vmem [shape: f32[2,1,32], index: 14, kind: input, shape index: {}]   ;;  %s10923_s15 = inlined_call_operand.vmem [shape: f32[2,1,32], index: 15, kind: input, shape index: {}]   ;;  %s10924_s16 = inlined_call_operand.vmem [shape: f32[2,1,32], index: 16, kind: input, shape index: {}]   ;;  %s10925_s17 = inlined_call_operand.hbm [shape: bf16[2,32,32], index: 17, kind: input, shape index: {}]   ;;  %s10926_s18 = inlined_call_operand.vmem [shape: f32[2,1,32], index: 18, kind: input, shape index: {}]   ;;  %s10927_s19 = inlined_call_operand.hbm [shape: bf16[2,32,32], index: 19, kind: input, shape index: {}]   ;;  %s10928_s20 = inlined_call_operand.vmem [shape: f32[2,1,32], index: 20, kind: input, shape index: {}]   ;;  %s10929_s21 = inlined_call_operand.vmem [shape: bf16[4,8], index: 21, kind: input, shape index: {}]   ;;  %s10930_s22 = inlined_call_operand.vmem [shape: f32[1,4,1], index: 22, kind: input, shape index: {}]   ;;  %s10931_s23 = inlined_call_operand.<no memory space> [shape: f32[1,1,1], index: 23, kind: input, shape index: {}]   ;;  %s10932_s24 = inlined_call_operand.vmem [shape: f32[1,1,32], index: 24, kind: input, shape index: {}]   ;;  %s10933_s26 = inlined_call_operand.vmem [shape: f32[16,4], index: 26, kind: output, shape index: {}]   ;;  %s10934_s25 = inlined_call_operand.<no memory space> [shape: f32[1,1], index: 25, kind: input, shape index: {}]  }
   0x1   :  { %10948 = sst [smem:[#allocation30_spill]] %s10908_s0  ;;  %v31_v0 = vstv %s10931_s23  ;;  %v33_v1 = vstv %s10934_s25 }
   0x2   :  { %10949 = sst [smem:[#allocation31_spill]] %s10909_s1  ;;  %32 = vst [vmem:[#allocation2] sm:$0x1] %v31_v0 }
   0x3   :  { %10950 = sst [smem:[#allocation32_spill]] %s10910_s2  ;;  %34 = vst [vmem:[#allocation3] sm:$0x1] %v33_v1 }
   0x4   :  { %10951 = sst [smem:[#allocation33_spill]] %s10911_s3 }
   0x5   :  { %10952 = sst [smem:[#allocation34_spill]] %s10912_s4 }
   0x6   :  { %10953 = sst [smem:[#allocation35_spill]] %s10913_s5 }
   0x7   :  { %10954 = sst [smem:[#allocation36_spill]] %s10914_s6 }
   0x8   :  { %10955 = sst [smem:[#allocation37_spill]] %s10915_s7 }
   0x9   :  { %10956 = sst [smem:[#allocation38_spill]] %s10916_s8 }
   0xa   :  { %10957 = sst [smem:[#allocation39_spill]] %s10917_s9 }
   0xb   :  { %10958 = sst [smem:[#allocation40_spill]] %s10918_s10 }
   0xc   :  { %10959 = sst [smem:[#allocation41_spill]] %s10921_s13 }
   0xd   :  { %10960 = sst [smem:[#allocation42_spill]] %s10933_s26 }
   0xe   :  { %35 = vsyncpa [#allocation5], 0 }
   0xf   :  { %36 = vsyncpa [#allocation7], 0 }
  0x10   :  { %37 = vsyncpa [#allocation10], 0 }
  0x11   :  { %38 = vsyncpa [#allocation13], 0 }
  0x12   :  { %39 = vsyncpa [#allocation16], 0  ;;  %s8221_s8 = smov 0  }
  0x13 LB: > { %10961 = sst [smem:[#allocation22_spill]] %s8060_s8  ;;  %s8230_s0 = sadd.s32 4294967295, %s8060_s8   ;;  %s8060_s8 = sphi %s8221_s8, %s45_s8  }
  0x14   : > { %s10962_s29 = sld [smem:[#allocation32_spill]]  ;;  %p6987_p0 = scmp.ge.s32.totalorder %s8060_s8, 1 }
  0x15   : > { %p627_p1 = scmp.lt.s32.totalorder %s8060_s8, 3  ;;  %p7352_p2 = scmp.eq.s32.totalorder %s8230_s0, 0 }
  0x16   : > { %s8062_s30 = smov [#allocation6]   ;;  %s10964_s6 = sld [smem:[#allocation39_spill]] }
  0x17   : > { %p8235_p3 = pnand %p6987_p0, %p627_p1  ;;  %s653_s2 = sshll.u32 %s8062_s30, 4  ;;  %s654_s2 = int_to_ptr.vmem [resolvable:$true] %s653_s2 }
  0x18   : > { %s8063_s3 = smov [#allocation9]   ;;  %s10966_s13 = sld [smem:[#allocation41_spill]] }
  0x19   : > { %p7327_p4 = pneg %p8235_p3  ;;  %s691_s7 = sshll.u32 %s8063_s3, 4  ;;  %s692_s7 = int_to_ptr.vmem [resolvable:$true] %s691_s7 }
  0x1a   : > { %s651_s25 = sshll.u32 %s10962_s29, 4  ;;  %s8064_s29 = smov 64   ;;  %s652_s25 = int_to_ptr.hbm [resolvable:$true] %s651_s25 }
  0x1b   : > { %p8246_p5 = pnand %p7352_p2, %p7327_p4  ;;  %s8065_s30 = smov 4  }
  0x1c   : > { %s689_s1 = sshll.u32 %s10964_s6, 4  ;;  %s8066_s5 = smov [#allocation12]   ;;  %s690_s1 = int_to_ptr.hbm [resolvable:$true] %s689_s1 }
  0x1d   : > { %7333 = dma.hbm_to_vmem [thread:$0]  (!%p8246_p5), %s652_s25, 16, %s654_s2, [#allocation7]  }
  0x1e   : > { %s723_s23 = sshll.u32 %s10966_s13, 4  ;;  %s725_s10 = sshll.u32 %s8066_s5, 4  ;;  %s724_s23 = int_to_ptr.hbm [resolvable:$true] %s723_s23  ;;  %s726_s10 = int_to_ptr.vmem [resolvable:$true] %s725_s10 }
  0x1f   : > { %7339 = dma.hbm_to_vmem [thread:$0]  (!%p8246_p5), %s690_s1, 512, %s692_s7, [#allocation10], %s8064_s29, %s8064_s29, %s8065_s30  }
  0x20   : > { %s10967_s8 = sld [smem:[#allocation31_spill]]  ;;  %s8067_s1 = smov [#allocation4]  }
  0x21   : > { %7345 = dma.hbm_to_vmem [thread:$0]  (!%p8246_p5), %s724_s23, 512, %s726_s10, [#allocation13], %s8064_s29, %s8064_s29, %s8065_s30  }
  0x22   : > { %s10968_s28 = sld [smem:[#allocation36_spill]]  ;;  %s641_s7 = sshll.u32 %s8067_s1, 4  ;;  %s642_s7 = int_to_ptr.vmem [resolvable:$true] %s641_s7 }
  0x23   : > { %s8068_s5 = smov [#allocation8]   ;;  %s706_s13 = sshll.u32 %s10919_s11, 4  ;;  %s707_s13 = int_to_ptr.hbm [resolvable:$true] %s706_s13 }
  0x24   : > { %s746_s25 = sshll.u32 %s10925_s17, 4  ;;  %s8069_s2 = smov [#allocation11]   ;;  %s747_s25 = int_to_ptr.hbm [resolvable:$true] %s746_s25 }
  0x26   : > { %s639_s26 = sshll.u32 %s10967_s8, 4  ;;  %s674_s8 = sshll.u32 %s8068_s5, 4  ;;  %s640_s26 = int_to_ptr.hbm [resolvable:$true] %s639_s26  ;;  %s675_s8 = int_to_ptr.vmem [resolvable:$true] %s674_s8 }
  0x27   : > { %7330 = dma.hbm_to_vmem [thread:$0]  (!%p8246_p5), %s640_s26, 16, %s642_s7, [#allocation5]  }
  0x28   : > { %s672_s4 = sshll.u32 %s10968_s28, 4  ;;  %s708_s28 = sshll.u32 %s8069_s2, 4  ;;  %s673_s4 = int_to_ptr.hbm [resolvable:$true] %s672_s4  ;;  %s709_s28 = int_to_ptr.vmem [resolvable:$true] %s708_s28 }
  0x29   : > { %7336 = dma.hbm_to_vmem [thread:$0]  (!%p8246_p5), %s673_s4, 128, %s675_s8, [#allocation7]  }
  0x2a   : > { %7342 = dma.hbm_to_vmem [thread:$0]  (!%p8246_p5), %s707_s13, 512, %s709_s28, [#allocation10], %s8064_s29, %s8064_s29, %s8065_s30  }
  0x2b   : > { %s8070_s26 = smov [#allocation14]   ;;  %s763_s4 = sshll.u32 %s10927_s19, 4  ;;  %s764_s4 = int_to_ptr.hbm [resolvable:$true] %s763_s4 }
  0x2c   : > { %s748_s1 = sshll.u32 %s8070_s26, 4  ;;  %s8071_s8 = smov [#allocation15]   ;;  %s749_s1 = int_to_ptr.vmem [resolvable:$true] %s748_s1 }
  0x2d   : > { %7348 = dma.hbm_to_vmem [thread:$0]  (!%p8246_p5), %s747_s25, 512, %s749_s1, [#allocation13], %s8064_s29, %s8064_s29, %s8065_s30  }
  0x2e   : > { %s765_s6 = sshll.u32 %s8071_s8, 4  ;;  %806 = sbr.rel (%p8235_p3) target bundleno = 6661 (0x1a05), region = 124  ;;  %s766_s6 = int_to_ptr.vmem [resolvable:$true] %s765_s6 }
  0x2f   : > { %7351 = dma.hbm_to_vmem [thread:$0]  (!%p8246_p5), %s764_s4, 512, %s766_s6, [#allocation16], %s8064_s29, %s8064_s29, %s8065_s30  }
  0x33   : > { %8039 = dma.done.wait (%p7352_p2), [#allocation5], 16  }
  0x34   : > { %8041 = vsyncadd (%p7352_p2), [#allocation5], 4294967280 }
  0x35   : > { %8043 = dma.done.wait (%p7352_p2), [#allocation7], 144  }
  0x36   : > { %8045 = vsyncadd (%p7352_p2), [#allocation7], 4294967152 }
  0x37   : > { %8047 = dma.done.wait (%p7352_p2), [#allocation10], 1024  }
  0x38   : > { %8049 = vsyncadd (%p7352_p2), [#allocation10], 4294966272 }
  0x39   : > { %8051 = dma.done.wait (%p7352_p2), [#allocation13], 1024  }
  0x3a   : > { %8053 = vsyncadd (%p7352_p2), [#allocation13], 4294966272 }
  0x3b   : > { %8055 = dma.done.wait (%p7352_p2), [#allocation16], 512  }
  0x3c   : > { %8057 = vsyncadd (%p7352_p2), [#allocation16], 4294966784  ;;  %v945_v2 = vlaneseq  ;;  %p910_p6 = scmp.lt.s32.totalorder %s8230_s0, 1  ;;  %v7400_v4 = vld [vmem:[#allocation6] ss:$0 sm:$0xff]  ;;  %s10969_s29 = sld [smem:[#allocation30_spill]] }
  0x3d   : > { %7422 = vrcp.f32 %v7400_v4  ;;  %v940_v7 = vand.u32 2147483648, %v7400_v4  ;;  %v7399_v8 = vld [vmem:[#allocation4] ss:$0 sm:$0xff]  ;;  %vm934_vm0 = vweird.f32 %v7400_v4  ;;  %v938_v10 = vand.u32 2147483647, %v7400_v4  ;;  %s10970_s10 = sld [smem:[#allocation33_spill]] }
  0x3e   : > { %v8322_v3 = vshrl.u32 %v945_v2, 7  ;;  %s11004_s0 = smov (!%p910_p6, %s8230_s0), 1  ;;  %s10971_s28 = sld [smem:[#allocation34_spill]]  ;;  %v8366_v36 = vld [vmem:[#allocation8] sm:$0xff]  ;;  %vm1059_vm4 = vcmask 261120  }
  0x3f   : > { %s7006_s13 = sshll.u32 %s11004_s0, 3  ;;  %v941_v13 = vor.u32 1.1754944e-38, %v940_v7  ;;  %vm939_vm3 = vcmp.eq.f32.partialorder %v938_v10, 8.507059e+37  ;;  %s10972_s7 = sld [smem:[#allocation35_spill]] }
  0x40   : > { %7395 = vset.pattern.permute.xlu1 %v8322_v3  ;;  %7394 = vset.pattern.permute.xlu0 %v8322_v3  ;;  %s10977_s8 = sld [smem:[#allocation37_spill]]  ;;  %s8073_s26 = smov 120  }
  0x41   : > { %7396 = vset.pattern.permute.xlu2 %v8322_v3  ;;  %s10980_s25 = sld [smem:[#allocation40_spill]]  ;;  %s8074_s1 = smov 112  }
  0x42   : > { %s913_s30 = scalar_lea.vmem %s10969_s29, %s7006_s13  ;;  %s10979_s29 = sld [smem:[#allocation38_spill]] }
  0x43   : > { %v7423_v5 = vpop.eup %7422  ;;  %v919_v11 = vld [vmem:[%s913_s30] sm:$0xff]  ;;  %s8076_s5 = smov 8   ;;  %s8077_s4 = smov 16  }
  0x44   : > { %v930_v6 = vmul.f32 %v7423_v5, %v7400_v4  ;;  %vm935_vm1 = vweird.f32 %v7423_v5  ;;  %v924_v14 = vsub.f32 %v919_v11, %v7399_v8  ;;  %v8349_v26 = vld [vmem:[%s10970_s10] sm:$0xff] }
  0x45   : > { %vm936_vm2 = vmor %vm934_vm0, %vm935_vm1  ;;  %v8354_v27 = vld [vmem:[%s10971_s28] sm:$0xff] }
  0x46   : > { %v931_v9 = vsub.f32 1.0, %v930_v6  ;;  %v8361_v32 = vld [vmem:[%s10972_s7] sm:$0xff]  ;;  %s10978_s6 = smov %s10977_s8  ;;  %s8075_s7 = smov 104  }
  0x48   : > { %v932_v12 = vmul.f32 %v7423_v5, %v931_v9 }
  0x4a   : > { %v933_v15 = vadd.f32 %v7423_v5, %v932_v12 }
  0x4c   : > { %v937_v16 = vsel %vm936_vm2, %v7423_v5, %v933_v15 }
  0x4d   : > { %v942_v17 = vsel %vm939_vm3, %v941_v13, %v937_v16 }
  0x4e   : > { %v8337_v18 = vmul.f32 %v942_v17, %v924_v14  ;;  %v8072_v17 = vmov 32.0  }
  0x50   : > { %v958_v19 = vperm.slane %v8337_v18, 2  ;;  %v944_v20 = vperm.slane %v8337_v18, 0  ;;  %v965_v21 = vperm.slane %v8337_v18, 3  ;;  %v951_v22 = vperm.slane %v8337_v18, 1 }
  0x51   : > { %v972_v23 = vperm.slane %v8337_v18, 4  ;;  %v979_v24 = vperm.slane %v8337_v18, 5  ;;  %v993_v25 = vperm.slane %v8337_v18, 7  ;;  %v986_v16 = vperm.slane %v8337_v18, 6 }
  0x52   : > { %963 = vperm.xlu1 %7395, %v958_v19   ;;  %949 = vperm.xlu0 %7394, %v944_v20  }
  0x5a   : > { %970 = vperm.xlu1 %7395, %v965_v21   ;;  %956 = vperm.xlu0 %7394, %v951_v22  }
  0x62   : > { %977 = vperm.xlu0 %7394, %v972_v23   ;;  %984 = vperm.xlu1 %7395, %v979_v24  }
  0x6a   : > { %998 = vperm.xlu0 %7394, %v993_v25  }
  0xc4   : > { %v964_v28 = vpop.permute.xlu1 %963  ;;  %v950_v29 = vpop.permute.xlu0 %949 }
  0xc5   : > { %v1003_v30 = vmul.f32 %v8349_v26, %v964_v28  ;;  %v1001_v31 = vmul.f32 %v8349_v26, %v950_v29  ;;  %v1021_v35 = vmul.f32 %v8361_v32, %v964_v28  ;;  %v1019_v37 = vmul.f32 %v8361_v32, %v950_v29 }
  0xc7   : > { %v1012_v33 = vadd.f32 %v8354_v27, %v1003_v30  ;;  %v1010_v34 = vadd.f32 %v8354_v27, %v1001_v31  ;;  %v1030_v38 = vadd.f32 %v8366_v36, %v1021_v35  ;;  %v1028_v44 = vadd.f32 %v8366_v36, %v1019_v37 }
  0xc9   : > { %7424 = vtanh.f32 %v1012_v33 }
  0xca   : > { %7426 = vtanh.f32 %v1010_v34 }
  0xcc   : > { %v971_v39 = vpop.permute.xlu1 %970  ;;  %v957_v40 = vpop.permute.xlu0 %956 }
  0xcd   : > { %v1004_v41 = vmul.f32 %v8349_v26, %v971_v39  ;;  %v1002_v42 = vmul.f32 %v8349_v26, %v957_v40  ;;  %v1022_v48 = vmul.f32 %v8361_v32, %v971_v39  ;;  %v1020_v52 = vmul.f32 %v8361_v32, %v957_v40 }
  0xcf   : > { %v7425_v43 = vpop.eup %7424  ;;  %v1013_v45 = vadd.f32 %v8354_v27, %v1004_v41  ;;  %v1011_v46 = vadd.f32 %v8354_v27, %v1002_v42  ;;  %v1031_v54 = vadd.f32 %v8366_v36, %v1022_v48  ;;  %v1029_v58 = vadd.f32 %v8366_v36, %v1020_v52 }
  0xd0   : > { %v7427_v47 = vpop.eup %7426  ;;  %v8376_v49 = vmul.f32 %v7425_v43, %v1030_v38 }
  0xd1   : > { %7428 = vtanh.f32 %v1013_v45  ;;  %v8378_v50 = vmul.f32 %v7427_v47, %v1028_v44 }
  0xd2   : > { %7430 = vtanh.f32 %v1011_v46  ;;  %v1066_v51 = vsel %vm1059_vm4, %v8376_v49, 0.0 }
  0xd3   : > { %1067 = vadd.xlane.f32.xlu1 %v1066_v51  ;;  %v1060_v53 = vsel %vm1059_vm4, %v8378_v50, 0.0 }
  0xd4   : > { %1061 = vadd.xlane.f32.xlu2 %v1060_v53  ;;  %v978_v55 = vpop.permute.xlu0 %977  ;;  %v985_v25 = vpop.permute.xlu1 %984 }
  0xd5   : > { %v1005_v56 = vmul.f32 %v8349_v26, %v978_v55  ;;  %v1023_v63 = vmul.f32 %v8361_v32, %v978_v55  ;;  %v1006_v30 = vmul.f32 %v8349_v26, %v985_v25  ;;  %v1024_v39 = vmul.f32 %v8361_v32, %v985_v25 }
  0xd7   : > { %v7429_v57 = vpop.eup %7428  ;;  %v1014_v59 = vadd.f32 %v8354_v27, %v1005_v56  ;;  %v1032_v6 = vadd.f32 %v8366_v36, %v1023_v63  ;;  %v1015_v33 = vadd.f32 %v8354_v27, %v1006_v30  ;;  %v1033_v42 = vadd.f32 %v8366_v36, %v1024_v39 }
  0xd8   : > { %v7431_v60 = vpop.eup %7430  ;;  %v8389_v61 = vmul.f32 %v7429_v57, %v1031_v54 }
  0xd9   : > { %7432 = vtanh.f32 %v1014_v59  ;;  %v8391_v62 = vmul.f32 %v7431_v60, %v1029_v58 }
  0xda   : > { %v1069_v0 = vsel %vm1059_vm4, %v8389_v61, 0.0 }
  0xdb   : > { %1070 = vadd.xlane.f32.xlu0 %v1069_v0  ;;  %v1063_v1 = vsel %vm1059_vm4, %v8391_v62, 0.0 }
  0xdc   : > { %1064 = vadd.xlane.f32.xlu2 %v1063_v1  ;;  %v999_v4 = vpop.permute.xlu0 %998 }
  0xdd   : > { %v1008_v5 = vmul.f32 %v8349_v26, %v999_v4  ;;  %v1026_v10 = vmul.f32 %v8361_v32, %v999_v4 }
  0xdf   : > { %v7433_v7 = vpop.eup %7432  ;;  %v1017_v8 = vadd.f32 %v8354_v27, %v1008_v5  ;;  %v1035_v12 = vadd.f32 %v8366_v36, %v1026_v10 }
  0xe0   : > { %v8401_v9 = vmul.f32 %v7433_v7, %v1032_v6 }
  0xe1   : > { %7434 = vtanh.f32 %v1017_v8 }
  0xe2   : > { %10973 = vst [vmem:[#allocation23_spill] sm:$0xff] %v8401_v9  ;;  %v1072_v11 = vsel %vm1059_vm4, %v8401_v9, 0.0  ;;  %7436 = vrcp.f32 %v8072_v17 }
  0xe3   : > { %1073 = vadd.xlane.f32.xlu0 %v1072_v11  ;;  %7438 = vtanh.f32 %v1015_v33 }
  0xe7   : > { %v7435_v13 = vpop.eup %7434 }
  0xe8   : > { %v8407_v14 = vmul.f32 %v7435_v13, %v1035_v12  ;;  %v7437_v19 = vpop.eup %7436  ;;  %v7276_v13 = vld [vmem:[#allocation9 + $0x8] sm:$0xff] }
  0xe9   : > { %v1085_v20 = vmul.f32 32.0, %v7437_v19  ;;  %vm1089_vm5 = vweird.f32 %v7437_v19  ;;  %v7439_v45 = vpop.eup %7438  ;;  %v1303_v17 = vsel %vm1059_vm4, %v7276_v13, 0 }
  0xea   : > { %10974 = vst [vmem:[#allocation24_spill] sm:$0xff] %v8407_v14  ;;  %v1081_v15 = vsel %vm1059_vm4, %v8407_v14, 0.0  ;;  %v8439_v55 = vmul.f32 %v7439_v45, %v1033_v42  ;;  %1311 = vmatpush.bf16.xpose.msra.mxu0 %v1303_v17 }
  0xeb   : > { %1082 = vadd.xlane.f32.xlu0 %v1081_v15  ;;  %v1086_v21 = vsub.f32 1.0, %v1085_v20  ;;  %v7278_v15 = vld [vmem:[#allocation11 + $0x8] sm:$0xff] }
  0xed   : > { %v1087_v22 = vmul.f32 %v7437_v19, %v1086_v21  ;;  %v7275_v21 = vld [vmem:[#allocation9] sm:$0xff] }
  0xee   : > { %v1300_v25 = vsel %vm1059_vm4, %v7275_v21, 0 }
  0xef   : > { %v1088_v23 = vadd.f32 %v7437_v19, %v1087_v22  ;;  %v7277_v22 = vld [vmem:[#allocation11] sm:$0xff] }
  0xf1   : > { %v8412_v24 = vsel %vm1089_vm5, %v7437_v19, %v1088_v23  ;;  %v1356_v19 = vsel %vm1059_vm4, %v7278_v15, 0  ;;  %v7279_v23 = vld [vmem:[#allocation12] sm:$0xff] }
  0xf2   : > { %10975 = vst [vmem:[#allocation25_spill] sm:$0xff] %v8412_v24  ;;  %1364 = vmatpush.bf16.xpose.msra.mxu1 %v1356_v19  ;;  %1312 = vmatpush.bf16.xpose.msra.mxu0 %v1300_v25 }
  0xf4   : > { %991 = vperm.xlu2 %7396, %v986_v16   ;;  %v7280_v16 = vld [vmem:[#allocation12 + $0x8] sm:$0xff] }
  0xf5   : > { %v1409_v20 = vsel %vm1059_vm4, %v7280_v16, 0  ;;  %v8506_v16 = vld [vmem:[%s10979_s29] ss:$0 sm:$0xff] }
  0xf6   : > { %1417 = vmatpush.bf16.xpose.msra.mxu2 %v1409_v20 }
 0x146   : > { %v1068_v46 = vpop.xlane.xlu1 %1067 }
 0x147   : > { %v1062_v28 = vpop.xlane.xlu2 %1061  ;;  %v1093_v53 = vmul.f32 %v8412_v24, %v1068_v46 }
 0x148   : > { %v1091_v29 = vmul.f32 %v8412_v24, %v1062_v28  ;;  %v1353_v28 = vsel %vm1059_vm4, %v7277_v22, 0 }
 0x149   : > { %v8446_v59 = vsub.f32 %v8376_v49, %v1093_v53  ;;  %1365 = vmatpush.bf16.xpose.msra.mxu1 %v1353_v28 }
 0x14a   : > { %v8417_v31 = vsub.f32 %v8378_v50, %v1091_v29  ;;  %v1406_v29 = vsel %vm1059_vm4, %v7279_v23, 0 }
 0x14b   : > { %v1109_v4 = vmul.f32 %v8446_v59, %v8446_v59  ;;  %1418 = vmatpush.bf16.xpose.msra.mxu2 %v1406_v29 }
 0x14c   : > { %v1107_v18 = vmul.f32 %v8417_v31, %v8417_v31 }
 0x14d   : > { %v1121_v10 = vsel %vm1059_vm4, %v1109_v4, 0.0 }
 0x14e   : > { %v1115_v34 = vsel %vm1059_vm4, %v1107_v18, 0.0  ;;  %v1071_v35 = vpop.xlane.xlu0 %1070 }
 0x14f   : > { %1116 = vadd.xlane.f32.xlu2 %v1115_v34  ;;  %v1065_v37 = vpop.xlane.xlu2 %1064 }
 0x150   : > { %v1092_v38 = vmul.f32 %v8412_v24, %v1065_v37 }
 0x152   : > { %v8426_v40 = vsub.f32 %v8391_v62, %v1092_v38 }
 0x154   : > { %v1108_v41 = vmul.f32 %v8426_v40, %v8426_v40 }
 0x156   : > { %v1118_v43 = vsel %vm1059_vm4, %v1108_v41, 0.0  ;;  %v1074_v44 = vpop.xlane.xlu0 %1073 }
 0x157   : > { %1119 = vadd.xlane.f32.xlu1 %v1118_v43  ;;  %v992_v47 = vpop.permute.xlu2 %991  ;;  %v1095_v48 = vmul.f32 %v8412_v24, %v1074_v44 }
 0x158   : > { %v1007_v51 = vmul.f32 %v8349_v26, %v992_v47  ;;  %v1025_v56 = vmul.f32 %v8361_v32, %v992_v47  ;;  %v1075_v26 = vsel %vm1059_vm4, %v8439_v55, 0.0  ;;  %v1094_v32 = vmul.f32 %v8412_v24, %v1071_v35 }
 0x159   : > { %v8435_v52 = vsub.f32 %v8401_v9, %v1095_v48 }
 0x15a   : > { %v1016_v54 = vadd.f32 %v8354_v27, %v1007_v51  ;;  %v1034_v27 = vadd.f32 %v8366_v36, %v1025_v56  ;;  %v8463_v7 = vsub.f32 %v8389_v61, %v1094_v32 }
 0x15b   : > { %v1111_v57 = vmul.f32 %v8435_v52, %v8435_v52 }
 0x15c   : > { %7440 = vtanh.f32 %v1016_v54  ;;  %v1110_v11 = vmul.f32 %v8463_v7, %v8463_v7 }
 0x15d   : > { %v1127_v58 = vsel %vm1059_vm4, %v1111_v57, 0.0 }
 0x15e   : > { %1128 = vadd.xlane.f32.xlu0 %v1127_v58  ;;  %v1083_v60 = vpop.xlane.xlu0 %1082  ;;  %v1124_v12 = vsel %vm1059_vm4, %v1110_v11, 0.0 }
 0x15f   : > { %1076 = vadd.xlane.f32.xlu1 %v1075_v26  ;;  %v1098_v63 = vmul.f32 %v8412_v24, %v1083_v60 }
 0x161   : > { %v8454_v0 = vsub.f32 %v8407_v14, %v1098_v63 }
 0x162   : > { %v7441_v1 = vpop.eup %7440 }
 0x163   : > { %v8458_v5 = vmul.f32 %v7441_v1, %v1034_v27  ;;  %v1114_v6 = vmul.f32 %v8454_v0, %v8454_v0 }
 0x165   : > { %10976 = vst [vmem:[#allocation26_spill] sm:$0xff] %v8458_v5  ;;  %v1078_v36 = vsel %vm1059_vm4, %v8458_v5, 0.0  ;;  %v1136_v8 = vsel %vm1059_vm4, %v1114_v6, 0.0 }
 0x166   : > { %1079 = vadd.xlane.f32.xlu2 %v1078_v36  ;;  %1137 = vadd.xlane.f32.xlu0 %v1136_v8  ;;  %v8496_v36 = vld [vmem:[%s10977_s8] ss:$0 sm:$0xff]  ;;  %s8078_s8 = smov 24  }
 0x167   : > { %1122 = vadd.xlane.f32.xlu1 %v1121_v10 }
 0x16e   : > { %1125 = vadd.xlane.f32.xlu2 %v1124_v12 }
 0x1c2   : > { %v1117_v30 = vpop.xlane.xlu2 %1116 }
 0x1c3   : > { %v1139_v18 = vmul.f32 %v1117_v30, %v8412_v24 }
 0x1c5   : > { %v1147_v33 = vadd.f32 1e-05, %v1139_v18 }
 0x1c7   : > { %7442 = vrsqrt.f32 %v1147_v33  ;;  %vm1161_vm7 = vweird.f32 %v1147_v33 }
 0x1ca   : > { %v1120_v34 = vpop.xlane.xlu1 %1119 }
 0x1cb   : > { %v1140_v35 = vmul.f32 %v1120_v34, %v8412_v24 }
 0x1cd   : > { %v7443_v37 = vpop.eup %7442  ;;  %v1148_v38 = vadd.f32 1e-05, %v1140_v35 }
 0x1ce   : > { %v1156_v39 = vmul.f32 %v7443_v37, %v1147_v33  ;;  %vm1162_vm6 = vweird.f32 %v7443_v37 }
 0x1cf   : > { %7444 = vrsqrt.f32 %v1148_v38  ;;  %vm1163_vm8 = vmor %vm1161_vm7, %vm1162_vm6  ;;  %vm1171_vm10 = vweird.f32 %v1148_v38 }
 0x1d0   : > { %v1157_v41 = vmul.f32 %v7443_v37, %v1156_v39 }
 0x1d2   : > { %v1158_v42 = vmul.f32 0.5, %v1157_v41  ;;  %v1077_v43 = vpop.xlane.xlu1 %1076 }
 0x1d3   : > { %v1096_v44 = vmul.f32 %v8412_v24, %v1077_v43 }
 0x1d4   : > { %v1159_v45 = vsub.f32 1.5, %v1158_v42 }
 0x1d5   : > { %v7445_v46 = vpop.eup %7444  ;;  %v8482_v47 = vsub.f32 %v8439_v55, %v1096_v44 }
 0x1d6   : > { %v1160_v48 = vmul.f32 %v7443_v37, %v1159_v45  ;;  %v1166_v51 = vmul.f32 %v7445_v46, %v1148_v38  ;;  %vm1172_vm9 = vweird.f32 %v7445_v46 }
 0x1d7   : > { %v1112_v53 = vmul.f32 %v8482_v47, %v8482_v47  ;;  %vm1173_vm11 = vmor %vm1171_vm10, %vm1172_vm9  ;;  %vm1464_vm10 = vcmask 64512  }
 0x1d8   : > { %v1167_v54 = vmul.f32 %v7445_v46, %v1166_v51  ;;  %v1164_v58 = vsel %vm1163_vm8, %v7443_v37, %v1160_v48 }
 0x1d9   : > { %v1080_v56 = vpop.xlane.xlu2 %1079  ;;  %v1130_v57 = vsel %vm1059_vm4, %v1112_v53, 0.0  ;;  %v1235_v6 = vmul.f32 %v1164_v58, %v8417_v31 }
 0x1da   : > { %v1168_v26 = vmul.f32 0.5, %v1167_v54  ;;  %v1097_v60 = vmul.f32 %v8412_v24, %v1080_v56  ;;  %1131 = vadd.xlane.f32.xlu1 %v1130_v57  ;;  %v1123_v27 = vpop.xlane.xlu1 %1122 }
 0x1db   : > { %v1141_v63 = vmul.f32 %v1123_v27, %v8412_v24  ;;  %v1246_v31 = vmul.f32 %v8496_v36, %v1235_v6 }
 0x1dc   : > { %v1169_v32 = vsub.f32 1.5, %v1168_v26  ;;  %v8490_v1 = vsub.f32 %v8458_v5, %v1097_v60 }
 0x1dd   : > { %v1149_v4 = vadd.f32 1e-05, %v1141_v63  ;;  %v1257_v22 = vadd.f32 %v8506_v16, %v1246_v31 }
 0x1de   : > { %v1170_v8 = vmul.f32 %v7445_v46, %v1169_v32  ;;  %v1113_v10 = vmul.f32 %v8490_v1, %v8490_v1 }
 0x1df   : > { %7446 = vrsqrt.f32 %v1149_v4  ;;  %vm1181_vm13 = vweird.f32 %v1149_v4 }
 0x1e0   : > { %v1174_v11 = vsel %vm1173_vm11, %v7445_v46, %v1170_v8  ;;  %v1133_v12 = vsel %vm1059_vm4, %v1113_v10, 0.0 }
 0x1e1   : > { %1134 = vadd.xlane.f32.xlu2 %v1133_v12  ;;  %v1126_v13 = vpop.xlane.xlu2 %1125  ;;  %v1236_v15 = vmul.f32 %v1174_v11, %v8426_v40 }
 0x1e2   : > { %v1142_v17 = vmul.f32 %v1126_v13, %v8412_v24 }
 0x1e3   : > { %v1247_v19 = vmul.f32 %v8496_v36, %v1236_v15 }
 0x1e4   : > { %v1150_v20 = vadd.f32 1e-05, %v1142_v17 }
 0x1e5   : > { %v7447_v21 = vpop.eup %7446  ;;  %v1258_v23 = vadd.f32 %v8506_v16, %v1247_v19 }
 0x1e6   : > { %v1176_v25 = vmul.f32 %v7447_v21, %v1149_v4  ;;  %7448 = vrsqrt.f32 %v1150_v20  ;;  %vm1182_vm12 = vweird.f32 %v7447_v21  ;;  %vm1191_vm0 = vweird.f32 %v1150_v20 }
 0x1e7   : > { %v1270_v40 = vpack.c.bf16 %v1258_v23, %v1257_v22  ;;  %vm1183_vm14 = vmor %vm1181_vm13, %vm1182_vm12 }
 0x1e8   : > { %v1177_v28 = vmul.f32 %v7447_v21, %v1176_v25 }
 0x1e9   : > { %7016 = vmatmul.msk.bf16.vlgmr.msra.gmra.mxu0 %vm1059_vm4, %v1270_v40  ;;  %7028 = vmatmul.msk.bf16.vlgmr.msra.gmra.mxu1 %vm1059_vm4, %v1270_v40 }
 0x1ea   : > { %v1178_v29 = vmul.f32 0.5, %v1177_v28  ;;  %7040 = vmatmul.msk.bf16.vlgmr.msra.gmra.mxu2 %vm1059_vm4, %v1270_v40 }
 0x1ec   : > { %v7449_v30 = vpop.eup %7448  ;;  %v1179_v18 = vsub.f32 1.5, %v1178_v29 }
 0x1ed   : > { %v1186_v33 = vmul.f32 %v7449_v30, %v1150_v20  ;;  %vm1192_vm15 = vweird.f32 %v7449_v30 }
 0x1ee   : > { %v1180_v34 = vmul.f32 %v7447_v21, %v1179_v18  ;;  %vm1193_vm1 = vmor %vm1191_vm0, %vm1192_vm15  ;;  %vm1734_vm0 = vcmask 1043456  }
 0x1ef   : > { %v1187_v35 = vmul.f32 %v7449_v30, %v1186_v33 }
 0x1f0   : > { %v1184_v37 = vsel %vm1183_vm14, %v7447_v21, %v1180_v34 }
 0x1f1   : > { %v1188_v38 = vmul.f32 0.5, %v1187_v35  ;;  %v1237_v41 = vmul.f32 %v1184_v37, %v8446_v59  ;;  %v1129_v59 = vpop.xlane.xlu0 %1128  ;;  %v8532_v35 = vld [vmem:[%s10920_s12] ss:$0 sm:$0xff] }
 0x1f2   : > { %v1143_v54 = vmul.f32 %v1129_v59, %v8412_v24 }
 0x1f3   : > { %v1189_v39 = vsub.f32 1.5, %v1188_v38  ;;  %v1248_v45 = vmul.f32 %v8496_v36, %v1237_v41 }
 0x1f4   : > { %v1151_v56 = vadd.f32 1e-05, %v1143_v54 }
 0x1f5   : > { %v1190_v42 = vmul.f32 %v7449_v30, %v1189_v39  ;;  %v1259_v48 = vadd.f32 %v8506_v16, %v1248_v45 }
 0x1f6   : > { %7450 = vrsqrt.f32 %v1151_v56  ;;  %vm1201_vm3 = vweird.f32 %v1151_v56 }
 0x1f7   : > { %v1194_v43 = vsel %vm1193_vm1, %v7449_v30, %v1190_v42 }
 0x1f8   : > { %v1238_v44 = vmul.f32 %v1194_v43, %v8463_v7 }
 0x1f9   : > { %v1138_v7 = vpop.xlane.xlu0 %1137 }
 0x1fa   : > { %v1249_v46 = vmul.f32 %v8496_v36, %v1238_v44  ;;  %v1146_v58 = vmul.f32 %v1138_v7, %v8412_v24 }
 0x1fc   : > { %v1260_v51 = vadd.f32 %v8506_v16, %v1249_v46  ;;  %v7451_v57 = vpop.eup %7450  ;;  %v1154_v60 = vadd.f32 1e-05, %v1146_v58 }
 0x1fd   : > { %v1196_v26 = vmul.f32 %v7451_v57, %v1151_v56  ;;  %vm1202_vm2 = vweird.f32 %v7451_v57 }
 0x1fe   : > { %v1271_v53 = vpack.c.bf16 %v1260_v51, %v1259_v48  ;;  %7452 = vrsqrt.f32 %v1154_v60  ;;  %vm1203_vm5 = vmor %vm1201_vm3, %vm1202_vm2  ;;  %vm1231_vm14 = vweird.f32 %v1154_v60  ;;  %vm3461_vm2 = vcmask 195584  }
 0x1ff   : > { %v1197_v27 = vmul.f32 %v7451_v57, %v1196_v26  ;;  %vm3452_vm3 = vcmask 130048  }
 0x200   : > { %7017 = vmatmul.msk.bf16.gmra.mxu0 %vm1059_vm4, %v1271_v53  ;;  %7029 = vmatmul.msk.bf16.gmra.mxu1 %vm1059_vm4, %v1271_v53 }
 0x201   : > { %7041 = vmatmul.msk.bf16.gmra.mxu2 %vm1059_vm4, %v1271_v53  ;;  %v1198_v6 = vmul.f32 0.5, %v1197_v27  ;;  %v8545_v53 = vld [vmem:[%s10980_s25] ss:$0 sm:$0xff] }
 0x203   : > { %v1199_v10 = vsub.f32 1.5, %v1198_v6 }
 0x204   : > { %v7453_v12 = vpop.eup %7452 }
 0x205   : > { %v1200_v31 = vmul.f32 %v7451_v57, %v1199_v10  ;;  %v1226_v17 = vmul.f32 %v7453_v12, %v1154_v60  ;;  %vm1232_vm11 = vweird.f32 %v7453_v12 }
 0x206   : > { %vm1233_vm15 = vmor %vm1231_vm14, %vm1232_vm11 }
 0x207   : > { %v1204_v21 = vsel %vm1203_vm5, %v7451_v57, %v1200_v31  ;;  %v1227_v22 = vmul.f32 %v7453_v12, %v1226_v17 }
 0x208   : > { %v1239_v29 = vmul.f32 %v1204_v21, %v8435_v52 }
 0x209   : > { %v1228_v30 = vmul.f32 0.5, %v1227_v22 }
 0x20a   : > { %v1250_v39 = vmul.f32 %v8496_v36, %v1239_v29 }
 0x20b   : > { %v1229_v41 = vsub.f32 1.5, %v1228_v30 }
 0x20c   : > { %v1261_v46 = vadd.f32 %v8506_v16, %v1250_v39 }
 0x20d   : > { %v1230_v51 = vmul.f32 %v7453_v12, %v1229_v41 }
 0x20f   : > { %v1234_v57 = vsel %vm1233_vm15, %v7453_v12, %v1230_v51 }
 0x24d   : > { %v1132_v63 = vpop.xlane.xlu1 %1131 }
 0x24e   : > { %v1144_v32 = vmul.f32 %v1132_v63, %v8412_v24  ;;  %v1242_v63 = vmul.f32 %v1234_v57, %v8454_v0 }
 0x250   : > { %v1152_v4 = vadd.f32 1e-05, %v1144_v32  ;;  %v1253_v10 = vmul.f32 %v8496_v36, %v1242_v63 }
 0x252   : > { %7454 = vrsqrt.f32 %v1152_v4  ;;  %vm1211_vm7 = vweird.f32 %v1152_v4 }
 0x254   : > { %v1135_v8 = vpop.xlane.xlu2 %1134 }
 0x255   : > { %v1145_v11 = vmul.f32 %v1135_v8, %v8412_v24 }
 0x257   : > { %v1153_v13 = vadd.f32 1e-05, %v1145_v11  ;;  %v1264_v11 = vadd.f32 %v8506_v16, %v1253_v10 }
 0x258   : > { %v7455_v15 = vpop.eup %7454 }
 0x259   : > { %v1206_v19 = vmul.f32 %v7455_v15, %v1152_v4  ;;  %7456 = vrsqrt.f32 %v1153_v13  ;;  %vm1212_vm6 = vweird.f32 %v7455_v15  ;;  %vm1221_vm12 = vweird.f32 %v1153_v13 }
 0x25a   : > { %vm1213_vm8 = vmor %vm1211_vm7, %vm1212_vm6 }
 0x25b   : > { %v1207_v20 = vmul.f32 %v7455_v15, %v1206_v19 }
 0x25d   : > { %v1208_v23 = vmul.f32 0.5, %v1207_v20 }
 0x25f   : > { %v7457_v25 = vpop.eup %7456  ;;  %v1209_v40 = vsub.f32 1.5, %v1208_v23 }
 0x260   : > { %v1216_v28 = vmul.f32 %v7457_v25, %v1153_v13  ;;  %vm1222_vm9 = vweird.f32 %v7457_v25 }
 0x261   : > { %v1210_v18 = vmul.f32 %v7455_v15, %v1209_v40  ;;  %vm1223_vm13 = vmor %vm1221_vm12, %vm1222_vm9 }
 0x262   : > { %v1217_v33 = vmul.f32 %v7457_v25, %v1216_v28 }
 0x263   : > { %v1214_v34 = vsel %vm1213_vm8, %v7455_v15, %v1210_v18 }
 0x264   : > { %v1218_v37 = vmul.f32 0.5, %v1217_v33  ;;  %v1240_v38 = vmul.f32 %v1214_v34, %v8482_v47 }
 0x266   : > { %v1219_v42 = vsub.f32 1.5, %v1218_v37  ;;  %v1367_v43 = vpop.f32.mrf.mxu1  ;;  %v1251_v52 = vmul.f32 %v8496_v36, %v1240_v38  ;;  %v1314_v56 = vpop.f32.mrf.mxu0  ;;  %v8599_v37 = vld [vmem:[%s10922_s14] ss:$0 sm:$0xff] }
 0x267   : > { %v1368_v44 = vadd.f32 %v8532_v35, %v1367_v43  ;;  %v1315_v58 = vadd.f32 %v8545_v53, %v1314_v56 }
 0x268   : > { %v1220_v45 = vmul.f32 %v7457_v25, %v1219_v42  ;;  %v1262_v48 = vadd.f32 %v8506_v16, %v1251_v52 }
 0x269   : > { %v8540_v47 = vpack.c.bf16 %v1368_v44, %v1368_v44  ;;  %v8558_v4 = vpack.c.bf16 %v1315_v58, %v1315_v58  ;;  %v8616_v58 = vand.u32 127, %v945_v2 }
 0x26a   : > { %v1272_v59 = vpack.c.bf16 %v1262_v48, %v1261_v46  ;;  %v1224_v54 = vsel %vm1223_vm13, %v7457_v25, %v1220_v45 }
 0x26b   : > { %v1469_v7 = vsel %vm1464_vm10, %v8540_v47, 0  ;;  %v1241_v27 = vmul.f32 %v1224_v54, %v8490_v1  ;;  %10981 = vst [vmem:[#allocation27_spill] sm:$0xff] %v8616_v58  ;;  %vm8634_vm1 = vcmp.ge.s32.totalorder %v8322_v3, %v8616_v58 }
 0x26c   : > { %7018 = vmatmul.msk.bf16.gmra.mxu0 %vm1059_vm4, %v1272_v59  ;;  %7030 = vmatmul.msk.bf16.gmra.mxu1 %vm1059_vm4, %v1272_v59 }
 0x26d   : > { %7042 = vmatmul.msk.bf16.gmra.mxu2 %vm1059_vm4, %v1272_v59  ;;  %1478 = vmatpush.bf16.xpose.msra.mxu3 %v1469_v7  ;;  %v1252_v6 = vmul.f32 %v8496_v36, %v1241_v27  ;;  %v1420_v18 = vpop.f32.mrf.mxu2 }
 0x26e   : > { %v1369_v26 = vpop.f32.mrf.mxu1  ;;  %v1316_v12 = vpop.f32.mrf.mxu0  ;;  %v1421_v38 = vadd.f32 %v8599_v37, %v1420_v18 }
 0x26f   : > { %v1370_v60 = vadd.f32 %v8532_v35, %v1369_v26  ;;  %v1263_v1 = vadd.f32 %v8506_v16, %v1252_v6  ;;  %v1317_v15 = vadd.f32 %v8545_v53, %v1316_v12 }
 0x270   : > { %v8603_v52 = vpack.c.bf16 %v1421_v38, %v1421_v38 }
 0x271   : > { %v8556_v32 = vpack.c.bf16 %v1370_v60, %v1370_v60  ;;  %v1273_v0 = vpack.c.bf16 %v1264_v11, %v1263_v1  ;;  %v8575_v36 = vpack.c.bf16 %v1317_v15, %v1317_v15 }
 0x272   : > { %v1736_v46 = vsel %vm1734_vm0, %v8603_v52, 0 }
 0x273   : > { %v1488_v8 = vsel %vm1464_vm10, %v8556_v32, 0 }
 0x274   : > { %7044 = vmatmul.msk.bf16.vlgmr.msra.gmra.mxu3 %vm1464_vm10, %v8558_v4 }
 0x275   : > { %1497 = vmatpush.bf16.xpose.msrb.mxu3 %v1488_v8  ;;  %v1422_v33 = vpop.f32.mrf.mxu2 }
 0x276   : > { %v1423_v48 = vadd.f32 %v8599_v37, %v1422_v33 }
 0x278   : > { %v8618_v26 = vpack.c.bf16 %v1423_v48, %v1423_v48 }
 0x27a   : > { %v1755_v11 = vsel %vm1734_vm0, %v8618_v26, 0 }
 0x27c   : > { %7019 = vmatmul.msk.bf16.gmra.mxu0 %vm1059_vm4, %v1273_v0  ;;  %7031 = vmatmul.msk.bf16.gmra.mxu1 %vm1059_vm4, %v1273_v0 }
 0x27d   : > { %7043 = vmatmul.msk.bf16.gmra.mxu2 %vm1059_vm4, %v1273_v0  ;;  %v1372_v13 = vpop.f32.mrf.mxu1  ;;  %v1319_v23 = vpop.f32.mrf.mxu0 }
 0x27e   : > { %v1373_v31 = vadd.f32 %v8532_v35, %v1372_v13  ;;  %v1320_v25 = vadd.f32 %v8545_v53, %v1319_v23 }
 0x280   : > { %v8573_v17 = vpack.c.bf16 %v1373_v31, %v1373_v31  ;;  %v8587_v40 = vpack.c.bf16 %v1320_v25, %v1320_v25 }
 0x282   : > { %v1507_v16 = vsel %vm1464_vm10, %v8573_v17, 0 }
 0x283   : > { %1516 = vmatpush.bf16.xpose.msra.mxu3 %v1507_v16 }
 0x284   : > { %7045 = vmatmul.msk.bf16.vlgmr.msrb.gmra.mxu3 %vm1464_vm10, %v8575_v36  ;;  %v1425_v34 = vpop.f32.mrf.mxu2 }
 0x285   : > { %v1374_v19 = vpop.f32.mrf.mxu1  ;;  %v1321_v28 = vpop.f32.mrf.mxu0  ;;  %v1426_v10 = vadd.f32 %v8599_v37, %v1425_v34 }
 0x286   : > { %v1375_v20 = vadd.f32 %v8532_v35, %v1374_v19  ;;  %v1322_v29 = vadd.f32 %v8545_v53, %v1321_v28 }
 0x287   : > { %v8648_v19 = vpack.c.bf16 %v1426_v10, %v1426_v10 }
 0x288   : > { %v8582_v21 = vpack.c.bf16 %v1375_v20, %v1375_v20  ;;  %v8592_v30 = vpack.c.bf16 %v1322_v29, %v1322_v29 }
 0x289   : > { %v1774_v33 = vsel %vm1734_vm0, %v8648_v19, 0 }
 0x28a   : > { %v1526_v22 = vsel %vm1464_vm10, %v8582_v21, 0 }
 0x28b   : > { %1535 = vmatpush.bf16.xpose.msrb.mxu3 %v1526_v22 }
 0x28c   : > { %v1427_v39 = vpop.f32.mrf.mxu2 }
 0x28d   : > { %v1428_v34 = vadd.f32 %v8599_v37, %v1427_v39 }
 0x28f   : > { %v8670_v48 = vpack.c.bf16 %v1428_v34, %v1428_v34 }
 0x294   : > { %7046 = vmatmul.msk.bf16.vlgmr.msra.gmra.mxu3 %vm1464_vm10, %v8587_v40 }
 0x2a4   : > { %7047 = vmatmul.msk.bf16.vlgmr.msrb.gmra.mxu3 %vm1464_vm10, %v8592_v30 }
 0x2e9   : > { %v1324_v41 = vpop.f32.mrf.mxu0  ;;  %v1377_v42 = vpop.f32.mrf.mxu1 }
 0x2ea   : > { %v1378_v43 = vadd.f32 %v8532_v35, %v1377_v42  ;;  %v1325_v51 = vadd.f32 %v8545_v53, %v1324_v41 }
 0x2ec   : > { %v8605_v44 = vpack.c.bf16 %v1378_v43, %v1378_v43  ;;  %v8622_v60 = vpack.c.bf16 %v1325_v51, %v1325_v51 }
 0x2ee   : > { %v1545_v45 = vsel %vm1464_vm10, %v8605_v44, 0 }
 0x2ef   : > { %1554 = vmatpush.bf16.xpose.msra.mxu3 %v1545_v45 }
 0x2f0   : > { %v1430_v59 = vpop.f32.mrf.mxu2 }
 0x2f1   : > { %v1431_v54 = vadd.f32 %v8599_v37, %v1430_v59  ;;  %v1326_v56 = vpop.f32.mrf.mxu0  ;;  %v1379_v7 = vpop.f32.mrf.mxu1 }
 0x2f2   : > { %v1380_v57 = vadd.f32 %v8532_v35, %v1379_v7  ;;  %v1327_v0 = vadd.f32 %v8545_v53, %v1326_v56 }
 0x2f3   : > { %v8620_v27 = vpack.c.bf16 %v1431_v54, %v1431_v54 }
 0x2f4   : > { %v8624_v63 = vpack.c.bf16 %v1380_v57, %v1380_v57  ;;  %v8654_v25 = vpack.c.bf16 %v1327_v0, %v1327_v0 }
 0x2f5   : > { %v1812_v6 = vsel %vm1734_vm0, %v8620_v27, 0 }
 0x2f6   : > { %7048 = vmatmul.msk.bf16.vlgmr.msra.gmra.mxu3 %vm1464_vm10, %v8622_v60  ;;  %v1564_v8 = vsel %vm1464_vm10, %v8624_v63, 0 }
 0x2f7   : > { %1745 = vmatpush.bf16.msrb.mxu3 %v1736_v46  ;;  %v1480_v1 = vpop.f32.mrf.mxu3  ;;  %1573 = vmatpush.bf16.xpose.msrb.mxu0 %v1564_v8 }
 0x2f8   : > { %v1617_v12 = vmul.f32 0.35355338, %v1480_v1  ;;  %v1432_v13 = vpop.f32.mrf.mxu2 }
 0x2f9   : > { %v1433_v15 = vadd.f32 %v8599_v37, %v1432_v13  ;;  %v1382_v31 = vpop.f32.mrf.mxu1  ;;  %v1329_v22 = vpop.f32.mrf.mxu0 }
 0x2fa   : > { %v1383_v3 = vadd.f32 %v8532_v35, %v1382_v31  ;;  %v8646_v16 = vsel %vm8634_vm1, %v1617_v12, -1e+30  ;;  %v1330_v41 = vadd.f32 %v8545_v53, %v1329_v22 }
 0x2fb   : > { %1821 = vmatpush.bf16.msra.mxu3 %v1812_v6  ;;  %v8650_v20 = vpack.c.bf16 %v1433_v15, %v1433_v15  ;;  %v1635_v23 = vsel %vm1464_vm10, %v8646_v16, -inf }
 0x2fc   : > { %v8656_v28 = vpack.c.bf16 %v1383_v3, %v1383_v3  ;;  %1636 = vmax.xlane.f32.xlu1 %v1635_v23  ;;  %v8674_v59 = vpack.c.bf16 %v1330_v41, %v1330_v41 }
 0x2fd   : > { %v1831_v18 = vsel %vm1734_vm0, %v8650_v20, 0 }
 0x2fe   : > { %7049 = vmatmul.msk.bf16.vlgmr.msrb.gmra.mxu0 %vm1464_vm10, %v8654_v25  ;;  %v1583_v29 = vsel %vm1464_vm10, %v8656_v28, 0 }
 0x2ff   : > { %1764 = vmatpush.bf16.msra.mxu0 %v1755_v11  ;;  %v1482_v38 = vpop.f32.mrf.mxu3  ;;  %1592 = vmatpush.bf16.xpose.msrb.mxu1 %v1583_v29 }
 0x300   : > { %v1435_v42 = vpop.f32.mrf.mxu2 }
 0x301   : > { %v1436_v43 = vadd.f32 %v8599_v37, %v1435_v42  ;;  %v1384_v45 = vpop.f32.mrf.mxu1  ;;  %v1331_v39 = vpop.f32.mrf.mxu0 }
 0x302   : > { %v1385_v46 = vadd.f32 %v8532_v35, %v1384_v45  ;;  %v1793_v35 = vsel %vm1734_vm0, %v8670_v48, 0  ;;  %v1332_v6 = vadd.f32 %v8545_v53, %v1331_v39 }
 0x303   : > { %1840 = vmatpush.bf16.msrb.mxu0 %v1831_v18  ;;  %v8672_v51 = vpack.c.bf16 %v1436_v43, %v1436_v43 }
 0x304   : > { %v8676_v54 = vpack.c.bf16 %v1385_v46, %v1385_v46  ;;  %v8693_v13 = vpack.c.bf16 %v1332_v6, %v1332_v6 }
 0x305   : > { %v1850_v56 = vsel %vm1734_vm0, %v8672_v51, 0 }
 0x306   : > { %7050 = vmatmul.msk.bf16.vlgmr.msrb.gmra.mxu1 %vm1464_vm10, %v8674_v59  ;;  %v1602_v7 = vsel %vm1464_vm10, %v8676_v54, 0 }
 0x307   : > { %1783 = vmatpush.bf16.msra.mxu1 %v1774_v33  ;;  %v1499_v57 = vpop.f32.mrf.mxu3  ;;  %1611 = vmatpush.bf16.xpose.msrb.mxu2 %v1602_v7 }
 0x308   : > { %v1618_v8 = vmul.f32 0.35355338, %v1499_v57  ;;  %v1437_v10 = vpop.f32.mrf.mxu2 }
 0x309   : > { %v1438_v1 = vadd.f32 %v8599_v37, %v1437_v10 }
 0x30a   : > { %v1628_v11 = vsel %vm8634_vm1, %v1618_v8, -1e+30 }
 0x30b   : > { %1859 = vmatpush.bf16.msrb.mxu1 %v1850_v56  ;;  %v8690_v0 = vpack.c.bf16 %v1438_v1, %v1438_v1  ;;  %v1638_v12 = vsel %vm1464_vm10, %v1628_v11, -inf }
 0x30c   : > { %1639 = vmax.xlane.f32.xlu1 %v1638_v12 }
 0x30d   : > { %v1869_v53 = vsel %vm1734_vm0, %v8690_v0, 0 }
 0x30e   : > { %7051 = vmatmul.msk.bf16.vlgmr.msrb.gmra.mxu2 %vm1464_vm10, %v8693_v13 }
 0x30f   : > { %1802 = vmatpush.bf16.msra.mxu2 %v1793_v35  ;;  %v1501_v15 = vpop.f32.mrf.mxu3 }
 0x313   : > { %1878 = vmatpush.bf16.msrb.mxu2 %v1869_v53 }
 0x317   : > { %v1518_v31 = vpop.f32.mrf.mxu3 }
 0x318   : > { %v1619_v37 = vmul.f32 0.35355338, %v1518_v31 }
 0x31a   : > { %v1629_v3 = vsel %vm8634_vm1, %v1619_v37, -1e+30 }
 0x31b   : > { %v1641_v22 = vsel %vm1464_vm10, %v1629_v3, -inf }
 0x31c   : > { %1642 = vmax.xlane.f32.xlu0 %v1641_v22 }
 0x31f   : > { %v1520_v23 = vpop.f32.mrf.mxu3 }
 0x327   : > { %v1537_v29 = vpop.f32.mrf.mxu3 }
 0x328   : > { %v1620_v18 = vmul.f32 0.35355338, %v1537_v29 }
 0x32a   : > { %v8704_v33 = vsel %vm8634_vm1, %v1620_v18, -1e+30 }
 0x32b   : > { %v1644_v34 = vsel %vm1464_vm10, %v8704_v33, -inf }
 0x32c   : > { %1645 = vmax.xlane.f32.xlu2 %v1644_v34 }
 0x32f   : > { %v1539_v38 = vpop.f32.mrf.mxu3 }
 0x36f   : > { %v1637_v41 = vpop.xlane.xlu1 %1636 }
 0x379   : > { %v1556_v42 = vpop.f32.mrf.mxu3 }
 0x37a   : > { %v1621_v43 = vmul.f32 0.35355338, %v1556_v42  ;;  %v1977_v42 = vunpack.c.l.b16 %v8582_v21  ;;  %v1890_v21 = vunpack.c.l.b16 %v8540_v47 }
 0x37b   : > { %v1575_v45 = vpop.f32.mrf.mxu0 }
 0x37c   : > { %v1622_v46 = vmul.f32 0.35355338, %v1575_v45  ;;  %v8710_v39 = vsel %vm8634_vm1, %v1621_v43, -1e+30 }
 0x37d   : > { %v1647_v56 = vsel %vm1464_vm10, %v8710_v39, -inf }
 0x37e   : > { %1648 = vmax.xlane.f32.xlu0 %v1647_v56  ;;  %v1632_v7 = vsel %vm8634_vm1, %v1622_v46, -1e+30  ;;  %v8728_v46 = vpack.c.b16 %v1977_v42, %v1977_v42 }
 0x37f   : > { %v1640_v57 = vpop.xlane.xlu1 %1639  ;;  %v1650_v35 = vsel %vm1464_vm10, %v1632_v7, -inf }
 0x380   : > { %v1660_v6 = vsub.f32 %v1628_v11, %v1640_v57  ;;  %1651 = vmax.xlane.f32.xlu1 %v1650_v35  ;;  %v1885_v35 = vunpack.c.l.b16 %v8558_v4  ;;  %v2006_v4 = vunpack.c.l.b16 %v8605_v44 }
 0x381   : > { %v1558_v8 = vpop.f32.mrf.mxu3 }
 0x382   : > { %v1669_v10 = vmul.f32 1.442695, %v1660_v6  ;;  %v8735_v6 = vpack.c.b16 %v1890_v21, %v1890_v21  ;;  %v8737_v8 = vpack.c.b16 %v1885_v35, %v1885_v35 }
 0x383   : > { %v1577_v1 = vpop.f32.mrf.mxu0  ;;  %v1594_v12 = vpop.f32.mrf.mxu1 }
 0x384   : > { %v1623_v53 = vmul.f32 0.35355338, %v1594_v12  ;;  %7458 = vpow2.f32 %v1669_v10  ;;  %v1659_v10 = vsub.f32 %v8646_v16, %v1637_v41 }
 0x386   : > { %v1633_v15 = vsel %vm8634_vm1, %v1623_v53, -1e+30  ;;  %v1667_v1 = vmul.f32 1.442695, %v1659_v10  ;;  %v8749_v53 = vpack.c.b16 %v2006_v4, %v2006_v4 }
 0x387   : > { %v1653_v31 = vsel %vm1464_vm10, %v1633_v15, -inf }
 0x388   : > { %1654 = vmax.xlane.f32.xlu0 %v1653_v31 }
 0x38a   : > { %v8720_v22 = vpop.eup %7458 }
 0x38b   : > { %v1596_v37 = vpop.f32.mrf.mxu1  ;;  %v1686_v11 = vsel %vm1464_vm10, %v8720_v22, 0.0 }
 0x38f   : > { %v1643_v23 = vpop.xlane.xlu0 %1642 }
 0x390   : > { %v1661_v29 = vsub.f32 %v1629_v3, %v1643_v23  ;;  %1687 = vadd.xlane.f32.xlu0 %v1686_v11 }
 0x391   : > { %v1613_v18 = vpop.f32.mrf.mxu2 }
 0x392   : > { %v1671_v34 = vmul.f32 1.442695, %v1661_v29  ;;  %v1624_v38 = vmul.f32 0.35355338, %v1613_v18 }
 0x394   : > { %7460 = vpow2.f32 %v1671_v34  ;;  %v1634_v43 = vsel %vm8634_vm1, %v1624_v38, -1e+30 }
 0x395   : > { %v1656_v45 = vsel %vm1464_vm10, %v1634_v43, -inf  ;;  %7462 = vpow2.f32 %v1667_v1 }
 0x396   : > { %1657 = vmax.xlane.f32.xlu2 %v1656_v45 }
 0x399   : > { %1979 = vrot.lane.b32.xlu1 %v8728_v46, %s8073_s26  ;;  %v1615_v3 = vpop.f32.mrf.mxu2 }
 0x39a   : > { %v7461_v56 = vpop.eup %7460 }
 0x39b   : > { %v1689_v57 = vsel %vm1464_vm10, %v7461_v56, 0.0  ;;  %v8744_v12 = vpop.eup %7462 }
 0x39c   : > { %1690 = vadd.xlane.f32.xlu0 %v1689_v57  ;;  %v1683_v47 = vsel %vm1464_vm10, %v8744_v12, 0.0 }
 0x39f   : > { %v1646_v31 = vpop.xlane.xlu2 %1645 }
 0x3a0   : > { %v1662_v16 = vsub.f32 %v8704_v33, %v1646_v31 }
 0x3a2   : > { %v1673_v29 = vmul.f32 1.442695, %v1662_v16 }
 0x3ae   : > { %1892 = vrot.lane.b32.xlu2 %v8735_v6, %s8073_s26 }
 0x3b0   : > { %1887 = vrot.lane.b32.xlu0 %v8737_v8, %s8073_s26 }
 0x3d7   : > { %1684 = vadd.xlane.f32.xlu2 %v1683_v47 }
 0x3ef   : > { %2008 = vrot.lane.b32.xlu2 %v8749_v53, %s8073_s26 }
 0x3f1   : > { %v1649_v37 = vpop.xlane.xlu0 %1648 }
 0x3f2   : > { %v1663_v33 = vsub.f32 %v8710_v39, %v1649_v37 }
 0x3f3   : > { %v1652_v23 = vpop.xlane.xlu1 %1651 }
 0x3f4   : > { %v1664_v11 = vsub.f32 %v1632_v7, %v1652_v23  ;;  %v1675_v21 = vmul.f32 1.442695, %v1663_v33  ;;  %v2001_v33 = vunpack.c.l.b16 %v8622_v60  ;;  %v2035_v60 = vunpack.c.l.b16 %v8624_v63 }
 0x3f6   : > { %v1677_v41 = vmul.f32 1.442695, %v1664_v11 }
 0x3f8   : > { %7464 = vpow2.f32 %v1677_v41 }
 0x3f9   : > { %7466 = vpow2.f32 %v1673_v29 }
 0x3fb   : > { %v1655_v18 = vpop.xlane.xlu0 %1654 }
 0x3fc   : > { %v1665_v34 = vsub.f32 %v1633_v15, %v1655_v18 }
 0x3fe   : > { %v8754_v38 = vpop.eup %7464  ;;  %v1679_v44 = vmul.f32 1.442695, %v1665_v34  ;;  %v2301_v34 = vunpack.c.l.b16 %v8670_v48  ;;  %v1914_v48 = vunpack.c.l.b16 %v8575_v36  ;;  %v2088_v36 = vunpack.c.l.b16 %v8693_v13 }
 0x3ff   : > { %v1698_v42 = vsel %vm1464_vm10, %v8754_v38, 0.0  ;;  %v8758_v3 = vpop.eup %7466 }
 0x400   : > { %7468 = vpow2.f32 %v1679_v44  ;;  %1699 = vadd.xlane.f32.xlu1 %v1698_v42  ;;  %v1692_v15 = vsel %vm1464_vm10, %v8758_v3, 0.0  ;;  %v8784_v44 = vpack.c.b16 %v2301_v34, %v2301_v34 }
 0x403   : > { %v1688_v45 = vpop.xlane.xlu0 %1687 }
 0x404   : > { %7470 = vrcp.f32 %v1688_v45 }
 0x405   : > { %7472 = vpow2.f32 %v1675_v21 }
 0x406   : > { %v8761_v7 = vpop.eup %7468 }
 0x407   : > { %v1701_v57 = vsel %vm1464_vm10, %v8761_v7, 0.0 }
 0x408   : > { %1693 = vadd.xlane.f32.xlu1 %v1692_v15  ;;  %1702 = vadd.xlane.f32.xlu0 %v1701_v57  ;;  %v8800_v15 = vpack.c.b16 %v1914_v48, %v1914_v48  ;;  %v8802_v57 = vpack.c.b16 %v2001_v33, %v2001_v33 }
 0x409   : > { %v1658_v35 = vpop.xlane.xlu2 %1657 }
 0x40a   : > { %v7471_v10 = vpop.eup %7470  ;;  %v1666_v1 = vsub.f32 %v1634_v43, %v1658_v35  ;;  %v2064_v43 = vunpack.c.l.b16 %v8656_v28  ;;  %v1972_v28 = vunpack.c.l.b16 %v8592_v30  ;;  %v2093_v30 = vunpack.c.l.b16 %v8676_v54 }
 0x40b   : > { %v1716_v47 = vmul.f32 %v7471_v10, %v8720_v22  ;;  %v8769_v37 = vpop.eup %7472  ;;  %v2030_v54 = vunpack.c.l.b16 %v8654_v25 }
 0x40c   : > { %v1681_v4 = vmul.f32 1.442695, %v1666_v1  ;;  %v1695_v41 = vsel %vm1464_vm10, %v8769_v37, 0.0  ;;  %v8778_v18 = vpack.c.b16 %v2064_v43, %v2064_v43  ;;  %v8790_v42 = vpack.c.b16 %v1972_v28, %v1972_v28 }
 0x40d   : > { %v1724_v31 = vpack.c.bf16 %v1716_v47, %v1716_v47  ;;  %v8812_v35 = vpack.c.b16 %v2093_v30, %v2093_v30  ;;  %v8820_v1 = vpack.c.b16 %v2088_v36, %v2088_v36  ;;  %v1943_v47 = vunpack.c.l.b16 %v8587_v40 }
 0x40e   : > { %7474 = vpow2.f32 %v1681_v4  ;;  %v8830_v13 = vpack.c.b16 %v2030_v54, %v2030_v54 }
 0x40f   : > { %v1691_v39 = vpop.xlane.xlu0 %1690  ;;  %7053 = vmatmul.msk.bf16.vlgmr.msra.gmra.mxu0 %vm1464_vm10, %v1724_v31  ;;  %v8832_v63 = vpack.c.b16 %v1943_v47, %v1943_v47 }
 0x410   : > { %7476 = vrcp.f32 %v1691_v39  ;;  %v2325_v39 = vunpack.c.l.b16 %v8620_v27  ;;  %v2229_v27 = vunpack.c.l.b16 %v8603_v52 }
 0x411   : > { %v1893_v10 = vpop.permute.xlu2 %1892 }
 0x414   : > { %v8771_v23 = vpop.eup %7474 }
 0x415   : > { %v1704_v11 = vsel %vm1464_vm10, %v8771_v23, 0.0 }
 0x416   : > { %v7477_v16 = vpop.eup %7476  ;;  %1705 = vadd.xlane.f32.xlu1 %v1704_v11  ;;  %v2059_v11 = vunpack.c.l.b16 %v8674_v59  ;;  %v8852_v59 = vpack.c.b16 %v2229_v27, %v2229_v27 }
 0x417   : > { %v1717_v22 = vmul.f32 %v7477_v16, %v7461_v56  ;;  %v1919_v56 = vunpack.c.l.b16 %v8556_v32  ;;  %v1948_v32 = vunpack.c.l.b16 %v8573_v17  ;;  %v8822_v17 = vpack.c.b16 %v2035_v60, %v2035_v60 }
 0x418   : > { %1696 = vadd.xlane.f32.xlu2 %v1695_v41  ;;  %v8841_v16 = vpack.c.b16 %v2325_v39, %v2325_v39  ;;  %v8843_v43 = vpack.c.b16 %v2059_v11, %v2059_v11 }
 0x419   : > { %v1725_v29 = vpack.c.bf16 %v1717_v22, %v1717_v22  ;;  %v8792_v45 = vpack.c.b16 %v1919_v56, %v1919_v56  ;;  %v8810_v21 = vpack.c.b16 %v1948_v32, %v1948_v32  ;;  %v1898_v22 = vsel %vm1464_vm10, %v1893_v10, 0 }
 0x41b   : > { %7054 = vmatmul.msk.bf16.vlgmr.msra.gmra.mxu1 %vm1464_vm10, %v1725_v29  ;;  %v1980_v29 = vpop.permute.xlu1 %1979 }
 0x41c   : > { %2066 = vrot.lane.b32.xlu0 %v8778_v18, %s8073_s26 }
 0x422   : > { %v1888_v34 = vpop.permute.xlu0 %1887 }
 0x424   : > { %2303 = vrot.lane.b32.xlu0 %v8784_v44, %s8073_s26 }
 0x42f   : > { %1974 = vrot.lane.b32.xlu1 %v8790_v42, %s8073_s26 }
 0x430   : > { %1921 = vrot.lane.b32.xlu2 %v8792_v45, %s8073_s26 }
 0x437   : > { %1916 = vrot.lane.b32.xlu1 %v8800_v15, %s8073_s26 }
 0x438   : > { %2003 = vrot.lane.b32.xlu2 %v8802_v57, %s8073_s26 }
 0x43f   : > { %1950 = vrot.lane.b32.xlu1 %v8810_v21, %s8073_s26 }
 0x440   : > { %2095 = vrot.lane.b32.xlu2 %v8812_v35, %s8073_s26 }
 0x447   : > { %2090 = vrot.lane.b32.xlu1 %v8820_v1, %s8073_s26 }
 0x448   : > { %2037 = vrot.lane.b32.xlu2 %v8822_v17, %s8073_s26 }
 0x44a   : > { %v1685_v4 = vpop.xlane.xlu2 %1684 }
 0x44b   : > { %7478 = vrcp.f32 %v1685_v4  ;;  %v1985_v4 = vsel %vm1464_vm10, %v1980_v29, 0 }
 0x44f   : > { %2032 = vrot.lane.b32.xlu1 %v8830_v13, %s8073_s26 }
 0x450   : > { %1945 = vrot.lane.b32.xlu2 %v8832_v63, %s8073_s26 }
 0x451   : > { %v7479_v31 = vpop.eup %7478 }
 0x452   : > { %v1715_v25 = vmul.f32 %v7479_v31, %v8744_v12  ;;  %v2253_v12 = vunpack.c.l.b16 %v8618_v26  ;;  %v2009_v36 = vpop.permute.xlu2 %2008 }
 0x454   : > { %v1723_v40 = vpack.c.bf16 %v1715_v25, %v1715_v25  ;;  %v8857_v41 = vpack.c.b16 %v2253_v12, %v2253_v12 }
 0x456   : > { %7052 = vmatmul.msk.bf16.vlgmr.msrb.gmra.mxu3 %vm1464_vm10, %v1723_v40 }
 0x457   : > { %1907 = vmatpush.bf16.xpose.msrb.mxu3 %v1898_v22  ;;  %2327 = vrot.lane.b32.xlu1 %v8841_v16, %s8073_s26 }
 0x458   : > { %2061 = vrot.lane.b32.xlu2 %v8843_v43, %s8073_s26 }
 0x460   : > { %2231 = vrot.lane.b32.xlu2 %v8852_v59, %s8073_s26 }
 0x468   : > { %2255 = vrot.lane.b32.xlu2 %v8857_v41, %s8073_s26 }
 0x473   : > { %v1700_v28 = vpop.xlane.xlu1 %1699 }
 0x474   : > { %7480 = vrcp.f32 %v1700_v28  ;;  %v2014_v28 = vsel %vm1464_vm10, %v2009_v36, 0 }
 0x47a   : > { %v7481_v56 = vpop.eup %7480 }
 0x47b   : > { %v1720_v48 = vmul.f32 %v7481_v56, %v8754_v38  ;;  %v1694_v52 = vpop.xlane.xlu1 %1693  ;;  %v1703_v33 = vpop.xlane.xlu0 %1702 }
 0x47c   : > { %7482 = vrcp.f32 %v1694_v52 }
 0x47d   : > { %v1728_v32 = vpack.c.bf16 %v1720_v48, %v1720_v48  ;;  %7484 = vrcp.f32 %v1703_v33 }
 0x47f   : > { %7057 = vmatmul.msk.bf16.vlgmr.msrb.gmra.mxu0 %vm1464_vm10, %v1728_v32 }
 0x482   : > { %v7483_v26 = vpop.eup %7482 }
 0x483   : > { %v7485_v30 = vpop.eup %7484  ;;  %v1718_v60 = vmul.f32 %v7483_v26, %v8758_v3 }
 0x484   : > { %v1721_v10 = vmul.f32 %v7485_v30, %v8761_v7 }
 0x485   : > { %v1726_v54 = vpack.c.bf16 %v1718_v60, %v1718_v60 }
 0x486   : > { %v1729_v47 = vpack.c.bf16 %v1721_v10, %v1721_v10 }
 0x487   : > { %7055 = vmatmul.msk.bf16.vlgmr.msra.gmra.mxu2 %vm1464_vm10, %v1726_v54 }
 0x488   : > { %7058 = vmatmul.msk.bf16.vlgmr.msrb.gmra.mxu1 %vm1464_vm10, %v1729_v47  ;;  %1994 = vmatpush.bf16.xpose.msra.mxu2 %v1985_v4 }
 0x489   : > { %v1706_v38 = vpop.xlane.xlu1 %1705 }
 0x48a   : > { %7486 = vrcp.f32 %v1706_v38 }
 0x48b   : > { %v1697_v31 = vpop.xlane.xlu2 %1696 }
 0x48c   : > { %7488 = vrcp.f32 %v1697_v31  ;;  %v8868_v39 = vpop.f32.mrf.mxu0 }
 0x490   : > { %v7487_v11 = vpop.eup %7486 }
 0x491   : > { %v1722_v3 = vmul.f32 %v7487_v11, %v8771_v23  ;;  %v2067_v23 = vpop.permute.xlu0 %2066 }
 0x492   : > { %v7489_v25 = vpop.eup %7488  ;;  %v2072_v4 = vsel %vm1464_vm10, %v2067_v23, 0 }
 0x493   : > { %v1719_v7 = vmul.f32 %v7489_v25, %v8769_v37  ;;  %v1922_v40 = vpop.permute.xlu2 %1921  ;;  %v1730_v12 = vpack.c.bf16 %v1722_v3, %v1722_v3 }
 0x494   : > { %v1927_v22 = vsel %vm1464_vm10, %v1922_v40, 0  ;;  %v1768_v27 = vpop.f32.mrf.mxu0 }
 0x495   : > { %v1727_v29 = vpack.c.bf16 %v1719_v7, %v1719_v7  ;;  %1936 = vmatpush.bf16.xpose.msra.mxu0 %v1927_v22 }
 0x497   : > { %7056 = vmatmul.msk.bf16.vlgmr.msra.gmra.mxu3 %vm1464_vm10, %v1727_v29  ;;  %7059 = vmatmul.msk.bf16.vlgmr.msrb.gmra.mxu2 %vm1464_vm10, %v1730_v12 }
 0x498   : > { %v8876_v56 = vpop.f32.mrf.mxu1  ;;  %2023 = vmatpush.bf16.xpose.msra.mxu3 %v2014_v28 }
 0x499   : > { %v2304_v32 = vpop.permute.xlu0 %2303 }
 0x49a   : > { %v2309_v30 = vsel %vm1734_vm0, %v2304_v32, 0 }
 0x49b   : > { %v2004_v48 = vpop.permute.xlu2 %2003 }
 0x4a0   : > { %v1787_v52 = vpop.f32.mrf.mxu1 }
 0x4a1   : > { %v1975_v37 = vpop.permute.xlu1 %1974 }
 0x4a3   : > { %v2096_v33 = vpop.permute.xlu2 %2095 }
 0x4a4   : > { %v2101_v26 = vsel %vm1464_vm10, %v2096_v33, 0 }
 0x4a5   : > { %2110 = vmatpush.bf16.xpose.msrb.mxu2 %v2101_v26 }
 0x4a7   : > { %7060 = vmatmul.msk.bf16.vlgmr.msrb.gmra.mxu3 %vm1464_vm10, %v1888_v34  ;;  %7063 = vmatmul.msk.bf16.vlgmr.msra.gmra.mxu2 %vm1464_vm10, %v1975_v37 }
 0x4a9   : > { %v1917_v36 = vpop.permute.xlu1 %1916 }
 0x4aa   : > { %7061 = vmatmul.msk.bf16.vlgmr.msra.gmra.mxu0 %vm1464_vm10, %v1917_v36 }
 0x4ab   : > { %v2038_v60 = vpop.permute.xlu2 %2037 }
 0x4ac   : > { %v2043_v10 = vsel %vm1464_vm10, %v2038_v60, 0 }
 0x4ad   : > { %2318 = vmatpush.bf16.msra.mxu2 %v2309_v30  ;;  %2052 = vmatpush.bf16.xpose.msrb.mxu0 %v2043_v10 }
 0x4b1   : > { %v1951_v54 = vpop.permute.xlu1 %1950 }
 0x4b2   : > { %v1956_v47 = vsel %vm1464_vm10, %v1951_v54, 0 }
 0x4b3   : > { %v1946_v38 = vpop.permute.xlu2 %1945  ;;  %1965 = vmatpush.bf16.xpose.msra.mxu1 %v1956_v47 }
 0x4b7   : > { %7064 = vmatmul.msk.bf16.vlgmr.msra.gmra.mxu3 %vm1464_vm10, %v2004_v48 }
 0x4b9   : > { %v2091_v34 = vpop.permute.xlu1 %2090 }
 0x4ba   : > { %7062 = vmatmul.msk.bf16.vlgmr.msra.gmra.mxu1 %vm1464_vm10, %v1946_v38  ;;  %7067 = vmatmul.msk.bf16.vlgmr.msrb.gmra.mxu2 %vm1464_vm10, %v2091_v34 }
 0x4bb   : > { %2081 = vmatpush.bf16.xpose.msrb.mxu1 %v2072_v4  ;;  %v2062_v31 = vpop.permute.xlu2 %2061 }
 0x4c1   : > { %v2033_v11 = vpop.permute.xlu1 %2032 }
 0x4c2   : > { %7065 = vmatmul.msk.bf16.vlgmr.msrb.gmra.mxu0 %vm1464_vm10, %v2033_v11 }
 0x4c3   : > { %v2232_v3 = vpop.permute.xlu2 %2231 }
 0x4c4   : > { %v2237_v25 = vsel %vm1734_vm0, %v2232_v3, 0 }
 0x4c5   : > { %2246 = vmatpush.bf16.msrb.mxu3 %v2237_v25 }
 0x4c9   : > { %v2328_v7 = vpop.permute.xlu1 %2327 }
 0x4ca   : > { %v2333_v40 = vsel %vm1734_vm0, %v2328_v7, 0  ;;  %7066 = vmatmul.msk.bf16.vlgmr.msrb.gmra.mxu1 %vm1464_vm10, %v2062_v31 }
 0x4cb   : > { %v2256_v22 = vpop.permute.xlu2 %2255  ;;  %2342 = vmatpush.bf16.msra.mxu3 %v2333_v40 }
 0x4cc   : > { %v2261_v27 = vsel %vm1734_vm0, %v2256_v22, 0 }
 0x4cd   : > { %2270 = vmatpush.bf16.msra.mxu0 %v2261_v27 }
 0x4d9   : > { %v8894_v12 = vpop.f32.mrf.mxu3 }
 0x4e1   : > { %v1749_v29 = vpop.f32.mrf.mxu3 }
 0x4fc   : > { %v8896_v28 = vpop.f32.mrf.mxu0 }
 0x504   : > { %v1844_v23 = vpop.f32.mrf.mxu0 }
 0x505   : > { %v8898_v48 = vpop.f32.mrf.mxu1 }
 0x506   : > { %10984 = vst [vmem:[#allocation28_spill] sm:$0xff] %v8898_v48 }
 0x50a   : > { %v8900_v52 = vpop.f32.mrf.mxu2 }
 0x50d   : > { %v1863_v37 = vpop.f32.mrf.mxu1 }
 0x512   : > { %v1806_v33 = vpop.f32.mrf.mxu2 }
 0x51a   : > { %v8902_v32 = vpop.f32.mrf.mxu3  ;;  %v8904_v26 = vpop.f32.mrf.mxu2 }
 0x51b   : > { %10985 = vst [vmem:[#allocation29_spill] sm:$0xff] %v8904_v26 }
 0x522   : > { %v1825_v30 = vpop.f32.mrf.mxu3  ;;  %v1882_v36 = vpop.f32.mrf.mxu2 }
 0x527   : > { %v1938_v60 = vpop.f32.mrf.mxu0 }
 0x528   : > { %v2117_v10 = vmul.f32 0.35355338, %v1938_v60 }
 0x52a   : > { %v1909_v54 = vpop.f32.mrf.mxu3  ;;  %v1996_v47 = vpop.f32.mrf.mxu2  ;;  %v2125_v4 = vsel %vm8634_vm1, %v2117_v10, -1e+30 }
 0x52b   : > { %v2135_v38 = vsel %vm1464_vm10, %v2125_v4, -inf }
 0x52c   : > { %2136 = vmax.xlane.f32.xlu1 %v2135_v38 }
 0x52f   : > { %v1940_v34 = vpop.f32.mrf.mxu0 }
 0x530   : > { %v2119_v34 = vmul.f32 0.35355338, %v1996_v47  ;;  %v2397_v47 = vunpack.c.l.b16 %v8690_v0  ;;  %v2277_v0 = vunpack.c.l.b16 %v8648_v19 }
 0x532   : > { %v1911_v31 = vpop.f32.mrf.mxu3  ;;  %v1998_v11 = vpop.f32.mrf.mxu2 }
 0x537   : > { %v1967_v3 = vpop.f32.mrf.mxu1 }
 0x538   : > { %v2118_v25 = vmul.f32 0.35355338, %v1967_v3 }
 0x53a   : > { %v2025_v7 = vpop.f32.mrf.mxu3  ;;  %v2126_v40 = vsel %vm8634_vm1, %v2118_v25, -1e+30 }
 0x53b   : > { %v2120_v22 = vmul.f32 0.35355338, %v2025_v7  ;;  %v2138_v27 = vsel %vm1464_vm10, %v2126_v40, -inf  ;;  %v2127_v7 = vsel %vm8634_vm1, %v2119_v34, -1e+30  ;;  %v8937_v34 = vpack.c.b16 %v2397_v47, %v2397_v47 }
 0x53c   : > { %2139 = vmax.xlane.f32.xlu1 %v2138_v27  ;;  %v2141_v27 = vsel %vm1464_vm10, %v2127_v7, -inf }
 0x53d   : > { %v2112_v29 = vpop.f32.mrf.mxu2  ;;  %v8914_v23 = vsel %vm8634_vm1, %v2120_v22, -1e+30 }
 0x53e   : > { %v2144_v37 = vsel %vm1464_vm10, %v8914_v23, -inf }
 0x53f   : > { %v2054_v33 = vpop.f32.mrf.mxu0  ;;  %2145 = vmax.xlane.f32.xlu0 %v2144_v37  ;;  %v1969_v30 = vpop.f32.mrf.mxu1 }
 0x540   : > { %v2121_v36 = vmul.f32 0.35355338, %v2054_v33  ;;  %v2116_v33 = vmul.f32 0.35355338, %v1909_v54  ;;  %v2123_v30 = vmul.f32 0.35355338, %v2112_v29 }
 0x542   : > { %v2027_v60 = vpop.f32.mrf.mxu3  ;;  %v2129_v10 = vsel %vm8634_vm1, %v2121_v36, -1e+30 }
 0x543   : > { %v2147_v38 = vsel %vm1464_vm10, %v2129_v10, -inf  ;;  %v8933_v60 = vsel %vm8634_vm1, %v2123_v30, -1e+30 }
 0x544   : > { %2148 = vmax.xlane.f32.xlu2 %v2147_v38  ;;  %v2124_v38 = vsel %vm8634_vm1, %v2116_v33, -1e+30  ;;  %v2153_v54 = vsel %vm1464_vm10, %v8933_v60, -inf }
 0x545   : > { %v2114_v31 = vpop.f32.mrf.mxu2  ;;  %v2132_v29 = vsel %vm1464_vm10, %v2124_v38, -inf }
 0x546   : > { %v8945_v31 = vpack.c.b16 %v2277_v0, %v2277_v0 }
 0x547   : > { %v2056_v11 = vpop.f32.mrf.mxu0  ;;  %v2083_v3 = vpop.f32.mrf.mxu1 }
 0x548   : > { %v2122_v25 = vmul.f32 0.35355338, %v2083_v3 }
 0x54a   : > { %v8925_v22 = vsel %vm8634_vm1, %v2122_v25, -1e+30 }
 0x54b   : > { %v2150_v37 = vsel %vm1464_vm10, %v8925_v22, -inf }
 0x54c   : > { %2142 = vmax.xlane.f32.xlu2 %v2141_v27  ;;  %2151 = vmax.xlane.f32.xlu1 %v2150_v37 }
 0x54f   : > { %v2085_v36 = vpop.f32.mrf.mxu1 }
 0x553   : > { %2399 = vrot.lane.b32.xlu0 %v8937_v34, %s8073_s26 }
 0x554   : > { %2154 = vmax.xlane.f32.xlu2 %v2153_v54  ;;  %2133 = vmax.xlane.f32.xlu1 %v2132_v29 }
 0x56c   : > { %2422 = vrot.lane.b32.xlu2 %v8735_v6, %s8074_s1 }
 0x56d   : > { %2279 = vrot.lane.b32.xlu1 %v8945_v31, %s8073_s26 }
 0x59f   : > { %v2137_v11 = vpop.xlane.xlu1 %2136 }
 0x5a0   : > { %v2157_v3 = vsub.f32 %v2125_v4, %v2137_v11 }
 0x5a2   : > { %v2166_v25 = vmul.f32 1.442695, %v2157_v3 }
 0x5a4   : > { %7490 = vpow2.f32 %v2166_v25 }
 0x5aa   : > { %v8951_v27 = vpop.eup %7490 }
 0x5ab   : > { %v2183_v37 = vsel %vm1464_vm10, %v8951_v27, 0.0 }
 0x5ac   : > { %2184 = vadd.xlane.f32.xlu1 %v2183_v37 }
 0x5af   : > { %v2140_v19 = vpop.xlane.xlu1 %2139 }
 0x5b0   : > { %v2158_v33 = vsub.f32 %v2126_v40, %v2140_v19 }
 0x5b2   : > { %v2168_v30 = vmul.f32 1.442695, %v2158_v33  ;;  %v2146_v0 = vpop.xlane.xlu0 %2145 }
 0x5b4   : > { %7492 = vpow2.f32 %v2168_v30 }
 0x5b7   : > { %v2149_v47 = vpop.xlane.xlu2 %2148 }
 0x5b8   : > { %v2161_v36 = vsub.f32 %v2129_v10, %v2149_v47 }
 0x5ba   : > { %v8955_v54 = vpop.eup %7492  ;;  %v2174_v29 = vmul.f32 1.442695, %v2161_v36 }
 0x5bb   : > { %v2186_v4 = vsel %vm1464_vm10, %v8955_v54, 0.0 }
 0x5bc   : > { %7494 = vpow2.f32 %v2174_v29  ;;  %2187 = vadd.xlane.f32.xlu2 %v2186_v4  ;;  %v2160_v29 = vsub.f32 %v8914_v23, %v2146_v0 }
 0x5be   : > { %v2172_v4 = vmul.f32 1.442695, %v2160_v29 }
 0x5bf   : > { %v2143_v11 = vpop.xlane.xlu2 %2142  ;;  %v2152_v3 = vpop.xlane.xlu1 %2151 }
 0x5c0   : > { %v2159_v25 = vsub.f32 %v2127_v7, %v2143_v11 }
 0x5c2   : > { %v8959_v58 = vpop.eup %7494  ;;  %v2170_v37 = vmul.f32 1.442695, %v2159_v25 }
 0x5c3   : > { %v2195_v40 = vsel %vm1464_vm10, %v8959_v58, 0.0 }
 0x5c4   : > { %7496 = vpow2.f32 %v2170_v37  ;;  %2196 = vadd.xlane.f32.xlu1 %v2195_v40  ;;  %v2373_v40 = vunpack.c.l.b16 %v8672_v51 }
 0x5c5   : > { %v2400_v10 = vpop.permute.xlu0 %2399 }
 0x5c6   : > { %v2405_v19 = vsel %vm1734_vm0, %v2400_v10, 0  ;;  %v2349_v10 = vunpack.c.l.b16 %v8650_v20 }
 0x5c7   : > { %v2134_v33 = vpop.xlane.xlu1 %2133  ;;  %2414 = vmatpush.bf16.msrb.mxu2 %v2405_v19  ;;  %v8988_v19 = vpack.c.b16 %v2373_v40, %v2373_v40  ;;  %v2155_v20 = vpop.xlane.xlu2 %2154 }
 0x5c8   : > { %v2156_v30 = vsub.f32 %v2124_v38, %v2134_v33  ;;  %v8994_v33 = vpack.c.b16 %v2349_v10, %v2349_v10  ;;  %v2163_v51 = vsub.f32 %v8933_v60, %v2155_v20 }
 0x5ca   : > { %v8964_v47 = vpop.eup %7496  ;;  %v2164_v36 = vmul.f32 1.442695, %v2156_v30  ;;  %v2178_v30 = vmul.f32 1.442695, %v2163_v51 }
 0x5cb   : > { %v2189_v7 = vsel %vm1464_vm10, %v8964_v47, 0.0 }
 0x5cc   : > { %2190 = vadd.xlane.f32.xlu1 %v2189_v7  ;;  %7498 = vpow2.f32 %v2164_v36  ;;  %v2162_v36 = vsub.f32 %v8925_v22, %v2152_v3 }
 0x5cd   : > { %7500 = vpow2.f32 %v2172_v4 }
 0x5ce   : > { %7502 = vpow2.f32 %v2178_v30  ;;  %v2176_v29 = vmul.f32 1.442695, %v2162_v36 }
 0x5d0   : > { %7504 = vpow2.f32 %v2176_v29 }
 0x5d2   : > { %v8969_v11 = vpop.eup %7498 }
 0x5d3   : > { %v2180_v38 = vsel %vm1464_vm10, %v8969_v11, 0.0  ;;  %v8975_v25 = vpop.eup %7500 }
 0x5d4   : > { %2420 = vrot.lane.b32.xlu2 %v8737_v8, %s8074_s1  ;;  %2181 = vadd.xlane.f32.xlu0 %v2180_v38  ;;  %v2192_v23 = vsel %vm1464_vm10, %v8975_v25, 0.0  ;;  %v9020_v7 = vpop.eup %7502 }
 0x5d5   : > { %v2201_v60 = vsel %vm1464_vm10, %v9020_v7, 0.0 }
 0x5d6   : > { %v9028_v22 = vpop.eup %7504 }
 0x5d7   : > { %v2198_v4 = vsel %vm1464_vm10, %v9028_v22, 0.0 }
 0x5dc   : > { %2491 = vrot.lane.b32.xlu2 %v8728_v46, %s8074_s1  ;;  %2193 = vadd.xlane.f32.xlu0 %v2192_v23  ;;  %v2423_v23 = vpop.permute.xlu2 %2422 }
 0x5df   : > { %v2280_v0 = vpop.permute.xlu1 %2279 }
 0x5e0   : > { %v2285_v37 = vsel %vm1734_vm0, %v2280_v0, 0 }
 0x5e1   : > { %2294 = vmatpush.bf16.msra.mxu1 %v2285_v37 }
 0x5e4   : > { %2445 = vrot.lane.b32.xlu2 %v8792_v45, %s8074_s1 }
 0x5e5   : > { %2514 = vrot.lane.b32.xlu1 %v8749_v53, %s8074_s1 }
 0x5ec   : > { %2489 = vrot.lane.b32.xlu2 %v8790_v42, %s8074_s1 }
 0x5ed   : > { %2375 = vrot.lane.b32.xlu1 %v8988_v19, %s8073_s26 }
 0x5f0   : > { %2351 = vrot.lane.b32.xlu0 %v8994_v33, %s8073_s26 }
 0x5f4   : > { %2443 = vrot.lane.b32.xlu2 %v8800_v15, %s8074_s1 }
 0x5f5   : > { %2512 = vrot.lane.b32.xlu1 %v8802_v57, %s8074_s1 }
 0x5fc   : > { %2468 = vrot.lane.b32.xlu2 %v8810_v21, %s8074_s1 }
 0x5fd   : > { %2583 = vrot.lane.b32.xlu1 %v8812_v35, %s8074_s1 }
 0x604   : > { %2466 = vrot.lane.b32.xlu2 %v8832_v63, %s8074_s1 }
 0x605   : > { %2537 = vrot.lane.b32.xlu1 %v8822_v17, %s8074_s1 }
 0x60c   : > { %2560 = vrot.lane.b32.xlu2 %v8778_v18, %s8074_s1 }
 0x60d   : > { %2535 = vrot.lane.b32.xlu1 %v8830_v13, %s8074_s1 }
 0x614   : > { %2716 = vrot.lane.b32.xlu2 %v8852_v59, %s8074_s1 }
 0x615   : > { %2558 = vrot.lane.b32.xlu1 %v8843_v43, %s8074_s1 }
 0x61a   : > { %2202 = vadd.xlane.f32.xlu0 %v2201_v60 }
 0x61c   : > { %2800 = vrot.lane.b32.xlu2 %v8841_v16, %s8074_s1 }
 0x61d   : > { %2737 = vrot.lane.b32.xlu1 %v8857_v41, %s8074_s1 }
 0x61f   : > { %v2185_v3 = vpop.xlane.xlu1 %2184 }
 0x620   : > { %7506 = vrcp.f32 %v2185_v3 }
 0x622   : > { %2199 = vadd.xlane.f32.xlu0 %v2198_v4 }
 0x626   : > { %v7507_v38 = vpop.eup %7506 }
 0x627   : > { %v2213_v0 = vmul.f32 %v7507_v38, %v8951_v27 }
 0x629   : > { %v2221_v37 = vpack.c.bf16 %v2213_v0, %v2213_v0 }
 0x62b   : > { %7069 = vmatmul.msk.bf16.vlgmr.msra.gmra.mxu0 %vm1464_vm10, %v2221_v37 }
 0x62f   : > { %v2188_v40 = vpop.xlane.xlu2 %2187 }
 0x630   : > { %7508 = vrcp.f32 %v2188_v40 }
 0x636   : > { %v7509_v10 = vpop.eup %7508  ;;  %2581 = vrot.lane.b32.xlu0 %v8820_v1, %s8074_s1 }
 0x637   : > { %v2214_v20 = vmul.f32 %v7509_v10, %v8955_v54  ;;  %v2421_v51 = vpop.permute.xlu2 %2420  ;;  %v2197_v30 = vpop.xlane.xlu1 %2196 }
 0x639   : > { %v2222_v36 = vpack.c.bf16 %v2214_v20, %v2214_v20 }
 0x63b   : > { %7070 = vmatmul.msk.bf16.vlgmr.msra.gmra.mxu1 %vm1464_vm10, %v2222_v36 }
 0x63e   : > { %2779 = vrot.lane.b32.xlu0 %v8784_v44, %s8074_s1 }
 0x63f   : > { %v2492_v27 = vpop.permute.xlu2 %2491  ;;  %v2191_v29 = vpop.xlane.xlu1 %2190 }
 0x640   : > { %7510 = vrcp.f32 %v2191_v29  ;;  %v2497_v0 = vsel %vm1464_vm10, %v2492_v27, 0  ;;  %v2428_v29 = vsel %vm1464_vm10, %v2423_v23, 0 }
 0x646   : > { %v7511_v60 = vpop.eup %7510 }
 0x647   : > { %v2215_v3 = vmul.f32 %v7511_v60, %v8964_v47  ;;  %v2446_v4 = vpop.permute.xlu2 %2445  ;;  %v2182_v38 = vpop.xlane.xlu0 %2181 }
 0x648   : > { %7512 = vrcp.f32 %v2182_v38 }
 0x649   : > { %v2223_v54 = vpack.c.bf16 %v2215_v3, %v2215_v3 }
 0x64b   : > { %7071 = vmatmul.msk.bf16.vlgmr.msra.gmra.mxu2 %vm1464_vm10, %v2223_v54 }
 0x64c   : > { %2506 = vmatpush.bf16.xpose.msra.mxu2 %v2497_v0 }
 0x64e   : > { %v7513_v37 = vpop.eup %7512 }
 0x64f   : > { %v9043_v40 = vpop.permute.xlu2 %2489  ;;  %v2212_v10 = vmul.f32 %v7513_v37, %v8969_v11  ;;  %v2194_v36 = vpop.xlane.xlu0 %2193 }
 0x650   : > { %7514 = vrcp.f32 %v2194_v36 }
 0x651   : > { %v2220_v20 = vpack.c.bf16 %v2212_v10, %v2212_v10  ;;  %7516 = vrcp.f32 %v2197_v30 }
 0x653   : > { %7068 = vmatmul.msk.bf16.vlgmr.msrb.gmra.mxu3 %vm1464_vm10, %v2220_v20 }
 0x654   : > { %2437 = vmatpush.bf16.xpose.msrb.mxu3 %v2428_v29 }
 0x656   : > { %v7515_v27 = vpop.eup %7514 }
 0x657   : > { %v2444_v47 = vpop.permute.xlu2 %2443  ;;  %v2515_v60 = vpop.permute.xlu1 %2514  ;;  %v2216_v3 = vmul.f32 %v7515_v27, %v8975_v25  ;;  %v2451_v25 = vsel %vm1464_vm10, %v2446_v4, 0 }
 0x658   : > { %v7517_v38 = vpop.eup %7516  ;;  %v2520_v20 = vsel %vm1464_vm10, %v2515_v60, 0 }
 0x659   : > { %v2217_v23 = vmul.f32 %v7517_v38, %v8959_v58  ;;  %v2224_v37 = vpack.c.bf16 %v2216_v3, %v2216_v3 }
 0x65b   : > { %v2225_v36 = vpack.c.bf16 %v2217_v23, %v2217_v23 }
 0x65f   : > { %v2469_v54 = vpop.permute.xlu2 %2468  ;;  %v2376_v0 = vpop.permute.xlu1 %2375 }
 0x660   : > { %v2474_v14 = vsel %vm1464_vm10, %v2469_v54, 0  ;;  %v2381_v11 = vsel %vm1734_vm0, %v2376_v0, 0 }
 0x661   : > { %2390 = vmatpush.bf16.msrb.mxu1 %v2381_v11 }
 0x662   : > { %v2352_v10 = vpop.permute.xlu0 %2351 }
 0x663   : > { %v2357_v30 = vsel %vm1734_vm0, %v2352_v10, 0  ;;  %7072 = vmatmul.msk.bf16.vlgmr.msra.gmra.mxu3 %vm1464_vm10, %v2224_v37 }
 0x664   : > { %2529 = vmatpush.bf16.xpose.msra.mxu3 %v2520_v20  ;;  %2366 = vmatpush.bf16.msrb.mxu0 %v2357_v30 }
 0x665   : > { %2483 = vmatpush.bf16.xpose.msra.mxu1 %v2474_v14 }
 0x667   : > { %v2467_v29 = vpop.permute.xlu2 %2466  ;;  %v2513_v27 = vpop.permute.xlu1 %2512  ;;  %7073 = vmatmul.msk.bf16.vlgmr.msrb.gmra.mxu0 %vm1464_vm10, %v2225_v36 }
 0x668   : > { %2460 = vmatpush.bf16.xpose.msra.mxu0 %v2451_v25 }
 0x66f   : > { %v2561_v58 = vpop.permute.xlu2 %2560  ;;  %v2584_v3 = vpop.permute.xlu1 %2583 }
 0x670   : > { %v2589_v36 = vsel %vm1464_vm10, %v2584_v3, 0 }
 0x673   : > { %7076 = vmatmul.msk.bf16.vlgmr.msrb.gmra.mxu3 %vm1464_vm10, %v2421_v51 }
 0x677   : > { %v2717_v14 = vpop.permute.xlu2 %2716  ;;  %v2538_v60 = vpop.permute.xlu1 %2537  ;;  %7077 = vmatmul.msk.bf16.vlgmr.msra.gmra.mxu0 %vm1464_vm10, %v2444_v47 }
 0x678   : > { %v2722_v38 = vsel %vm1734_vm0, %v2717_v14, 0  ;;  %v2543_v54 = vsel %vm1464_vm10, %v2538_v60, 0 }
 0x679   : > { %2552 = vmatpush.bf16.xpose.msrb.mxu0 %v2543_v54  ;;  %2731 = vmatpush.bf16.msrb.mxu3 %v2722_v38  ;;  %v2566_v38 = vsel %vm1464_vm10, %v2561_v58, 0 }
 0x67f   : > { %v2536_v4 = vpop.permute.xlu1 %2535  ;;  %v2801_v0 = vpop.permute.xlu2 %2800 }
 0x680   : > { %v2806_v11 = vsel %vm1734_vm0, %v2801_v0, 0 }
 0x683   : > { %7080 = vmatmul.msk.bf16.vlgmr.msra.gmra.mxu3 %vm1464_vm10, %v2513_v27 }
 0x684   : > { %2815 = vmatpush.bf16.msra.mxu3 %v2806_v11 }
 0x687   : > { %v2559_v23 = vpop.permute.xlu1 %2558  ;;  %7081 = vmatmul.msk.bf16.vlgmr.msrb.gmra.mxu0 %vm1464_vm10, %v2536_v4 }
 0x68d   : > { %v2203_v51 = vpop.xlane.xlu0 %2202 }
 0x68e   : > { %7518 = vrcp.f32 %v2203_v51 }
 0x68f   : > { %v2738_v37 = vpop.permute.xlu1 %2737 }
 0x690   : > { %v2743_v10 = vsel %vm1734_vm0, %v2738_v37, 0 }
 0x691   : > { %2752 = vmatpush.bf16.msra.mxu0 %v2743_v10 }
 0x694   : > { %v7519_v20 = vpop.eup %7518 }
 0x695   : > { %v2219_v47 = vmul.f32 %v7519_v20, %v9020_v7  ;;  %v2200_v30 = vpop.xlane.xlu0 %2199 }
 0x696   : > { %7520 = vrcp.f32 %v2200_v30 }
 0x697   : > { %v2227_v25 = vpack.c.bf16 %v2219_v47, %v2219_v47 }
 0x699   : > { %7075 = vmatmul.msk.bf16.vlgmr.msrb.gmra.mxu2 %vm1464_vm10, %v2227_v25 }
 0x69a   : > { %2598 = vmatpush.bf16.xpose.msrb.mxu2 %v2589_v36 }
 0x69c   : > { %v7521_v27 = vpop.eup %7520 }
 0x69d   : > { %v2218_v14 = vmul.f32 %v7521_v27, %v9028_v22 }
 0x69f   : > { %v2226_v60 = vpack.c.bf16 %v2218_v14, %v2218_v14 }
 0x6a1   : > { %7074 = vmatmul.msk.bf16.vlgmr.msrb.gmra.mxu1 %vm1464_vm10, %v2226_v60 }
 0x6a2   : > { %2575 = vmatpush.bf16.xpose.msrb.mxu1 %v2566_v38 }
 0x6a8   : > { %v9071_v54 = vpop.f32.mrf.mxu0  ;;  %v2582_v7 = vpop.permute.xlu0 %2581 }
 0x6a9   : > { %7079 = vmatmul.msk.bf16.vlgmr.msra.gmra.mxu2 %vm1464_vm10, %v9043_v40 }
 0x6b0   : > { %v2274_v4 = vpop.f32.mrf.mxu0  ;;  %v2780_v3 = vpop.permute.xlu0 %2779 }
 0x6b1   : > { %v2785_v0 = vsel %vm1734_vm0, %v2780_v3, 0  ;;  %7078 = vmatmul.msk.bf16.vlgmr.msra.gmra.mxu1 %vm1464_vm10, %v2467_v29 }
 0x6b2   : > { %2794 = vmatpush.bf16.msra.mxu2 %v2785_v0 }
 0x6b8   : > { %v9077_v22 = vpop.f32.mrf.mxu1 }
 0x6b9   : > { %7083 = vmatmul.msk.bf16.vlgmr.msrb.gmra.mxu2 %vm1464_vm10, %v2582_v7 }
 0x6c0   : > { %v2298_v58 = vpop.f32.mrf.mxu1 }
 0x6c1   : > { %7082 = vmatmul.msk.bf16.vlgmr.msrb.gmra.mxu1 %vm1464_vm10, %v2559_v23 }
 0x6ce   : > { %v9081_v11 = vpop.f32.mrf.mxu2 }
 0x6d6   : > { %v2322_v51 = vpop.f32.mrf.mxu2  ;;  %v9083_v37 = vpop.f32.mrf.mxu3 }
 0x6de   : > { %v2250_v40 = vpop.f32.mrf.mxu3 }
 0x6e4   : > { %v9085_v10 = vpop.f32.mrf.mxu0 }
 0x6e6   : > { %v9087_v20 = vpop.f32.mrf.mxu3 }
 0x6ec   : > { %v2370_v47 = vpop.f32.mrf.mxu0 }
 0x6ee   : > { %v2346_v29 = vpop.f32.mrf.mxu3 }
 0x6f4   : > { %v2462_v30 = vpop.f32.mrf.mxu0 }
 0x6f5   : > { %v2605_v25 = vmul.f32 0.35355338, %v2462_v30 }
 0x6f6   : > { %v2439_v36 = vpop.f32.mrf.mxu3 }
 0x6f7   : > { %v2604_v27 = vmul.f32 0.35355338, %v2439_v36  ;;  %v2613_v14 = vsel %vm8634_vm1, %v2605_v25, -1e+30 }
 0x6f8   : > { %v2623_v23 = vsel %vm1464_vm10, %v2613_v14, -inf }
 0x6f9   : > { %2624 = vmax.xlane.f32.xlu0 %v2623_v23  ;;  %v2612_v60 = vsel %vm8634_vm1, %v2604_v27, -1e+30 }
 0x6fa   : > { %v2620_v38 = vsel %vm1464_vm10, %v2612_v60, -inf }
 0x6fb   : > { %2621 = vmax.xlane.f32.xlu2 %v2620_v38 }
 0x6fc   : > { %v2464_v7 = vpop.f32.mrf.mxu0 }
 0x6fe   : > { %v2441_v4 = vpop.f32.mrf.mxu3 }
 0x704   : > { %v2554_v3 = vpop.f32.mrf.mxu0 }
 0x705   : > { %v2609_v0 = vmul.f32 0.35355338, %v2554_v3 }
 0x706   : > { %v2531_v58 = vpop.f32.mrf.mxu3 }
 0x707   : > { %v2608_v51 = vmul.f32 0.35355338, %v2531_v58  ;;  %v2617_v40 = vsel %vm8634_vm1, %v2609_v0, -1e+30 }
 0x708   : > { %v2635_v47 = vsel %vm1464_vm10, %v2617_v40, -inf }
 0x709   : > { %2636 = vmax.xlane.f32.xlu1 %v2635_v47  ;;  %v2616_v29 = vsel %vm8634_vm1, %v2608_v51, -1e+30 }
 0x70a   : > { %v2632_v30 = vsel %vm1464_vm10, %v2616_v29, -inf }
 0x70b   : > { %2633 = vmax.xlane.f32.xlu2 %v2632_v30 }
 0x70c   : > { %v2556_v25 = vpop.f32.mrf.mxu0 }
 0x70e   : > { %v2533_v36 = vpop.f32.mrf.mxu3 }
 0x71c   : > { %v9101_v27 = vpop.f32.mrf.mxu2 }
 0x71e   : > { %v9103_v23 = vpop.f32.mrf.mxu1 }
 0x724   : > { %v2418_v38 = vpop.f32.mrf.mxu2 }
 0x726   : > { %v2394_v7 = vpop.f32.mrf.mxu1 }
 0x72c   : > { %v2508_v4 = vpop.f32.mrf.mxu2 }
 0x72d   : > { %v2607_v3 = vmul.f32 0.35355338, %v2508_v4 }
 0x72e   : > { %v2485_v0 = vpop.f32.mrf.mxu1 }
 0x72f   : > { %v2606_v58 = vmul.f32 0.35355338, %v2485_v0  ;;  %v2615_v47 = vsel %vm8634_vm1, %v2607_v3, -1e+30 }
 0x730   : > { %v2629_v51 = vsel %vm1464_vm10, %v2615_v47, -inf }
 0x731   : > { %2630 = vmax.xlane.f32.xlu1 %v2629_v51  ;;  %v2614_v30 = vsel %vm8634_vm1, %v2606_v58, -1e+30 }
 0x732   : > { %v2626_v25 = vsel %vm1464_vm10, %v2614_v30, -inf }
 0x733   : > { %2627 = vmax.xlane.f32.xlu0 %v2626_v25 }
 0x734   : > { %v2510_v36 = vpop.f32.mrf.mxu2 }
 0x736   : > { %v2487_v26 = vpop.f32.mrf.mxu1 }
 0x73c   : > { %v2600_v38 = vpop.f32.mrf.mxu2 }
 0x73d   : > { %v2611_v7 = vmul.f32 0.35355338, %v2600_v38 }
 0x73e   : > { %v2577_v5 = vpop.f32.mrf.mxu1 }
 0x73f   : > { %v2610_v4 = vmul.f32 0.35355338, %v2577_v5  ;;  %v9113_v0 = vsel %vm8634_vm1, %v2611_v7, -1e+30 }
 0x740   : > { %v2641_v3 = vsel %vm1464_vm10, %v9113_v0, -inf }
 0x741   : > { %2642 = vmax.xlane.f32.xlu2 %v2641_v3  ;;  %v2618_v58 = vsel %vm8634_vm1, %v2610_v4, -1e+30 }
 0x742   : > { %v2638_v51 = vsel %vm1464_vm10, %v2618_v58, -inf }
 0x743   : > { %2639 = vmax.xlane.f32.xlu0 %v2638_v51 }
 0x744   : > { %v2602_v25 = vpop.f32.mrf.mxu2 }
 0x746   : > { %v2579_v26 = vpop.f32.mrf.mxu1 }
 0x759   : > { %2758 = vrot.lane.b32.xlu2 %v8945_v31, %s8074_s1 }
 0x76c   : > { %v2625_v5 = vpop.xlane.xlu0 %2624 }
 0x76d   : > { %v2645_v36 = vsub.f32 %v2613_v14, %v2625_v5 }
 0x76e   : > { %v2622_v38 = vpop.xlane.xlu2 %2621 }
 0x76f   : > { %v2654_v7 = vmul.f32 1.442695, %v2645_v36  ;;  %v2644_v48 = vsub.f32 %v2612_v60, %v2622_v38 }
 0x771   : > { %7522 = vpow2.f32 %v2654_v7  ;;  %v2652_v24 = vmul.f32 1.442695, %v2644_v48 }
 0x773   : > { %7524 = vpow2.f32 %v2652_v24 }
 0x777   : > { %v9122_v3 = vpop.eup %7522 }
 0x778   : > { %v2671_v4 = vsel %vm1464_vm10, %v9122_v3, 0.0 }
 0x779   : > { %v9126_v9 = vpop.eup %7524  ;;  %2672 = vadd.xlane.f32.xlu0 %v2671_v4 }
 0x77a   : > { %v2668_v51 = vsel %vm1464_vm10, %v9126_v9, 0.0 }
 0x77b   : > { %2669 = vadd.xlane.f32.xlu1 %v2668_v51 }
 0x77c   : > { %v2637_v25 = vpop.xlane.xlu1 %2636 }
 0x77d   : > { %v2649_v14 = vsub.f32 %v2617_v40, %v2637_v25 }
 0x77e   : > { %v2634_v26 = vpop.xlane.xlu2 %2633 }
 0x77f   : > { %v2662_v5 = vmul.f32 1.442695, %v2649_v14  ;;  %v2648_v60 = vsub.f32 %v2616_v29, %v2634_v26 }
 0x781   : > { %7526 = vpow2.f32 %v2662_v5  ;;  %v2660_v48 = vmul.f32 1.442695, %v2648_v60 }
 0x783   : > { %7528 = vpow2.f32 %v2660_v48 }
 0x787   : > { %v9130_v24 = vpop.eup %7526 }
 0x788   : > { %v2683_v36 = vsel %vm1464_vm10, %v9130_v24, 0.0 }
 0x789   : > { %2684 = vadd.xlane.f32.xlu0 %v2683_v36  ;;  %v9134_v38 = vpop.eup %7528 }
 0x78a   : > { %v2680_v7 = vsel %vm1464_vm10, %v9134_v38, 0.0 }
 0x791   : > { %2681 = vadd.xlane.f32.xlu0 %v2680_v7 }
 0x7a4   : > { %v2631_v4 = vpop.xlane.xlu1 %2630 }
 0x7a5   : > { %v2647_v40 = vsub.f32 %v2615_v47, %v2631_v4  ;;  %2821 = vrot.lane.b32.xlu0 %v8994_v33, %s8074_s1 }
 0x7a6   : > { %v2628_v29 = vpop.xlane.xlu0 %2627 }
 0x7a7   : > { %v2658_v51 = vmul.f32 1.442695, %v2647_v40  ;;  %v2646_v25 = vsub.f32 %v2614_v30, %v2628_v29 }
 0x7a9   : > { %7530 = vpow2.f32 %v2658_v51  ;;  %v2656_v14 = vmul.f32 1.442695, %v2646_v25 }
 0x7ab   : > { %7532 = vpow2.f32 %v2656_v14 }
 0x7af   : > { %v9140_v26 = vpop.eup %7530 }
 0x7b0   : > { %v2677_v5 = vsel %vm1464_vm10, %v9140_v26, 0.0 }
 0x7b1   : > { %v9144_v60 = vpop.eup %7532  ;;  %2678 = vadd.xlane.f32.xlu1 %v2677_v5 }
 0x7b2   : > { %v2674_v47 = vsel %vm1464_vm10, %v9144_v60, 0.0 }
 0x7b3   : > { %2675 = vadd.xlane.f32.xlu2 %v2674_v47 }
 0x7b4   : > { %v2643_v48 = vpop.xlane.xlu2 %2642 }
 0x7b6   : > { %v2640_v36 = vpop.xlane.xlu0 %2639 }
 0x7b7   : > { %v2650_v4 = vsub.f32 %v2618_v58, %v2640_v36 }
 0x7b9   : > { %v2664_v40 = vmul.f32 1.442695, %v2650_v4 }
 0x7bb   : > { %7534 = vpow2.f32 %v2664_v40 }
 0x7bc   : > { %v2759_v7 = vpop.permute.xlu2 %2758 }
 0x7bd   : > { %v2764_v30 = vsel %vm1734_vm0, %v2759_v7, 0 }
 0x7be   : > { %2773 = vmatpush.bf16.msra.mxu1 %v2764_v30 }
 0x7c1   : > { %v9151_v29 = vpop.eup %7534 }
 0x7c2   : > { %v2686_v51 = vsel %vm1464_vm10, %v9151_v29, 0.0 }
 0x7ca   : > { %2886 = vrot.lane.b32.xlu1 %v8735_v6, %s8075_s7 }
 0x7cb   : > { %2863 = vrot.lane.b32.xlu2 %v8937_v34, %s8074_s1 }
 0x7cf   : > { %2687 = vadd.xlane.f32.xlu0 %v2686_v51 }
 0x7d2   : > { %2909 = vrot.lane.b32.xlu1 %v8792_v45, %s8075_s7 }
 0x7d3   : > { %2884 = vrot.lane.b32.xlu2 %v8737_v8, %s8075_s7 }
 0x7da   : > { %2955 = vrot.lane.b32.xlu1 %v8728_v46, %s8075_s7 }
 0x7db   : > { %2842 = vrot.lane.b32.xlu2 %v8988_v19, %s8074_s1 }
 0x7e2   : > { %2953 = vrot.lane.b32.xlu1 %v8790_v42, %s8075_s7 }
 0x7e3   : > { %2907 = vrot.lane.b32.xlu2 %v8800_v15, %s8075_s7  ;;  %3001 = vrot.lane.b32.xlu0 %v8822_v17, %s8075_s7 }
 0x7eb   : > { %2932 = vrot.lane.b32.xlu2 %v8810_v21, %s8075_s7  ;;  %3180 = vrot.lane.b32.xlu0 %v8852_v59, %s8075_s7  ;;  %v2651_v21 = vsub.f32 %v9113_v0, %v2643_v48 }
 0x7ec   : > { %v2673_v6 = vpop.xlane.xlu0 %2672 }
 0x7ed   : > { %7536 = vrcp.f32 %v2673_v6  ;;  %v2666_v25 = vmul.f32 1.442695, %v2651_v21 }
 0x7ee   : > { %v2670_v46 = vpop.xlane.xlu1 %2669 }
 0x7ef   : > { %7538 = vrcp.f32 %v2670_v46 }
 0x7f0   : > { %7540 = vpow2.f32 %v2666_v25 }
 0x7f3   : > { %v7537_v8 = vpop.eup %7536  ;;  %2930 = vrot.lane.b32.xlu2 %v8832_v63, %s8075_s7 }
 0x7f4   : > { %v2701_v42 = vmul.f32 %v7537_v8, %v9122_v3 }
 0x7f5   : > { %v7539_v45 = vpop.eup %7538 }
 0x7f6   : > { %v2709_v15 = vpack.c.bf16 %v2701_v42, %v2701_v42  ;;  %v2700_v17 = vmul.f32 %v7539_v45, %v9126_v9  ;;  %v9186_v3 = vpop.eup %7540 }
 0x7f7   : > { %v2689_v0 = vsel %vm1464_vm10, %v9186_v3, 0.0 }
 0x7f8   : > { %v2708_v58 = vpack.c.bf16 %v2700_v17, %v2700_v17  ;;  %7085 = vmatmul.msk.bf16.vlgmr.msra.gmra.mxu0 %vm1464_vm10, %v2709_v15 }
 0x7fa   : > { %7084 = vmatmul.msk.bf16.vlgmr.msrb.gmra.mxu3 %vm1464_vm10, %v2708_v58 }
 0x7fb   : > { %3047 = vrot.lane.b32.xlu2 %v8812_v35, %s8075_s7 }
 0x7fc   : > { %v2685_v59 = vpop.xlane.xlu0 %2684 }
 0x803   : > { %3045 = vrot.lane.b32.xlu2 %v8820_v1, %s8075_s7 }
 0x804   : > { %v2682_v63 = vpop.xlane.xlu0 %2681 }
 0x805   : > { %7542 = vrcp.f32 %v2682_v63 }
 0x806   : > { %7544 = vrcp.f32 %v2685_v59 }
 0x80b   : > { %v7543_v9 = vpop.eup %7542  ;;  %3022 = vrot.lane.b32.xlu2 %v8843_v43, %s8075_s7 }
 0x80c   : > { %v2704_v14 = vmul.f32 %v7543_v9, %v9134_v38  ;;  %2690 = vadd.xlane.f32.xlu1 %v2689_v0  ;;  %v7545_v5 = vpop.eup %7544 }
 0x80d   : > { %v2705_v1 = vmul.f32 %v7545_v5, %v9130_v24 }
 0x80e   : > { %v2712_v35 = vpack.c.bf16 %v2704_v14, %v2704_v14 }
 0x80f   : > { %v2713_v36 = vpack.c.bf16 %v2705_v1, %v2705_v1 }
 0x810   : > { %7088 = vmatmul.msk.bf16.vlgmr.msra.gmra.mxu3 %vm1464_vm10, %v2712_v35 }
 0x817   : > { %v2822_v47 = vpop.permute.xlu0 %2821 }
 0x818   : > { %v2827_v48 = vsel %vm1734_vm0, %v2822_v47, 0 }
 0x819   : > { %2836 = vmatpush.bf16.msrb.mxu0 %v2827_v48 }
 0x81c   : > { %7089 = vmatmul.msk.bf16.vlgmr.msrb.gmra.mxu0 %vm1464_vm10, %v2713_v36 }
 0x824   : > { %v2679_v43 = vpop.xlane.xlu1 %2678 }
 0x825   : > { %7546 = vrcp.f32 %v2679_v43  ;;  %2978 = vrot.lane.b32.xlu1 %v8749_v53, %s8075_s7 }
 0x826   : > { %v2676_v38 = vpop.xlane.xlu2 %2675 }
 0x827   : > { %7548 = vrcp.f32 %v2676_v38 }
 0x82b   : > { %v7547_v7 = vpop.eup %7546 }
 0x82c   : > { %v2703_v4 = vmul.f32 %v7547_v7, %v9140_v26 }
 0x82d   : > { %v7549_v30 = vpop.eup %7548  ;;  %2976 = vrot.lane.b32.xlu1 %v8802_v57, %s8075_s7 }
 0x82e   : > { %v2711_v24 = vpack.c.bf16 %v2703_v4, %v2703_v4  ;;  %v2702_v40 = vmul.f32 %v7549_v30, %v9144_v60  ;;  %v2864_v51 = vpop.permute.xlu2 %2863 }
 0x82f   : > { %v2869_v6 = vsel %vm1734_vm0, %v2864_v51, 0 }
 0x830   : > { %v2710_v46 = vpack.c.bf16 %v2702_v40, %v2702_v40  ;;  %7087 = vmatmul.msk.bf16.vlgmr.msra.gmra.mxu2 %vm1464_vm10, %v2711_v24 }
 0x831   : > { %2878 = vmatpush.bf16.msrb.mxu2 %v2869_v6 }
 0x832   : > { %7086 = vmatmul.msk.bf16.vlgmr.msra.gmra.mxu1 %vm1464_vm10, %v2710_v46 }
 0x835   : > { %2999 = vrot.lane.b32.xlu1 %v8830_v13, %s8075_s7 }
 0x836   : > { %v2885_v53 = vpop.permute.xlu2 %2884 }
 0x83c   : > { %v2887_v26 = vpop.permute.xlu1 %2886 }
 0x83d   : > { %v2892_v8 = vsel %vm1464_vm10, %v2887_v26, 0  ;;  %3024 = vrot.lane.b32.xlu1 %v8778_v18, %s8075_s7 }
 0x83e   : > { %2901 = vmatpush.bf16.xpose.msrb.mxu3 %v2892_v8  ;;  %v2843_v57 = vpop.permute.xlu2 %2842 }
 0x83f   : > { %v2848_v60 = vsel %vm1734_vm0, %v2843_v57, 0 }
 0x840   : > { %2857 = vmatpush.bf16.msrb.mxu1 %v2848_v60 }
 0x842   : > { %v2688_v42 = vpop.xlane.xlu0 %2687 }
 0x843   : > { %7550 = vrcp.f32 %v2688_v42 }
 0x844   : > { %v2910_v45 = vpop.permute.xlu1 %2909 }
 0x845   : > { %v2915_v15 = vsel %vm1464_vm10, %v2910_v45, 0  ;;  %7092 = vmatmul.msk.bf16.vlgmr.msrb.gmra.mxu3 %vm1464_vm10, %v2885_v53 }
 0x846   : > { %v2908_v13 = vpop.permute.xlu2 %2907  ;;  %2924 = vmatpush.bf16.xpose.msra.mxu0 %v2915_v15 }
 0x849   : > { %v7551_v17 = vpop.eup %7550 }
 0x84a   : > { %v2706_v58 = vmul.f32 %v7551_v17, %v9151_v29 }
 0x84c   : > { %v2714_v21 = vpack.c.bf16 %v2706_v58, %v2706_v58  ;;  %v2956_v59 = vpop.permute.xlu1 %2955 }
 0x84d   : > { %v2961_v18 = vsel %vm1464_vm10, %v2956_v59, 0  ;;  %7093 = vmatmul.msk.bf16.vlgmr.msra.gmra.mxu0 %vm1464_vm10, %v2908_v13 }
 0x84e   : > { %2970 = vmatpush.bf16.xpose.msra.mxu2 %v2961_v18  ;;  %v2933_v25 = vpop.permute.xlu2 %2932  ;;  %7090 = vmatmul.msk.bf16.vlgmr.msrb.gmra.mxu1 %vm1464_vm10, %v2714_v21 }
 0x84f   : > { %v2938_v63 = vsel %vm1464_vm10, %v2933_v25, 0 }
 0x850   : > { %2947 = vmatpush.bf16.xpose.msra.mxu1 %v2938_v63 }
 0x854   : > { %v2954_v35 = vpop.permute.xlu1 %2953 }
 0x855   : > { %v3002_v9 = vpop.permute.xlu0 %3001 }
 0x856   : > { %v3007_v0 = vsel %vm1464_vm10, %v3002_v9, 0  ;;  %v2931_v14 = vpop.permute.xlu2 %2930 }
 0x857   : > { %3016 = vmatpush.bf16.xpose.msrb.mxu0 %v3007_v0 }
 0x85d   : > { %v3181_v24 = vpop.permute.xlu0 %3180 }
 0x85e   : > { %7094 = vmatmul.msk.bf16.vlgmr.msra.gmra.mxu1 %vm1464_vm10, %v2931_v14  ;;  %v3048_v38 = vpop.permute.xlu2 %3047  ;;  %v3186_v6 = vsel %vm1734_vm0, %v3181_v24, 0 }
 0x85f   : > { %v3053_v4 = vsel %vm1464_vm10, %v3048_v38, 0 }
 0x866   : > { %v3046_v57 = vpop.permute.xlu2 %3045 }
 0x86e   : > { %v3023_v13 = vpop.permute.xlu2 %3022 }
 0x875   : > { %v9221_v29 = vpop.f32.mrf.mxu0 }
 0x87d   : > { %v9223_v5 = vpop.f32.mrf.mxu3  ;;  %v2756_v1 = vpop.f32.mrf.mxu0 }
 0x87f   : > { %v2691_v47 = vpop.xlane.xlu1 %2690 }
 0x880   : > { %7552 = vrcp.f32 %v2691_v47 }
 0x885   : > { %v2735_v48 = vpop.f32.mrf.mxu3 }
 0x886   : > { %v7553_v36 = vpop.eup %7552 }
 0x887   : > { %v2707_v43 = vmul.f32 %v7553_v36, %v9186_v3 }
 0x889   : > { %v2715_v7 = vpack.c.bf16 %v2707_v43, %v2707_v43 }
 0x88b   : > { %7091 = vmatmul.msk.bf16.vlgmr.msrb.gmra.mxu2 %vm1464_vm10, %v2715_v7 }
 0x88c   : > { %3062 = vmatpush.bf16.xpose.msrb.mxu2 %v3053_v4 }
 0x893   : > { %v9228_v30 = vpop.f32.mrf.mxu3 }
 0x897   : > { %v2979_v40 = vpop.permute.xlu1 %2978 }
 0x898   : > { %v2984_v51 = vsel %vm1464_vm10, %v2979_v40, 0 }
 0x899   : > { %v9232_v46 = vpop.f32.mrf.mxu0  ;;  %2993 = vmatpush.bf16.xpose.msra.mxu3 %v2984_v51 }
 0x89b   : > { %v2819_v3 = vpop.f32.mrf.mxu3  ;;  %7095 = vmatmul.msk.bf16.vlgmr.msra.gmra.mxu2 %vm1464_vm10, %v2954_v35 }
 0x89f   : > { %v2977_v53 = vpop.permute.xlu1 %2976 }
 0x8a0   : > { %7096 = vmatmul.msk.bf16.vlgmr.msra.gmra.mxu3 %vm1464_vm10, %v2977_v53 }
 0x8a1   : > { %3195 = vmatpush.bf16.msrb.mxu3 %v3186_v6  ;;  %v2840_v26 = vpop.f32.mrf.mxu0 }
 0x8a7   : > { %v3000_v8 = vpop.permute.xlu1 %2999 }
 0x8a8   : > { %7097 = vmatmul.msk.bf16.vlgmr.msrb.gmra.mxu0 %vm1464_vm10, %v3000_v8 }
 0x8ab   : > { %7099 = vmatmul.msk.bf16.vlgmr.msrb.gmra.mxu2 %vm1464_vm10, %v3046_v57 }
 0x8af   : > { %v3025_v60 = vpop.permute.xlu1 %3024  ;;  %v9238_v42 = vpop.f32.mrf.mxu1 }
 0x8b0   : > { %v3030_v45 = vsel %vm1464_vm10, %v3025_v60, 0 }
 0x8b1   : > { %3039 = vmatpush.bf16.xpose.msrb.mxu1 %v3030_v45 }
 0x8b3   : > { %v9241_v15 = vpop.f32.mrf.mxu2 }
 0x8b7   : > { %v2777_v17 = vpop.f32.mrf.mxu1 }
 0x8b8   : > { %7098 = vmatmul.msk.bf16.vlgmr.msrb.gmra.mxu1 %vm1464_vm10, %v3023_v13 }
 0x8bb   : > { %v2798_v58 = vpop.f32.mrf.mxu2 }
 0x8c8   : > { %v2903_v21 = vpop.f32.mrf.mxu3 }
 0x8c9   : > { %v3068_v43 = vmul.f32 0.35355338, %v2903_v21 }
 0x8ca   : > { %v2926_v59 = vpop.f32.mrf.mxu0 }
 0x8cb   : > { %v3069_v18 = vmul.f32 0.35355338, %v2926_v59  ;;  %v9244_v25 = vpop.f32.mrf.mxu1  ;;  %v3076_v7 = vsel %vm8634_vm1, %v3068_v43, -1e+30 }
 0x8cc   : > { %v3084_v4 = vsel %vm1464_vm10, %v3076_v7, -inf }
 0x8cd   : > { %v3077_v63 = vsel %vm8634_vm1, %v3069_v18, -1e+30 }
 0x8ce   : > { %v3087_v9 = vsel %vm1464_vm10, %v3077_v63, -inf }
 0x8cf   : > { %3088 = vmax.xlane.f32.xlu0 %v3087_v9 }
 0x8d0   : > { %v2905_v0 = vpop.f32.mrf.mxu3 }
 0x8d2   : > { %v2928_v14 = vpop.f32.mrf.mxu0 }
 0x8d3   : > { %v2861_v35 = vpop.f32.mrf.mxu1 }
 0x8db   : > { %v2949_v1 = vpop.f32.mrf.mxu1 }
 0x8dc   : > { %v3070_v47 = vmul.f32 0.35355338, %v2949_v1 }
 0x8de   : > { %v3078_v48 = vsel %vm8634_vm1, %v3070_v47, -1e+30 }
 0x8df   : > { %v3090_v36 = vsel %vm1464_vm10, %v3078_v48, -inf }
 0x8e0   : > { %3091 = vmax.xlane.f32.xlu1 %v3090_v36 }
 0x8e3   : > { %v2951_v38 = vpop.f32.mrf.mxu1 }
 0x8e8   : > { %3085 = vmax.xlane.f32.xlu1 %v3084_v4 }
 0x90e   : > { %v9255_v24 = vpop.f32.mrf.mxu2 }
 0x916   : > { %v2882_v40 = vpop.f32.mrf.mxu2 }
 0x91e   : > { %v2972_v51 = vpop.f32.mrf.mxu2 }
 0x91f   : > { %v3071_v36 = vmul.f32 0.35355338, %v2972_v51 }
 0x921   : > { %v3079_v38 = vsel %vm8634_vm1, %v3071_v36, -1e+30 }
 0x922   : > { %v3093_v4 = vsel %vm1464_vm10, %v3079_v38, -inf }
 0x923   : > { %v2995_v6 = vpop.f32.mrf.mxu3 }
 0x924   : > { %v3072_v3 = vmul.f32 0.35355338, %v2995_v6 }
 0x925   : > { %v3018_v53 = vpop.f32.mrf.mxu0 }
 0x926   : > { %v3073_v26 = vmul.f32 0.35355338, %v3018_v53  ;;  %v2974_v8 = vpop.f32.mrf.mxu2  ;;  %v3080_v57 = vsel %vm8634_vm1, %v3072_v3, -1e+30 }
 0x927   : > { %v3096_v60 = vsel %vm1464_vm10, %v3080_v57, -inf }
 0x928   : > { %v3081_v45 = vsel %vm8634_vm1, %v3073_v26, -1e+30  ;;  %3097 = vmax.xlane.f32.xlu0 %v3096_v60 }
 0x929   : > { %v3099_v13 = vsel %vm1464_vm10, %v3081_v45, -inf }
 0x92a   : > { %3100 = vmax.xlane.f32.xlu2 %v3099_v13 }
 0x92b   : > { %v2997_v17 = vpop.f32.mrf.mxu3 }
 0x92d   : > { %v3020_v58 = vpop.f32.mrf.mxu0 }
 0x92e   : > { %v3064_v21 = vpop.f32.mrf.mxu2 }
 0x92f   : > { %v3075_v59 = vmul.f32 0.35355338, %v3064_v21 }
 0x931   : > { %v9265_v18 = vsel %vm8634_vm1, %v3075_v59, -1e+30 }
 0x932   : > { %v3105_v9 = vsel %vm1464_vm10, %v9265_v18, -inf }
 0x933   : > { %3106 = vmax.xlane.f32.xlu1 %v3105_v9 }
 0x935   : > { %v3041_v0 = vpop.f32.mrf.mxu1 }
 0x936   : > { %v3074_v14 = vmul.f32 0.35355338, %v3041_v0  ;;  %v3066_v35 = vpop.f32.mrf.mxu2 }
 0x938   : > { %v3082_v1 = vsel %vm8634_vm1, %v3074_v14, -1e+30 }
 0x939   : > { %v3102_v47 = vsel %vm1464_vm10, %v3082_v1, -inf }
 0x93a   : > { %3103 = vmax.xlane.f32.xlu2 %v3102_v47 }
 0x93d   : > { %v3043_v43 = vpop.f32.mrf.mxu1 }
 0x942   : > { %3094 = vmax.xlane.f32.xlu2 %v3093_v4  ;;  %v3089_v40 = vpop.xlane.xlu0 %3088 }
 0x943   : > { %v3109_v6 = vsub.f32 %v3077_v63, %v3089_v40 }
 0x945   : > { %v3118_v3 = vmul.f32 1.442695, %v3109_v6 }
 0x947   : > { %7554 = vpow2.f32 %v3118_v3 }
 0x94d   : > { %v7555_v53 = vpop.eup %7554 }
 0x94e   : > { %v3135_v26 = vsel %vm1464_vm10, %v7555_v53, 0.0 }
 0x94f   : > { %3136 = vadd.xlane.f32.xlu1 %v3135_v26 }
 0x953   : > { %v3092_v8 = vpop.xlane.xlu1 %3091 }
 0x954   : > { %v3110_v60 = vsub.f32 %v3078_v48, %v3092_v8 }
 0x956   : > { %v3120_v13 = vmul.f32 1.442695, %v3110_v60 }
 0x958   : > { %7556 = vpow2.f32 %v3120_v13 }
 0x95a   : > { %3201 = vrot.lane.b32.xlu2 %v8857_v41, %s8075_s7 }
 0x95b   : > { %v3086_v51 = vpop.xlane.xlu1 %3085 }
 0x95c   : > { %v3108_v17 = vsub.f32 %v3076_v7, %v3086_v51 }
 0x95e   : > { %v9278_v58 = vpop.eup %7556  ;;  %v3116_v21 = vmul.f32 1.442695, %v3108_v17 }
 0x95f   : > { %v3138_v63 = vsel %vm1464_vm10, %v9278_v58, 0.0 }
 0x960   : > { %7558 = vpow2.f32 %v3116_v21  ;;  %3139 = vadd.xlane.f32.xlu1 %v3138_v63 }
 0x966   : > { %v7559_v59 = vpop.eup %7558 }
 0x967   : > { %v3132_v9 = vsel %vm1464_vm10, %v7559_v59, 0.0 }
 0x968   : > { %3133 = vadd.xlane.f32.xlu0 %v3132_v9 }
 0x979   : > { %3222 = vrot.lane.b32.xlu1 %v8945_v31, %s8075_s7 }
 0x97c   : > { %3243 = vrot.lane.b32.xlu0 %v8784_v44, %s8075_s7 }
 0x981   : > { %3264 = vrot.lane.b32.xlu1 %v8841_v16, %s8075_s7 }
 0x99b   : > { %v3098_v41 = vpop.xlane.xlu0 %3097 }
 0x99c   : > { %v3112_v48 = vsub.f32 %v3080_v57, %v3098_v41 }
 0x99d   : > { %v3101_v7 = vpop.xlane.xlu2 %3100 }
 0x99e   : > { %v3124_v0 = vmul.f32 1.442695, %v3112_v48  ;;  %v3113_v14 = vsub.f32 %v3081_v45, %v3101_v7 }
 0x9a0   : > { %7560 = vpow2.f32 %v3124_v0  ;;  %v3126_v35 = vmul.f32 1.442695, %v3113_v14 }
 0x9a2   : > { %7562 = vpow2.f32 %v3126_v35 }
 0x9a6   : > { %v9289_v47 = vpop.eup %7560  ;;  %v3107_v26 = vpop.xlane.xlu1 %3106 }
 0x9a7   : > { %v3144_v36 = vsel %vm1464_vm10, %v9289_v47, 0.0 }
 0x9a8   : > { %v9293_v31 = vpop.eup %7562  ;;  %3145 = vadd.xlane.f32.xlu0 %v3144_v36 }
 0x9a9   : > { %v3147_v44 = vsel %vm1464_vm10, %v9293_v31, 0.0 }
 0x9aa   : > { %3148 = vadd.xlane.f32.xlu2 %v3147_v44 }
 0x9ad   : > { %v3104_v16 = vpop.xlane.xlu2 %3103 }
 0x9ae   : > { %v3114_v57 = vsub.f32 %v3082_v1, %v3104_v16 }
 0x9b0   : > { %v3128_v43 = vmul.f32 1.442695, %v3114_v57 }
 0x9b2   : > { %7564 = vpow2.f32 %v3128_v43 }
 0x9b5   : > { %v3095_v45 = vpop.xlane.xlu2 %3094 }
 0x9b6   : > { %v3111_v4 = vsub.f32 %v3079_v38, %v3095_v45 }
 0x9b8   : > { %v9297_v40 = vpop.eup %7564  ;;  %v3122_v6 = vmul.f32 1.442695, %v3111_v4 }
 0x9b9   : > { %v3150_v3 = vsel %vm1464_vm10, %v9297_v40, 0.0 }
 0x9ba   : > { %7566 = vpow2.f32 %v3122_v6  ;;  %3151 = vadd.xlane.f32.xlu2 %v3150_v3 }
 0x9bc   : > { %3327 = vrot.lane.b32.xlu0 %v8937_v34, %s8075_s7 }
 0x9bd   : > { %v3202_v8 = vpop.permute.xlu2 %3201 }
 0x9be   : > { %v3207_v60 = vsel %vm1734_vm0, %v3202_v8, 0 }
 0x9bf   : > { %3216 = vmatpush.bf16.msra.mxu0 %v3207_v60 }
 0x9c0   : > { %v9304_v1 = vpop.eup %7566 }
 0x9c1   : > { %v3141_v38 = vsel %vm1464_vm10, %v9304_v1, 0.0 }
 0x9c2   : > { %3142 = vadd.xlane.f32.xlu1 %v3141_v38  ;;  %v3137_v13 = vpop.xlane.xlu1 %3136 }
 0x9c3   : > { %7568 = vrcp.f32 %v3137_v13 }
 0x9c4   : > { %3356 = vrot.lane.b32.xlu0 %v9083_v37, %s8076_s5 }
 0x9c9   : > { %v7569_v51 = vpop.eup %7568 }
 0x9ca   : > { %v3165_v17 = vmul.f32 %v7569_v51, %v7555_v53 }
 0x9cc   : > { %v3173_v21 = vpack.c.bf16 %v3165_v17, %v3165_v17  ;;  %3358 = vrot.lane.b32.xlu0 %v9071_v54, %s8076_s5 }
 0x9ce   : > { %7101 = vmatmul.msk.bf16.vlgmr.msra.gmra.mxu0 %vm1464_vm10, %v3173_v21 }
 0x9d2   : > { %3306 = vrot.lane.b32.xlu2 %v8988_v19, %s8075_s7 }
 0x9d3   : > { %v3140_v54 = vpop.xlane.xlu1 %3139 }
 0x9d4   : > { %3390 = vrot.lane.b32.xlu0 %v9221_v29, %s8077_s4 }
 0x9da   : > { %3388 = vrot.lane.b32.xlu2 %v9223_v5, %s8077_s4 }
 0x9db   : > { %3285 = vrot.lane.b32.xlu1 %v8994_v33, %s8075_s7  ;;  %v3134_v34 = vpop.xlane.xlu0 %3133 }
 0x9dc   : > { %7570 = vrcp.f32 %v3134_v34  ;;  %3360 = vrot.lane.b32.xlu0 %v9077_v22, %s8076_s5 }
 0x9dd   : > { %7572 = vrcp.f32 %v3140_v54 }
 0x9e2   : > { %v7571_v37 = vpop.eup %7570  ;;  %3362 = vrot.lane.b32.xlu2 %v9081_v11, %s8076_s5 }
 0x9e3   : > { %v3164_v19 = vmul.f32 %v7571_v37, %v7559_v59  ;;  %v7573_v5 = vpop.eup %7572 }
 0x9e4   : > { %3392 = vrot.lane.b32.xlu0 %v9238_v42, %s8077_s4  ;;  %v3166_v33 = vmul.f32 %v7573_v5, %v9278_v58  ;;  %v3115_v58 = vsub.f32 %v9265_v18, %v3107_v26 }
 0x9e5   : > { %v3172_v29 = vpack.c.bf16 %v3164_v19, %v3164_v19 }
 0x9e6   : > { %v3174_v11 = vpack.c.bf16 %v3166_v33, %v3166_v33  ;;  %v3130_v9 = vmul.f32 1.442695, %v3115_v58 }
 0x9e7   : > { %7100 = vmatmul.msk.bf16.vlgmr.msrb.gmra.mxu3 %vm1464_vm10, %v3172_v29 }
 0x9e8   : > { %7574 = vpow2.f32 %v3130_v9 }
 0x9ea   : > { %3394 = vrot.lane.b32.xlu2 %v9241_v15, %s8077_s4 }
 0x9eb   : > { %v3223_v22 = vpop.permute.xlu1 %3222 }
 0x9ec   : > { %v3228_v53 = vsel %vm1734_vm0, %v3223_v22, 0  ;;  %3366 = vrot.lane.b32.xlu0 %v9085_v10, %s8076_s5 }
 0x9ed   : > { %3237 = vmatpush.bf16.msra.mxu1 %v3228_v53 }
 0x9ee   : > { %v3244_v63 = vpop.permute.xlu0 %3243  ;;  %v7575_v10 = vpop.eup %7574 }
 0x9ef   : > { %v3249_v42 = vsel %vm1734_vm0, %v3244_v63, 0  ;;  %v3153_v41 = vsel %vm1464_vm10, %v7575_v10, 0.0 }
 0x9f0   : > { %7102 = vmatmul.msk.bf16.vlgmr.msra.gmra.mxu1 %vm1464_vm10, %v3174_v11  ;;  %3258 = vmatpush.bf16.msra.mxu2 %v3249_v42 }
 0x9f2   : > { %3364 = vrot.lane.b32.xlu2 %v9087_v20, %s8076_s5 }
 0x9f3   : > { %v3265_v15 = vpop.permute.xlu1 %3264 }
 0x9f4   : > { %v3270_v59 = vsel %vm1734_vm0, %v3265_v15, 0 }
 0x9f5   : > { %3279 = vmatpush.bf16.msra.mxu3 %v3270_v59 }
 0x9fa   : > { %3398 = vrot.lane.b32.xlu2 %v9232_v46, %s8077_s4 }
 0xa05   : > { %3154 = vadd.xlane.f32.xlu1 %v3153_v41 }
 0xa1b   : > { %v3146_v48 = vpop.xlane.xlu0 %3145 }
 0xa1c   : > { %7576 = vrcp.f32 %v3146_v48 }
 0xa1d   : > { %v3149_v0 = vpop.xlane.xlu2 %3148 }
 0xa1e   : > { %3396 = vrot.lane.b32.xlu1 %v9228_v30, %s8077_s4 }
 0xa22   : > { %v7577_v20 = vpop.eup %7576 }
 0xa23   : > { %v3168_v18 = vmul.f32 %v7577_v20, %v9289_v47 }
 0xa25   : > { %v3176_v7 = vpack.c.bf16 %v3168_v18, %v3168_v18 }
 0xa26   : > { %3368 = vrot.lane.b32.xlu1 %v9103_v23, %s8076_s5 }
 0xa27   : > { %7104 = vmatmul.msk.bf16.vlgmr.msra.gmra.mxu3 %vm1464_vm10, %v3176_v7 }
 0xa2d   : > { %v3152_v46 = vpop.xlane.xlu2 %3151 }
 0xa2e   : > { %7578 = vrcp.f32 %v3152_v46  ;;  %v3328_v14 = vpop.permute.xlu0 %3327 }
 0xa2f   : > { %v3333_v35 = vsel %vm1734_vm0, %v3328_v14, 0 }
 0xa30   : > { %3342 = vmatpush.bf16.msrb.mxu2 %v3333_v35 }
 0xa34   : > { %v7579_v36 = vpop.eup %7578 }
 0xa35   : > { %v3170_v44 = vmul.f32 %v7579_v36, %v9297_v40  ;;  %v3307_v30 = vpop.permute.xlu2 %3306  ;;  %v3143_v16 = vpop.xlane.xlu1 %3142 }
 0xa36   : > { %v3312_v47 = vsel %vm1734_vm0, %v3307_v30, 0  ;;  %7580 = vrcp.f32 %v3143_v16  ;;  %v3357_v33 = vpop.permute.xlu0 %3356 }
 0xa37   : > { %v3178_v57 = vpack.c.bf16 %v3170_v44, %v3170_v44  ;;  %3321 = vmatpush.bf16.msrb.mxu1 %v3312_v47  ;;  %7582 = vrcp.f32 %v3149_v0 }
 0xa3a   : > { %7106 = vmatmul.msk.bf16.vlgmr.msrb.gmra.mxu1 %vm1464_vm10, %v3178_v57 }
 0xa3c   : > { %v7581_v23 = vpop.eup %7580 }
 0xa3d   : > { %v3167_v43 = vmul.f32 %v7581_v23, %v9304_v1  ;;  %v7583_v4 = vpop.eup %7582  ;;  %v3389_v54 = vpop.permute.xlu2 %3388 }
 0xa3e   : > { %v3169_v40 = vmul.f32 %v7583_v4, %v9293_v31  ;;  %v3359_v11 = vpop.permute.xlu0 %3358  ;;  %v3444_v4 = vsel %vm1464_vm10, %v8894_v12, %v3357_v33 }
 0xa3f   : > { %v3175_v45 = vpack.c.bf16 %v3167_v43, %v3167_v43  ;;  %v3445_v9 = vsel %vm1464_vm10, %v8868_v39, %v3359_v11 }
 0xa40   : > { %v3177_v8 = vpack.c.bf16 %v3169_v40, %v3169_v40 }
 0xa41   : > { %7103 = vmatmul.msk.bf16.vlgmr.msra.gmra.mxu2 %vm1464_vm10, %v3175_v45 }
 0xa45   : > { %v9361_v37 = vpop.permute.xlu2 %3362 }
 0xa46   : > { %v3391_v15 = vpop.permute.xlu0 %3390 }
 0xa4b   : > { %v3218_v6 = vpop.f32.mrf.mxu0 }
 0xa4c   : > { %3422 = vrot.lane.b32.xlu2 %v3218_v6, %s8078_s8  ;;  %v3453_v6 = vsel %vm3452_vm3, %v3444_v4, %v3389_v54  ;;  %v10987_v54 = vld [vmem:[#allocation25_spill] sm:$0xff] }
 0xa4d   : > { %v3286_v3 = vpop.permute.xlu1 %3285  ;;  %v3395_v29 = vpop.permute.xlu2 %3394 }
 0xa4e   : > { %v3291_v26 = vsel %vm1734_vm0, %v3286_v3, 0 }
 0xa4f   : > { %3300 = vmatpush.bf16.msrb.mxu0 %v3291_v26 }
 0xa52   : > { %7105 = vmatmul.msk.bf16.vlgmr.msrb.gmra.mxu0 %vm1464_vm10, %v3177_v8 }
 0xa53   : > { %v3220_v60 = vpop.f32.mrf.mxu0 }
 0xa54   : > { %v3447_v60 = vsel %vm1464_vm10, %v8900_v52, %v9361_v37  ;;  %v10986_v52 = vld [vmem:[#allocation23_spill] sm:$0xff] }
 0xa55   : > { %v3365_v53 = vpop.permute.xlu2 %3364  ;;  %v3456_v12 = vsel %vm3452_vm3, %v3447_v60, %v3395_v29 }
 0xa5d   : > { %v3399_v42 = vpop.permute.xlu2 %3398 }
 0xa6a   : > { %v3197_v1 = vpop.f32.mrf.mxu3 }
 0xa6d   : > { %v3239_v38 = vpop.f32.mrf.mxu1 }
 0xa6e   : > { %3424 = vrot.lane.b32.xlu0 %v3239_v38, %s8078_s8 }
 0xa72   : > { %v3199_v13 = vpop.f32.mrf.mxu3 }
 0xa75   : > { %v3241_v51 = vpop.f32.mrf.mxu1 }
 0xa78   : > { %v3155_v17 = vpop.xlane.xlu1 %3154 }
 0xa79   : > { %7584 = vrcp.f32 %v3155_v17 }
 0xa7f   : > { %v7585_v31 = vpop.eup %7584 }
 0xa80   : > { %v3171_v21 = vmul.f32 %v7585_v31, %v7575_v10  ;;  %v3454_v10 = vsel %vm3452_vm3, %v3445_v9, %v3391_v15 }
 0xa82   : > { %v3179_v34 = vpack.c.bf16 %v3171_v21, %v3171_v21 }
 0xa84   : > { %7107 = vmatmul.msk.bf16.vlgmr.msrb.gmra.mxu2 %vm1464_vm10, %v3179_v34 }
 0xa90   : > { %v3397_v16 = vpop.permute.xlu1 %3396 }
 0xa98   : > { %v3369_v47 = vpop.permute.xlu1 %3368 }
 0xaa6   : > { %v3423_v59 = vpop.permute.xlu2 %3422 }
 0xaa7   : > { %v3463_v48 = vsel %vm3461_vm2, %v3454_v10, %v3423_v59 }
 0xaa8   : > { %v9369_v18 = vadd.f32 %v3463_v48, %v8391_v62  ;;  %v3361_v62 = vpop.permute.xlu0 %3360 }
 0xaa9   : > { %v3446_v44 = vsel %vm1464_vm10, %v8876_v56, %v3361_v62 }
 0xaaa   : > { %v3281_v19 = vpop.f32.mrf.mxu3  ;;  %v3483_v7 = vsel %vm1059_vm4, %v9369_v18, 0.0 }
 0xaab   : > { %3428 = vrot.lane.b32.xlu0 %v3281_v19, %s8078_s8 }
 0xab0   : > { %v3393_v46 = vpop.permute.xlu0 %3392 }
 0xab2   : > { %v3283_v5 = vpop.f32.mrf.mxu3 }
 0xab7   : > { %v3323_v22 = vpop.f32.mrf.mxu1 }
 0xab8   : > { %v3367_v35 = vpop.permute.xlu0 %3366 }
 0xab9   : > { %v3449_v57 = vsel %vm1464_vm10, %v8896_v28, %v3367_v35 }
 0xaba   : > { %v3458_v43 = vsel %vm3452_vm3, %v3449_v57, %v3399_v42 }
 0xabf   : > { %v3325_v63 = vpop.f32.mrf.mxu1 }
 0xac4   : > { %v3260_v58 = vpop.f32.mrf.mxu2 }
 0xacc   : > { %v3262_v41 = vpop.f32.mrf.mxu2 }
 0xacf   : > { %v3302_v20 = vpop.f32.mrf.mxu0 }
 0xad0   : > { %3430 = vrot.lane.b32.xlu1 %v3302_v20, %s8078_s8 }
 0xad5   : > { %3484 = vadd.xlane.f32.xlu0 %v3483_v7 }
 0xad7   : > { %v3304_v0 = vpop.f32.mrf.mxu0 }
 0xad8   : > { %3420 = vrot.lane.b32.xlu1 %v3197_v1, %s8078_s8 }
 0xae0   : > { %3370 = vrot.lane.b32.xlu1 %v9101_v27, %s8076_s5  ;;  %v3425_v36 = vpop.permute.xlu0 %3424  ;;  %v3455_v27 = vsel %vm3452_vm3, %v3446_v44, %v3393_v46  ;;  %v10990_v46 = vld [vmem:[#allocation29_spill] sm:$0xff] }
 0xae1   : > { %v3464_v30 = vsel %vm3461_vm2, %v3455_v27, %v3425_v36 }
 0xae8   : > { %3426 = vrot.lane.b32.xlu1 %v3260_v58, %s8078_s8  ;;  %v10989_v58 = vld [vmem:[#allocation26_spill] sm:$0xff] }
 0xaf0   : > { %3400 = vrot.lane.b32.xlu1 %v9244_v25, %s8077_s4  ;;  %v9388_v25 = vadd.f32 %v3464_v30, %v8376_v49 }
 0xaf8   : > { %3402 = vrot.lane.b32.xlu1 %v9255_v24, %s8077_s4  ;;  %v3486_v24 = vsel %vm1059_vm4, %v9388_v25, 0.0 }
 0xb00   : > { %3432 = vrot.lane.b32.xlu1 %v3323_v22, %s8078_s8  ;;  %v10988_v22 = vld [vmem:[#allocation28_spill] sm:$0xff] }
 0xb07   : > { %v3344_v39 = vpop.f32.mrf.mxu2 }
 0xb0f   : > { %v3346_v14 = vpop.f32.mrf.mxu2 }
 0xb1d   : > { %v3429_v8 = vpop.permute.xlu0 %3428 }
 0xb2a   : > { %3487 = vadd.xlane.f32.xlu1 %v3486_v24  ;;  %v10991_v24 = vld [vmem:[#allocation24_spill] sm:$0xff] }
 0xb42   : > { %v3431_v23 = vpop.permute.xlu1 %3430 }
 0xb43   : > { %v3467_v56 = vsel %vm3461_vm2, %v3458_v43, %v3431_v23 }
 0xb44   : > { %v9397_v45 = vadd.f32 %v3467_v56, %v8439_v55 }
 0xb46   : > { %v3495_v49 = vsel %vm1059_vm4, %v9397_v45, 0.0 }
 0xb47   : > { %3496 = vadd.xlane.f32.xlu0 %v3495_v49 }
 0xb48   : > { %v3485_v21 = vpop.xlane.xlu0 %3484 }
 0xb49   : > { %v3505_v37 = vmul.f32 %v3485_v21, %v10987_v54 }
 0xb4a   : > { %v3421_v40 = vpop.permute.xlu1 %3420 }
 0xb4b   : > { %v3462_v28 = vsel %vm3461_vm2, %v3453_v6, %v3421_v40 }
 0xb4c   : > { %v9406_v3 = vadd.f32 %v3462_v28, %v8378_v50  ;;  %v3448_v50 = vsel %vm1464_vm10, %v8902_v32, %v3365_v53  ;;  %v3450_v53 = vsel %vm1464_vm10, %v10988_v22, %v3369_v47 }
 0xb4d   : > { %v3457_v51 = vsel %vm3452_vm3, %v3448_v50, %v3397_v16 }
 0xb4e   : > { %v3480_v26 = vsel %vm1059_vm4, %v9406_v3, 0.0  ;;  %v3466_v31 = vsel %vm3461_vm2, %v3457_v51, %v3429_v8 }
 0xb4f   : > { %3481 = vadd.xlane.f32.xlu2 %v3480_v26  ;;  %v9425_v34 = vadd.f32 %v3466_v31, %v10986_v52  ;;  %v7282_v52 = vld [vmem:[#allocation14 + $0x8] sm:$0xff] }
 0xb51   : > { %v3492_v32 = vsel %vm1059_vm4, %v9425_v34, 0.0 }
 0xb52   : > { %v3371_v55 = vpop.permute.xlu1 %3370 }
 0xb53   : > { %v3451_v14 = vsel %vm1464_vm10, %v10990_v46, %v3371_v55 }
 0xb5a   : > { %v3427_v1 = vpop.permute.xlu1 %3426 }
 0xb5b   : > { %v3465_v38 = vsel %vm3461_vm2, %v3456_v12, %v3427_v1 }
 0xb5c   : > { %v9416_v13 = vadd.f32 %v3465_v38, %v8389_v61  ;;  %v9429_v61 = vsub.f32 %v9369_v18, %v3505_v37  ;;  %v7284_v37 = vld [vmem:[#allocation15 + $0x8] sm:$0xff] }
 0xb5e   : > { %v3489_v17 = vsel %vm1059_vm4, %v9416_v13, 0.0  ;;  %v3521_v5 = vmul.f32 %v9429_v61, %v9429_v61 }
 0xb5f   : > { %3490 = vadd.xlane.f32.xlu0 %v3489_v17 }
 0xb60   : > { %v3531_v33 = vsel %vm1059_vm4, %v3521_v5, 0.0  ;;  %v7281_v5 = vld [vmem:[#allocation14] sm:$0xff] }
 0xb62   : > { %v3401_v19 = vpop.permute.xlu1 %3400 }
 0xb63   : > { %v3459_v11 = vsel %vm3452_vm3, %v3450_v53, %v3401_v19  ;;  %v3713_v53 = vsel %vm1059_vm4, %v7281_v5, 0 }
 0xb67   : > { %3434 = vrot.lane.b32.xlu2 %v3344_v39, %s8078_s8  ;;  %3493 = vadd.xlane.f32.xlu0 %v3492_v32  ;;  %v3716_v32 = vsel %vm1059_vm4, %v7282_v52, 0 }
 0xb68   : > { %3724 = vmatpush.bf16.xpose.msrb.mxu3 %v3716_v32 }
 0xb6a   : > { %v3403_v29 = vpop.permute.xlu1 %3402 }
 0xb6b   : > { %v3460_v36 = vsel %vm3452_vm3, %v3451_v14, %v3403_v29  ;;  %v3777_v29 = vsel %vm1059_vm4, %v7284_v37, 0 }
 0xb6c   : > { %3785 = vmatpush.bf16.xpose.msra.mxu0 %v3777_v29 }
 0xb6f   : > { %3532 = vadd.xlane.f32.xlu0 %v3531_v33  ;;  %v7283_v33 = vld [vmem:[#allocation15] sm:$0xff] }
 0xb70   : > { %3725 = vmatpush.bf16.xpose.msrb.mxu3 %v3713_v53 }
 0xb72   : > { %v3433_v63 = vpop.permute.xlu1 %3432 }
 0xb73   : > { %v3468_v42 = vsel %vm3461_vm2, %v3459_v11, %v3433_v63  ;;  %v3774_v11 = vsel %vm1059_vm4, %v7283_v33, 0 }
 0xb74   : > { %v9442_v15 = vadd.f32 %v3468_v42, %v10989_v58  ;;  %3786 = vmatpush.bf16.xpose.msra.mxu0 %v3774_v11 }
 0xb76   : > { %v3498_v59 = vsel %vm1059_vm4, %v9442_v15, 0.0 }
 0xb77   : > { %3499 = vadd.xlane.f32.xlu0 %v3498_v59 }
 0xb9d   : > { %v3488_v9 = vpop.xlane.xlu1 %3487 }
 0xb9e   : > { %v3506_v10 = vmul.f32 %v3488_v9, %v10987_v54 }
 0xba0   : > { %v9448_v41 = vsub.f32 %v9388_v25, %v3506_v10 }
 0xba2   : > { %v3522_v48 = vmul.f32 %v9448_v41, %v9448_v41 }
 0xba4   : > { %v3534_v20 = vsel %vm1059_vm4, %v3522_v48, 0.0 }
 0xba5   : > { %3535 = vadd.xlane.f32.xlu1 %v3534_v20 }
 0xbba   : > { %v3497_v44 = vpop.xlane.xlu0 %3496 }
 0xbbb   : > { %v3509_v43 = vmul.f32 %v3497_v44, %v10987_v54 }
 0xbbd   : > { %v9477_v4 = vsub.f32 %v9397_v45, %v3509_v43 }
 0xbbf   : > { %v3525_v55 = vmul.f32 %v9477_v4, %v9477_v4 }
 0xbc1   : > { %v3543_v60 = vsel %vm1059_vm4, %v3525_v55, 0.0  ;;  %v9515_v55 = vld [vmem:[%s10923_s15] ss:$0 sm:$0xff] }
 0xbc2   : > { %v3482_v7 = vpop.xlane.xlu2 %3481 }
 0xbc3   : > { %v3504_v0 = vmul.f32 %v3482_v7, %v10987_v54 }
 0xbc5   : > { %v9455_v62 = vsub.f32 %v9406_v3, %v3504_v0 }
 0xbc7   : > { %v3520_v39 = vmul.f32 %v9455_v62, %v9455_v62 }
 0xbc9   : > { %v3528_v35 = vsel %vm1059_vm4, %v3520_v39, 0.0 }
 0xbca   : > { %3529 = vadd.xlane.f32.xlu2 %v3528_v35  ;;  %v3435_v27 = vpop.permute.xlu2 %3434 }
 0xbcb   : > { %v3469_v30 = vsel %vm3461_vm2, %v3460_v36, %v3435_v27 }
 0xbcc   : > { %v9465_v16 = vadd.f32 %v3469_v30, %v10991_v24 }
 0xbce   : > { %v3501_v47 = vsel %vm1059_vm4, %v9465_v16, 0.0 }
 0xbcf   : > { %3502 = vadd.xlane.f32.xlu0 %v3501_v47 }
 0xbd2   : > { %v3491_v57 = vpop.xlane.xlu0 %3490 }
 0xbd3   : > { %v3507_v23 = vmul.f32 %v3491_v57, %v10987_v54 }
 0xbd5   : > { %v9472_v56 = vsub.f32 %v9416_v13, %v3507_v23 }
 0xbd7   : > { %v3523_v49 = vmul.f32 %v9472_v56, %v9472_v56 }
 0xbd9   : > { %v3537_v6 = vsel %vm1059_vm4, %v3523_v49, 0.0 }
 0xbda   : > { %3538 = vadd.xlane.f32.xlu0 %v3537_v6  ;;  %v3494_v40 = vpop.xlane.xlu0 %3493 }
 0xbdb   : > { %v3508_v28 = vmul.f32 %v3494_v40, %v10987_v54 }
 0xbdd   : > { %v9482_v26 = vsub.f32 %v9425_v34, %v3508_v28 }
 0xbdf   : > { %v3524_v8 = vmul.f32 %v9482_v26, %v9482_v26 }
 0xbe1   : > { %v3540_v12 = vsel %vm1059_vm4, %v3524_v8, 0.0 }
 0xbe2   : > { %3544 = vadd.xlane.f32.xlu0 %v3543_v60  ;;  %3541 = vadd.xlane.f32.xlu1 %v3540_v12  ;;  %v3533_v1 = vpop.xlane.xlu0 %3532 }
 0xbe3   : > { %v3553_v21 = vmul.f32 %v3533_v1, %v10987_v54 }
 0xbe5   : > { %v3561_v19 = vadd.f32 1e-05, %v3553_v21 }
 0xbe7   : > { %7586 = vrsqrt.f32 %v3561_v19  ;;  %vm3584_vm6 = vweird.f32 %v3561_v19 }
 0xbea   : > { %v3500_v38 = vpop.xlane.xlu0 %3499 }
 0xbeb   : > { %v3510_v50 = vmul.f32 %v3500_v38, %v10987_v54 }
 0xbed   : > { %v9492_v51 = vsub.f32 %v9442_v15, %v3510_v50  ;;  %v7587_v63 = vpop.eup %7586  ;;  %v9521_v50 = vld [vmem:[%s10924_s16] ss:$0 sm:$0xff] }
 0xbee   : > { %v3579_v58 = vmul.f32 %v7587_v63, %v3561_v19  ;;  %vm3585_vm5 = vweird.f32 %v7587_v63 }
 0xbef   : > { %v3526_v17 = vmul.f32 %v9492_v51, %v9492_v51  ;;  %vm3586_vm7 = vmor %vm3584_vm6, %vm3585_vm5 }
 0xbf0   : > { %v3580_v9 = vmul.f32 %v7587_v63, %v3579_v58 }
 0xbf1   : > { %v3546_v31 = vsel %vm1059_vm4, %v3526_v17, 0.0 }
 0xbf2   : > { %3547 = vadd.xlane.f32.xlu1 %v3546_v31  ;;  %v3581_v7 = vmul.f32 0.5, %v3580_v9 }
 0xbf4   : > { %v3582_v46 = vsub.f32 1.5, %v3581_v7 }
 0xbf6   : > { %v3583_v27 = vmul.f32 %v7587_v63, %v3582_v46 }
 0xbf8   : > { %v3587_v23 = vsel %vm3586_vm7, %v7587_v63, %v3583_v27 }
 0xbf9   : > { %v3649_v8 = vmul.f32 %v3587_v23, %v9429_v61 }
 0xbfb   : > { %v3660_v17 = vmul.f32 %v9515_v55, %v3649_v8 }
 0xbfd   : > { %v3671_v5 = vadd.f32 %v9521_v50, %v3660_v17 }
 0xc18   : > { %v3536_v22 = vpop.xlane.xlu1 %3535 }
 0xc19   : > { %v3554_v42 = vmul.f32 %v3536_v22, %v10987_v54 }
 0xc1b   : > { %v3562_v59 = vadd.f32 1e-05, %v3554_v42 }
 0xc1d   : > { %7588 = vrsqrt.f32 %v3562_v59  ;;  %vm3594_vm13 = vweird.f32 %v3562_v59 }
 0xc23   : > { %v7589_v35 = vpop.eup %7588 }
 0xc24   : > { %v3589_v30 = vmul.f32 %v7589_v35, %v3562_v59  ;;  %vm3595_vm12 = vweird.f32 %v7589_v35 }
 0xc25   : > { %vm3596_vm14 = vmor %vm3594_vm13, %vm3595_vm12 }
 0xc26   : > { %v3590_v43 = vmul.f32 %v7589_v35, %v3589_v30 }
 0xc28   : > { %v3591_v12 = vmul.f32 0.5, %v3590_v43 }
 0xc2a   : > { %v3592_v21 = vsub.f32 1.5, %v3591_v12 }
 0xc2c   : > { %v3593_v11 = vmul.f32 %v7589_v35, %v3592_v21 }
 0xc2e   : > { %v3597_v58 = vsel %vm3596_vm14, %v7589_v35, %v3593_v11 }
 0xc3d   : > { %v3530_v10 = vpop.xlane.xlu2 %3529 }
 0xc3e   : > { %v3552_v48 = vmul.f32 %v3530_v10, %v10987_v54 }
 0xc40   : > { %v3560_v20 = vadd.f32 1e-05, %v3552_v48 }
 0xc42   : > { %7590 = vrsqrt.f32 %v3560_v20  ;;  %v3503_v0 = vpop.xlane.xlu0 %3502  ;;  %vm3574_vm9 = vweird.f32 %v3560_v20 }
 0xc43   : > { %v3511_v39 = vmul.f32 %v3503_v0, %v10987_v54 }
 0xc45   : > { %v9506_v14 = vsub.f32 %v9465_v16, %v3511_v39 }
 0xc47   : > { %v3527_v36 = vmul.f32 %v9506_v14, %v9506_v14 }
 0xc48   : > { %v7591_v44 = vpop.eup %7590 }
 0xc49   : > { %v3569_v24 = vmul.f32 %v7591_v44, %v3560_v20  ;;  %v3549_v47 = vsel %vm1059_vm4, %v3527_v36, 0.0  ;;  %vm3575_vm8 = vweird.f32 %v7591_v44  ;;  %v3650_v20 = vmul.f32 %v3597_v58, %v9448_v41 }
 0xc4a   : > { %3550 = vadd.xlane.f32.xlu2 %v3549_v47  ;;  %vm3576_vm11 = vmor %vm3574_vm9, %vm3575_vm8 }
 0xc4b   : > { %v3570_v57 = vmul.f32 %v7591_v44, %v3569_v24  ;;  %v3661_v30 = vmul.f32 %v9515_v55, %v3650_v20 }
 0xc4d   : > { %v3571_v49 = vmul.f32 0.5, %v3570_v57  ;;  %v3539_v6 = vpop.xlane.xlu0 %3538  ;;  %v3672_v23 = vadd.f32 %v9521_v50, %v3661_v30 }
 0xc4e   : > { %v3555_v40 = vmul.f32 %v3539_v6, %v10987_v54 }
 0xc4f   : > { %v3572_v28 = vsub.f32 1.5, %v3571_v49 }
 0xc50   : > { %v3563_v60 = vadd.f32 1e-05, %v3555_v40 }
 0xc51   : > { %v3573_v1 = vmul.f32 %v7591_v44, %v3572_v28 }
 0xc52   : > { %7592 = vrsqrt.f32 %v3563_v60  ;;  %vm3604_vm5 = vweird.f32 %v3563_v60 }
 0xc53   : > { %v3577_v38 = vsel %vm3576_vm11, %v7591_v44, %v3573_v1 }
 0xc54   : > { %v3648_v31 = vmul.f32 %v3577_v38, %v9455_v62 }
 0xc55   : > { %v3542_v52 = vpop.xlane.xlu1 %3541  ;;  %v3545_v37 = vpop.xlane.xlu0 %3544 }
 0xc56   : > { %v3659_v61 = vmul.f32 %v9515_v55, %v3648_v31  ;;  %v3556_v19 = vmul.f32 %v3542_v52, %v10987_v54  ;;  %v3557_v32 = vmul.f32 %v3545_v37, %v10987_v54 }
 0xc58   : > { %v7593_v29 = vpop.eup %7592  ;;  %v3670_v33 = vadd.f32 %v9521_v50, %v3659_v61  ;;  %v3564_v22 = vadd.f32 1e-05, %v3556_v19  ;;  %v3565_v53 = vadd.f32 1e-05, %v3557_v32 }
 0xc59   : > { %v3599_v63 = vmul.f32 %v7593_v29, %v3563_v60  ;;  %vm3605_vm15 = vweird.f32 %v7593_v29 }
 0xc5a   : > { %v3683_v62 = vpack.c.bf16 %v3671_v5, %v3670_v33  ;;  %7594 = vrsqrt.f32 %v3564_v22  ;;  %vm3606_vm6 = vmor %vm3604_vm5, %vm3605_vm15  ;;  %vm3614_vm9 = vweird.f32 %v3564_v22  ;;  %vm3624_vm12 = vweird.f32 %v3565_v53 }
 0xc5b   : > { %v3600_v42 = vmul.f32 %v7593_v29, %v3599_v63  ;;  %7596 = vrsqrt.f32 %v3565_v53 }
 0xc5c   : > { %7116 = vmatmul.msk.bf16.vlgmr.msrb.gmra.mxu3 %vm1059_vm4, %v3683_v62  ;;  %7128 = vmatmul.msk.bf16.vlgmr.msra.gmra.mxu0 %vm1059_vm4, %v3683_v62 }
 0xc5d   : > { %v3601_v9 = vmul.f32 0.5, %v3600_v42 }
 0xc5f   : > { %v3602_v10 = vsub.f32 1.5, %v3601_v9 }
 0xc60   : > { %v7595_v48 = vpop.eup %7594 }
 0xc61   : > { %v7597_v7 = vpop.eup %7596  ;;  %v3603_v0 = vmul.f32 %v7593_v29, %v3602_v10  ;;  %v3609_v39 = vmul.f32 %v7595_v48, %v3564_v22  ;;  %vm3615_vm7 = vweird.f32 %v7595_v48 }
 0xc62   : > { %v3619_v59 = vmul.f32 %v7597_v7, %v3565_v53  ;;  %vm3625_vm8 = vweird.f32 %v7597_v7  ;;  %vm3616_vm11 = vmor %vm3614_vm9, %vm3615_vm7 }
 0xc63   : > { %v3607_v46 = vsel %vm3606_vm6, %v7593_v29, %v3603_v0  ;;  %v3610_v36 = vmul.f32 %v7595_v48, %v3609_v39  ;;  %vm3626_vm13 = vmor %vm3624_vm12, %vm3625_vm8 }
 0xc64   : > { %v3651_v44 = vmul.f32 %v3607_v46, %v9472_v56  ;;  %v3620_v27 = vmul.f32 %v7597_v7, %v3619_v59 }
 0xc65   : > { %v3611_v35 = vmul.f32 0.5, %v3610_v36  ;;  %v3548_v21 = vpop.xlane.xlu1 %3547 }
 0xc66   : > { %v3621_v24 = vmul.f32 0.5, %v3620_v27  ;;  %v3662_v47 = vmul.f32 %v9515_v55, %v3651_v44  ;;  %v3558_v52 = vmul.f32 %v3548_v21, %v10987_v54 }
 0xc67   : > { %v3612_v57 = vsub.f32 1.5, %v3611_v35 }
 0xc68   : > { %v3622_v41 = vsub.f32 1.5, %v3621_v24  ;;  %v3673_v43 = vadd.f32 %v9521_v50, %v3662_v47  ;;  %v3566_v37 = vadd.f32 1e-05, %v3558_v52 }
 0xc69   : > { %v3613_v49 = vmul.f32 %v7595_v48, %v3612_v57 }
 0xc6a   : > { %v3623_v6 = vmul.f32 %v7597_v7, %v3622_v41  ;;  %v3684_v56 = vpack.c.bf16 %v3673_v43, %v3672_v23  ;;  %7598 = vrsqrt.f32 %v3566_v37  ;;  %vm3634_vm15 = vweird.f32 %v3566_v37 }
 0xc6b   : > { %v3617_v40 = vsel %vm3616_vm11, %v7595_v48, %v3613_v49 }
 0xc6c   : > { %v3627_v28 = vsel %vm3626_vm13, %v7597_v7, %v3623_v6  ;;  %7117 = vmatmul.msk.bf16.gmra.mxu3 %vm1059_vm4, %v3684_v56  ;;  %7129 = vmatmul.msk.bf16.gmra.mxu0 %vm1059_vm4, %v3684_v56  ;;  %v3652_v8 = vmul.f32 %v3617_v40, %v9482_v26 }
 0xc6d   : > { %v3653_v60 = vmul.f32 %v3627_v28, %v9477_v4 }
 0xc6e   : > { %v3663_v12 = vmul.f32 %v9515_v55, %v3652_v8 }
 0xc6f   : > { %v3664_v1 = vmul.f32 %v9515_v55, %v3653_v60 }
 0xc70   : > { %v3674_v38 = vadd.f32 %v9521_v50, %v3663_v12  ;;  %v7599_v26 = vpop.eup %7598 }
 0xc71   : > { %v3675_v17 = vadd.f32 %v9521_v50, %v3664_v1  ;;  %v3629_v4 = vmul.f32 %v7599_v26, %v3566_v37  ;;  %vm3635_vm14 = vweird.f32 %v7599_v26 }
 0xc72   : > { %vm3636_vm5 = vmor %vm3634_vm15, %vm3635_vm14 }
 0xc73   : > { %v3685_v31 = vpack.c.bf16 %v3675_v17, %v3674_v38  ;;  %v3630_v61 = vmul.f32 %v7599_v26, %v3629_v4 }
 0xc75   : > { %v3631_v5 = vmul.f32 0.5, %v3630_v61 }
 0xc77   : > { %v3632_v33 = vsub.f32 1.5, %v3631_v5 }
 0xc79   : > { %v3633_v53 = vmul.f32 %v7599_v26, %v3632_v33 }
 0xc7b   : > { %v3637_v62 = vsel %vm3636_vm5, %v7599_v26, %v3633_v53 }
 0xc7c   : > { %7118 = vmatmul.msk.bf16.gmra.mxu3 %vm1059_vm4, %v3685_v31  ;;  %7130 = vmatmul.msk.bf16.gmra.mxu0 %vm1059_vm4, %v3685_v31  ;;  %v3654_v9 = vmul.f32 %v3637_v62, %v9492_v51  ;;  %v9561_v51 = vld [vmem:[%s10926_s18] ss:$0 sm:$0xff] }
 0xc7e   : > { %v3665_v7 = vmul.f32 %v9515_v55, %v3654_v9 }
 0xc80   : > { %v3676_v39 = vadd.f32 %v9521_v50, %v3665_v7 }
 0xcbd   : > { %v3551_v19 = vpop.xlane.xlu2 %3550 }
 0xcbe   : > { %v3559_v32 = vmul.f32 %v3551_v19, %v10987_v54 }
 0xcc0   : > { %v3567_v29 = vadd.f32 1e-05, %v3559_v32 }
 0xcc2   : > { %7600 = vrsqrt.f32 %v3567_v29  ;;  %vm3644_vm7 = vweird.f32 %v3567_v29 }
 0xcc8   : > { %v7601_v22 = vpop.eup %7600 }
 0xcc9   : > { %v3639_v11 = vmul.f32 %v7601_v22, %v3567_v29  ;;  %vm3645_vm6 = vweird.f32 %v7601_v22 }
 0xcca   : > { %vm3646_vm8 = vmor %vm3644_vm7, %vm3645_vm6 }
 0xccb   : > { %v3640_v63 = vmul.f32 %v7601_v22, %v3639_v11 }
 0xccd   : > { %v3641_v42 = vmul.f32 0.5, %v3640_v63 }
 0xccf   : > { %v3642_v58 = vsub.f32 1.5, %v3641_v42 }
 0xcd1   : > { %v3643_v10 = vmul.f32 %v7601_v22, %v3642_v58 }
 0xcd3   : > { %v3647_v48 = vsel %vm3646_vm8, %v7601_v22, %v3643_v10 }
 0xcd4   : > { %v3655_v20 = vmul.f32 %v3647_v48, %v9506_v14 }
 0xcd6   : > { %v3666_v0 = vmul.f32 %v9515_v55, %v3655_v20  ;;  %v9567_v55 = vld [vmem:[%s10928_s20] ss:$0 sm:$0xff] }
 0xcd8   : > { %v3677_v59 = vadd.f32 %v9521_v50, %v3666_v0 }
 0xcd9   : > { %v3788_v46 = vpop.f32.mrf.mxu0 }
 0xcda   : > { %v3686_v36 = vpack.c.bf16 %v3677_v59, %v3676_v39  ;;  %v3789_v27 = vadd.f32 %v9567_v55, %v3788_v46 }
 0xcdc   : > { %7119 = vmatmul.msk.bf16.gmra.mxu3 %vm1059_vm4, %v3686_v36  ;;  %7131 = vmatmul.msk.bf16.gmra.mxu0 %vm1059_vm4, %v3686_v36 }
 0xcdf   : > { %v3727_v14 = vpop.f32.mrf.mxu3 }
 0xce0   : > { %v3728_v44 = vadd.f32 %v9561_v51, %v3727_v14 }
 0xce1   : > { %v3790_v50 = vpop.f32.mrf.mxu0 }
 0xce2   : > { %7602 = vtanh.f32 %v3728_v44  ;;  %v3791_v43 = vadd.f32 %v9567_v55, %v3790_v50 }
 0xce7   : > { %v3729_v30 = vpop.f32.mrf.mxu3 }
 0xce8   : > { %v7603_v35 = vpop.eup %7602  ;;  %v3730_v24 = vadd.f32 %v9561_v51, %v3729_v30 }
 0xce9   : > { %v3808_v47 = vmul.f32 %v7603_v35, %v3789_v27  ;;  %v3793_v23 = vpop.f32.mrf.mxu0 }
 0xcea   : > { %7604 = vtanh.f32 %v3730_v24  ;;  %v3794_v8 = vadd.f32 %v9567_v55, %v3793_v23 }
 0xceb   : > { %v9572_v57 = vadd.f32 %v3808_v47, %v9406_v3 }
 0xced   : > { %v3828_v41 = vsel %vm1059_vm4, %v9572_v57, 0.0 }
 0xcee   : > { %3829 = vadd.xlane.f32.xlu0 %v3828_v41 }
 0xcef   : > { %v3732_v49 = vpop.f32.mrf.mxu3 }
 0xcf0   : > { %v7605_v6 = vpop.eup %7604  ;;  %v3733_v56 = vadd.f32 %v9561_v51, %v3732_v49 }
 0xcf1   : > { %v3809_v40 = vmul.f32 %v7605_v6, %v3791_v43  ;;  %v3795_v1 = vpop.f32.mrf.mxu0 }
 0xcf2   : > { %7606 = vtanh.f32 %v3733_v56  ;;  %v3796_v21 = vadd.f32 %v9567_v55, %v3795_v1 }
 0xcf3   : > { %v9579_v28 = vadd.f32 %v3809_v40, %v9369_v18 }
 0xcf5   : > { %v3831_v3 = vsel %vm1059_vm4, %v9579_v28, 0.0 }
 0xcf6   : > { %3832 = vadd.xlane.f32.xlu1 %v3831_v3 }
 0xcf7   : > { %v3734_v60 = vpop.f32.mrf.mxu3 }
 0xcf8   : > { %v7607_v12 = vpop.eup %7606  ;;  %v3735_v38 = vadd.f32 %v9561_v51, %v3734_v60 }
 0xcf9   : > { %v3810_v17 = vmul.f32 %v7607_v12, %v3794_v8  ;;  %v3798_v61 = vpop.f32.mrf.mxu0 }
 0xcfa   : > { %7608 = vtanh.f32 %v3735_v38  ;;  %v3799_v32 = vadd.f32 %v9567_v55, %v3798_v61 }
 0xcfb   : > { %v9586_v31 = vadd.f32 %v3810_v17, %v9388_v25 }
 0xcfd   : > { %v3834_v18 = vsel %vm1059_vm4, %v9586_v31, 0.0 }
 0xcfe   : > { %3835 = vadd.xlane.f32.xlu2 %v3834_v18 }
 0xcff   : > { %v3737_v52 = vpop.f32.mrf.mxu3 }
 0xd00   : > { %v7609_v37 = vpop.eup %7608  ;;  %v3738_v26 = vadd.f32 %v9561_v51, %v3737_v52 }
 0xd01   : > { %v3811_v4 = vmul.f32 %v7609_v37, %v3796_v21  ;;  %v3800_v11 = vpop.f32.mrf.mxu0 }
 0xd02   : > { %7610 = vtanh.f32 %v3738_v26  ;;  %v3801_v63 = vadd.f32 %v9567_v55, %v3800_v11 }
 0xd03   : > { %v9593_v19 = vadd.f32 %v3811_v4, %v9416_v13 }
 0xd05   : > { %v3837_v25 = vsel %vm1059_vm4, %v9593_v19, 0.0 }
 0xd06   : > { %3838 = vadd.xlane.f32.xlu0 %v3837_v25 }
 0xd07   : > { %v3739_v29 = vpop.f32.mrf.mxu3 }
 0xd08   : > { %v7611_v5 = vpop.eup %7610  ;;  %v3740_v33 = vadd.f32 %v9561_v51, %v3739_v29  ;;  %v7286_v29 = vld [vmem:[#allocation9 + $0x18] sm:$0xff] }
 0xd09   : > { %v3812_v22 = vmul.f32 %v7611_v5, %v3799_v32  ;;  %v7288_v5 = vld [vmem:[#allocation11 + $0x18] sm:$0xff] }
 0xd0a   : > { %7612 = vtanh.f32 %v3740_v33  ;;  %v7290_v33 = vld [vmem:[#allocation12 + $0x18] sm:$0xff]  ;;  %v4121_v11 = vsel %vm1059_vm4, %v7288_v5, 0 }
 0xd0b   : > { %v9600_v53 = vadd.f32 %v3812_v22, %v9425_v34  ;;  %v4066_v22 = vsel %vm1059_vm4, %v7286_v29, 0  ;;  %4129 = vmatpush.bf16.xpose.msra.mxu2 %v4121_v11 }
 0xd0c   : > { %4074 = vmatpush.bf16.xpose.msra.mxu1 %v4066_v22 }
 0xd0d   : > { %v3840_v13 = vsel %vm1059_vm4, %v9600_v53, 0.0 }
 0xd0e   : > { %3841 = vadd.xlane.f32.xlu1 %v3840_v13  ;;  %v4176_v13 = vsel %vm1059_vm4, %v7290_v33, 0 }
 0xd0f   : > { %4184 = vmatpush.bf16.xpose.msra.mxu3 %v4176_v13  ;;  %v9699_v13 = vld [vmem:[%s10979_s29 + $0x1] ss:$0 sm:$0xff] }
 0xd10   : > { %v7613_v62 = vpop.eup %7612 }
 0xd11   : > { %v3813_v42 = vmul.f32 %v7613_v62, %v3801_v63  ;;  %v7285_v63 = vld [vmem:[#allocation9 + $0x10] sm:$0xff] }
 0xd12   : > { %v7287_v62 = vld [vmem:[#allocation11 + $0x10] sm:$0xff] }
 0xd13   : > { %v9606_v58 = vadd.f32 %v3813_v42, %v9397_v45  ;;  %v7289_v42 = vld [vmem:[#allocation12 + $0x10] sm:$0xff] }
 0xd15   : > { %v3843_v9 = vsel %vm1059_vm4, %v9606_v58, 0.0 }
 0xd16   : > { %3844 = vadd.xlane.f32.xlu2 %v3843_v9 }
 0xd59   : > { %v3803_v20 = vpop.f32.mrf.mxu0 }
 0xd5a   : > { %v3804_v45 = vadd.f32 %v9567_v55, %v3803_v20 }
 0xd5f   : > { %v3742_v10 = vpop.f32.mrf.mxu3 }
 0xd60   : > { %v3743_v34 = vadd.f32 %v9561_v51, %v3742_v10  ;;  %v4063_v10 = vsel %vm1059_vm4, %v7285_v63, 0 }
 0xd61   : > { %v3830_v48 = vpop.xlane.xlu0 %3829  ;;  %v3805_v35 = vpop.f32.mrf.mxu0  ;;  %4075 = vmatpush.bf16.xpose.msra.mxu1 %v4063_v10 }
 0xd62   : > { %7614 = vtanh.f32 %v3743_v34  ;;  %v3852_v7 = vmul.f32 %v3830_v48, %v10987_v54  ;;  %v3806_v41 = vadd.f32 %v9567_v55, %v3805_v35  ;;  %v4118_v34 = vsel %vm1059_vm4, %v7287_v62, 0 }
 0xd63   : > { %v4173_v48 = vsel %vm1059_vm4, %v7289_v42, 0  ;;  %4130 = vmatpush.bf16.xpose.msra.mxu2 %v4118_v34 }
 0xd64   : > { %v9613_v0 = vsub.f32 %v9572_v57, %v3852_v7  ;;  %4185 = vmatpush.bf16.xpose.msra.mxu3 %v4173_v48 }
 0xd66   : > { %v3868_v39 = vmul.f32 %v9613_v0, %v9613_v0 }
 0xd67   : > { %v3744_v59 = vpop.f32.mrf.mxu3 }
 0xd68   : > { %v7615_v46 = vpop.eup %7614  ;;  %v3745_v36 = vadd.f32 %v9561_v51, %v3744_v59  ;;  %v3876_v14 = vsel %vm1059_vm4, %v3868_v39, 0.0 }
 0xd69   : > { %v3814_v44 = vmul.f32 %v7615_v46, %v3804_v45  ;;  %v3833_v50 = vpop.xlane.xlu1 %3832  ;;  %3877 = vadd.xlane.f32.xlu0 %v3876_v14 }
 0xd6a   : > { %7616 = vtanh.f32 %v3745_v36  ;;  %v3853_v27 = vmul.f32 %v3833_v50, %v10987_v54 }
 0xd6b   : > { %v9622_v30 = vadd.f32 %v3814_v44, %v9442_v15 }
 0xd6c   : > { %v9625_v24 = vsub.f32 %v9579_v28, %v3853_v27 }
 0xd6d   : > { %10992 = vst [vmem:[#allocation23_spill] sm:$0xff] %v9622_v30  ;;  %v3846_v47 = vsel %vm1059_vm4, %v9622_v30, 0.0 }
 0xd6e   : > { %3847 = vadd.xlane.f32.xlu2 %v3846_v47  ;;  %v3869_v51 = vmul.f32 %v9625_v24, %v9625_v24 }
 0xd70   : > { %v7617_v23 = vpop.eup %7616  ;;  %v3879_v43 = vsel %vm1059_vm4, %v3869_v51, 0.0 }
 0xd71   : > { %v3836_v49 = vpop.xlane.xlu2 %3835  ;;  %3880 = vadd.xlane.f32.xlu1 %v3879_v43  ;;  %v3815_v15 = vmul.f32 %v7617_v23, %v3806_v41 }
 0xd72   : > { %v3854_v6 = vmul.f32 %v3836_v49, %v10987_v54 }
 0xd73   : > { %v9635_v56 = vadd.f32 %v3815_v15, %v9465_v16 }
 0xd74   : > { %v9638_v40 = vsub.f32 %v9586_v31, %v3854_v6 }
 0xd75   : > { %10993 = vst [vmem:[#allocation25_spill] sm:$0xff] %v9635_v56  ;;  %v3849_v3 = vsel %vm1059_vm4, %v9635_v56, 0.0 }
 0xd76   : > { %3850 = vadd.xlane.f32.xlu0 %v3849_v3  ;;  %v3870_v55 = vmul.f32 %v9638_v40, %v9638_v40 }
 0xd78   : > { %v3882_v8 = vsel %vm1059_vm4, %v3870_v55, 0.0 }
 0xd79   : > { %3883 = vadd.xlane.f32.xlu1 %v3882_v8  ;;  %v3839_v60 = vpop.xlane.xlu0 %3838 }
 0xd7a   : > { %v3855_v12 = vmul.f32 %v3839_v60, %v10987_v54 }
 0xd7c   : > { %v9647_v1 = vsub.f32 %v9593_v19, %v3855_v12 }
 0xd7e   : > { %v3871_v16 = vmul.f32 %v9647_v1, %v9647_v1 }
 0xd80   : > { %v3885_v38 = vsel %vm1059_vm4, %v3871_v16, 0.0 }
 0xd81   : > { %v3842_v17 = vpop.xlane.xlu1 %3841  ;;  %3886 = vadd.xlane.f32.xlu2 %v3885_v38 }
 0xd82   : > { %v3856_v18 = vmul.f32 %v3842_v17, %v10987_v54 }
 0xd84   : > { %v9654_v21 = vsub.f32 %v9600_v53, %v3856_v18 }
 0xd86   : > { %v3872_v52 = vmul.f32 %v9654_v21, %v9654_v21 }
 0xd88   : > { %v3888_v37 = vsel %vm1059_vm4, %v3872_v52, 0.0 }
 0xd89   : > { %v3845_v26 = vpop.xlane.xlu2 %3844  ;;  %3889 = vadd.xlane.f32.xlu0 %v3888_v37 }
 0xd8a   : > { %v3857_v4 = vmul.f32 %v3845_v26, %v10987_v54 }
 0xd8c   : > { %v9661_v61 = vsub.f32 %v9606_v58, %v3857_v4 }
 0xd8e   : > { %v3873_v25 = vmul.f32 %v9661_v61, %v9661_v61 }
 0xd90   : > { %v3891_v32 = vsel %vm1059_vm4, %v3873_v25, 0.0  ;;  %v9693_v25 = vld [vmem:[%s10978_s6 + $0x1] ss:$0 sm:$0xff] }
 0xd91   : > { %3892 = vadd.xlane.f32.xlu1 %v3891_v32 }
 0xddc   : > { %v3878_v9 = vpop.xlane.xlu0 %3877 }
 0xddd   : > { %v3900_v20 = vmul.f32 %v3878_v9, %v10987_v54 }
 0xddf   : > { %v3908_v7 = vadd.f32 1e-05, %v3900_v20 }
 0xde1   : > { %7618 = vrsqrt.f32 %v3908_v7  ;;  %v3848_v39 = vpop.xlane.xlu2 %3847  ;;  %vm3922_vm11 = vweird.f32 %v3908_v7 }
 0xde2   : > { %v3858_v45 = vmul.f32 %v3848_v39, %v10987_v54 }
 0xde4   : > { %v9675_v59 = vsub.f32 %v9622_v30, %v3858_v45  ;;  %v3881_v46 = vpop.xlane.xlu1 %3880 }
 0xde5   : > { %v3901_v36 = vmul.f32 %v3881_v46, %v10987_v54 }
 0xde6   : > { %v3874_v14 = vmul.f32 %v9675_v59, %v9675_v59 }
 0xde7   : > { %v7619_v44 = vpop.eup %7618  ;;  %v3909_v50 = vadd.f32 1e-05, %v3901_v36 }
 0xde8   : > { %v3917_v27 = vmul.f32 %v7619_v44, %v3908_v7  ;;  %v3894_v35 = vsel %vm1059_vm4, %v3874_v14, 0.0  ;;  %vm3923_vm9 = vweird.f32 %v7619_v44 }
 0xde9   : > { %7620 = vrsqrt.f32 %v3909_v50  ;;  %3895 = vadd.xlane.f32.xlu2 %v3894_v35  ;;  %v3851_v47 = vpop.xlane.xlu0 %3850  ;;  %vm3924_vm12 = vmor %vm3922_vm11, %vm3923_vm9  ;;  %vm3932_vm14 = vweird.f32 %v3909_v50 }
 0xdea   : > { %v3918_v51 = vmul.f32 %v7619_v44, %v3917_v27  ;;  %v3859_v41 = vmul.f32 %v3851_v47, %v10987_v54 }
 0xdec   : > { %v3919_v23 = vmul.f32 0.5, %v3918_v51  ;;  %v9683_v43 = vsub.f32 %v9635_v56, %v3859_v41  ;;  %v3884_v49 = vpop.xlane.xlu1 %3883 }
 0xded   : > { %v3902_v15 = vmul.f32 %v3884_v49, %v10987_v54 }
 0xdee   : > { %v3920_v6 = vsub.f32 1.5, %v3919_v23  ;;  %v3875_v3 = vmul.f32 %v9683_v43, %v9683_v43 }
 0xdef   : > { %v7621_v55 = vpop.eup %7620  ;;  %v3910_v8 = vadd.f32 1e-05, %v3902_v15 }
 0xdf0   : > { %v3921_v60 = vmul.f32 %v7619_v44, %v3920_v6  ;;  %v3927_v12 = vmul.f32 %v7621_v55, %v3909_v50  ;;  %v3897_v16 = vsel %vm1059_vm4, %v3875_v3, 0.0  ;;  %vm3933_vm13 = vweird.f32 %v7621_v55 }
 0xdf1   : > { %7622 = vrsqrt.f32 %v3910_v8  ;;  %3898 = vadd.xlane.f32.xlu0 %v3897_v16  ;;  %vm3934_vm15 = vmor %vm3932_vm14, %vm3933_vm13  ;;  %vm3942_vm6 = vweird.f32 %v3910_v8 }
 0xdf2   : > { %v3928_v38 = vmul.f32 %v7621_v55, %v3927_v12  ;;  %v3925_v17 = vsel %vm3924_vm12, %v7619_v44, %v3921_v60 }
 0xdf3   : > { %v3996_v32 = vmul.f32 %v3925_v17, %v9613_v0 }
 0xdf4   : > { %v3929_v18 = vmul.f32 0.5, %v3928_v38  ;;  %v3887_v52 = vpop.xlane.xlu2 %3886 }
 0xdf5   : > { %v3903_v37 = vmul.f32 %v3887_v52, %v10987_v54  ;;  %v4007_v63 = vmul.f32 %v9693_v25, %v3996_v32 }
 0xdf6   : > { %v3930_v26 = vsub.f32 1.5, %v3929_v18 }
 0xdf7   : > { %v7623_v4 = vpop.eup %7622  ;;  %v3911_v29 = vadd.f32 1e-05, %v3903_v37  ;;  %v4018_v20 = vadd.f32 %v9699_v13, %v4007_v63 }
 0xdf8   : > { %v3931_v5 = vmul.f32 %v7621_v55, %v3930_v26  ;;  %v3937_v33 = vmul.f32 %v7623_v4, %v3910_v8  ;;  %vm3943_vm5 = vweird.f32 %v7623_v4 }
 0xdf9   : > { %7624 = vrsqrt.f32 %v3911_v29  ;;  %vm3944_vm7 = vmor %vm3942_vm6, %vm3943_vm5  ;;  %vm3952_vm9 = vweird.f32 %v3911_v29 }
 0xdfa   : > { %v3935_v22 = vsel %vm3934_vm15, %v7621_v55, %v3931_v5  ;;  %v3938_v11 = vmul.f32 %v7623_v4, %v3937_v33 }
 0xdfb   : > { %v3997_v62 = vmul.f32 %v3935_v22, %v9625_v24 }
 0xdfc   : > { %v3939_v42 = vmul.f32 0.5, %v3938_v11  ;;  %v3890_v9 = vpop.xlane.xlu0 %3889 }
 0xdfd   : > { %v4008_v0 = vmul.f32 %v9693_v25, %v3997_v62  ;;  %v3904_v10 = vmul.f32 %v3890_v9, %v10987_v54 }
 0xdfe   : > { %v3940_v34 = vsub.f32 1.5, %v3939_v42 }
 0xdff   : > { %v7625_v48 = vpop.eup %7624  ;;  %v4019_v7 = vadd.f32 %v9699_v13, %v4008_v0  ;;  %v3912_v39 = vadd.f32 1e-05, %v3904_v10 }
 0xe00   : > { %v3941_v45 = vmul.f32 %v7623_v4, %v3940_v34  ;;  %v3947_v46 = vmul.f32 %v7625_v48, %v3911_v29  ;;  %vm3953_vm8 = vweird.f32 %v7625_v48 }
 0xe01   : > { %v4033_v36 = vpack.c.bf16 %v4019_v7, %v4018_v20  ;;  %7626 = vrsqrt.f32 %v3912_v39  ;;  %vm3954_vm11 = vmor %vm3952_vm9, %vm3953_vm8  ;;  %vm3962_vm13 = vweird.f32 %v3912_v39 }
 0xe02   : > { %v3948_v24 = vmul.f32 %v7625_v48, %v3947_v46  ;;  %v3945_v14 = vsel %vm3944_vm7, %v7623_v4, %v3941_v45 }
 0xe03   : > { %7143 = vmatmul.msk.bf16.vlgmr.msra.gmra.mxu1 %vm1059_vm4, %v4033_v36  ;;  %7156 = vmatmul.msk.bf16.vlgmr.msra.gmra.mxu2 %vm1059_vm4, %v4033_v36  ;;  %v3998_v51 = vmul.f32 %v3945_v14, %v9638_v40 }
 0xe04   : > { %v3949_v44 = vmul.f32 0.5, %v3948_v24  ;;  %7169 = vmatmul.msk.bf16.vlgmr.msra.gmra.mxu3 %vm1059_vm4, %v4033_v36  ;;  %v3893_v50 = vpop.xlane.xlu1 %3892 }
 0xe05   : > { %v3905_v27 = vmul.f32 %v3893_v50, %v10987_v54  ;;  %v4009_v55 = vmul.f32 %v9693_v25, %v3998_v51 }
 0xe06   : > { %v3950_v35 = vsub.f32 1.5, %v3949_v44 }
 0xe07   : > { %v7627_v47 = vpop.eup %7626  ;;  %v3913_v41 = vadd.f32 1e-05, %v3905_v27  ;;  %v4020_v38 = vadd.f32 %v9699_v13, %v4009_v55 }
 0xe08   : > { %v3951_v23 = vmul.f32 %v7625_v48, %v3950_v35  ;;  %v3957_v49 = vmul.f32 %v7627_v47, %v3912_v39  ;;  %vm3963_vm12 = vweird.f32 %v7627_v47 }
 0xe09   : > { %7628 = vrsqrt.f32 %v3913_v41  ;;  %vm3964_vm14 = vmor %vm3962_vm13, %vm3963_vm12  ;;  %vm3972_vm5 = vweird.f32 %v3913_v41 }
 0xe0a   : > { %v3955_v15 = vsel %vm3954_vm11, %v7625_v48, %v3951_v23  ;;  %v3958_v6 = vmul.f32 %v7627_v47, %v3957_v49 }
 0xe0b   : > { %v3999_v3 = vmul.f32 %v3955_v15, %v9647_v1 }
 0xe0c   : > { %v3959_v8 = vmul.f32 0.5, %v3958_v6 }
 0xe0d   : > { %v4010_v60 = vmul.f32 %v9693_v25, %v3999_v3 }
 0xe0e   : > { %v3960_v12 = vsub.f32 1.5, %v3959_v8 }
 0xe0f   : > { %v7629_v16 = vpop.eup %7628  ;;  %v4021_v40 = vadd.f32 %v9699_v13, %v4010_v60 }
 0xe10   : > { %v3961_v17 = vmul.f32 %v7627_v47, %v3960_v12  ;;  %v3967_v18 = vmul.f32 %v7629_v16, %v3913_v41  ;;  %vm3973_vm15 = vweird.f32 %v7629_v16 }
 0xe11   : > { %v4034_v52 = vpack.c.bf16 %v4021_v40, %v4020_v38  ;;  %vm3974_vm6 = vmor %vm3972_vm5, %vm3973_vm15 }
 0xe12   : > { %v3968_v37 = vmul.f32 %v7629_v16, %v3967_v18  ;;  %v3965_v1 = vsel %vm3964_vm14, %v7627_v47, %v3961_v17 }
 0xe13   : > { %7144 = vmatmul.msk.bf16.gmra.mxu1 %vm1059_vm4, %v4034_v52  ;;  %7157 = vmatmul.msk.bf16.gmra.mxu2 %vm1059_vm4, %v4034_v52  ;;  %v4000_v32 = vmul.f32 %v3965_v1, %v9654_v21 }
 0xe14   : > { %v3969_v26 = vmul.f32 0.5, %v3968_v37  ;;  %7170 = vmatmul.msk.bf16.gmra.mxu3 %vm1059_vm4, %v4034_v52 }
 0xe15   : > { %v4011_v22 = vmul.f32 %v9693_v25, %v4000_v32 }
 0xe16   : > { %v3970_v4 = vsub.f32 1.5, %v3969_v26 }
 0xe17   : > { %v4022_v63 = vadd.f32 %v9699_v13, %v4011_v22 }
 0xe18   : > { %v3971_v29 = vmul.f32 %v7629_v16, %v3970_v4 }
 0xe1a   : > { %v3975_v5 = vsel %vm3974_vm6, %v7629_v16, %v3971_v29 }
 0xe1b   : > { %v4001_v33 = vmul.f32 %v3975_v5, %v9661_v61 }
 0xe1d   : > { %v4012_v11 = vmul.f32 %v9693_v25, %v4001_v33 }
 0xe1f   : > { %v4023_v62 = vadd.f32 %v9699_v13, %v4012_v11 }
 0xe21   : > { %v4035_v42 = vpack.c.bf16 %v4023_v62, %v4022_v63 }
 0xe23   : > { %7145 = vmatmul.msk.bf16.gmra.mxu1 %vm1059_vm4, %v4035_v42  ;;  %7158 = vmatmul.msk.bf16.gmra.mxu2 %vm1059_vm4, %v4035_v42 }
 0xe24   : > { %7171 = vmatmul.msk.bf16.gmra.mxu3 %vm1059_vm4, %v4035_v42 }
 0xe5c   : > { %v3896_v21 = vpop.xlane.xlu2 %3895 }
 0xe5d   : > { %v3906_v9 = vmul.f32 %v3896_v21, %v10987_v54 }
 0xe5f   : > { %v3914_v0 = vadd.f32 1e-05, %v3906_v9 }
 0xe61   : > { %7630 = vrsqrt.f32 %v3914_v0  ;;  %vm3982_vm8 = vweird.f32 %v3914_v0 }
 0xe64   : > { %v3899_v61 = vpop.xlane.xlu0 %3898 }
 0xe65   : > { %v3907_v10 = vmul.f32 %v3899_v61, %v10987_v54 }
 0xe67   : > { %v7631_v34 = vpop.eup %7630  ;;  %v3915_v48 = vadd.f32 1e-05, %v3907_v10 }
 0xe68   : > { %v3977_v20 = vmul.f32 %v7631_v34, %v3914_v0  ;;  %vm3983_vm7 = vweird.f32 %v7631_v34 }
 0xe69   : > { %7632 = vrsqrt.f32 %v3915_v48  ;;  %vm3984_vm9 = vmor %vm3982_vm8, %vm3983_vm7  ;;  %vm3992_vm12 = vweird.f32 %v3915_v48 }
 0xe6a   : > { %v3978_v7 = vmul.f32 %v7631_v34, %v3977_v20 }
 0xe6c   : > { %v3979_v39 = vmul.f32 0.5, %v3978_v7 }
 0xe6e   : > { %v3980_v45 = vsub.f32 1.5, %v3979_v39 }
 0xe6f   : > { %v7633_v46 = vpop.eup %7632 }
 0xe70   : > { %v3981_v36 = vmul.f32 %v7631_v34, %v3980_v45  ;;  %v3987_v24 = vmul.f32 %v7633_v46, %v3915_v48  ;;  %vm3993_vm11 = vweird.f32 %v7633_v46  ;;  %v9789_v48 = vld [vmem:[%s10922_s14 + $0x1] ss:$0 sm:$0xff] }
 0xe71   : > { %vm3994_vm13 = vmor %vm3992_vm12, %vm3993_vm11 }
 0xe72   : > { %v3988_v14 = vmul.f32 %v7633_v46, %v3987_v24  ;;  %v3985_v44 = vsel %vm3984_vm9, %v7631_v34, %v3981_v36 }
 0xe73   : > { %v4002_v35 = vmul.f32 %v3985_v44, %v9675_v59  ;;  %v9742_v59 = vld [vmem:[%s10920_s12 + $0x1] ss:$0 sm:$0xff] }
 0xe74   : > { %v3989_v50 = vmul.f32 0.5, %v3988_v14 }
 0xe75   : > { %v4013_v23 = vmul.f32 %v9693_v25, %v4002_v35 }
 0xe76   : > { %v3990_v27 = vsub.f32 1.5, %v3989_v50 }
 0xe77   : > { %v4024_v15 = vadd.f32 %v9699_v13, %v4013_v23 }
 0xe78   : > { %v3991_v47 = vmul.f32 %v7633_v46, %v3990_v27 }
 0xe7a   : > { %v3995_v51 = vsel %vm3994_vm13, %v7633_v46, %v3991_v47 }
 0xe7b   : > { %v4003_v41 = vmul.f32 %v3995_v51, %v9683_v43 }
 0xe7d   : > { %v4014_v49 = vmul.f32 %v9693_v25, %v4003_v41 }
 0xe7f   : > { %v4025_v6 = vadd.f32 %v9699_v13, %v4014_v49  ;;  %v9749_v13 = vld [vmem:[%s10980_s25 + $0x1] ss:$0 sm:$0xff] }
 0xe80   : > { %v4077_v3 = vpop.f32.mrf.mxu1 }
 0xe81   : > { %v4036_v55 = vpack.c.bf16 %v4025_v6, %v4024_v15  ;;  %v4078_v38 = vadd.f32 %v9749_v13, %v4077_v3 }
 0xe83   : > { %7146 = vmatmul.msk.bf16.gmra.mxu1 %vm1059_vm4, %v4036_v55  ;;  %7159 = vmatmul.msk.bf16.gmra.mxu2 %vm1059_vm4, %v4036_v55  ;;  %v9757_v52 = vpack.c.bf16 %v4078_v38, %v4078_v38 }
 0xe84   : > { %7172 = vmatmul.msk.bf16.gmra.mxu3 %vm1059_vm4, %v4036_v55 }
 0xe86   : > { %v4132_v43 = vpop.f32.mrf.mxu2 }
 0xe87   : > { %v4133_v25 = vadd.f32 %v9742_v59, %v4132_v43  ;;  %v4187_v8 = vpop.f32.mrf.mxu3 }
 0xe88   : > { %v4079_v12 = vpop.f32.mrf.mxu1  ;;  %v4188_v50 = vadd.f32 %v9789_v48, %v4187_v8 }
 0xe89   : > { %v9751_v60 = vpack.c.bf16 %v4133_v25, %v4133_v25  ;;  %v4080_v4 = vadd.f32 %v9749_v13, %v4079_v12 }
 0xe8a   : > { %v9808_v41 = vpack.c.bf16 %v4188_v50, %v4188_v50 }
 0xe8b   : > { %v4235_v16 = vsel %vm1464_vm10, %v9751_v60, 0  ;;  %v9767_v33 = vpack.c.bf16 %v4080_v4, %v4080_v4 }
 0xe8c   : > { %4244 = vmatpush.bf16.xpose.msrb.mxu0 %v4235_v16  ;;  %v4499_v55 = vsel %vm1734_vm0, %v9808_v41, 0 }
 0xe8e   : > { %v4134_v40 = vpop.f32.mrf.mxu2 }
 0xe8f   : > { %v4135_v17 = vadd.f32 %v9742_v59, %v4134_v40  ;;  %v4189_v18 = vpop.f32.mrf.mxu3 }
 0xe90   : > { %v4082_v26 = vpop.f32.mrf.mxu1  ;;  %v4190_v16 = vadd.f32 %v9789_v48, %v4189_v18 }
 0xe91   : > { %v9759_v37 = vpack.c.bf16 %v4135_v17, %v4135_v17  ;;  %v4083_v63 = vadd.f32 %v9749_v13, %v4082_v26 }
 0xe92   : > { %v9832_v26 = vpack.c.bf16 %v4190_v16, %v4190_v16 }
 0xe93   : > { %7173 = vmatmul.msk.bf16.vlgmr.msrb.gmra.mxu0 %vm1464_vm10, %v9757_v52  ;;  %v4254_v1 = vsel %vm1464_vm10, %v9759_v37, 0  ;;  %v9777_v0 = vpack.c.bf16 %v4083_v63, %v4083_v63 }
 0xe94   : > { %4263 = vmatpush.bf16.xpose.msrb.mxu1 %v4254_v1  ;;  %v4518_v18 = vsel %vm1734_vm0, %v9832_v26, 0 }
 0xe96   : > { %v4137_v32 = vpop.f32.mrf.mxu2 }
 0xe97   : > { %v4138_v29 = vadd.f32 %v9742_v59, %v4137_v32  ;;  %v4192_v5 = vpop.f32.mrf.mxu3 }
 0xe98   : > { %v4084_v62 = vpop.f32.mrf.mxu1 }
 0xe99   : > { %v9769_v22 = vpack.c.bf16 %v4138_v29, %v4138_v29  ;;  %v4085_v34 = vadd.f32 %v9749_v13, %v4084_v62 }
 0xe9b   : > { %v4273_v11 = vsel %vm1464_vm10, %v9769_v22, 0  ;;  %7174 = vmatmul.msk.bf16.vlgmr.msrb.gmra.mxu1 %vm1464_vm10, %v9767_v33  ;;  %v9793_v36 = vpack.c.bf16 %v4085_v34, %v4085_v34 }
 0xe9c   : > { %4282 = vmatpush.bf16.xpose.msrb.mxu2 %v4273_v11  ;;  %v4193_v11 = vadd.f32 %v9789_v48, %v4192_v5 }
 0xe9e   : > { %v4139_v42 = vpop.f32.mrf.mxu2 }
 0xe9f   : > { %v4140_v21 = vadd.f32 %v9742_v59, %v4139_v42  ;;  %v4194_v9 = vpop.f32.mrf.mxu3 }
 0xea0   : > { %v4087_v45 = vpop.f32.mrf.mxu1  ;;  %v4195_v6 = vadd.f32 %v9789_v48, %v4194_v9 }
 0xea1   : > { %v9779_v61 = vpack.c.bf16 %v4140_v21, %v4140_v21  ;;  %v4088_v35 = vadd.f32 %v9749_v13, %v4087_v45 }
 0xea2   : > { %v9822_v25 = vpack.c.bf16 %v4195_v6, %v4195_v6 }
 0xea3   : > { %7175 = vmatmul.msk.bf16.vlgmr.msrb.gmra.mxu2 %vm1464_vm10, %v9777_v0  ;;  %v4292_v10 = vsel %vm1464_vm10, %v9779_v61, 0  ;;  %v9810_v23 = vpack.c.bf16 %v4088_v35, %v4088_v35 }
 0xea4   : > { %4301 = vmatpush.bf16.xpose.msra.mxu0 %v4292_v10  ;;  %v4556_v12 = vsel %vm1734_vm0, %v9822_v25, 0  ;;  %v9846_v10 = vpack.c.bf16 %v4193_v11, %v4193_v11 }
 0xea6   : > { %v4142_v20 = vpop.f32.mrf.mxu2  ;;  %v4537_v50 = vsel %vm1734_vm0, %v9846_v10, 0 }
 0xea7   : > { %v4143_v7 = vadd.f32 %v9742_v59, %v4142_v20  ;;  %v4197_v39 = vpop.f32.mrf.mxu3 }
 0xea8   : > { %v4198_v46 = vadd.f32 %v9789_v48, %v4197_v39  ;;  %v4089_v15 = vpop.f32.mrf.mxu1 }
 0xea9   : > { %v9795_v24 = vpack.c.bf16 %v4143_v7, %v4143_v7  ;;  %v4090_v43 = vadd.f32 %v9749_v13, %v4089_v15 }
 0xeaa   : > { %v9797_v14 = vpack.c.bf16 %v4198_v46, %v4198_v46 }
 0xeab   : > { %v4311_v44 = vsel %vm1464_vm10, %v9795_v24, 0  ;;  %7176 = vmatmul.msk.bf16.vlgmr.msra.gmra.mxu0 %vm1464_vm10, %v9793_v36  ;;  %v9824_v8 = vpack.c.bf16 %v4090_v43, %v4090_v43 }
 0xeac   : > { %v4575_v27 = vsel %vm1734_vm0, %v9797_v14, 0  ;;  %4320 = vmatpush.bf16.xpose.msra.mxu1 %v4311_v44 }
 0xead   : > { %4584 = vmatpush.bf16.msrb.mxu3 %v4575_v27 }
 0xeae   : > { %v4144_v47 = vpop.f32.mrf.mxu2 }
 0xeaf   : > { %v4145_v51 = vadd.f32 %v9742_v59, %v4144_v47  ;;  %v4199_v17 = vpop.f32.mrf.mxu3 }
 0xeb0   : > { %v4200_v32 = vadd.f32 %v9789_v48, %v4199_v17 }
 0xeb1   : > { %v9812_v49 = vpack.c.bf16 %v4145_v51, %v4145_v51 }
 0xeb2   : > { %v9843_v42 = vpack.c.bf16 %v4200_v32, %v4200_v32 }
 0xeb3   : > { %7177 = vmatmul.msk.bf16.vlgmr.msra.gmra.mxu1 %vm1464_vm10, %v9810_v23  ;;  %v4330_v3 = vsel %vm1464_vm10, %v9812_v49, 0 }
 0xeb4   : > { %4339 = vmatpush.bf16.xpose.msra.mxu2 %v4330_v3  ;;  %v4594_v44 = vsel %vm1734_vm0, %v9843_v42, 0 }
 0xebb   : > { %7178 = vmatmul.msk.bf16.vlgmr.msra.gmra.mxu2 %vm1464_vm10, %v9824_v8 }
 0xebc   : > { %4508 = vmatpush.bf16.msrb.mxu2 %v4499_v55 }
 0xec0   : > { %4565 = vmatpush.bf16.msra.mxu2 %v4556_v12 }
 0xf00   : > { %v4092_v38 = vpop.f32.mrf.mxu1 }
 0xf01   : > { %v4093_v63 = vadd.f32 %v9749_v13, %v4092_v38 }
 0xf03   : > { %v9848_v7 = vpack.c.bf16 %v4093_v63, %v4093_v63  ;;  %v4740_v63 = vunpack.c.l.b16 %v9779_v61  ;;  %v4648_v61 = vunpack.c.l.b16 %v9757_v52 }
 0xf06   : > { %v4147_v40 = vpop.f32.mrf.mxu2 }
 0xf07   : > { %v4148_v1 = vadd.f32 %v9742_v59, %v4147_v40  ;;  %v4202_v21 = vpop.f32.mrf.mxu3 }
 0xf08   : > { %v4094_v34 = vpop.f32.mrf.mxu1  ;;  %v4203_v45 = vadd.f32 %v9789_v48, %v4202_v21 }
 0xf09   : > { %v9834_v4 = vpack.c.bf16 %v4148_v1, %v4148_v1  ;;  %v4095_v35 = vadd.f32 %v9749_v13, %v4094_v34 }
 0xf0a   : > { %v9868_v47 = vpack.c.bf16 %v4203_v45, %v4203_v45 }
 0xf0b   : > { %v4349_v29 = vsel %vm1464_vm10, %v9834_v4, 0  ;;  %v9870_v6 = vpack.c.bf16 %v4095_v35, %v4095_v35  ;;  %v9899_v35 = vpack.c.b16 %v4648_v61, %v4648_v61 }
 0xf0c   : > { %4358 = vmatpush.bf16.xpose.msrb.mxu0 %v4349_v29  ;;  %v4613_v55 = vsel %vm1734_vm0, %v9868_v47, 0 }
 0xf0e   : > { %v4149_v62 = vpop.f32.mrf.mxu2 }
 0xf0f   : > { %v4150_v9 = vadd.f32 %v9742_v59, %v4149_v62 }
 0xf10   : > { %v4246_v20 = vpop.f32.mrf.mxu0 }
 0xf11   : > { %v9850_v5 = vpack.c.bf16 %v4150_v9, %v4150_v9  ;;  %v4383_v39 = vmul.f32 0.35355338, %v4246_v20  ;;  %v9888_v20 = vpack.c.b16 %v4740_v63, %v4740_v63 }
 0xf13   : > { %v9855_v46 = vsel %vm8634_vm1, %v4383_v39, -1e+30  ;;  %7179 = vmatmul.msk.bf16.vlgmr.msrb.gmra.mxu0 %vm1464_vm10, %v9848_v7  ;;  %v4368_v59 = vsel %vm1464_vm10, %v9850_v5, 0 }
 0xf14   : > { %4527 = vmatpush.bf16.msra.mxu0 %v4518_v18  ;;  %4377 = vmatpush.bf16.xpose.msrb.mxu1 %v4368_v59  ;;  %v4399_v27 = vsel %vm1464_vm10, %v9855_v46, -inf }
 0xf15   : > { %4400 = vmax.xlane.f32.xlu1 %v4399_v27 }
 0xf18   : > { %4603 = vmatpush.bf16.msrb.mxu0 %v4594_v44  ;;  %v4248_v51 = vpop.f32.mrf.mxu0  ;;  %v4265_v15 = vpop.f32.mrf.mxu1  ;;  %v4653_v44 = vunpack.c.l.b16 %v9751_v60 }
 0xf19   : > { %v4384_v3 = vmul.f32 0.35355338, %v4265_v15 }
 0xf1b   : > { %v4392_v43 = vsel %vm8634_vm1, %v4384_v3, -1e+30  ;;  %7180 = vmatmul.msk.bf16.vlgmr.msrb.gmra.mxu1 %vm1464_vm10, %v9870_v6 }
 0xf1c   : > { %4546 = vmatpush.bf16.msra.mxu1 %v4537_v50  ;;  %v4402_v13 = vsel %vm1464_vm10, %v4392_v43, -inf  ;;  %v9895_v50 = vpack.c.b16 %v4653_v44, %v4653_v44 }
 0xf1d   : > { %4403 = vmax.xlane.f32.xlu1 %v4402_v13 }
 0xf20   : > { %4622 = vmatpush.bf16.msrb.mxu1 %v4613_v55  ;;  %v4267_v12 = vpop.f32.mrf.mxu1 }
 0xf26   : > { %v4284_v16 = vpop.f32.mrf.mxu2 }
 0xf27   : > { %v4385_v38 = vmul.f32 0.35355338, %v4284_v16 }
 0xf28   : > { %v4303_v40 = vpop.f32.mrf.mxu0 }
 0xf29   : > { %v4393_v17 = vsel %vm8634_vm1, %v4385_v38, -1e+30  ;;  %v4386_v1 = vmul.f32 0.35355338, %v4303_v40 }
 0xf2a   : > { %v4405_v32 = vsel %vm1464_vm10, %v4393_v17, -inf }
 0xf2b   : > { %v4394_v29 = vsel %vm8634_vm1, %v4386_v1, -1e+30  ;;  %4406 = vmax.xlane.f32.xlu0 %v4405_v32 }
 0xf2c   : > { %v4408_v11 = vsel %vm1464_vm10, %v4394_v29, -inf }
 0xf2d   : > { %4409 = vmax.xlane.f32.xlu2 %v4408_v11 }
 0xf2e   : > { %v4286_v18 = vpop.f32.mrf.mxu2 }
 0xf30   : > { %v4305_v62 = vpop.f32.mrf.mxu0  ;;  %v4322_v21 = vpop.f32.mrf.mxu1 }
 0xf31   : > { %v4387_v9 = vmul.f32 0.35355338, %v4322_v21 }
 0xf33   : > { %v4395_v34 = vsel %vm8634_vm1, %v4387_v9, -1e+30 }
 0xf34   : > { %v4411_v39 = vsel %vm1464_vm10, %v4395_v34, -inf }
 0xf35   : > { %4412 = vmax.xlane.f32.xlu0 %v4411_v39 }
 0xf36   : > { %4742 = vrot.lane.b32.xlu1 %v9888_v20, %s8073_s26 }
 0xf38   : > { %v4324_v45 = vpop.f32.mrf.mxu1 }
 0xf3e   : > { %v4341_v59 = vpop.f32.mrf.mxu2 }
 0xf3f   : > { %v4388_v51 = vmul.f32 0.35355338, %v4341_v59 }
 0xf41   : > { %v9905_v15 = vsel %vm8634_vm1, %v4388_v51, -1e+30 }
 0xf42   : > { %v4414_v60 = vsel %vm1464_vm10, %v9905_v15, -inf }
 0xf45   : > { %4655 = vrot.lane.b32.xlu2 %v9895_v50, %s8073_s26 }
 0xf46   : > { %v4343_v27 = vpop.f32.mrf.mxu2 }
 0xf49   : > { %4650 = vrot.lane.b32.xlu0 %v9899_v35, %s8073_s26 }
 0xf60   : > { %4415 = vmax.xlane.f32.xlu1 %v4414_v60 }
 0xf88   : > { %v4401_v52 = vpop.xlane.xlu1 %4400 }
 0xf89   : > { %v4423_v16 = vsub.f32 %v9855_v46, %v4401_v52 }
 0xf8b   : > { %v4431_v32 = vmul.f32 1.442695, %v4423_v16 }
 0xf90   : > { %v4404_v3 = vpop.xlane.xlu1 %4403  ;;  %v4360_v55 = vpop.f32.mrf.mxu0 }
 0xf91   : > { %v4424_v13 = vsub.f32 %v4392_v43, %v4404_v3  ;;  %v4389_v12 = vmul.f32 0.35355338, %v4360_v55 }
 0xf93   : > { %v4433_v38 = vmul.f32 1.442695, %v4424_v13  ;;  %v9912_v40 = vsel %vm8634_vm1, %v4389_v12, -1e+30 }
 0xf94   : > { %v4417_v1 = vsel %vm1464_vm10, %v9912_v40, -inf }
 0xf95   : > { %7634 = vpow2.f32 %v4433_v38  ;;  %4418 = vmax.xlane.f32.xlu0 %v4417_v1 }
 0xf96   : > { %7636 = vpow2.f32 %v4431_v32 }
 0xf98   : > { %v4362_v11 = vpop.f32.mrf.mxu0  ;;  %v4379_v18 = vpop.f32.mrf.mxu1 }
 0xf99   : > { %v4390_v63 = vmul.f32 0.35355338, %v4379_v18  ;;  %v4764_v18 = vunpack.c.l.b16 %v9810_v23  ;;  %v4798_v23 = vunpack.c.l.b16 %v9812_v49 }
 0xf9b   : > { %v9916_v62 = vpop.eup %7634  ;;  %v9920_v46 = vsel %vm8634_vm1, %v4390_v63, -1e+30  ;;  %v9949_v63 = vpack.c.b16 %v4764_v18, %v4764_v18 }
 0xf9c   : > { %v4420_v43 = vsel %vm1464_vm10, %v9920_v46, -inf  ;;  %v4450_v21 = vsel %vm1464_vm10, %v9916_v62, 0.0  ;;  %v9926_v44 = vpop.eup %7636 }
 0xf9d   : > { %4421 = vmax.xlane.f32.xlu2 %v4420_v43  ;;  %4451 = vadd.xlane.f32.xlu0 %v4450_v21  ;;  %v4447_v60 = vsel %vm1464_vm10, %v9926_v44, 0.0  ;;  %v4769_v43 = vunpack.c.l.b16 %v9795_v24  ;;  %v4856_v21 = vunpack.c.l.b16 %v9850_v5  ;;  %v9967_v24 = vpack.c.b16 %v4798_v23, %v4798_v23 }
 0xf9e   : > { %v4407_v9 = vpop.xlane.xlu0 %4406 }
 0xf9f   : > { %v4425_v39 = vsub.f32 %v4393_v17, %v4407_v9 }
 0xfa0   : > { %v4410_v45 = vpop.xlane.xlu2 %4409  ;;  %v4381_v59 = vpop.f32.mrf.mxu1 }
 0xfa1   : > { %v4435_v61 = vmul.f32 1.442695, %v4425_v39  ;;  %v4426_v27 = vsub.f32 %v4394_v29, %v4410_v45  ;;  %v9957_v39 = vpack.c.b16 %v4769_v43, %v4769_v43 }
 0xfa3   : > { %7638 = vpow2.f32 %v4435_v61  ;;  %v4437_v51 = vmul.f32 1.442695, %v4426_v27  ;;  %v4706_v61 = vunpack.c.l.b16 %v9777_v0  ;;  %v4992_v0 = vunpack.c.l.b16 %v9808_v41 }
 0xfa4   : > { %v4677_v41 = vunpack.c.l.b16 %v9767_v33 }
 0xfa5   : > { %7640 = vpow2.f32 %v4437_v51  ;;  %4448 = vadd.xlane.f32.xlu2 %v4447_v60  ;;  %v9972_v27 = vpack.c.b16 %v4706_v61, %v4706_v61 }
 0xfa8   : > { %v4656_v52 = vpop.permute.xlu2 %4655  ;;  %v4413_v13 = vpop.xlane.xlu0 %4412 }
 0xfa9   : > { %v9930_v3 = vpop.eup %7638  ;;  %v4661_v55 = vsel %vm1464_vm10, %v4656_v52, 0  ;;  %v4427_v17 = vsub.f32 %v4395_v34, %v4413_v13  ;;  %v4682_v34 = vunpack.c.l.b16 %v9759_v37  ;;  %v9955_v9 = vpop.permute.xlu1 %4742  ;;  %v9959_v37 = vpack.c.b16 %v4856_v21, %v4856_v21 }
 0xfaa   : > { %4670 = vmatpush.bf16.xpose.msra.mxu3 %v4661_v55  ;;  %v4453_v12 = vsel %vm1464_vm10, %v9930_v3, 0.0  ;;  %v9986_v52 = vpack.c.b16 %v4992_v0, %v4992_v0  ;;  %v5088_v55 = vunpack.c.l.b16 %v9797_v14  ;;  %v4735_v13 = vunpack.c.l.b16 %v9793_v36 }
 0xfab   : > { %v9935_v16 = vpop.eup %7640  ;;  %4454 = vadd.xlane.f32.xlu0 %v4453_v12  ;;  %v4439_v29 = vmul.f32 1.442695, %v4427_v17  ;;  %v9944_v11 = vpack.c.b16 %v4682_v34, %v4682_v34 }
 0xfac   : > { %v4456_v38 = vsel %vm1464_vm10, %v9935_v16, 0.0  ;;  %v9992_v17 = vpack.c.b16 %v5088_v55, %v5088_v55  ;;  %v9994_v12 = vpack.c.b16 %v4735_v13, %v4735_v13 }
 0xfad   : > { %4457 = vadd.xlane.f32.xlu1 %v4456_v38  ;;  %7642 = vpow2.f32 %v4439_v29 }
 0xfb3   : > { %v9939_v1 = vpop.eup %7642 }
 0xfb4   : > { %v4459_v32 = vsel %vm1464_vm10, %v9939_v1, 0.0 }
 0xfb5   : > { %4460 = vadd.xlane.f32.xlu2 %v4459_v32 }
 0xfbb   : > { %v10005_v14 = vpop.permute.xlu0 %4650 }
 0xfbf   : > { %4684 = vrot.lane.b32.xlu0 %v9944_v11, %s8073_s26 }
 0xfc7   : > { %4766 = vrot.lane.b32.xlu0 %v9949_v63, %s8073_s26 }
 0xfcd   : > { %4771 = vrot.lane.b32.xlu2 %v9957_v39, %s8073_s26 }
 0xfcf   : > { %4858 = vrot.lane.b32.xlu0 %v9959_v37, %s8073_s26 }
 0xfd3   : > { %v4416_v45 = vpop.xlane.xlu1 %4415 }
 0xfd4   : > { %v4428_v59 = vsub.f32 %v9905_v15, %v4416_v45  ;;  %v4827_v15 = vunpack.c.l.b16 %v9834_v4  ;;  %v10001_v4 = vpack.c.b16 %v4677_v41, %v4677_v41  ;;  %v4204_v45 = vpop.f32.mrf.mxu3 }
 0xfd6   : > { %v4441_v5 = vmul.f32 1.442695, %v4428_v59  ;;  %v9981_v60 = vpack.c.b16 %v4827_v15, %v4827_v15 }
 0xfd7   : > { %4800 = vrot.lane.b32.xlu0 %v9967_v24, %s8073_s26 }
 0xfd8   : > { %7644 = vpow2.f32 %v4441_v5  ;;  %v4205_v5 = vadd.f32 %v9789_v48, %v4204_v45 }
 0xfda   : > { %v10018_v0 = vpack.c.bf16 %v4205_v5, %v4205_v5 }
 0xfde   : > { %v9974_v51 = vpop.eup %7644 }
 0xfdf   : > { %4708 = vrot.lane.b32.xlu0 %v9972_v27, %s8073_s26  ;;  %v4462_v49 = vsel %vm1464_vm10, %v9974_v51, 0.0 }
 0xfe0   : > { %4463 = vadd.xlane.f32.xlu1 %v4462_v49 }
 0xfe7   : > { %4829 = vrot.lane.b32.xlu0 %v9981_v60, %s8073_s26 }
 0xfef   : > { %4994 = vrot.lane.b32.xlu0 %v9986_v52, %s8073_s26 }
 0xff7   : > { %5090 = vrot.lane.b32.xlu0 %v9992_v17, %s8073_s26 }
 0xff9   : > { %4737 = vrot.lane.b32.xlu1 %v9994_v12, %s8073_s26 }
 0xfff   : > { %5185 = vrot.lane.b32.xlu0 %v9895_v50, %s8074_s1 }
0x1001   : > { %4679 = vrot.lane.b32.xlu1 %v10001_v4, %s8073_s26 }
0x1008   : > { %v4419_v36 = vpop.xlane.xlu0 %4418 }
0x1009   : > { %v4429_v29 = vsub.f32 %v9912_v40, %v4419_v36 }
0x100b   : > { %v4443_v38 = vmul.f32 1.442695, %v4429_v29  ;;  %v4822_v29 = vunpack.c.l.b16 %v9848_v7  ;;  %v5064_v7 = vunpack.c.l.b16 %v9822_v25 }
0x100d   : > { %7646 = vpow2.f32 %v4443_v38 }
0x1010   : > { %v4422_v32 = vpop.xlane.xlu2 %4421  ;;  %v4452_v34 = vpop.xlane.xlu0 %4451 }
0x1011   : > { %7648 = vrcp.f32 %v4452_v34  ;;  %v4430_v59 = vsub.f32 %v9920_v46, %v4422_v32  ;;  %v4632_v46 = vsel %vm1734_vm0, %v10018_v0, 0 }
0x1013   : > { %v10010_v18 = vpop.eup %7646  ;;  %v4445_v61 = vmul.f32 1.442695, %v4430_v59 }
0x1014   : > { %v4465_v33 = vsel %vm1464_vm10, %v10010_v18, 0.0 }
0x1015   : > { %4466 = vadd.xlane.f32.xlu2 %v4465_v33  ;;  %v10031_v33 = vpack.c.b16 %v4822_v29, %v4822_v29 }
0x1017   : > { %v7649_v43 = vpop.eup %7648 }
0x1018   : > { %v4480_v21 = vmul.f32 %v7649_v43, %v9916_v62  ;;  %v4449_v23 = vpop.xlane.xlu2 %4448 }
0x1019   : > { %7650 = vrcp.f32 %v4449_v23 }
0x101a   : > { %v4488_v40 = vpack.c.bf16 %v4480_v21, %v4480_v21 }
0x101c   : > { %7182 = vmatmul.msk.bf16.vlgmr.msra.gmra.mxu0 %vm1464_vm10, %v4488_v40 }
0x101e   : > { %v4455_v49 = vpop.xlane.xlu0 %4454 }
0x101f   : > { %v7651_v15 = vpop.eup %7650  ;;  %7652 = vrcp.f32 %v4455_v49  ;;  %v4748_v49 = vsel %vm1464_vm10, %v9955_v9, 0  ;;  %v4851_v9 = vunpack.c.l.b16 %v9870_v6  ;;  %v5016_v6 = vunpack.c.l.b16 %v9832_v26 }
0x1020   : > { %v4479_v55 = vmul.f32 %v7651_v15, %v9926_v44  ;;  %7654 = vpow2.f32 %v4445_v61  ;;  %v4458_v13 = vpop.xlane.xlu1 %4457  ;;  %v10039_v61 = vpack.c.b16 %v5064_v7, %v5064_v7 }
0x1021   : > { %7656 = vrcp.f32 %v4458_v13  ;;  %v10056_v13 = vpack.c.b16 %v4851_v9, %v4851_v9 }
0x1022   : > { %v4487_v62 = vpack.c.bf16 %v4479_v55, %v4479_v55 }
0x1024   : > { %7181 = vmatmul.msk.bf16.vlgmr.msrb.gmra.mxu2 %vm1464_vm10, %v4487_v62 }
0x1025   : > { %v7653_v41 = vpop.eup %7652  ;;  %4641 = vmatpush.bf16.msrb.mxu2 %v4632_v46  ;;  %v4793_v46 = vunpack.c.l.b16 %v9824_v8 }
0x1026   : > { %v4481_v48 = vmul.f32 %v7653_v41, %v9930_v3  ;;  %v10025_v36 = vpop.eup %7654 }
0x1027   : > { %v4468_v44 = vsel %vm1464_vm10, %v10025_v36, 0.0  ;;  %v7657_v34 = vpop.eup %7656  ;;  %v10061_v41 = vpack.c.b16 %v4793_v46, %v4793_v46 }
0x1028   : > { %v4489_v38 = vpack.c.bf16 %v4481_v48, %v4481_v48  ;;  %v4461_v32 = vpop.xlane.xlu2 %4460  ;;  %v4482_v3 = vmul.f32 %v7657_v34, %v9935_v16 }
0x1029   : > { %7658 = vrcp.f32 %v4461_v32 }
0x102a   : > { %7183 = vmatmul.msk.bf16.vlgmr.msra.gmra.mxu1 %vm1464_vm10, %v4489_v38  ;;  %v4490_v45 = vpack.c.bf16 %v4482_v3, %v4482_v3  ;;  %v10067_v38 = vpack.c.b16 %v5016_v6, %v5016_v6 }
0x102b   : > { %4469 = vadd.xlane.f32.xlu1 %v4468_v44 }
0x102d   : > { %4824 = vrot.lane.b32.xlu2 %v10031_v33, %s8073_s26 }
0x102f   : > { %v7659_v43 = vpop.eup %7658 }
0x1030   : > { %v4483_v21 = vmul.f32 %v7659_v43, %v9939_v1  ;;  %v4772_v59 = vpop.permute.xlu2 %4771  ;;  %v4711_v1 = vunpack.c.l.b16 %v9769_v22 }
0x1031   : > { %v4685_v23 = vpop.permute.xlu0 %4684  ;;  %v4777_v16 = vsel %vm1464_vm10, %v4772_v59, 0 }
0x1032   : > { %v4690_v40 = vsel %vm1464_vm10, %v4685_v23, 0  ;;  %v4491_v5 = vpack.c.bf16 %v4483_v21, %v4483_v21  ;;  %v10049_v55 = vpack.c.b16 %v4711_v1, %v4711_v1 }
0x1033   : > { %4699 = vmatpush.bf16.xpose.msra.mxu0 %v4690_v40 }
0x1034   : > { %7184 = vmatmul.msk.bf16.vlgmr.msra.gmra.mxu2 %vm1464_vm10, %v4490_v45  ;;  %7185 = vmatmul.msk.bf16.vlgmr.msrb.gmra.mxu3 %vm1464_vm10, %v4491_v5 }
0x1035   : > { %4757 = vmatpush.bf16.xpose.msra.mxu2 %v4748_v49  ;;  %4786 = vmatpush.bf16.xpose.msrb.mxu3 %v4777_v16 }
0x1036   : > { %5066 = vrot.lane.b32.xlu2 %v10039_v61, %s8073_s26 }
0x1039   : > { %v4767_v25 = vpop.permute.xlu0 %4766 }
0x1041   : > { %v4859_v15 = vpop.permute.xlu0 %4858 }
0x1042   : > { %v4864_v46 = vsel %vm1464_vm10, %v4859_v15, 0 }
0x1044   : > { %4713 = vrot.lane.b32.xlu1 %v10049_v55, %s8073_s26  ;;  %7189 = vmatmul.msk.bf16.vlgmr.msra.gmra.mxu3 %vm1464_vm10, %v10005_v14 }
0x1049   : > { %v4801_v62 = vpop.permute.xlu0 %4800 }
0x104a   : > { %v4806_v44 = vsel %vm1464_vm10, %v4801_v62, 0 }
0x104c   : > { %4853 = vrot.lane.b32.xlu1 %v10056_v13, %s8073_s26 }
0x1051   : > { %v4709_v22 = vpop.permute.xlu0 %4708 }
0x1053   : > { %v4464_v48 = vpop.xlane.xlu1 %4463 }
0x1054   : > { %7660 = vrcp.f32 %v4464_v48  ;;  %4795 = vrot.lane.b32.xlu1 %v10061_v41, %s8073_s26  ;;  %7193 = vmatmul.msk.bf16.vlgmr.msrb.gmra.mxu3 %vm1464_vm10, %v4767_v25 }
0x1059   : > { %v4830_v14 = vpop.permute.xlu0 %4829 }
0x105a   : > { %v7661_v29 = vpop.eup %7660 }
0x105b   : > { %v4484_v32 = vmul.f32 %v7661_v29, %v9974_v51 }
0x105c   : > { %5018 = vrot.lane.b32.xlu1 %v10067_v38, %s8073_s26 }
0x105d   : > { %v4492_v8 = vpack.c.bf16 %v4484_v32, %v4484_v32 }
0x105f   : > { %7186 = vmatmul.msk.bf16.vlgmr.msrb.gmra.mxu0 %vm1464_vm10, %v4492_v8 }
0x1060   : > { %4815 = vmatpush.bf16.xpose.msrb.mxu0 %v4806_v44 }
0x1061   : > { %v4995_v34 = vpop.permute.xlu0 %4994 }
0x1062   : > { %v5000_v3 = vsel %vm1734_vm0, %v4995_v34, 0 }
0x1063   : > { %5009 = vmatpush.bf16.msra.mxu3 %v5000_v3 }
0x1069   : > { %v5091_v26 = vpop.permute.xlu0 %5090 }
0x106a   : > { %v5096_v43 = vsel %vm1734_vm0, %v5091_v26, 0 }
0x106b   : > { %v4738_v7 = vpop.permute.xlu1 %4737  ;;  %5105 = vmatpush.bf16.msrb.mxu3 %v5096_v43 }
0x1073   : > { %v4680_v21 = vpop.permute.xlu1 %4679 }
0x1074   : > { %7190 = vmatmul.msk.bf16.vlgmr.msra.gmra.mxu0 %vm1464_vm10, %v4680_v21 }
0x1088   : > { %v4467_v51 = vpop.xlane.xlu2 %4466 }
0x1089   : > { %7662 = vrcp.f32 %v4467_v51 }
0x108f   : > { %v7663_v23 = vpop.eup %7662 }
0x1090   : > { %v4485_v45 = vmul.f32 %v7663_v23, %v10010_v18  ;;  %v4825_v18 = vpop.permute.xlu2 %4824 }
0x1092   : > { %v4493_v59 = vpack.c.bf16 %v4485_v45, %v4485_v45 }
0x1094   : > { %7187 = vmatmul.msk.bf16.vlgmr.msrb.gmra.mxu1 %vm1464_vm10, %v4493_v59 }
0x1098   : > { %v5067_v32 = vpop.permute.xlu2 %5066 }
0x1099   : > { %v10079_v40 = vpop.f32.mrf.mxu0  ;;  %v5072_v15 = vsel %vm1734_vm0, %v5067_v32, 0 }
0x109e   : > { %v4470_v5 = vpop.xlane.xlu1 %4469 }
0x109f   : > { %7664 = vrcp.f32 %v4470_v5 }
0x10a1   : > { %v4531_v49 = vpop.f32.mrf.mxu0 }
0x10a5   : > { %v7665_v16 = vpop.eup %7664 }
0x10a6   : > { %v4486_v25 = vmul.f32 %v7665_v16, %v10025_v36  ;;  %v4835_v36 = vsel %vm1464_vm10, %v4830_v14, 0 }
0x10a7   : > { %v10082_v1 = vpop.f32.mrf.mxu2  ;;  %v10084_v9 = vpop.f32.mrf.mxu1 }
0x10a8   : > { %v4494_v62 = vpack.c.bf16 %v4486_v25, %v4486_v25 }
0x10aa   : > { %7188 = vmatmul.msk.bf16.vlgmr.msrb.gmra.mxu2 %vm1464_vm10, %v4494_v62 }
0x10ab   : > { %4873 = vmatpush.bf16.xpose.msrb.mxu2 %v4864_v46 }
0x10af   : > { %v4512_v48 = vpop.f32.mrf.mxu2  ;;  %v4550_v6 = vpop.f32.mrf.mxu1 }
0x10b6   : > { %v4714_v29 = vpop.permute.xlu1 %4713 }
0x10b7   : > { %v4719_v8 = vsel %vm1464_vm10, %v4714_v29, 0  ;;  %v10089_v44 = vpop.f32.mrf.mxu2  ;;  %v10092_v34 = vpop.f32.mrf.mxu3 }
0x10b8   : > { %4728 = vmatpush.bf16.xpose.msra.mxu1 %v4719_v8 }
0x10ba   : > { %7192 = vmatmul.msk.bf16.vlgmr.msra.gmra.mxu2 %vm1464_vm10, %v4738_v7 }
0x10bb   : > { %5081 = vmatpush.bf16.msra.mxu2 %v5072_v15 }
0x10be   : > { %v4854_v3 = vpop.permute.xlu1 %4853 }
0x10bf   : > { %v4569_v26 = vpop.f32.mrf.mxu2  ;;  %7191 = vmatmul.msk.bf16.vlgmr.msra.gmra.mxu1 %vm1464_vm10, %v4709_v22  ;;  %v4588_v43 = vpop.f32.mrf.mxu3 }
0x10c0   : > { %4844 = vmatpush.bf16.xpose.msrb.mxu1 %v4835_v36 }
0x10c6   : > { %v4796_v21 = vpop.permute.xlu1 %4795 }
0x10c7   : > { %7194 = vmatmul.msk.bf16.vlgmr.msrb.gmra.mxu0 %vm1464_vm10, %v4796_v21  ;;  %v4672_v51 = vpop.f32.mrf.mxu3 }
0x10c8   : > { %v4879_v23 = vmul.f32 0.35355338, %v4672_v51 }
0x10ca   : > { %7196 = vmatmul.msk.bf16.vlgmr.msrb.gmra.mxu2 %vm1464_vm10, %v4854_v3  ;;  %v4887_v14 = vsel %vm8634_vm1, %v4879_v23, -1e+30 }
0x10cb   : > { %v4895_v45 = vsel %vm1464_vm10, %v4887_v14, -inf }
0x10cc   : > { %4896 = vmax.xlane.f32.xlu1 %v4895_v45 }
0x10ce   : > { %v5019_v7 = vpop.permute.xlu1 %5018 }
0x10cf   : > { %v5024_v59 = vsel %vm1734_vm0, %v5019_v7, 0  ;;  %7195 = vmatmul.msk.bf16.vlgmr.msrb.gmra.mxu1 %vm1464_vm10, %v4825_v18  ;;  %v4674_v22 = vpop.f32.mrf.mxu3 }
0x10d0   : > { %5033 = vmatpush.bf16.msra.mxu0 %v5024_v59 }
0x10d7   : > { %v4788_v5 = vpop.f32.mrf.mxu3 }
0x10d8   : > { %v4883_v49 = vmul.f32 0.35355338, %v4788_v5 }
0x10da   : > { %v10106_v16 = vsel %vm8634_vm1, %v4883_v49, -1e+30 }
0x10db   : > { %v4907_v25 = vsel %vm1464_vm10, %v10106_v16, -inf }
0x10dc   : > { %v10110_v62 = vpop.f32.mrf.mxu0  ;;  %4908 = vmax.xlane.f32.xlu2 %v4907_v25 }
0x10df   : > { %v4790_v46 = vpop.f32.mrf.mxu3 }
0x10e4   : > { %v4607_v48 = vpop.f32.mrf.mxu0 }
0x10f1   : > { %v4701_v6 = vpop.f32.mrf.mxu0 }
0x10f2   : > { %v4880_v29 = vmul.f32 0.35355338, %v4701_v6 }
0x10f4   : > { %v4888_v18 = vsel %vm8634_vm1, %v4880_v29, -1e+30 }
0x10f5   : > { %v4898_v32 = vsel %vm1464_vm10, %v4888_v18, -inf }
0x10f6   : > { %4899 = vmax.xlane.f32.xlu1 %v4898_v32 }
0x10f9   : > { %v4703_v8 = vpop.f32.mrf.mxu0 }
0x1111   : > { %v10115_v36 = vpop.f32.mrf.mxu1 }
0x1112   : > { %10994 = vst [vmem:[#allocation28_spill] sm:$0xff] %v10115_v36 }
0x1119   : > { %v4626_v15 = vpop.f32.mrf.mxu1 }
0x112d   : > { %v10117_v3 = vpop.f32.mrf.mxu2 }
0x112e   : > { %10995 = vst [vmem:[#allocation26_spill] sm:$0xff] %v10117_v3 }
0x1135   : > { %v4645_v26 = vpop.f32.mrf.mxu2 }
0x113c   : > { %v4730_v43 = vpop.f32.mrf.mxu1 }
0x113d   : > { %v4881_v21 = vmul.f32 0.35355338, %v4730_v43  ;;  %v4759_v51 = vpop.f32.mrf.mxu2 }
0x113e   : > { %v4882_v23 = vmul.f32 0.35355338, %v4759_v51 }
0x113f   : > { %v4889_v45 = vsel %vm8634_vm1, %v4881_v21, -1e+30  ;;  %v4897_v59 = vpop.xlane.xlu1 %4896 }
0x1140   : > { %v10123_v7 = vsel %vm8634_vm1, %v4882_v23, -1e+30  ;;  %v4901_v22 = vsel %vm1464_vm10, %v4889_v45, -inf  ;;  %v4919_v5 = vsub.f32 %v4887_v14, %v4897_v59 }
0x1141   : > { %4902 = vmax.xlane.f32.xlu1 %v4901_v22  ;;  %v4904_v49 = vsel %vm1464_vm10, %v10123_v7, -inf }
0x1142   : > { %4905 = vmax.xlane.f32.xlu0 %v4904_v49  ;;  %v4927_v25 = vmul.f32 1.442695, %v4919_v5 }
0x1144   : > { %v4732_v46 = vpop.f32.mrf.mxu1  ;;  %v4817_v48 = vpop.f32.mrf.mxu0  ;;  %7666 = vpow2.f32 %v4927_v25 }
0x1145   : > { %v4884_v6 = vmul.f32 0.35355338, %v4817_v48  ;;  %v4761_v29 = vpop.f32.mrf.mxu2  ;;  %v5112_v48 = vunpack.c.l.b16 %v9843_v42  ;;  %v5136_v42 = vunpack.c.l.b16 %v9868_v47  ;;  %v5186_v47 = vpop.permute.xlu0 %5185 }
0x1147   : > { %v10130_v32 = vsel %vm8634_vm1, %v4884_v6, -1e+30  ;;  %v10148_v6 = vpack.c.b16 %v5112_v48, %v5112_v48 }
0x1148   : > { %v4910_v8 = vsel %vm1464_vm10, %v10130_v32, -inf }
0x114a   : > { %4911 = vmax.xlane.f32.xlu0 %v4910_v8  ;;  %v10134_v14 = vpop.eup %7666 }
0x114b   : > { %v4943_v15 = vsel %vm1464_vm10, %v10134_v14, 0.0 }
0x114c   : > { %v4819_v26 = vpop.f32.mrf.mxu0  ;;  %v4846_v43 = vpop.f32.mrf.mxu1  ;;  %4944 = vadd.xlane.f32.xlu2 %v4943_v15 }
0x114d   : > { %v4885_v21 = vmul.f32 0.35355338, %v4846_v43  ;;  %v4875_v51 = vpop.f32.mrf.mxu2 }
0x114e   : > { %v4886_v23 = vmul.f32 0.35355338, %v4875_v51 }
0x114f   : > { %v10140_v59 = vsel %vm8634_vm1, %v4885_v21, -1e+30  ;;  %v5040_v21 = vunpack.c.l.b16 %v9846_v10 }
0x1150   : > { %v4894_v22 = vsel %vm8634_vm1, %v4886_v23, -1e+30  ;;  %v4913_v5 = vsel %vm1464_vm10, %v10140_v59, -inf  ;;  %v4909_v23 = vpop.xlane.xlu2 %4908 }
0x1151   : > { %4914 = vmax.xlane.f32.xlu1 %v4913_v5  ;;  %v4916_v49 = vsel %vm1464_vm10, %v4894_v22, -inf  ;;  %v10168_v51 = vpack.c.b16 %v5040_v21, %v5040_v21 }
0x1152   : > { %4917 = vmax.xlane.f32.xlu0 %v4916_v49 }
0x1154   : > { %v4848_v25 = vpop.f32.mrf.mxu1 }
0x1155   : > { %v4877_v46 = vpop.f32.mrf.mxu2  ;;  %v4923_v25 = vsub.f32 %v10106_v16, %v4909_v23 }
0x1166   : > { %5114 = vrot.lane.b32.xlu0 %v10148_v6, %s8073_s26 }
0x1169   : > { %v4900_v29 = vpop.xlane.xlu1 %4899 }
0x116a   : > { %v4920_v8 = vsub.f32 %v4888_v18, %v4900_v29  ;;  %v10163_v18 = vpack.c.b16 %v5136_v42, %v5136_v42  ;;  %v4935_v29 = vmul.f32 1.442695, %v4923_v25 }
0x116c   : > { %v4929_v15 = vmul.f32 1.442695, %v4920_v8 }
0x116e   : > { %7668 = vpow2.f32 %v4929_v15  ;;  %5183 = vrot.lane.b32.xlu0 %v9899_v35, %s8074_s1 }
0x1174   : > { %v10154_v26 = vpop.eup %7668 }
0x1175   : > { %v4946_v43 = vsel %vm1464_vm10, %v10154_v26, 0.0 }
0x1176   : > { %4947 = vadd.xlane.f32.xlu1 %v4946_v43  ;;  %5254 = vrot.lane.b32.xlu0 %v9888_v20, %s8074_s1 }
0x117e   : > { %5277 = vrot.lane.b32.xlu0 %v9957_v39, %s8074_s1 }
0x1186   : > { %5138 = vrot.lane.b32.xlu0 %v10163_v18, %s8073_s26 }
0x118e   : > { %5275 = vrot.lane.b32.xlu0 %v9949_v63, %s8074_s1 }
0x118f   : > { %5042 = vrot.lane.b32.xlu1 %v10168_v51, %s8073_s26 }
0x1196   : > { %5346 = vrot.lane.b32.xlu0 %v9959_v37, %s8074_s1 }
0x1197   : > { %5208 = vrot.lane.b32.xlu1 %v9944_v11, %s8074_s1 }
0x119f   : > { %5252 = vrot.lane.b32.xlu1 %v9994_v12, %s8074_s1 }
0x11b4   : > { %v4903_v10 = vpop.xlane.xlu1 %4902 }
0x11b5   : > { %v4921_v5 = vsub.f32 %v4889_v45, %v4903_v10  ;;  %v4906_v49 = vpop.xlane.xlu0 %4905 }
0x11b6   : > { %v4922_v48 = vsub.f32 %v10123_v7, %v4906_v49 }
0x11b7   : > { %v4931_v46 = vmul.f32 1.442695, %v4921_v5 }
0x11b8   : > { %v4933_v8 = vmul.f32 1.442695, %v4922_v48 }
0x11b9   : > { %7670 = vpow2.f32 %v4931_v46 }
0x11ba   : > { %7672 = vpow2.f32 %v4935_v29  ;;  %v5191_v29 = vsel %vm1464_vm10, %v5186_v47, 0 }
0x11bb   : > { %7674 = vpow2.f32 %v4933_v8 }
0x11bd   : > { %v4912_v15 = vpop.xlane.xlu0 %4911 }
0x11bf   : > { %v10182_v43 = vpop.eup %7670  ;;  %v4945_v42 = vpop.xlane.xlu2 %4944 }
0x11c0   : > { %v4949_v21 = vsel %vm1464_vm10, %v10182_v43, 0.0  ;;  %7676 = vrcp.f32 %v4945_v42  ;;  %v10186_v45 = vpop.eup %7672 }
0x11c1   : > { %4950 = vadd.xlane.f32.xlu2 %v4949_v21  ;;  %v10188_v16 = vpop.eup %7674  ;;  %v4955_v46 = vsel %vm1464_vm10, %v10186_v45, 0.0  ;;  %v5160_v21 = vunpack.c.l.b16 %v10018_v0 }
0x11c2   : > { %v4952_v25 = vsel %vm1464_vm10, %v10188_v16, 0.0 }
0x11c5   : > { %v4918_v23 = vpop.xlane.xlu0 %4917 }
0x11c6   : > { %v4926_v7 = vsub.f32 %v4894_v22, %v4918_v23  ;;  %v7677_v10 = vpop.eup %7676  ;;  %v10203_v23 = vpack.c.b16 %v5160_v21, %v5160_v21 }
0x11c7   : > { %v4975_v5 = vmul.f32 %v7677_v10, %v10134_v14 }
0x11c8   : > { %v4941_v49 = vmul.f32 1.442695, %v4926_v7  ;;  %v4915_v7 = vpop.xlane.xlu1 %4914 }
0x11c9   : > { %4953 = vadd.xlane.f32.xlu1 %v4952_v25  ;;  %4956 = vadd.xlane.f32.xlu2 %v4955_v46  ;;  %v4983_v48 = vpack.c.bf16 %v4975_v5, %v4975_v5 }
0x11ca   : > { %7678 = vpow2.f32 %v4941_v49 }
0x11cb   : > { %7197 = vmatmul.msk.bf16.vlgmr.msra.gmra.mxu3 %vm1464_vm10, %v4983_v48  ;;  %v4925_v48 = vsub.f32 %v10140_v59, %v4915_v7 }
0x11cc   : > { %5200 = vmatpush.bf16.xpose.msra.mxu3 %v5191_v29  ;;  %v4924_v29 = vsub.f32 %v10130_v32, %v4912_v15 }
0x11d0   : > { %v10197_v22 = vpop.eup %7678 }
0x11d1   : > { %v4964_v14 = vsel %vm1464_vm10, %v10197_v22, 0.0 }
0x11d2   : > { %4965 = vadd.xlane.f32.xlu0 %v4964_v14  ;;  %v4939_v14 = vmul.f32 1.442695, %v4925_v48 }
0x11d8   : > { %v5115_v8 = vpop.permute.xlu0 %5114 }
0x11d9   : > { %v5120_v42 = vsel %vm1734_vm0, %v5115_v8, 0  ;;  %v4937_v8 = vmul.f32 1.442695, %v4924_v29 }
0x11da   : > { %5129 = vmatpush.bf16.msrb.mxu0 %v5120_v42 }
0x11e0   : > { %v10207_v47 = vpop.permute.xlu0 %5183 }
0x11e1   : > { %5162 = vrot.lane.b32.xlu2 %v10203_v23, %s8073_s26 }
0x11e2   : > { %5206 = vrot.lane.b32.xlu1 %v10001_v4, %s8074_s1 }
0x11e6   : > { %5344 = vrot.lane.b32.xlu0 %v10056_v13, %s8074_s1 }
0x11e8   : > { %v5255_v5 = vpop.permute.xlu0 %5254 }
0x11e9   : > { %v4948_v10 = vpop.xlane.xlu1 %4947 }
0x11ea   : > { %7680 = vrcp.f32 %v4948_v10 }
0x11eb   : > { %7682 = vpow2.f32 %v4939_v14 }
0x11ec   : > { %7684 = vpow2.f32 %v4937_v8 }
0x11ee   : > { %5298 = vrot.lane.b32.xlu0 %v10061_v41, %s8074_s1 }
0x11f0   : > { %v7681_v0 = vpop.eup %7680  ;;  %v5278_v46 = vpop.permute.xlu0 %5277 }
0x11f1   : > { %v4976_v49 = vmul.f32 %v7681_v0, %v10154_v26  ;;  %v10225_v0 = vpop.eup %7682 }
0x11f2   : > { %v10227_v59 = vpop.eup %7684  ;;  %v4961_v15 = vsel %vm1464_vm10, %v10225_v0, 0.0 }
0x11f3   : > { %v4984_v25 = vpack.c.bf16 %v4976_v49, %v4976_v49  ;;  %v4958_v49 = vsel %vm1464_vm10, %v10227_v59, 0.0 }
0x11f5   : > { %7198 = vmatmul.msk.bf16.vlgmr.msra.gmra.mxu0 %vm1464_vm10, %v4984_v25 }
0x11f6   : > { %5321 = vrot.lane.b32.xlu0 %v10031_v33, %s8074_s1 }
0x11f8   : > { %v5139_v42 = vpop.permute.xlu0 %5138 }
0x11f9   : > { %v5144_v10 = vsel %vm1734_vm0, %v5139_v42, 0 }
0x11fe   : > { %5500 = vrot.lane.b32.xlu0 %v10067_v38, %s8074_s1 }
0x1200   : > { %v5276_v29 = vpop.permute.xlu0 %5275 }
0x1201   : > { %v5043_v21 = vpop.permute.xlu1 %5042 }
0x1202   : > { %v5048_v26 = vsel %vm1734_vm0, %v5043_v21, 0 }
0x1203   : > { %5057 = vmatpush.bf16.msra.mxu1 %v5048_v26 }
0x1207   : > { %5153 = vmatpush.bf16.msrb.mxu1 %v5144_v10 }
0x1208   : > { %v5347_v10 = vpop.permute.xlu0 %5346 }
0x1209   : > { %v5209_v32 = vpop.permute.xlu1 %5208 }
0x120a   : > { %v5214_v7 = vsel %vm1464_vm10, %v5209_v32, 0  ;;  %4962 = vadd.xlane.f32.xlu2 %v4961_v15 }
0x120b   : > { %5223 = vmatpush.bf16.xpose.msra.mxu0 %v5214_v7 }
0x120c   : > { %4959 = vadd.xlane.f32.xlu1 %v4958_v49 }
0x1211   : > { %v5253_v25 = vpop.permute.xlu1 %5252 }
0x1222   : > { %5300 = vrot.lane.b32.xlu2 %v9967_v24, %s8074_s1 }
0x1225   : > { %5231 = vrot.lane.b32.xlu1 %v10049_v55, %s8074_s1 }
0x122a   : > { %5542 = vrot.lane.b32.xlu2 %v10039_v61, %s8074_s1 }
0x122d   : > { %5229 = vrot.lane.b32.xlu1 %v9972_v27, %s8074_s1 }
0x1234   : > { %v4951_v48 = vpop.xlane.xlu2 %4950 }
0x1235   : > { %7686 = vrcp.f32 %v4951_v48  ;;  %5323 = vrot.lane.b32.xlu1 %v9981_v60, %s8074_s1 }
0x123b   : > { %v7687_v14 = vpop.eup %7686 }
0x123c   : > { %v4977_v8 = vmul.f32 %v7687_v14, %v10182_v43  ;;  %v4957_v42 = vpop.xlane.xlu2 %4956  ;;  %v4954_v21 = vpop.xlane.xlu1 %4953 }
0x123d   : > { %7688 = vrcp.f32 %v4957_v42  ;;  %5479 = vrot.lane.b32.xlu1 %v9986_v52, %s8074_s1 }
0x123e   : > { %v4985_v26 = vpack.c.bf16 %v4977_v8, %v4977_v8  ;;  %7690 = vrcp.f32 %v4954_v21  ;;  %v5283_v21 = vsel %vm1464_vm10, %v5278_v46, 0  ;;  %v5352_v46 = vsel %vm1464_vm10, %v5347_v10, 0 }
0x1240   : > { %7199 = vmatmul.msk.bf16.vlgmr.msra.gmra.mxu1 %vm1464_vm10, %v4985_v26  ;;  %v5260_v26 = vsel %vm1464_vm10, %v5255_v5, 0 }
0x1243   : > { %v7689_v32 = vpop.eup %7688 }
0x1244   : > { %v7691_v15 = vpop.eup %7690  ;;  %v4979_v7 = vmul.f32 %v7689_v32, %v10186_v45  ;;  %v5163_v49 = vpop.permute.xlu2 %5162 }
0x1245   : > { %v4978_v48 = vmul.f32 %v7691_v15, %v10188_v16  ;;  %v5168_v43 = vsel %vm1734_vm0, %v5163_v49, 0  ;;  %5563 = vrot.lane.b32.xlu1 %v9992_v17, %s8074_s1  ;;  %v4966_v8 = vpop.xlane.xlu0 %4965 }
0x1246   : > { %v4987_v14 = vpack.c.bf16 %v4979_v7, %v4979_v7  ;;  %5177 = vmatpush.bf16.msrb.mxu2 %v5168_v43  ;;  %7692 = vrcp.f32 %v4966_v8 }
0x1247   : > { %v4986_v42 = vpack.c.bf16 %v4978_v48, %v4978_v48 }
0x1248   : > { %7201 = vmatmul.msk.bf16.vlgmr.msrb.gmra.mxu3 %vm1464_vm10, %v4987_v14 }
0x1249   : > { %7200 = vmatmul.msk.bf16.vlgmr.msra.gmra.mxu2 %vm1464_vm10, %v4986_v42  ;;  %5292 = vmatpush.bf16.xpose.msrb.mxu3 %v5283_v21 }
0x124a   : > { %5269 = vmatpush.bf16.xpose.msra.mxu2 %v5260_v26 }
0x124c   : > { %v7693_v16 = vpop.eup %7692 }
0x124d   : > { %v4982_v32 = vmul.f32 %v7693_v16, %v10197_v22 }
0x124e   : > { %v10257_v45 = vpop.f32.mrf.mxu3 }
0x124f   : > { %v4990_v15 = vpack.c.bf16 %v4982_v32, %v4982_v32 }
0x1254   : > { %v5207_v49 = vpop.permute.xlu1 %5206 }
0x1256   : > { %v5013_v7 = vpop.f32.mrf.mxu3 }
0x1258   : > { %7205 = vmatmul.msk.bf16.vlgmr.msra.gmra.mxu3 %vm1464_vm10, %v10207_v47  ;;  %v5345_v48 = vpop.permute.xlu0 %5344 }
0x1259   : > { %7204 = vmatmul.msk.bf16.vlgmr.msrb.gmra.mxu2 %vm1464_vm10, %v4990_v15 }
0x125a   : > { %5361 = vmatpush.bf16.xpose.msrb.mxu2 %v5352_v46 }
0x1260   : > { %v5299_v10 = vpop.permute.xlu0 %5298 }
0x1268   : > { %7209 = vmatmul.msk.bf16.vlgmr.msrb.gmra.mxu3 %vm1464_vm10, %v5276_v29  ;;  %v5322_v15 = vpop.permute.xlu0 %5321 }
0x1269   : > { %7208 = vmatmul.msk.bf16.vlgmr.msra.gmra.mxu2 %vm1464_vm10, %v5253_v25 }
0x1272   : > { %v10266_v5 = vpop.f32.mrf.mxu0 }
0x1279   : > { %7212 = vmatmul.msk.bf16.vlgmr.msrb.gmra.mxu2 %vm1464_vm10, %v5345_v48 }
0x127a   : > { %v5037_v22 = vpop.f32.mrf.mxu0 }
0x127d   : > { %v4963_v43 = vpop.xlane.xlu2 %4962 }
0x127e   : > { %7694 = vrcp.f32 %v4963_v43 }
0x127f   : > { %v4960_v14 = vpop.xlane.xlu1 %4959 }
0x1280   : > { %7696 = vrcp.f32 %v4960_v14 }
0x1284   : > { %v7695_v47 = vpop.eup %7694 }
0x1285   : > { %v4981_v42 = vmul.f32 %v7695_v47, %v10225_v0  ;;  %v5301_v8 = vpop.permute.xlu2 %5300  ;;  %v5501_v0 = vpop.permute.xlu0 %5500 }
0x1286   : > { %v7697_v21 = vpop.eup %7696  ;;  %v5306_v16 = vsel %vm1464_vm10, %v5301_v8, 0 }
0x1287   : > { %v4989_v29 = vpack.c.bf16 %v4981_v42, %v4981_v42  ;;  %v4980_v25 = vmul.f32 %v7697_v21, %v10227_v59  ;;  %v5506_v59 = vsel %vm1734_vm0, %v5501_v0, 0 }
0x1289   : > { %v4988_v26 = vpack.c.bf16 %v4980_v25, %v4980_v25  ;;  %7203 = vmatmul.msk.bf16.vlgmr.msrb.gmra.mxu1 %vm1464_vm10, %v4989_v29 }
0x128b   : > { %7202 = vmatmul.msk.bf16.vlgmr.msrb.gmra.mxu0 %vm1464_vm10, %v4988_v26 }
0x128c   : > { %5315 = vmatpush.bf16.xpose.msrb.mxu0 %v5306_v16 }
0x128d   : > { %v5543_v32 = vpop.permute.xlu2 %5542 }
0x128e   : > { %v5548_v7 = vsel %vm1734_vm0, %v5543_v32, 0 }
0x128f   : > { %5557 = vmatpush.bf16.msra.mxu2 %v5548_v7 }
0x1297   : > { %v5232_v46 = vpop.permute.xlu1 %5231 }
0x1298   : > { %v5237_v48 = vsel %vm1464_vm10, %v5232_v46, 0 }
0x1299   : > { %5246 = vmatpush.bf16.xpose.msra.mxu1 %v5237_v48 }
0x129b   : > { %7206 = vmatmul.msk.bf16.vlgmr.msra.gmra.mxu0 %vm1464_vm10, %v5207_v49 }
0x129c   : > { %5515 = vmatpush.bf16.msra.mxu0 %v5506_v59 }
0x129f   : > { %v5230_v22 = vpop.permute.xlu1 %5229 }
0x12a0   : > { %7207 = vmatmul.msk.bf16.vlgmr.msra.gmra.mxu1 %vm1464_vm10, %v5230_v22 }
0x12a7   : > { %v5324_v43 = vpop.permute.xlu1 %5323 }
0x12a8   : > { %v5329_v14 = vsel %vm1464_vm10, %v5324_v43, 0 }
0x12a9   : > { %5338 = vmatpush.bf16.xpose.msrb.mxu1 %v5329_v14 }
0x12ab   : > { %7210 = vmatmul.msk.bf16.vlgmr.msrb.gmra.mxu0 %vm1464_vm10, %v5299_v10 }
0x12af   : > { %v5480_v47 = vpop.permute.xlu1 %5479 }
0x12b0   : > { %v5485_v42 = vsel %vm1734_vm0, %v5480_v47, 0  ;;  %7211 = vmatmul.msk.bf16.vlgmr.msrb.gmra.mxu1 %vm1464_vm10, %v5322_v15 }
0x12b1   : > { %5494 = vmatpush.bf16.msra.mxu3 %v5485_v42 }
0x12b7   : > { %v5564_v8 = vpop.permute.xlu1 %5563 }
0x12b8   : > { %v5569_v21 = vsel %vm1734_vm0, %v5564_v8, 0 }
0x12b9   : > { %5578 = vmatpush.bf16.msrb.mxu3 %v5569_v21 }
0x12bd   : > { %v10284_v49 = vpop.f32.mrf.mxu1 }
0x12c5   : > { %v5061_v29 = vpop.f32.mrf.mxu1 }
0x12cb   : > { %v10286_v25 = vpop.f32.mrf.mxu3 }
0x12cc   : > { %v10288_v26 = vpop.f32.mrf.mxu2 }
0x12d3   : > { %v5109_v16 = vpop.f32.mrf.mxu3 }
0x12d4   : > { %v5085_v32 = vpop.f32.mrf.mxu2 }
0x12db   : > { %v5202_v10 = vpop.f32.mrf.mxu3 }
0x12dc   : > { %v10290_v7 = vpop.f32.mrf.mxu2  ;;  %v5367_v46 = vmul.f32 0.35355338, %v5202_v10 }
0x12de   : > { %v5375_v15 = vsel %vm8634_vm1, %v5367_v46, -1e+30 }
0x12df   : > { %v5383_v0 = vsel %vm1464_vm10, %v5375_v15, -inf }
0x12e0   : > { %5384 = vmax.xlane.f32.xlu1 %v5383_v0 }
0x12e3   : > { %v5204_v48 = vpop.f32.mrf.mxu3 }
0x12e4   : > { %v5181_v59 = vpop.f32.mrf.mxu2 }
0x12eb   : > { %v5294_v22 = vpop.f32.mrf.mxu3 }
0x12ec   : > { %v5271_v43 = vpop.f32.mrf.mxu2  ;;  %v5371_v14 = vmul.f32 0.35355338, %v5294_v22 }
0x12ed   : > { %v5370_v30 = vmul.f32 0.35355338, %v5271_v43 }
0x12ee   : > { %v10297_v47 = vsel %vm8634_vm1, %v5371_v14, -1e+30 }
0x12ef   : > { %v5395_v42 = vsel %vm1464_vm10, %v10297_v47, -inf }
0x12f0   : > { %5396 = vmax.xlane.f32.xlu1 %v5395_v42 }
0x12f3   : > { %v5296_v8 = vpop.f32.mrf.mxu3 }
0x12f4   : > { %v5273_v21 = vpop.f32.mrf.mxu2 }
0x12fc   : > { %v5363_v29 = vpop.f32.mrf.mxu2 }
0x12fd   : > { %v5374_v16 = vmul.f32 0.35355338, %v5363_v29 }
0x12ff   : > { %v10303_v32 = vsel %vm8634_vm1, %v5374_v16, -1e+30 }
0x1300   : > { %v5404_v10 = vsel %vm1464_vm10, %v10303_v32, -inf }
0x1301   : > { %5405 = vmax.xlane.f32.xlu1 %v5404_v10 }
0x1304   : > { %v5365_v46 = vpop.f32.mrf.mxu2 }
0x1306   : > { %v10307_v0 = vpop.f32.mrf.mxu1 }
0x1308   : > { %v10309_v48 = vpop.f32.mrf.mxu0 }
0x130e   : > { %v5157_v59 = vpop.f32.mrf.mxu1 }
0x1310   : > { %v5133_v22 = vpop.f32.mrf.mxu0 }
0x1318   : > { %v5225_v14 = vpop.f32.mrf.mxu0 }
0x1319   : > { %v5368_v42 = vmul.f32 0.35355338, %v5225_v14 }
0x131a   : > { %5521 = vrot.lane.b32.xlu1 %v10168_v51, %s8074_s1 }
0x131b   : > { %v5376_v8 = vsel %vm8634_vm1, %v5368_v42, -1e+30 }
0x131c   : > { %v5386_v21 = vsel %vm1464_vm10, %v5376_v8, -inf }
0x131d   : > { %v5248_v29 = vpop.f32.mrf.mxu1  ;;  %5387 = vmax.xlane.f32.xlu2 %v5386_v21 }
0x131e   : > { %v5369_v16 = vmul.f32 0.35355338, %v5248_v29 }
0x1320   : > { %v5227_v10 = vpop.f32.mrf.mxu0  ;;  %v5377_v46 = vsel %vm8634_vm1, %v5369_v16, -1e+30  ;;  %v5378_v16 = vsel %vm8634_vm1, %v5370_v30, -1e+30 }
0x1321   : > { %v5389_v59 = vsel %vm1464_vm10, %v5377_v46, -inf }
0x1325   : > { %v5250_v22 = vpop.f32.mrf.mxu1  ;;  %5390 = vmax.xlane.f32.xlu2 %v5389_v59 }
0x1326   : > { %v5392_v22 = vsel %vm1464_vm10, %v5378_v16, -inf }
0x1328   : > { %v5317_v14 = vpop.f32.mrf.mxu0 }
0x1329   : > { %v5372_v56 = vmul.f32 0.35355338, %v5317_v14 }
0x132b   : > { %v5380_v3 = vsel %vm8634_vm1, %v5372_v56, -1e+30 }
0x132c   : > { %v5398_v42 = vsel %vm1464_vm10, %v5380_v3, -inf }
0x132d   : > { %v5340_v36 = vpop.f32.mrf.mxu1  ;;  %5399 = vmax.xlane.f32.xlu0 %v5398_v42 }
0x132e   : > { %v5373_v21 = vmul.f32 0.35355338, %v5340_v36 }
0x1330   : > { %v5381_v29 = vsel %vm8634_vm1, %v5373_v21, -1e+30  ;;  %v5319_v10 = vpop.f32.mrf.mxu0 }
0x1331   : > { %v5401_v59 = vsel %vm1464_vm10, %v5381_v29, -inf }
0x1332   : > { %5402 = vmax.xlane.f32.xlu2 %v5401_v59 }
0x1335   : > { %v5342_v14 = vpop.f32.mrf.mxu1  ;;  %5393 = vmax.xlane.f32.xlu0 %v5392_v22 }
0x1349   : > { %5584 = vrot.lane.b32.xlu0 %v10148_v6, %s8074_s1 }
0x134a   : > { %5649 = vrot.lane.b32.xlu2 %v9895_v50, %s8075_s7 }
0x1351   : > { %5626 = vrot.lane.b32.xlu0 %v10203_v23, %s8074_s1 }
0x1352   : > { %5672 = vrot.lane.b32.xlu2 %v9944_v11, %s8075_s7 }
0x1353   : > { %v5385_v30 = vpop.xlane.xlu1 %5384 }
0x1354   : > { %v5407_v56 = vsub.f32 %v5375_v15, %v5385_v30 }
0x1356   : > { %v5415_v43 = vmul.f32 1.442695, %v5407_v56 }
0x1358   : > { %7698 = vpow2.f32 %v5415_v43 }
0x1359   : > { %5647 = vrot.lane.b32.xlu0 %v9899_v35, %s8075_s7 }
0x135a   : > { %5718 = vrot.lane.b32.xlu2 %v9888_v20, %s8075_s7 }
0x135e   : > { %v10344_v42 = vpop.eup %7698 }
0x135f   : > { %v5431_v11 = vsel %vm1464_vm10, %v10344_v42, 0.0 }
0x1361   : > { %5605 = vrot.lane.b32.xlu0 %v10163_v18, %s8074_s1 }
0x1363   : > { %v5397_v36 = vpop.xlane.xlu1 %5396 }
0x1364   : > { %v5411_v59 = vsub.f32 %v10297_v47, %v5397_v36 }
0x1366   : > { %v5423_v22 = vmul.f32 1.442695, %v5411_v59 }
0x1374   : > { %v10342_v50 = vpop.xlane.xlu1 %5405 }
0x138b   : > { %5432 = vadd.xlane.f32.xlu0 %v5431_v11 }
0x138c   : > { %v5522_v35 = vpop.permute.xlu1 %5521 }
0x138d   : > { %v5527_v21 = vsel %vm1734_vm0, %v5522_v35, 0 }
0x138e   : > { %5536 = vmatpush.bf16.msra.mxu1 %v5527_v21 }
0x1390   : > { %v5388_v20 = vpop.xlane.xlu2 %5387 }
0x1391   : > { %v5408_v10 = vsub.f32 %v5376_v8, %v5388_v20 }
0x1393   : > { %v5417_v15 = vmul.f32 1.442695, %v5408_v10 }
0x1395   : > { %7700 = vpow2.f32 %v5417_v15 }
0x1396   : > { %7702 = vpow2.f32 %v5423_v22 }
0x1398   : > { %v5391_v14 = vpop.xlane.xlu2 %5390 }
0x1399   : > { %v5409_v30 = vsub.f32 %v5377_v46, %v5391_v14 }
0x139b   : > { %v10350_v56 = vpop.eup %7700  ;;  %v5419_v43 = vmul.f32 1.442695, %v5409_v30 }
0x139c   : > { %v5434_v11 = vsel %vm1464_vm10, %v10350_v56, 0.0  ;;  %v10354_v21 = vpop.eup %7702 }
0x139d   : > { %7704 = vpow2.f32 %v5419_v43  ;;  %5435 = vadd.xlane.f32.xlu2 %v5434_v11  ;;  %v5443_v36 = vsel %vm1464_vm10, %v10354_v21, 0.0 }
0x13a0   : > { %v5400_v35 = vpop.xlane.xlu0 %5399 }
0x13a1   : > { %v5412_v8 = vsub.f32 %v5380_v3, %v5400_v35 }
0x13a3   : > { %v10356_v20 = vpop.eup %7704  ;;  %v5425_v47 = vmul.f32 1.442695, %v5412_v8 }
0x13a4   : > { %v5437_v46 = vsel %vm1464_vm10, %v10356_v20, 0.0 }
0x13a5   : > { %7706 = vpow2.f32 %v5425_v47  ;;  %5444 = vadd.xlane.f32.xlu2 %v5443_v36  ;;  %5438 = vadd.xlane.f32.xlu1 %v5437_v46  ;;  %v5403_v10 = vpop.xlane.xlu2 %5402 }
0x13a6   : > { %v5413_v59 = vsub.f32 %v5381_v29, %v5403_v10 }
0x13a8   : > { %v5427_v15 = vmul.f32 1.442695, %v5413_v59  ;;  %v5394_v22 = vpop.xlane.xlu0 %5393 }
0x13a9   : > { %v5410_v14 = vsub.f32 %v5378_v16, %v5394_v22 }
0x13aa   : > { %7708 = vpow2.f32 %v5427_v15 }
0x13ab   : > { %v10362_v30 = vpop.eup %7706  ;;  %v5421_v3 = vmul.f32 1.442695, %v5410_v14 }
0x13ac   : > { %v5446_v43 = vsel %vm1464_vm10, %v10362_v30, 0.0 }
0x13ad   : > { %7710 = vpow2.f32 %v5421_v3  ;;  %5447 = vadd.xlane.f32.xlu0 %v5446_v43 }
0x13b0   : > { %v10366_v11 = vpop.eup %7708 }
0x13b1   : > { %v5449_v35 = vsel %vm1464_vm10, %v10366_v11, 0.0 }
0x13b2   : > { %5450 = vadd.xlane.f32.xlu1 %v5449_v35 }
0x13b3   : > { %v10370_v8 = vpop.eup %7710 }
0x13b4   : > { %v5440_v29 = vsel %vm1464_vm10, %v10370_v8, 0.0 }
0x13b5   : > { %5441 = vadd.xlane.f32.xlu0 %v5440_v29 }
0x13bb   : > { %v5585_v16 = vpop.permute.xlu0 %5584 }
0x13bc   : > { %v5590_v47 = vsel %vm1734_vm0, %v5585_v16, 0 }
0x13bd   : > { %5716 = vrot.lane.b32.xlu2 %v9994_v12, %s8075_s7  ;;  %5599 = vmatpush.bf16.msrb.mxu0 %v5590_v47  ;;  %v5414_v12 = vsub.f32 %v10303_v32, %v10342_v50 }
0x13bf   : > { %v5429_v22 = vmul.f32 1.442695, %v5414_v12 }
0x13c1   : > { %7712 = vpow2.f32 %v5429_v22 }
0x13c3   : > { %v5627_v36 = vpop.permute.xlu0 %5626 }
0x13c4   : > { %v5632_v46 = vsel %vm1734_vm0, %v5627_v36, 0 }
0x13c5   : > { %5641 = vmatpush.bf16.msrb.mxu2 %v5632_v46 }
0x13c9   : > { %5670 = vrot.lane.b32.xlu0 %v10001_v4, %s8075_s7 }
0x13cb   : > { %5739 = vrot.lane.b32.xlu1 %v9949_v63, %s8075_s7  ;;  %v10382_v10 = vpop.permute.xlu0 %5647  ;;  %v10393_v63 = vpop.eup %7712 }
0x13cc   : > { %v5452_v4 = vsel %vm1464_vm10, %v10393_v63, 0.0 }
0x13d1   : > { %5695 = vrot.lane.b32.xlu0 %v10049_v55, %s8075_s7  ;;  %v5650_v55 = vpop.permute.xlu2 %5649 }
0x13d3   : > { %v5606_v59 = vpop.permute.xlu0 %5605 }
0x13d4   : > { %v5611_v15 = vsel %vm1734_vm0, %v5606_v59, 0 }
0x13d5   : > { %5620 = vmatpush.bf16.msrb.mxu1 %v5611_v15 }
0x13d9   : > { %5693 = vrot.lane.b32.xlu0 %v9972_v27, %s8075_s7  ;;  %v5673_v32 = vpop.permute.xlu2 %5672 }
0x13da   : > { %v5678_v29 = vsel %vm1464_vm10, %v5673_v32, 0 }
0x13e1   : > { %5810 = vrot.lane.b32.xlu0 %v9959_v37, %s8075_s7  ;;  %v5719_v14 = vpop.permute.xlu2 %5718 }
0x13e6   : > { %5453 = vadd.xlane.f32.xlu2 %v5452_v4 }
0x13e9   : > { %5808 = vrot.lane.b32.xlu0 %v10056_v13, %s8075_s7  ;;  %v5655_v13 = vsel %vm1464_vm10, %v5650_v55, 0 }
0x13f1   : > { %5785 = vrot.lane.b32.xlu0 %v10031_v33, %s8075_s7 }
0x13fe   : > { %5741 = vrot.lane.b32.xlu2 %v9957_v39, %s8075_s7  ;;  %v5433_v27 = vpop.xlane.xlu0 %5432 }
0x13ff   : > { %7714 = vrcp.f32 %v5433_v27 }
0x1405   : > { %v7715_v37 = vpop.eup %7714 }
0x1406   : > { %v5463_v50 = vmul.f32 %v7715_v37, %v10344_v42  ;;  %5764 = vrot.lane.b32.xlu2 %v9967_v24, %s8075_s7 }
0x1408   : > { %v5471_v3 = vpack.c.bf16 %v5463_v50, %v5463_v50  ;;  %v5724_v50 = vsel %vm1464_vm10, %v5719_v14, 0 }
0x140a   : > { %7213 = vmatmul.msk.bf16.vlgmr.msra.gmra.mxu3 %vm1464_vm10, %v5471_v3 }
0x140b   : > { %5664 = vmatpush.bf16.xpose.msra.mxu3 %v5655_v13 }
0x140e   : > { %5762 = vrot.lane.b32.xlu2 %v10061_v41, %s8075_s7 }
0x1410   : > { %v5436_v33 = vpop.xlane.xlu2 %5435 }
0x1411   : > { %7716 = vrcp.f32 %v5436_v33 }
0x1416   : > { %5787 = vrot.lane.b32.xlu2 %v9981_v60, %s8075_s7 }
0x1417   : > { %v7717_v39 = vpop.eup %7716 }
0x1418   : > { %v5464_v42 = vmul.f32 %v7717_v39, %v10350_v56  ;;  %v5439_v43 = vpop.xlane.xlu1 %5438  ;;  %v5445_v24 = vpop.xlane.xlu2 %5444 }
0x1419   : > { %7718 = vrcp.f32 %v5439_v43 }
0x141a   : > { %v5472_v35 = vpack.c.bf16 %v5464_v42, %v5464_v42  ;;  %7720 = vrcp.f32 %v5445_v24 }
0x141c   : > { %7214 = vmatmul.msk.bf16.vlgmr.msra.gmra.mxu0 %vm1464_vm10, %v5472_v35 }
0x141d   : > { %5687 = vmatpush.bf16.xpose.msra.mxu0 %v5678_v29 }
0x141f   : > { %v7719_v16 = vpop.eup %7718 }
0x1420   : > { %v7721_v41 = vpop.eup %7720  ;;  %v5465_v47 = vmul.f32 %v7719_v16, %v10356_v20  ;;  %v5448_v36 = vpop.xlane.xlu0 %5447 }
0x1421   : > { %v5467_v60 = vmul.f32 %v7721_v41, %v10354_v21  ;;  %7722 = vrcp.f32 %v5448_v36  ;;  %v5717_v13 = vpop.permute.xlu2 %5716 }
0x1422   : > { %v5473_v46 = vpack.c.bf16 %v5465_v47, %v5465_v47 }
0x1423   : > { %v5475_v56 = vpack.c.bf16 %v5467_v60, %v5467_v60 }
0x1424   : > { %7215 = vmatmul.msk.bf16.vlgmr.msra.gmra.mxu1 %vm1464_vm10, %v5473_v46 }
0x1425   : > { %7217 = vmatmul.msk.bf16.vlgmr.msrb.gmra.mxu3 %vm1464_vm10, %v5475_v56  ;;  %v5451_v59 = vpop.xlane.xlu1 %5450 }
0x1426   : > { %7724 = vrcp.f32 %v5451_v59 }
0x1427   : > { %v7723_v12 = vpop.eup %7722 }
0x1428   : > { %v5468_v15 = vmul.f32 %v7723_v12, %v10362_v30  ;;  %v5442_v22 = vpop.xlane.xlu0 %5441 }
0x1429   : > { %7726 = vrcp.f32 %v5442_v22 }
0x142a   : > { %v5476_v4 = vpack.c.bf16 %v5468_v15, %v5468_v15 }
0x142c   : > { %v7725_v55 = vpop.eup %7724  ;;  %7218 = vmatmul.msk.bf16.vlgmr.msrb.gmra.mxu0 %vm1464_vm10, %v5476_v4 }
0x142d   : > { %v5469_v21 = vmul.f32 %v7725_v55, %v10366_v11 }
0x142f   : > { %v7727_v20 = vpop.eup %7726  ;;  %v5477_v27 = vpack.c.bf16 %v5469_v21, %v5469_v21 }
0x1430   : > { %v5466_v32 = vmul.f32 %v7727_v20, %v10370_v8 }
0x1432   : > { %v5474_v37 = vpack.c.bf16 %v5466_v32, %v5466_v32 }
0x1434   : > { %7216 = vmatmul.msk.bf16.vlgmr.msra.gmra.mxu2 %vm1464_vm10, %v5474_v37  ;;  %7219 = vmatmul.msk.bf16.vlgmr.msrb.gmra.mxu1 %vm1464_vm10, %v5477_v27 }
0x1435   : > { %7221 = vmatmul.msk.bf16.vlgmr.msra.gmra.mxu3 %vm1464_vm10, %v10382_v10  ;;  %5733 = vmatpush.bf16.xpose.msra.mxu2 %v5724_v50 }
0x143b   : > { %v5671_v30 = vpop.permute.xlu0 %5670 }
0x143c   : > { %7222 = vmatmul.msk.bf16.vlgmr.msra.gmra.mxu0 %vm1464_vm10, %v5671_v30 }
0x143d   : > { %v5740_v29 = vpop.permute.xlu1 %5739 }
0x1443   : > { %v5696_v3 = vpop.permute.xlu0 %5695 }
0x1444   : > { %v5701_v11 = vsel %vm1464_vm10, %v5696_v3, 0 }
0x1445   : > { %5710 = vmatpush.bf16.xpose.msra.mxu1 %v5701_v11 }
0x144b   : > { %v5694_v8 = vpop.permute.xlu0 %5693 }
0x144c   : > { %7223 = vmatmul.msk.bf16.vlgmr.msra.gmra.mxu1 %vm1464_vm10, %v5694_v8 }
0x1453   : > { %v5811_v43 = vpop.permute.xlu0 %5810 }
0x1454   : > { %v5816_v35 = vsel %vm1464_vm10, %v5811_v43, 0 }
0x1459   : > { %v5454_v14 = vpop.xlane.xlu2 %5453 }
0x145a   : > { %7728 = vrcp.f32 %v5454_v14 }
0x1460   : > { %v7729_v33 = vpop.eup %7728 }
0x1461   : > { %v5470_v39 = vmul.f32 %v7729_v33, %v10393_v63  ;;  %v5742_v42 = vpop.permute.xlu2 %5741  ;;  %v5809_v63 = vpop.permute.xlu0 %5808 }
0x1462   : > { %v5747_v10 = vsel %vm1464_vm10, %v5742_v42, 0 }
0x1463   : > { %v5478_v24 = vpack.c.bf16 %v5470_v39, %v5470_v39  ;;  %5756 = vmatpush.bf16.xpose.msrb.mxu3 %v5747_v10 }
0x1465   : > { %7220 = vmatmul.msk.bf16.vlgmr.msrb.gmra.mxu2 %vm1464_vm10, %v5478_v24 }
0x1466   : > { %5825 = vmatpush.bf16.xpose.msrb.mxu2 %v5816_v35 }
0x1469   : > { %v5765_v16 = vpop.permute.xlu2 %5764  ;;  %v5786_v46 = vpop.permute.xlu0 %5785 }
0x146a   : > { %v5770_v41 = vsel %vm1464_vm10, %v5765_v16, 0  ;;  %7225 = vmatmul.msk.bf16.vlgmr.msrb.gmra.mxu3 %vm1464_vm10, %v5740_v29 }
0x146b   : > { %5779 = vmatpush.bf16.xpose.msrb.mxu0 %v5770_v41 }
0x1471   : > { %v5763_v47 = vpop.permute.xlu2 %5762 }
0x1472   : > { %7226 = vmatmul.msk.bf16.vlgmr.msrb.gmra.mxu0 %vm1464_vm10, %v5763_v47 }
0x1475   : > { %7224 = vmatmul.msk.bf16.vlgmr.msra.gmra.mxu2 %vm1464_vm10, %v5717_v13 }
0x1479   : > { %v5788_v36 = vpop.permute.xlu2 %5787 }
0x147a   : > { %v5793_v60 = vsel %vm1464_vm10, %v5788_v36, 0 }
0x147b   : > { %5802 = vmatpush.bf16.xpose.msrb.mxu1 %v5793_v60 }
0x1482   : > { %7227 = vmatmul.msk.bf16.vlgmr.msrb.gmra.mxu1 %vm1464_vm10, %v5786_v46 }
0x1485   : > { %7228 = vmatmul.msk.bf16.vlgmr.msrb.gmra.mxu2 %vm1464_vm10, %v5809_v63 }
0x148d   : > { %v10442_v56 = vpop.f32.mrf.mxu3 }
0x1495   : > { %v5498_v59 = vpop.f32.mrf.mxu3 }
0x1499   : > { %v10444_v12 = vpop.f32.mrf.mxu0 }
0x14a1   : > { %v5519_v15 = vpop.f32.mrf.mxu0  ;;  %v10446_v22 = vpop.f32.mrf.mxu1 }
0x14a8   : > { %v10448_v4 = vpop.f32.mrf.mxu3 }
0x14a9   : > { %v5540_v55 = vpop.f32.mrf.mxu1  ;;  %v10450_v21 = vpop.f32.mrf.mxu0 }
0x14b0   : > { %v5582_v20 = vpop.f32.mrf.mxu3 }
0x14b1   : > { %v5603_v32 = vpop.f32.mrf.mxu0  ;;  %v10452_v27 = vpop.f32.mrf.mxu1 }
0x14b7   : > { %v10454_v37 = vpop.f32.mrf.mxu2 }
0x14b8   : > { %v5666_v50 = vpop.f32.mrf.mxu3 }
0x14b9   : > { %v5831_v30 = vmul.f32 0.35355338, %v5666_v50  ;;  %v5624_v3 = vpop.f32.mrf.mxu1  ;;  %v5689_v11 = vpop.f32.mrf.mxu0 }
0x14ba   : > { %v5832_v8 = vmul.f32 0.35355338, %v5689_v11 }
0x14bb   : > { %v5839_v13 = vsel %vm8634_vm1, %v5831_v30, -1e+30 }
0x14bc   : > { %v5840_v14 = vsel %vm8634_vm1, %v5832_v8, -1e+30  ;;  %v5847_v33 = vsel %vm1464_vm10, %v5839_v13, -inf }
0x14bd   : > { %5848 = vmax.xlane.f32.xlu1 %v5847_v33  ;;  %v5850_v39 = vsel %vm1464_vm10, %v5840_v14, -inf }
0x14be   : > { %5851 = vmax.xlane.f32.xlu2 %v5850_v39 }
0x14bf   : > { %v5561_v42 = vpop.f32.mrf.mxu2 }
0x14c0   : > { %v5668_v43 = vpop.f32.mrf.mxu3 }
0x14c1   : > { %v5691_v10 = vpop.f32.mrf.mxu0 }
0x14c9   : > { %v5712_v24 = vpop.f32.mrf.mxu1 }
0x14ca   : > { %v5833_v35 = vmul.f32 0.35355338, %v5712_v24 }
0x14cc   : > { %v5841_v29 = vsel %vm8634_vm1, %v5833_v35, -1e+30 }
0x14cd   : > { %v5853_v16 = vsel %vm1464_vm10, %v5841_v29, -inf }
0x14ce   : > { %5854 = vmax.xlane.f32.xlu2 %v5853_v16 }
0x14d1   : > { %v5714_v41 = vpop.f32.mrf.mxu1 }
0x14e8   : > { %v10465_v47 = vpop.f32.mrf.mxu2 }
0x14ed   : > { %v5758_v63 = vpop.f32.mrf.mxu3 }
0x14ee   : > { %v5835_v36 = vmul.f32 0.35355338, %v5758_v63 }
0x14ef   : > { %v5781_v60 = vpop.f32.mrf.mxu0 }
0x14f0   : > { %v5843_v46 = vsel %vm8634_vm1, %v5835_v36, -1e+30  ;;  %v5836_v59 = vmul.f32 0.35355338, %v5781_v60  ;;  %v5645_v15 = vpop.f32.mrf.mxu2 }
0x14f1   : > { %v5859_v55 = vsel %vm1464_vm10, %v5843_v46, -inf }
0x14f2   : > { %v5844_v20 = vsel %vm8634_vm1, %v5836_v59, -1e+30  ;;  %5860 = vmax.xlane.f32.xlu1 %v5859_v55 }
0x14f3   : > { %v5862_v32 = vsel %vm1464_vm10, %v5844_v20, -inf }
0x14f4   : > { %5863 = vmax.xlane.f32.xlu0 %v5862_v32 }
0x14f5   : > { %v5760_v50 = vpop.f32.mrf.mxu3 }
0x14f7   : > { %v5783_v30 = vpop.f32.mrf.mxu0 }
0x14f8   : > { %v5735_v3 = vpop.f32.mrf.mxu2 }
0x14f9   : > { %v5834_v43 = vmul.f32 0.35355338, %v5735_v3 }
0x14fb   : > { %v5842_v24 = vsel %vm8634_vm1, %v5834_v43, -1e+30 }
0x14fc   : > { %v5856_v63 = vsel %vm1464_vm10, %v5842_v24, -inf }
0x14ff   : > { %v5804_v11 = vpop.f32.mrf.mxu1 }
0x1500   : > { %v5837_v8 = vmul.f32 0.35355338, %v5804_v11  ;;  %v5737_v33 = vpop.f32.mrf.mxu2 }
0x1502   : > { %v5845_v39 = vsel %vm8634_vm1, %v5837_v8, -1e+30 }
0x1503   : > { %v5865_v42 = vsel %vm1464_vm10, %v5845_v39, -inf }
0x1504   : > { %5866 = vmax.xlane.f32.xlu0 %v5865_v42 }
0x1507   : > { %v5806_v10 = vpop.f32.mrf.mxu1 }
0x1508   : > { %v5827_v35 = vpop.f32.mrf.mxu2 }
0x1509   : > { %v5838_v16 = vmul.f32 0.35355338, %v5827_v35 }
0x150b   : > { %v10480_v41 = vsel %vm8634_vm1, %v5838_v16, -1e+30 }
0x150c   : > { %5857 = vmax.xlane.f32.xlu0 %v5856_v63  ;;  %v5868_v36 = vsel %vm1464_vm10, %v10480_v41, -inf }
0x150d   : > { %5869 = vmax.xlane.f32.xlu2 %v5868_v36 }
0x1510   : > { %v5829_v60 = vpop.f32.mrf.mxu2 }
0x1520   : > { %5964 = vrot.lane.b32.xlu0 %v10067_v38, %s8075_s7 }
0x1528   : > { %6006 = vrot.lane.b32.xlu0 %v10039_v61, %s8075_s7 }
0x1530   : > { %v5849_v59 = vpop.xlane.xlu1 %5848 }
0x1531   : > { %v5871_v15 = vsub.f32 %v5839_v13, %v5849_v59  ;;  %v5852_v55 = vpop.xlane.xlu2 %5851 }
0x1532   : > { %v5872_v2 = vsub.f32 %v5840_v14, %v5852_v55 }
0x1533   : > { %v5879_v32 = vmul.f32 1.442695, %v5871_v15 }
0x1534   : > { %v5881_v50 = vmul.f32 1.442695, %v5872_v2 }
0x1535   : > { %7730 = vpow2.f32 %v5879_v32 }
0x1536   : > { %7732 = vpow2.f32 %v5881_v50 }
0x153b   : > { %v10489_v30 = vpop.eup %7730 }
0x153c   : > { %v10491_v3 = vpop.eup %7732  ;;  %v5895_v11 = vsel %vm1464_vm10, %v10489_v30, 0.0 }
0x153d   : > { %5896 = vadd.xlane.f32.xlu1 %v5895_v11  ;;  %v5898_v38 = vsel %vm1464_vm10, %v10491_v3, 0.0 }
0x153e   : > { %5899 = vadd.xlane.f32.xlu2 %v5898_v38 }
0x1541   : > { %v5855_v61 = vpop.xlane.xlu2 %5854 }
0x1542   : > { %v5873_v13 = vsub.f32 %v5841_v29, %v5855_v61 }
0x1544   : > { %v5883_v8 = vmul.f32 1.442695, %v5873_v13 }
0x1546   : > { %7734 = vpow2.f32 %v5883_v8 }
0x154c   : > { %v10497_v14 = vpop.eup %7734 }
0x154d   : > { %v5901_v33 = vsel %vm1464_vm10, %v10497_v14, 0.0 }
0x154e   : > { %5902 = vadd.xlane.f32.xlu2 %v5901_v33 }
0x1556   : > { %5943 = vrot.lane.b32.xlu1 %v9986_v52, %s8075_s7 }
0x1565   : > { %v5861_v35 = vpop.xlane.xlu1 %5860 }
0x1566   : > { %5985 = vrot.lane.b32.xlu2 %v10168_v51, %s8075_s7  ;;  %v5875_v29 = vsub.f32 %v5843_v46, %v5861_v35 }
0x1567   : > { %v5864_v42 = vpop.xlane.xlu0 %5863 }
0x1568   : > { %v5876_v43 = vsub.f32 %v5844_v20, %v5864_v42  ;;  %v5887_v63 = vmul.f32 1.442695, %v5875_v29 }
0x156a   : > { %v5889_v10 = vmul.f32 1.442695, %v5876_v43 }
0x156c   : > { %7736 = vpow2.f32 %v5889_v10 }
0x156d   : > { %7738 = vpow2.f32 %v5887_v63 }
0x156e   : > { %6027 = vrot.lane.b32.xlu2 %v9992_v17, %s8075_s7 }
0x1572   : > { %v10507_v16 = vpop.eup %7736 }
0x1573   : > { %v5910_v36 = vsel %vm1464_vm10, %v10507_v16, 0.0  ;;  %v10511_v59 = vpop.eup %7738 }
0x1574   : > { %5911 = vadd.xlane.f32.xlu0 %v5910_v36  ;;  %v5907_v46 = vsel %vm1464_vm10, %v10511_v59, 0.0 }
0x1577   : > { %v5867_v52 = vpop.xlane.xlu0 %5866 }
0x1578   : > { %v5877_v60 = vsub.f32 %v5845_v39, %v5867_v52 }
0x157a   : > { %v5891_v51 = vmul.f32 1.442695, %v5877_v60 }
0x157c   : > { %7740 = vpow2.f32 %v5891_v51 }
0x157f   : > { %v5858_v20 = vpop.xlane.xlu0 %5857 }
0x1580   : > { %5908 = vadd.xlane.f32.xlu1 %v5907_v46  ;;  %v5874_v15 = vsub.f32 %v5842_v24, %v5858_v20 }
0x1582   : > { %v10515_v17 = vpop.eup %7740  ;;  %v5885_v39 = vmul.f32 1.442695, %v5874_v15 }
0x1583   : > { %v5913_v55 = vsel %vm1464_vm10, %v10515_v17, 0.0 }
0x1584   : > { %7742 = vpow2.f32 %v5885_v39 }
0x1588   : > { %5914 = vadd.xlane.f32.xlu1 %v5913_v55  ;;  %6090 = vrot.lane.b32.xlu0 %v10203_v23, %s8075_s7 }
0x158a   : > { %v10523_v32 = vpop.eup %7742 }
0x158b   : > { %v5904_v24 = vsel %vm1464_vm10, %v10523_v32, 0.0 }
0x1590   : > { %6119 = vrot.lane.b32.xlu0 %v10257_v45, %s8076_s5  ;;  %v5870_v45 = vpop.xlane.xlu2 %5869 }
0x1592   : > { %v5965_v2 = vpop.permute.xlu0 %5964 }
0x1593   : > { %v5970_v50 = vsel %vm1734_vm0, %v5965_v2, 0 }
0x1594   : > { %5979 = vmatpush.bf16.msra.mxu0 %v5970_v50 }
0x1597   : > { %5905 = vadd.xlane.f32.xlu2 %v5904_v24 }
0x1598   : > { %6151 = vrot.lane.b32.xlu0 %v10442_v56, %s8077_s4 }
0x159a   : > { %v6007_v11 = vpop.permute.xlu0 %6006 }
0x159b   : > { %v6012_v23 = vsel %vm1734_vm0, %v6007_v11, 0 }
0x159c   : > { %6021 = vmatpush.bf16.msra.mxu2 %v6012_v23 }
0x15a0   : > { %6125 = vrot.lane.b32.xlu0 %v10288_v26, %s8076_s5 }
0x15a1   : > { %6069 = vrot.lane.b32.xlu1 %v10163_v18, %s8075_s7 }
0x15a8   : > { %6157 = vrot.lane.b32.xlu0 %v10454_v37, %s8077_s4 }
0x15a9   : > { %6121 = vrot.lane.b32.xlu1 %v10266_v5, %s8076_s5 }
0x15af   : > { %6048 = vrot.lane.b32.xlu2 %v10148_v6, %s8075_s7  ;;  %s11001_s7 = sld [smem:[#allocation42_spill]] }
0x15b0   : > { %6127 = vrot.lane.b32.xlu0 %v10286_v25, %s8076_s5  ;;  %v5897_v5 = vpop.xlane.xlu1 %5896  ;;  %v5878_v25 = vsub.f32 %v10480_v41, %v5870_v45 }
0x15b1   : > { %6123 = vrot.lane.b32.xlu1 %v10284_v49, %s8076_s5  ;;  %v5900_v26 = vpop.xlane.xlu2 %5899 }
0x15b2   : > { %7744 = vrcp.f32 %v5900_v26  ;;  %v5893_v8 = vmul.f32 1.442695, %v5878_v25 }
0x15b3   : > { %7746 = vrcp.f32 %v5897_v5 }
0x15b8   : > { %v7745_v56 = vpop.eup %7744  ;;  %6161 = vrot.lane.b32.xlu0 %v10450_v21, %s8077_s4 }
0x15b9   : > { %v5928_v18 = vmul.f32 %v7745_v56, %v10491_v3  ;;  %6155 = vrot.lane.b32.xlu1 %v10446_v22, %s8077_s4  ;;  %v7747_v49 = vpop.eup %7746 }
0x15ba   : > { %v5927_v21 = vmul.f32 %v7747_v49, %v10489_v30 }
0x15bb   : > { %v5936_v37 = vpack.c.bf16 %v5928_v18, %v5928_v18 }
0x15bc   : > { %v5935_v33 = vpack.c.bf16 %v5927_v21, %v5927_v21 }
0x15bd   : > { %7230 = vmatmul.msk.bf16.vlgmr.msra.gmra.mxu0 %vm1464_vm10, %v5936_v37 }
0x15c1   : > { %6159 = vrot.lane.b32.xlu1 %v10448_v4, %s8077_s4  ;;  %v5903_v6 = vpop.xlane.xlu2 %5902 }
0x15c2   : > { %7748 = vrcp.f32 %v5903_v6 }
0x15c3   : > { %7750 = vpow2.f32 %v5893_v8 }
0x15c8   : > { %v7749_v38 = vpop.eup %7748  ;;  %v5944_v3 = vpop.permute.xlu1 %5943 }
0x15c9   : > { %v5929_v61 = vmul.f32 %v7749_v38, %v10497_v14  ;;  %v5949_v22 = vsel %vm1734_vm0, %v5944_v3, 0  ;;  %6131 = vrot.lane.b32.xlu1 %v10307_v0, %s8076_s5  ;;  %v5986_v13 = vpop.permute.xlu2 %5985  ;;  %v7751_v0 = vpop.eup %7750 }
0x15ca   : > { %5958 = vmatpush.bf16.msra.mxu3 %v5949_v22  ;;  %v5991_v4 = vsel %vm1734_vm0, %v5986_v13, 0  ;;  %v5916_v14 = vsel %vm1464_vm10, %v7751_v0, 0.0 }
0x15cb   : > { %v5937_v42 = vpack.c.bf16 %v5929_v61, %v5929_v61  ;;  %6000 = vmatpush.bf16.msra.mxu1 %v5991_v4 }
0x15cd   : > { %7229 = vmatmul.msk.bf16.vlgmr.msra.gmra.mxu3 %vm1464_vm10, %v5935_v33 }
0x15ce   : > { %7231 = vmatmul.msk.bf16.vlgmr.msra.gmra.mxu1 %vm1464_vm10, %v5937_v42 }
0x15d1   : > { %6133 = vrot.lane.b32.xlu1 %v10290_v7, %s8076_s5  ;;  %v6028_v41 = vpop.permute.xlu2 %6027 }
0x15d2   : > { %v6033_v30 = vsel %vm1734_vm0, %v6028_v41, 0 }
0x15d3   : > { %6042 = vmatpush.bf16.msrb.mxu3 %v6033_v30 }
0x15d8   : > { %5917 = vadd.xlane.f32.xlu2 %v5916_v14 }
0x15e7   : > { %v5912_v43 = vpop.xlane.xlu0 %5911 }
0x15f0   : > { %6153 = vrot.lane.b32.xlu2 %v10444_v12, %s8077_s4 }
0x15f3   : > { %v5909_v10 = vpop.xlane.xlu1 %5908 }
0x15f4   : > { %7752 = vrcp.f32 %v5909_v10 }
0x15f5   : > { %7754 = vrcp.f32 %v5912_v43 }
0x15f8   : > { %6129 = vrot.lane.b32.xlu2 %v10309_v48, %s8076_s5  ;;  %s917_s5 = scalar_lea.vmem %s11001_s7, %s7006_s13 }
0x15fa   : > { %v7753_v35 = vpop.eup %7752  ;;  %v6091_v29 = vpop.permute.xlu0 %6090 }
0x15fb   : > { %v5931_v7 = vmul.f32 %v7753_v35, %v10511_v59  ;;  %v6096_v63 = vsel %vm1734_vm0, %v6091_v29, 0  ;;  %v5915_v60 = vpop.xlane.xlu1 %5914  ;;  %v7755_v48 = vpop.eup %7754 }
0x15fc   : > { %6105 = vmatpush.bf16.msrb.mxu2 %v6096_v63  ;;  %7756 = vrcp.f32 %v5915_v60  ;;  %v5932_v59 = vmul.f32 %v7755_v48, %v10507_v16 }
0x15fd   : > { %v5939_v36 = vpack.c.bf16 %v5931_v7, %v5931_v7 }
0x15fe   : > { %v5940_v45 = vpack.c.bf16 %v5932_v59, %v5932_v59 }
0x15ff   : > { %7233 = vmatmul.msk.bf16.vlgmr.msrb.gmra.mxu3 %vm1464_vm10, %v5939_v36 }
0x1602   : > { %v10573_v52 = vpop.permute.xlu0 %6119  ;;  %v7757_v46 = vpop.eup %7756 }
0x1603   : > { %v5933_v15 = vmul.f32 %v7757_v46, %v10515_v17 }
0x1605   : > { %v5941_v26 = vpack.c.bf16 %v5933_v15, %v5933_v15 }
0x160a   : > { %v5906_v12 = vpop.xlane.xlu2 %5905  ;;  %v10575_v51 = vpop.permute.xlu0 %6151 }
0x160b   : > { %7758 = vrcp.f32 %v5906_v12 }
0x1611   : > { %v7759_v20 = vpop.eup %7758 }
0x1612   : > { %v5930_v55 = vmul.f32 %v7759_v20, %v10523_v32  ;;  %v6049_v39 = vpop.permute.xlu2 %6048  ;;  %v6126_v2 = vpop.permute.xlu0 %6125 }
0x1613   : > { %v6070_v50 = vpop.permute.xlu1 %6069  ;;  %v6054_v24 = vsel %vm1734_vm0, %v6049_v39, 0  ;;  %v6210_v16 = vsel %vm1464_vm10, %v10089_v44, %v6126_v2 }
0x1614   : > { %v5938_v11 = vpack.c.bf16 %v5930_v55, %v5930_v55  ;;  %v6075_v23 = vsel %vm1734_vm0, %v6070_v50, 0  ;;  %6063 = vmatpush.bf16.msrb.mxu0 %v6054_v24 }
0x1615   : > { %6084 = vmatpush.bf16.msrb.mxu1 %v6075_v23 }
0x1616   : > { %7232 = vmatmul.msk.bf16.vlgmr.msra.gmra.mxu2 %vm1464_vm10, %v5938_v11 }
0x1617   : > { %7234 = vmatmul.msk.bf16.vlgmr.msrb.gmra.mxu0 %vm1464_vm10, %v5940_v45 }
0x1618   : > { %7235 = vmatmul.msk.bf16.vlgmr.msrb.gmra.mxu1 %vm1464_vm10, %v5941_v26 }
0x161a   : > { %v6158_v17 = vpop.permute.xlu0 %6157 }
0x161b   : > { %v10588_v32 = vsel %vm3452_vm3, %v6210_v16, %v6158_v17  ;;  %v6122_v61 = vpop.permute.xlu1 %6121 }
0x161c   : > { %v6208_v7 = vsel %vm1464_vm10, %v10079_v40, %v6122_v61 }
0x1622   : > { %v6128_v42 = vpop.permute.xlu0 %6127 }
0x1623   : > { %v6124_v13 = vpop.permute.xlu1 %6123  ;;  %v6211_v11 = vsel %vm1464_vm10, %v10092_v34, %v6128_v42 }
0x162a   : > { %v6162_v10 = vpop.permute.xlu0 %6161 }
0x162b   : > { %v6156_v41 = vpop.permute.xlu1 %6155 }
0x1633   : > { %v6160_v35 = vpop.permute.xlu1 %6159 }
0x163a   : > { %v5981_v56 = vpop.f32.mrf.mxu0 }
0x163b   : > { %6185 = vrot.lane.b32.xlu0 %v5981_v56, %s8078_s8  ;;  %v6132_v20 = vpop.permute.xlu1 %6131 }
0x1642   : > { %v5983_v18 = vpop.f32.mrf.mxu0 }
0x1643   : > { %v6134_v15 = vpop.permute.xlu1 %6133 }
0x164b   : > { %v6002_v5 = vpop.f32.mrf.mxu1  ;;  %v5918_v37 = vpop.xlane.xlu2 %5917 }
0x164c   : > { %7760 = vrcp.f32 %v5918_v37  ;;  %6187 = vrot.lane.b32.xlu2 %v6002_v5, %s8078_s8 }
0x1650   : > { %v5960_v6 = vpop.f32.mrf.mxu3 }
0x1651   : > { %6183 = vrot.lane.b32.xlu1 %v5960_v6, %s8078_s8 }
0x1652   : > { %v7761_v49 = vpop.eup %7760 }
0x1653   : > { %v5934_v25 = vmul.f32 %v7761_v49, %v7751_v0  ;;  %v6004_v21 = vpop.f32.mrf.mxu1  ;;  %v6154_v0 = vpop.permute.xlu2 %6153 }
0x1654   : > { %v6216_v63 = vsel %vm3452_vm3, %v6208_v7, %v6154_v0  ;;  %v10998_v7 = vld [vmem:[#allocation26_spill] sm:$0xff] }
0x1655   : > { %v5942_v44 = vpack.c.bf16 %v5934_v25, %v5934_v25 }
0x1657   : > { %7236 = vmatmul.msk.bf16.vlgmr.msrb.gmra.mxu2 %vm1464_vm10, %v5942_v44 }
0x1658   : > { %v5962_v38 = vpop.f32.mrf.mxu3 }
0x165b   : > { %v6130_v29 = vpop.permute.xlu2 %6129 }
0x165c   : > { %v6212_v26 = vsel %vm1464_vm10, %v10110_v62, %v6130_v29 }
0x165d   : > { %v6220_v34 = vsel %vm3452_vm3, %v6212_v26, %v6162_v10 }
0x1682   : > { %v6044_v3 = vpop.f32.mrf.mxu3 }
0x1683   : > { %6191 = vrot.lane.b32.xlu2 %v6044_v3, %s8078_s8 }
0x168a   : > { %v6046_v22 = vpop.f32.mrf.mxu3 }
0x1694   : > { %v6065_v8 = vpop.f32.mrf.mxu0 }
0x1695   : > { %v6086_v4 = vpop.f32.mrf.mxu1  ;;  %6193 = vrot.lane.b32.xlu1 %v6065_v8, %s8078_s8 }
0x1699   : > { %v6023_v33 = vpop.f32.mrf.mxu2 }
0x169c   : > { %v6067_v30 = vpop.f32.mrf.mxu0 }
0x169d   : > { %v6088_v14 = vpop.f32.mrf.mxu1  ;;  %6189 = vrot.lane.b32.xlu1 %v6023_v33, %s8078_s8 }
0x16a1   : > { %v6025_v43 = vpop.f32.mrf.mxu2 }
0x16a5   : > { %6163 = vrot.lane.b32.xlu1 %v10452_v27, %s8077_s4  ;;  %v6209_v27 = vsel %vm1464_vm10, %v10084_v9, %v6124_v13  ;;  %v6207_v9 = vsel %vm1464_vm10, %v10082_v1, %v10573_v52  ;;  %v6219_v1 = vsel %vm3452_vm3, %v6211_v11, %v6160_v35 }
0x16a6   : > { %v6188_v12 = vpop.permute.xlu2 %6187  ;;  %v6217_v46 = vsel %vm3452_vm3, %v6209_v27, %v6156_v41  ;;  %v6215_v55 = vsel %vm3452_vm3, %v6207_v9, %v10575_v51  ;;  %v10999_v27 = vld [vmem:[#allocation25_spill] sm:$0xff] }
0x16a7   : > { %v6225_v59 = vsel %vm3461_vm2, %v6217_v46, %v6188_v12 }
0x16ad   : > { %v6186_v36 = vpop.permute.xlu0 %6185  ;;  %6165 = vrot.lane.b32.xlu1 %v10465_v47, %s8077_s4  ;;  %v10615_v47 = vadd.f32 %v6225_v59, %v9586_v31 }
0x16ae   : > { %v6224_v60 = vsel %vm3461_vm2, %v6216_v63, %v6186_v36  ;;  %v6214_v63 = vsel %vm1464_vm10, %v10998_v7, %v6134_v15 }
0x16af   : > { %v10606_v48 = vadd.f32 %v6224_v60, %v9579_v28  ;;  %v6249_v28 = vsel %vm1059_vm4, %v10615_v47, 0.0 }
0x16b1   : > { %v6246_v40 = vsel %vm1059_vm4, %v10606_v48, 0.0 }
0x16b2   : > { %6247 = vadd.xlane.f32.xlu2 %v6246_v40 }
0x16b5   : > { %6195 = vrot.lane.b32.xlu1 %v6086_v4, %s8078_s8  ;;  %v10997_v4 = vld [vmem:[#allocation23_spill] sm:$0xff] }
0x16ba   : > { %6250 = vadd.xlane.f32.xlu2 %v6249_v28 }
0x16c3   : > { %v6184_v39 = vpop.permute.xlu1 %6183 }
0x16c4   : > { %v6223_v2 = vsel %vm3461_vm2, %v6215_v55, %v6184_v39 }
0x16c5   : > { %v10627_v31 = vadd.f32 %v6223_v2, %v9572_v57 }
0x16c7   : > { %v6243_v50 = vsel %vm1059_vm4, %v10627_v31, 0.0 }
0x16c8   : > { %6244 = vadd.xlane.f32.xlu0 %v6243_v50 }
0x16da   : > { %v6107_v24 = vpop.f32.mrf.mxu2 }
0x16dc   : > { %6197 = vrot.lane.b32.xlu0 %v6107_v24, %s8078_s8 }
0x16dd   : > { %v6192_v52 = vpop.permute.xlu2 %6191 }
0x16de   : > { %v6227_v51 = vsel %vm3461_vm2, %v6219_v1, %v6192_v52 }
0x16df   : > { %v10637_v23 = vadd.f32 %v6227_v51, %v9600_v53 }
0x16e1   : > { %v6255_v57 = vsel %vm1059_vm4, %v10637_v23, 0.0 }
0x16e2   : > { %6256 = vadd.xlane.f32.xlu2 %v6255_v57  ;;  %v6109_v45 = vpop.f32.mrf.mxu2 }
0x1707   : > { %v6194_v16 = vpop.permute.xlu1 %6193 }
0x1708   : > { %v6228_v17 = vsel %vm3461_vm2, %v6220_v34, %v6194_v16  ;;  %v7292_v34 = vld [vmem:[#allocation14 + $0x18] sm:$0xff] }
0x1709   : > { %v10646_v56 = vadd.f32 %v6228_v17, %v9606_v58  ;;  %v7294_v16 = vld [vmem:[#allocation15 + $0x18] sm:$0xff] }
0x170b   : > { %v6258_v53 = vsel %vm1059_vm4, %v10646_v56, 0.0 }
0x170c   : > { %6259 = vadd.xlane.f32.xlu2 %v6258_v53  ;;  %v6481_v53 = vsel %vm1059_vm4, %v7292_v34, 0 }
0x170d   : > { %6489 = vmatpush.bf16.xpose.msra.mxu3 %v6481_v53 }
0x170f   : > { %v6190_v18 = vpop.permute.xlu1 %6189 }
0x1710   : > { %v6226_v5 = vsel %vm3461_vm2, %v10588_v32, %v6190_v18  ;;  %v10996_v32 = vld [vmem:[#allocation28_spill] sm:$0xff]  ;;  %v6544_v18 = vsel %vm1059_vm4, %v7294_v16, 0 }
0x1711   : > { %v10653_v37 = vadd.f32 %v6226_v5, %v9593_v19  ;;  %v6213_v19 = vsel %vm1464_vm10, %v10996_v32, %v6132_v20  ;;  %6552 = vmatpush.bf16.xpose.msra.mxu0 %v6544_v18 }
0x1713   : > { %v6252_v62 = vsel %vm1059_vm4, %v10653_v37, 0.0 }
0x1714   : > { %6253 = vadd.xlane.f32.xlu1 %v6252_v62 }
0x1717   : > { %v6164_v6 = vpop.permute.xlu1 %6163 }
0x1718   : > { %v6221_v3 = vsel %vm3452_vm3, %v6213_v19, %v6164_v6 }
0x171f   : > { %v6166_v49 = vpop.permute.xlu1 %6165 }
0x1720   : > { %v6222_v36 = vsel %vm3452_vm3, %v6214_v63, %v6166_v49  ;;  %v7291_v49 = vld [vmem:[#allocation14 + $0x10] sm:$0xff] }
0x1725   : > { %v6248_v25 = vpop.xlane.xlu2 %6247 }
0x1726   : > { %v6268_v58 = vmul.f32 %v6248_v25, %v10987_v54  ;;  %v7293_v25 = vld [vmem:[#allocation15 + $0x10] sm:$0xff] }
0x1727   : > { %v6196_v44 = vpop.permute.xlu1 %6195 }
0x1728   : > { %v10659_v21 = vsub.f32 %v10606_v48, %v6268_v58  ;;  %v6229_v22 = vsel %vm3461_vm2, %v6221_v3, %v6196_v44  ;;  %v6478_v44 = vsel %vm1059_vm4, %v7291_v49, 0 }
0x1729   : > { %v10670_v33 = vadd.f32 %v6229_v22, %v10997_v4  ;;  %6490 = vmatpush.bf16.xpose.msra.mxu3 %v6478_v44 }
0x172a   : > { %v6284_v38 = vmul.f32 %v10659_v21, %v10659_v21 }
0x172b   : > { %v6261_v0 = vsel %vm1059_vm4, %v10670_v33, 0.0 }
0x172c   : > { %v6294_v61 = vsel %vm1059_vm4, %v6284_v38, 0.0  ;;  %v6541_v38 = vsel %vm1059_vm4, %v7293_v25, 0 }
0x172d   : > { %v6251_v13 = vpop.xlane.xlu2 %6250  ;;  %6295 = vadd.xlane.f32.xlu2 %v6294_v61  ;;  %6553 = vmatpush.bf16.xpose.msra.mxu0 %v6541_v38 }
0x172e   : > { %v6269_v8 = vmul.f32 %v6251_v13, %v10987_v54 }
0x1730   : > { %v10673_v42 = vsub.f32 %v10615_v47, %v6269_v8 }
0x1732   : > { %v6285_v41 = vmul.f32 %v10673_v42, %v10673_v42 }
0x1734   : > { %v6297_v30 = vsel %vm1059_vm4, %v6285_v41, 0.0 }
0x1735   : > { %6298 = vadd.xlane.f32.xlu1 %v6297_v30  ;;  %6262 = vadd.xlane.f32.xlu2 %v6261_v0 }
0x173b   : > { %v6245_v14 = vpop.xlane.xlu0 %6244 }
0x173c   : > { %v6267_v43 = vmul.f32 %v6245_v14, %v10987_v54 }
0x173e   : > { %v10682_v10 = vsub.f32 %v10627_v31, %v6267_v43 }
0x1740   : > { %v6283_v35 = vmul.f32 %v10682_v10, %v10682_v10 }
0x1742   : > { %v6291_v29 = vsel %vm1059_vm4, %v6283_v35, 0.0 }
0x1743   : > { %6292 = vadd.xlane.f32.xlu0 %v6291_v29 }
0x174e   : > { %v6198_v60 = vpop.permute.xlu0 %6197 }
0x174f   : > { %v6230_v12 = vsel %vm3461_vm2, %v6222_v36, %v6198_v60  ;;  %v10734_v60 = vld [vmem:[%s10923_s15 + $0x1] ss:$0 sm:$0xff] }
0x1750   : > { %v10692_v46 = vadd.f32 %v6230_v12, %v10999_v27 }
0x1752   : > { %v6264_v20 = vsel %vm1059_vm4, %v10692_v46, 0.0 }
0x1753   : > { %6265 = vadd.xlane.f32.xlu2 %v6264_v20 }
0x1755   : > { %v6257_v40 = vpop.xlane.xlu2 %6256 }
0x1756   : > { %v6271_v59 = vmul.f32 %v6257_v40, %v10987_v54 }
0x1758   : > { %v10698_v28 = vsub.f32 %v10637_v23, %v6271_v59 }
0x175a   : > { %v6287_v15 = vmul.f32 %v10698_v28, %v10698_v28 }
0x175c   : > { %v6303_v9 = vsel %vm1059_vm4, %v6287_v15, 0.0  ;;  %v10745_v15 = vld [vmem:[%s10924_s16 + $0x1] ss:$0 sm:$0xff] }
0x175d   : > { %6304 = vadd.xlane.f32.xlu1 %v6303_v9 }
0x177f   : > { %v6260_v55 = vpop.xlane.xlu2 %6259 }
0x1780   : > { %v6272_v50 = vmul.f32 %v6260_v55, %v10987_v54 }
0x1782   : > { %v10711_v1 = vsub.f32 %v10646_v56, %v6272_v50 }
0x1784   : > { %v6288_v51 = vmul.f32 %v10711_v1, %v10711_v1 }
0x1786   : > { %v6306_v57 = vsel %vm1059_vm4, %v6288_v51, 0.0 }
0x1787   : > { %v6254_v39 = vpop.xlane.xlu1 %6253 }
0x1788   : > { %v6270_v2 = vmul.f32 %v6254_v39, %v10987_v54 }
0x178a   : > { %v10706_v24 = vsub.f32 %v10653_v37, %v6270_v2 }
0x178c   : > { %v6286_v11 = vmul.f32 %v10706_v24, %v10706_v24 }
0x178e   : > { %v6300_v52 = vsel %vm1059_vm4, %v6286_v11, 0.0 }
0x178f   : > { %6301 = vadd.xlane.f32.xlu2 %v6300_v52 }
0x1797   : > { %6307 = vadd.xlane.f32.xlu2 %v6306_v57 }
0x17a0   : > { %v6296_v45 = vpop.xlane.xlu2 %6295 }
0x17a1   : > { %v6316_v26 = vmul.f32 %v6296_v45, %v10987_v54 }
0x17a3   : > { %v6324_v17 = vadd.f32 1e-05, %v6316_v26 }
0x17a5   : > { %7762 = vrsqrt.f32 %v6324_v17  ;;  %vm6347_vm2 = vweird.f32 %v6324_v17 }
0x17a8   : > { %v6263_v5 = vpop.xlane.xlu2 %6262  ;;  %v6299_v52 = vpop.xlane.xlu1 %6298 }
0x17a9   : > { %v6273_v62 = vmul.f32 %v6263_v5, %v10987_v54  ;;  %v6317_v51 = vmul.f32 %v6299_v52, %v10987_v54 }
0x17ab   : > { %v10722_v6 = vsub.f32 %v10670_v33, %v6273_v62  ;;  %v7763_v32 = vpop.eup %7762  ;;  %v6325_v57 = vadd.f32 1e-05, %v6317_v51 }
0x17ac   : > { %v6342_v3 = vmul.f32 %v7763_v32, %v6324_v17  ;;  %vm6348_vm1 = vweird.f32 %v7763_v32 }
0x17ad   : > { %v6289_v58 = vmul.f32 %v10722_v6, %v10722_v6  ;;  %vm6349_vm3 = vmor %vm6347_vm2, %vm6348_vm1  ;;  %vm6357_vm7 = vweird.f32 %v6325_v57 }
0x17ae   : > { %v6343_v61 = vmul.f32 %v7763_v32, %v6342_v3 }
0x17af   : > { %v6309_v19 = vsel %vm1059_vm4, %v6289_v58, 0.0 }
0x17b0   : > { %6310 = vadd.xlane.f32.xlu0 %v6309_v19  ;;  %v6344_v4 = vmul.f32 0.5, %v6343_v61 }
0x17b2   : > { %v6345_v41 = vsub.f32 1.5, %v6344_v4 }
0x17b4   : > { %v6346_v0 = vmul.f32 %v7763_v32, %v6345_v41 }
0x17b6   : > { %v6293_v22 = vpop.xlane.xlu0 %6292  ;;  %v6350_v35 = vsel %vm6349_vm3, %v7763_v32, %v6346_v0 }
0x17b7   : > { %v6315_v13 = vmul.f32 %v6293_v22, %v10987_v54  ;;  %v6412_v12 = vmul.f32 %v6350_v35, %v10659_v21 }
0x17b9   : > { %v6323_v8 = vadd.f32 1e-05, %v6315_v13  ;;  %v6423_v9 = vmul.f32 %v10734_v60, %v6412_v12 }
0x17bb   : > { %7764 = vrsqrt.f32 %v6323_v8  ;;  %vm6337_vm15 = vweird.f32 %v6323_v8  ;;  %v6434_v2 = vadd.f32 %v10745_v15, %v6423_v9 }
0x17bc   : > { %7766 = vrsqrt.f32 %v6325_v57 }
0x17c1   : > { %v7765_v30 = vpop.eup %7764 }
0x17c2   : > { %v6332_v14 = vmul.f32 %v7765_v30, %v6323_v8  ;;  %vm6338_vm14 = vweird.f32 %v7765_v30  ;;  %v7767_v45 = vpop.eup %7766 }
0x17c3   : > { %vm6339_vm5 = vmor %vm6337_vm15, %vm6338_vm14  ;;  %v6352_v34 = vmul.f32 %v7767_v45, %v6325_v57  ;;  %vm6358_vm6 = vweird.f32 %v7767_v45 }
0x17c4   : > { %v6333_v43 = vmul.f32 %v7765_v30, %v6332_v14  ;;  %vm6359_vm8 = vmor %vm6357_vm7, %vm6358_vm6 }
0x17c5   : > { %v6353_v17 = vmul.f32 %v7767_v45, %v6352_v34 }
0x17c6   : > { %v6334_v29 = vmul.f32 0.5, %v6333_v43  ;;  %v6266_v7 = vpop.xlane.xlu2 %6265 }
0x17c7   : > { %v6274_v63 = vmul.f32 %v6266_v7, %v10987_v54  ;;  %v6354_v62 = vmul.f32 0.5, %v6353_v17 }
0x17c8   : > { %v6335_v36 = vsub.f32 1.5, %v6334_v29 }
0x17c9   : > { %v10738_v27 = vsub.f32 %v10692_v46, %v6274_v63  ;;  %v6355_v49 = vsub.f32 1.5, %v6354_v62 }
0x17ca   : > { %v6336_v20 = vmul.f32 %v7765_v30, %v6335_v36 }
0x17cb   : > { %v6290_v40 = vmul.f32 %v10738_v27, %v10738_v27  ;;  %v6356_v19 = vmul.f32 %v7767_v45, %v6355_v49 }
0x17cc   : > { %v6340_v59 = vsel %vm6339_vm5, %v7765_v30, %v6336_v20 }
0x17cd   : > { %v6411_v55 = vmul.f32 %v6340_v59, %v10682_v10  ;;  %v6312_v21 = vsel %vm1059_vm4, %v6290_v40, 0.0  ;;  %v6360_v13 = vsel %vm6359_vm8, %v7767_v45, %v6356_v19 }
0x17ce   : > { %6313 = vadd.xlane.f32.xlu1 %v6312_v21  ;;  %v6413_v0 = vmul.f32 %v6360_v13, %v10673_v42 }
0x17cf   : > { %v6422_v39 = vmul.f32 %v10734_v60, %v6411_v55 }
0x17d0   : > { %v6305_v10 = vpop.xlane.xlu1 %6304  ;;  %v6424_v36 = vmul.f32 %v10734_v60, %v6413_v0 }
0x17d1   : > { %v6433_v50 = vadd.f32 %v10745_v15, %v6422_v39  ;;  %v6319_v26 = vmul.f32 %v6305_v10, %v10987_v54 }
0x17d2   : > { %v6435_v9 = vadd.f32 %v10745_v15, %v6424_v36 }
0x17d3   : > { %v6448_v11 = vpack.c.bf16 %v6434_v2, %v6433_v50  ;;  %v6327_v16 = vadd.f32 1e-05, %v6319_v26 }
0x17d5   : > { %7248 = vmatmul.msk.bf16.vlgmr.msra.gmra.mxu3 %vm1059_vm4, %v6448_v11  ;;  %7261 = vmatmul.msk.bf16.vlgmr.msra.gmra.mxu0 %vm1059_vm4, %v6448_v11  ;;  %7768 = vrsqrt.f32 %v6327_v16  ;;  %vm6377_vm14 = vweird.f32 %v6327_v16 }
0x17db   : > { %v7769_v58 = vpop.eup %7768 }
0x17dc   : > { %v6372_v3 = vmul.f32 %v7769_v58, %v6327_v16  ;;  %vm6378_vm1 = vweird.f32 %v7769_v58 }
0x17dd   : > { %vm6379_vm15 = vmor %vm6377_vm14, %vm6378_vm1 }
0x17de   : > { %v6373_v8 = vmul.f32 %v7769_v58, %v6372_v3 }
0x17e0   : > { %v6374_v14 = vmul.f32 0.5, %v6373_v8  ;;  %v8079_v8 = vmov 0  }
0x17e1   : > { %7398 = vset.pattern.permute.xlu0 %v8079_v8  ;;  %7397 = vset.pattern.permute.xlu2 %v8079_v8 }
0x17e2   : > { %v6375_v12 = vsub.f32 1.5, %v6374_v14 }
0x17e4   : > { %v6376_v55 = vmul.f32 %v7769_v58, %v6375_v12 }
0x17e6   : > { %v6380_v2 = vsel %vm6379_vm15, %v7769_v58, %v6376_v55  ;;  %vm6836_vm15 = vcmask 1041409  }
0x17e7   : > { %v6415_v11 = vmul.f32 %v6380_v2, %v10698_v28  ;;  %v6600_v2 = vld [vmem:[%s10930_s22] sm:$0xf] }
0x17e8   : > { %6603 = vperm.xlu2 %7397, %v6600_v2  }
0x17e9   : > { %v6426_v57 = vmul.f32 %v10734_v60, %v6415_v11 }
0x17eb   : > { %v6437_v26 = vadd.f32 %v10745_v15, %v6426_v57 }
0x1802   : > { %v6302_v53 = vpop.xlane.xlu2 %6301 }
0x1803   : > { %v6318_v18 = vmul.f32 %v6302_v53, %v10987_v54 }
0x1805   : > { %v6326_v5 = vadd.f32 1e-05, %v6318_v18 }
0x1807   : > { %7770 = vrsqrt.f32 %v6326_v5  ;;  %vm6367_vm11 = vweird.f32 %v6326_v5 }
0x180a   : > { %v6308_v25 = vpop.xlane.xlu2 %6307 }
0x180b   : > { %v6320_v44 = vmul.f32 %v6308_v25, %v10987_v54 }
0x180d   : > { %v7771_v38 = vpop.eup %7770  ;;  %v6328_v32 = vadd.f32 1e-05, %v6320_v44 }
0x180e   : > { %v6362_v61 = vmul.f32 %v7771_v38, %v6326_v5  ;;  %vm6368_vm9 = vweird.f32 %v7771_v38 }
0x180f   : > { %7772 = vrsqrt.f32 %v6328_v32  ;;  %vm6369_vm12 = vmor %vm6367_vm11, %vm6368_vm9  ;;  %vm6387_vm2 = vweird.f32 %v6328_v32 }
0x1810   : > { %v6363_v22 = vmul.f32 %v7771_v38, %v6362_v61 }
0x1812   : > { %v6364_v4 = vmul.f32 0.5, %v6363_v22  ;;  %v7419_v22 = vld [vmem:[#allocation2] ss:$0 sm:$0xff] }
0x1813   : > { %6749 = vperm.xlu0 %7398, %v7419_v22  }
0x1814   : > { %v6365_v41 = vsub.f32 1.5, %v6364_v4 }
0x1815   : > { %v7773_v30 = vpop.eup %7772 }
0x1816   : > { %v6366_v43 = vmul.f32 %v7771_v38, %v6365_v41  ;;  %v6382_v35 = vmul.f32 %v7773_v30, %v6328_v32  ;;  %vm6388_vm13 = vweird.f32 %v7773_v30 }
0x1817   : > { %vm6389_vm3 = vmor %vm6387_vm2, %vm6388_vm13 }
0x1818   : > { %v6370_v29 = vsel %vm6369_vm12, %v7771_v38, %v6366_v43  ;;  %v6383_v7 = vmul.f32 %v7773_v30, %v6382_v35  ;;  %v10790_v35 = vld [vmem:[%s10928_s20 + $0x1] ss:$0 sm:$0xff]  ;;  %vm6780_vm12 = vcmask 257024  }
0x1819   : > { %v6414_v63 = vmul.f32 %v6370_v29, %v10706_v24 }
0x181a   : > { %v6384_v20 = vmul.f32 0.5, %v6383_v7 }
0x181b   : > { %v6425_v40 = vmul.f32 %v10734_v60, %v6414_v63 }
0x181c   : > { %v6385_v59 = vsub.f32 1.5, %v6384_v20 }
0x181d   : > { %v6436_v42 = vadd.f32 %v10745_v15, %v6425_v40 }
0x181e   : > { %v6386_v21 = vmul.f32 %v7773_v30, %v6385_v59 }
0x181f   : > { %v6449_v39 = vpack.c.bf16 %v6436_v42, %v6435_v9 }
0x1820   : > { %v6390_v24 = vsel %vm6389_vm3, %v7773_v30, %v6386_v21  ;;  %v10804_v21 = vld [vmem:[%s10929_s21] sm:$0x3] }
0x1821   : > { %7249 = vmatmul.msk.bf16.gmra.mxu3 %vm1059_vm4, %v6449_v39  ;;  %7262 = vmatmul.msk.bf16.gmra.mxu0 %vm1059_vm4, %v6449_v39  ;;  %v6416_v50 = vmul.f32 %v6390_v24, %v10711_v1 }
0x1823   : > { %v6427_v52 = vmul.f32 %v10734_v60, %v6416_v50  ;;  %v6311_v51 = vpop.xlane.xlu0 %6310 }
0x1824   : > { %v6321_v45 = vmul.f32 %v6311_v51, %v10987_v54 }
0x1825   : > { %v6438_v10 = vadd.f32 %v10745_v15, %v6427_v52 }
0x1826   : > { %v6329_v16 = vadd.f32 1e-05, %v6321_v45 }
0x1827   : > { %v6450_v34 = vpack.c.bf16 %v6438_v10, %v6437_v26 }
0x1828   : > { %7774 = vrsqrt.f32 %v6329_v16  ;;  %vm6397_vm6 = vweird.f32 %v6329_v16 }
0x182e   : > { %v7775_v1 = vpop.eup %7774 }
0x182f   : > { %v6392_v28 = vmul.f32 %v7775_v1, %v6329_v16  ;;  %vm6398_vm5 = vweird.f32 %v7775_v1 }
0x1830   : > { %vm6399_vm7 = vmor %vm6397_vm6, %vm6398_vm5  ;;  %vm6838_vm5 = vcmask 1042434   ;;  %vm6840_vm6 = vcmask 1043459  }
0x1831   : > { %7250 = vmatmul.msk.bf16.gmra.mxu3 %vm1059_vm4, %v6450_v34  ;;  %7263 = vmatmul.msk.bf16.gmra.mxu0 %vm1059_vm4, %v6450_v34  ;;  %v6393_v17 = vmul.f32 %v7775_v1, %v6392_v28 }
0x1833   : > { %v6394_v62 = vmul.f32 0.5, %v6393_v17 }
0x1835   : > { %v6395_v49 = vsub.f32 1.5, %v6394_v62 }
0x1837   : > { %v6396_v58 = vmul.f32 %v7775_v1, %v6395_v49 }
0x1839   : > { %v6400_v32 = vsel %vm6399_vm7, %v7775_v1, %v6396_v58  ;;  %vm6842_vm7 = vcmask 1044484  }
0x183a   : > { %v6417_v61 = vmul.f32 %v6400_v32, %v10722_v6 }
0x183c   : > { %v6428_v0 = vmul.f32 %v10734_v60, %v6417_v61 }
0x183e   : > { %v6439_v29 = vadd.f32 %v10745_v15, %v6428_v0 }
0x1841   : > { %v6314_v53 = vpop.xlane.xlu1 %6313 }
0x1842   : > { %v6322_v18 = vmul.f32 %v6314_v53, %v10987_v54  ;;  %v10781_v54 = vld [vmem:[%s10926_s18 + $0x1] ss:$0 sm:$0xff] }
0x1844   : > { %v6330_v5 = vadd.f32 1e-05, %v6322_v18 }
0x1846   : > { %7776 = vrsqrt.f32 %v6330_v5  ;;  %vm6407_vm9 = vweird.f32 %v6330_v5 }
0x184c   : > { %v7777_v25 = vpop.eup %7776 }
0x184d   : > { %v6402_v44 = vmul.f32 %v7777_v25, %v6330_v5  ;;  %vm6408_vm8 = vweird.f32 %v7777_v25 }
0x184e   : > { %vm6409_vm11 = vmor %vm6407_vm9, %vm6408_vm8  ;;  %vm6844_vm8 = vcmask 1045509   ;;  %vm6846_vm9 = vcmask 1046534  }
0x184f   : > { %v6403_v38 = vmul.f32 %v7777_v25, %v6402_v44 }
0x1851   : > { %v6404_v19 = vmul.f32 0.5, %v6403_v38 }
0x1852   : > { %v6555_v43 = vpop.f32.mrf.mxu0 }
0x1853   : > { %v6405_v3 = vsub.f32 1.5, %v6404_v19 }
0x1855   : > { %v6406_v13 = vmul.f32 %v7777_v25, %v6405_v3 }
0x1857   : > { %v6410_v4 = vsel %vm6409_vm11, %v7777_v25, %v6406_v13  ;;  %vm6848_vm11 = vcmask 1047559  }
0x1858   : > { %v6418_v41 = vmul.f32 %v6410_v4, %v10738_v27  ;;  %v6492_v30 = vpop.f32.mrf.mxu3  ;;  %v6556_v27 = vadd.f32 %v10790_v35, %v6555_v43 }
0x1859   : > { %v6493_v6 = vadd.f32 %v10781_v54, %v6492_v30 }
0x185a   : > { %v6429_v14 = vmul.f32 %v10734_v60, %v6418_v41  ;;  %v6557_v59 = vpop.f32.mrf.mxu0 }
0x185b   : > { %7778 = vtanh.f32 %v6493_v6  ;;  %v6558_v42 = vadd.f32 %v10790_v35, %v6557_v59 }
0x185c   : > { %v6440_v7 = vadd.f32 %v10745_v15, %v6429_v14 }
0x185e   : > { %v6451_v63 = vpack.c.bf16 %v6440_v7, %v6439_v29  ;;  %v10840_v7 = vpop.permute.xlu2 %6603 }
0x1860   : > { %v6494_v36 = vpop.f32.mrf.mxu3  ;;  %7251 = vmatmul.msk.bf16.gmra.mxu3 %vm1059_vm4, %v6451_v63  ;;  %7264 = vmatmul.msk.bf16.gmra.mxu0 %vm1059_vm4, %v6451_v63 }
0x1861   : > { %v7779_v60 = vpop.eup %7778  ;;  %v6495_v12 = vadd.f32 %v10781_v54, %v6494_v36 }
0x1862   : > { %v6575_v20 = vmul.f32 %v7779_v60, %v6556_v27 }
0x1863   : > { %7780 = vtanh.f32 %v6495_v12  ;;  %v10849_v12 = vld [vmem:[%s10932_s24] ss:$0 sm:$0xff] }
0x1864   : > { %v6583_v40 = vadd.f32 %v6575_v20, %v10627_v31 }
0x1866   : > { %v6592_v9 = vpack.c.bf16 %v6583_v40, %v6583_v40 }
0x1868   : > { %v6610_v15 = vsel %vm1734_vm0, %v6592_v9, 0 }
0x1869   : > { %v7781_v55 = vpop.eup %7780  ;;  %6619 = vmatpush.bf16.msra.mxu1 %v6610_v15 }
0x186a   : > { %v6576_v39 = vmul.f32 %v7781_v55, %v6558_v42 }
0x186c   : > { %v6584_v24 = vadd.f32 %v6576_v39, %v10606_v48  ;;  %7265 = vmatmul.msk.bf16.vlgmr.msra.gmra.mxu1 %vm1464_vm10, %v10804_v21 }
0x186e   : > { %v6593_v31 = vpack.c.bf16 %v6584_v24, %v6584_v24 }
0x1870   : > { %v6626_v50 = vsel %vm1734_vm0, %v6593_v31, 0 }
0x1871   : > { %6635 = vmatpush.bf16.msra.mxu2 %v6626_v50 }
0x1874   : > { %7266 = vmatmul.msk.bf16.vlgmr.msra.gmra.mxu2 %vm1464_vm10, %v10804_v21 }
0x1885   : > { %v10842_v27 = vpop.permute.xlu0 %6749 }
0x189e   : > { %v6560_v11 = vpop.f32.mrf.mxu0 }
0x189f   : > { %v6561_v48 = vadd.f32 %v10790_v35, %v6560_v11 }
0x18a4   : > { %v6497_v52 = vpop.f32.mrf.mxu3 }
0x18a5   : > { %v6498_v51 = vadd.f32 %v10781_v54, %v6497_v52 }
0x18a6   : > { %v6562_v45 = vpop.f32.mrf.mxu0 }
0x18a7   : > { %7782 = vtanh.f32 %v6498_v51  ;;  %v6563_v28 = vadd.f32 %v10790_v35, %v6562_v45 }
0x18ac   : > { %v6499_v57 = vpop.f32.mrf.mxu3 }
0x18ad   : > { %v7783_v10 = vpop.eup %7782  ;;  %v6500_v26 = vadd.f32 %v10781_v54, %v6499_v57 }
0x18ae   : > { %v6577_v34 = vmul.f32 %v7783_v10, %v6561_v48  ;;  %v6565_v49 = vpop.f32.mrf.mxu0 }
0x18af   : > { %7784 = vtanh.f32 %v6500_v26 }
0x18b0   : > { %v6585_v16 = vadd.f32 %v6577_v34, %v10615_v47  ;;  %v6566_v47 = vadd.f32 %v10790_v35, %v6565_v49 }
0x18b2   : > { %v6594_v1 = vpack.c.bf16 %v6585_v16, %v6585_v16 }
0x18b4   : > { %v6502_v17 = vpop.f32.mrf.mxu3  ;;  %v6642_v53 = vsel %vm1734_vm0, %v6594_v1, 0 }
0x18b5   : > { %v7785_v18 = vpop.eup %7784  ;;  %v6503_v5 = vadd.f32 %v10781_v54, %v6502_v17  ;;  %6651 = vmatpush.bf16.msrb.mxu1 %v6642_v53 }
0x18b6   : > { %v6578_v62 = vmul.f32 %v7785_v18, %v6563_v28  ;;  %v6567_v22 = vpop.f32.mrf.mxu0 }
0x18b7   : > { %7786 = vtanh.f32 %v6503_v5 }
0x18b8   : > { %7267 = vmatmul.msk.bf16.vlgmr.msrb.gmra.mxu1 %vm1464_vm10, %v10804_v21  ;;  %v6586_v25 = vadd.f32 %v6578_v62, %v10653_v37  ;;  %v6568_v37 = vadd.f32 %v10790_v35, %v6567_v22 }
0x18ba   : > { %v6595_v58 = vpack.c.bf16 %v6586_v25, %v6586_v25 }
0x18bc   : > { %v6504_v44 = vpop.f32.mrf.mxu3  ;;  %v6658_v38 = vsel %vm1734_vm0, %v6595_v58, 0 }
0x18bd   : > { %v7787_v32 = vpop.eup %7786  ;;  %v6505_v19 = vadd.f32 %v10781_v54, %v6504_v44  ;;  %6667 = vmatpush.bf16.msrb.mxu2 %v6658_v38 }
0x18be   : > { %v6579_v3 = vmul.f32 %v7787_v32, %v6566_v47 }
0x18bf   : > { %7788 = vtanh.f32 %v6505_v19 }
0x18c0   : > { %7268 = vmatmul.msk.bf16.vlgmr.msrb.gmra.mxu2 %vm1464_vm10, %v10804_v21  ;;  %v6587_v61 = vadd.f32 %v6579_v3, %v10637_v23  ;;  %v7421_v23 = vld [vmem:[#allocation3] ss:$0 sm:$0xff] }
0x18c1   : > { %6809 = vperm.xlu2 %7397, %v7421_v23  }
0x18c2   : > { %v6596_v13 = vpack.c.bf16 %v6587_v61, %v6587_v61 }
0x18c4   : > { %v6674_v8 = vsel %vm1734_vm0, %v6596_v13, 0 }
0x18c5   : > { %v7789_v4 = vpop.eup %7788  ;;  %6683 = vmatpush.bf16.msra.mxu1 %v6674_v8 }
0x18c6   : > { %v6580_v41 = vmul.f32 %v7789_v4, %v6568_v37 }
0x18c8   : > { %7269 = vmatmul.msk.bf16.vlgmr.msra.gmra.mxu1 %vm1464_vm10, %v10804_v21  ;;  %v6588_v30 = vadd.f32 %v6580_v41, %v10646_v56 }
0x18ca   : > { %v6597_v0 = vpack.c.bf16 %v6588_v30, %v6588_v30 }
0x18cc   : > { %v6690_v6 = vsel %vm1734_vm0, %v6597_v0, 0 }
0x18cd   : > { %6699 = vmatpush.bf16.msra.mxu2 %v6690_v6 }
0x18d0   : > { %7270 = vmatmul.msk.bf16.vlgmr.msra.gmra.mxu2 %vm1464_vm10, %v10804_v21 }
0x18dd   : > { %v6570_v29 = vpop.f32.mrf.mxu0 }
0x18de   : > { %v6571_v36 = vadd.f32 %v10790_v35, %v6570_v29 }
0x18e3   : > { %v6507_v14 = vpop.f32.mrf.mxu3 }
0x18e4   : > { %v6508_v43 = vadd.f32 %v10781_v54, %v6507_v14 }
0x18e5   : > { %v6572_v39 = vpop.f32.mrf.mxu0 }
0x18e6   : > { %7790 = vtanh.f32 %v6508_v43  ;;  %v6573_v50 = vadd.f32 %v10790_v35, %v6572_v39 }
0x18e9   : > { %v6621_v63 = vpop.f32.mrf.mxu1 }
0x18ea   : > { %v6622_v56 = vadd.f32 %v6621_v63, %v10840_v7 }
0x18eb   : > { %v6509_v60 = vpop.f32.mrf.mxu3 }
0x18ec   : > { %v7791_v20 = vpop.eup %7790  ;;  %v6510_v40 = vadd.f32 %v10781_v54, %v6509_v60  ;;  %vm6737_vm4 = vcmp.gt.f32.partialorder %v6622_v56, 0.0  ;;  %v6752_v59 = vmul.f32 %v10842_v27, %v6622_v56 }
0x18ed   : > { %v6581_v9 = vmul.f32 %v7791_v20, %v6571_v36 }
0x18ee   : > { %7792 = vtanh.f32 %v6510_v40  ;;  %v6760_v42 = vsel %vm6737_vm4, %v6622_v56, %v6752_v59  ;;  %vm6851_vm4 = vcmask 31744  }
0x18ef   : > { %v6589_v15 = vadd.f32 %v6581_v9, %v10670_v33  ;;  %v6772_v55 = vmul.f32 %v10849_v12, %v6760_v42 }
0x18f1   : > { %v6598_v24 = vpack.c.bf16 %v6589_v15, %v6589_v15  ;;  %v6781_v31 = vsel %vm6780_vm12, %v6772_v55, 0.0  ;;  %v6623_v2 = vpop.f32.mrf.mxu1 }
0x18f2   : > { %6782 = vadd.xlane.f32.xlu1 %v6781_v31 }
0x18f3   : > { %v6706_v54 = vsel %vm1734_vm0, %v6598_v24, 0 }
0x18f4   : > { %v7793_v11 = vpop.eup %7792  ;;  %6715 = vmatpush.bf16.msrb.mxu1 %v6706_v54 }
0x18f5   : > { %v6582_v52 = vmul.f32 %v7793_v11, %v6573_v50 }
0x18f7   : > { %7271 = vmatmul.msk.bf16.vlgmr.msrb.gmra.mxu1 %vm1464_vm10, %v10804_v21  ;;  %v6590_v33 = vadd.f32 %v6582_v52, %v10692_v46  ;;  %v6637_v51 = vpop.f32.mrf.mxu2 }
0x18f8   : > { %v6638_v48 = vadd.f32 %v6637_v51, %v10840_v7  ;;  %v11000_v51 = vld [vmem:[#allocation27_spill] sm:$0xff] }
0x18f9   : > { %v6599_v57 = vpack.c.bf16 %v6590_v33, %v6590_v33 }
0x18fa   : > { %vm6738_vm13 = vcmp.gt.f32.partialorder %v6638_v48, 0.0  ;;  %v6753_v10 = vmul.f32 %v10842_v27, %v6638_v48 }
0x18fb   : > { %v6722_v45 = vsel %vm1734_vm0, %v6599_v57, 0 }
0x18fc   : > { %6731 = vmatpush.bf16.msrb.mxu2 %v6722_v45  ;;  %v6761_v35 = vsel %vm6738_vm13, %v6638_v48, %v6753_v10 }
0x18fd   : > { %v6773_v26 = vmul.f32 %v10849_v12, %v6761_v35 }
0x18ff   : > { %7272 = vmatmul.msk.bf16.vlgmr.msrb.gmra.mxu2 %vm1464_vm10, %v10804_v21  ;;  %v6784_v34 = vsel %vm6780_vm12, %v6773_v26, 0.0  ;;  %v6639_v16 = vpop.f32.mrf.mxu2 }
0x1900   : > { %6785 = vadd.xlane.f32.xlu1 %v6784_v34 }
0x191b   : > { %v6810_v31 = vpop.permute.xlu2 %6809 }
0x1935   : > { %v6653_v46 = vpop.f32.mrf.mxu1 }
0x1936   : > { %v6654_v1 = vadd.f32 %v6653_v46, %v10840_v7 }
0x1938   : > { %vm6739_vm1 = vcmp.gt.f32.partialorder %v6654_v1, 0.0  ;;  %v6754_v28 = vmul.f32 %v10842_v27, %v6654_v1 }
0x193a   : > { %v6762_v17 = vsel %vm6739_vm1, %v6654_v1, %v6754_v28 }
0x193b   : > { %v6774_v53 = vmul.f32 %v10849_v12, %v6762_v17 }
0x193d   : > { %v6655_v18 = vpop.f32.mrf.mxu1  ;;  %v6787_v5 = vsel %vm6780_vm12, %v6774_v53, 0.0 }
0x193e   : > { %6788 = vadd.xlane.f32.xlu1 %v6787_v5 }
0x1943   : > { %v6669_v62 = vpop.f32.mrf.mxu2 }
0x1944   : > { %v6670_v21 = vadd.f32 %v6669_v62, %v10840_v7 }
0x1945   : > { %v6685_v49 = vpop.f32.mrf.mxu1 }
0x1946   : > { %vm6740_vm10 = vcmp.gt.f32.partialorder %v6670_v21, 0.0  ;;  %v6755_v25 = vmul.f32 %v10842_v27, %v6670_v21  ;;  %v6686_v58 = vadd.f32 %v6685_v49, %v10840_v7 }
0x1948   : > { %vm6741_vm0 = vcmp.gt.f32.partialorder %v6686_v58, 0.0  ;;  %v6756_v47 = vmul.f32 %v10842_v27, %v6686_v58  ;;  %v6763_v44 = vsel %vm6740_vm10, %v6670_v21, %v6755_v25 }
0x1949   : > { %v6775_v38 = vmul.f32 %v10849_v12, %v6763_v44 }
0x194a   : > { %v6764_v32 = vsel %vm6741_vm0, %v6686_v58, %v6756_v47 }
0x194b   : > { %v6671_v19 = vpop.f32.mrf.mxu2  ;;  %v6790_v3 = vsel %vm6780_vm12, %v6775_v38, 0.0  ;;  %v6776_v61 = vmul.f32 %v10849_v12, %v6764_v32 }
0x194c   : > { %6791 = vadd.xlane.f32.xlu1 %v6790_v3 }
0x194d   : > { %v6793_v22 = vsel %vm6780_vm12, %v6776_v61, 0.0  ;;  %v6687_v13 = vpop.f32.mrf.mxu1 }
0x194e   : > { %6794 = vadd.xlane.f32.xlu2 %v6793_v22 }
0x1953   : > { %v6701_v37 = vpop.f32.mrf.mxu2 }
0x1954   : > { %v6702_v8 = vadd.f32 %v6701_v37, %v10840_v7 }
0x1956   : > { %vm6742_vm2 = vcmp.gt.f32.partialorder %v6702_v8, 0.0  ;;  %v6757_v4 = vmul.f32 %v10842_v27, %v6702_v8 }
0x1958   : > { %v6765_v41 = vsel %vm6742_vm2, %v6702_v8, %v6757_v4 }
0x1959   : > { %v6777_v30 = vmul.f32 %v10849_v12, %v6765_v41 }
0x195b   : > { %v6796_v0 = vsel %vm6780_vm12, %v6777_v30, 0.0  ;;  %v6703_v6 = vpop.f32.mrf.mxu2 }
0x195c   : > { %6797 = vadd.xlane.f32.xlu1 %v6796_v0 }
0x1965   : > { %v6783_v55 = vpop.xlane.xlu1 %6782 }
0x1966   : > { %v6812_v11 = vadd.f32 %v6810_v31, %v6783_v55 }
0x1968   : > { %v6828_v10 = vperm.slane %v6812_v11, %v11000_v51 }
0x1973   : > { %v6786_v39 = vpop.xlane.xlu1 %6785 }
0x1974   : > { %v6717_v23 = vpop.f32.mrf.mxu1  ;;  %v6813_v50 = vadd.f32 %v6810_v31, %v6786_v39 }
0x1975   : > { %v6718_v14 = vadd.f32 %v6717_v23, %v10840_v7 }
0x1977   : > { %vm6743_vm3 = vcmp.gt.f32.partialorder %v6718_v14, 0.0  ;;  %v6758_v43 = vmul.f32 %v10842_v27, %v6718_v14 }
0x1979   : > { %v6766_v29 = vsel %vm6743_vm3, %v6718_v14, %v6758_v43 }
0x197a   : > { %v6778_v63 = vmul.f32 %v10849_v12, %v6766_v29 }
0x197c   : > { %v6799_v56 = vsel %vm6780_vm12, %v6778_v63, 0.0  ;;  %v6719_v36 = vpop.f32.mrf.mxu1 }
0x197d   : > { %6800 = vadd.xlane.f32.xlu0 %v6799_v56 }
0x1982   : > { %v6733_v60 = vpop.f32.mrf.mxu2 }
0x1983   : > { %v6734_v20 = vadd.f32 %v6733_v60, %v10840_v7 }
0x1985   : > { %vm6744_vm14 = vcmp.gt.f32.partialorder %v6734_v20, 0.0  ;;  %v6759_v40 = vmul.f32 %v10842_v27, %v6734_v20  ;;  %v6829_v27 = vperm.slane %v6813_v50, %v11000_v51 }
0x1987   : > { %v6767_v59 = vsel %vm6744_vm14, %v6734_v20, %v6759_v40  ;;  %v6837_v34 = vsel %vm6836_vm15, %v6829_v27, %v6828_v10 }
0x1988   : > { %v6779_v9 = vmul.f32 %v10849_v12, %v6767_v59 }
0x198a   : > { %v6802_v42 = vsel %vm6780_vm12, %v6779_v9, 0.0  ;;  %v6735_v15 = vpop.f32.mrf.mxu2 }
0x198b   : > { %6803 = vadd.xlane.f32.xlu1 %v6802_v42 }
0x19b1   : > { %v6789_v24 = vpop.xlane.xlu1 %6788 }
0x19b2   : > { %v6814_v54 = vadd.f32 %v6810_v31, %v6789_v24 }
0x19b4   : > { %v6830_v12 = vperm.slane %v6814_v54, %v11000_v51 }
0x19b6   : > { %v6839_v16 = vsel %vm6838_vm5, %v6830_v12, %v6837_v34 }
0x19bf   : > { %v6792_v2 = vpop.xlane.xlu1 %6791 }
0x19c0   : > { %v6815_v52 = vadd.f32 %v6810_v31, %v6792_v2 }
0x19c1   : > { %v6795_v7 = vpop.xlane.xlu2 %6794 }
0x19c2   : > { %v6816_v57 = vadd.f32 %v6810_v31, %v6795_v7  ;;  %v6831_v45 = vperm.slane %v6815_v52, %v11000_v51 }
0x19c4   : > { %v6832_v46 = vperm.slane %v6816_v57, %v11000_v51  ;;  %v6841_v1 = vsel %vm6840_vm6, %v6831_v45, %v6839_v16 }
0x19c6   : > { %v6843_v5 = vsel %vm6842_vm7, %v6832_v46, %v6841_v1 }
0x19cf   : > { %v6798_v33 = vpop.xlane.xlu1 %6797 }
0x19d0   : > { %v6817_v35 = vadd.f32 %v6810_v31, %v6798_v33 }
0x19d2   : > { %v6833_v28 = vperm.slane %v6817_v35, %v11000_v51 }
0x19d4   : > { %v6845_v62 = vsel %vm6844_vm8, %v6833_v28, %v6843_v5 }
0x19f0   : > { %v6801_v48 = vpop.xlane.xlu0 %6800 }
0x19f1   : > { %v6818_v26 = vadd.f32 %v6810_v31, %v6801_v48 }
0x19f3   : > { %v6834_v17 = vperm.slane %v6818_v26, %v11000_v51 }
0x19f5   : > { %v6847_v49 = vsel %vm6846_vm9, %v6834_v17, %v6845_v62 }
0x19fe   : > { %v6804_v53 = vpop.xlane.xlu1 %6803 }
0x19ff   : > { %v6819_v18 = vadd.f32 %v6810_v31, %v6804_v53 }
0x1a01   : > { %v6835_v21 = vperm.slane %v6819_v18, %v11000_v51 }
0x1a03   : > { %v6849_v25 = vsel %vm6848_vm11, %v6835_v21, %v6847_v49 }
0x1a04   : > { %6852 = vst.msk [vmem:[%s917_s5] sm:$0xff] %vm6851_vm4, %v6849_v25 }
0x1a05 PF: > { %s11002_s4 = sld [smem:[#allocation22_spill]] }
0x1a0b   : > { %s45_s8 = sadd.s32 1, %s11002_s4  }
0x1a0c   : > { %p42_p7 = scmp.ge.s32.totalorder %s45_s8, 4  }
0x1a0e   :  { %44 = sbr.rel (!%p42_p7) target bundleno = 19 (0x13), region = 201 }
0x1a13   :  { %6872 = vsyncpa [#allocation5], 1 }
0x1a14   :  { %6874 = vsyncpa [#allocation5 + $0x1], 1 }
0x1a15   :  { %6875 = vsyncpa [#allocation7], 1 }
0x1a16   :  { %6876 = vsyncpa [#allocation10], 1 }
0x1a17   :  { %6877 = vsyncpa [#allocation13], 1 }
0x1a18   :  { %6878 = vsyncpa [#allocation16], 1 }

</bundles_post_ra>
